<compile_context>
chip_gen: v6e
topology: v6e:2x2x1
jax: 0.10.0
libtpu: 0.0.40
codegen_flags: <defaults>
</compile_context>

<pallas_src>
import numpy as np
import jax
import jax.numpy as jnp
from jax.experimental import pallas as pl
from jax.experimental.pallas import tpu as pltpu

LEAK = 0.01      # nn.LeakyReLU default negative slope (assumed RNB activation)
TM_MAX = 256     # 256-aligned tiles feed the v6e/v7x 2x256x256 MXU; fine on v5e
TN_MAX = 256
SMALL_K = 8      # convs with K < 8 (the 3-channel nin convs) go through XLA


def _round_up(x, m):
    return (x + m - 1) // m * m


# --------------------------------------------------------------------------
# Pallas kernel: [LeakyReLU] -> bf16 GEMM (f32 acc) -> + shift [+ residual]
# --------------------------------------------------------------------------
def _make_mm_kernel(act_in: bool, has_res: bool):
    def kernel(x_ref, w_ref, t_ref, *rest):
        o_ref = rest[-1]
        x = x_ref[...]                                  # bf16 (TM, K)
        if act_in:
            xf = x.astype(jnp.float32)                  # keep LeakyReLU math in f32
            x = jnp.where(xf >= 0.0, xf, LEAK * xf).astype(jnp.bfloat16)
        acc = jnp.dot(x, w_ref[...], preferred_element_type=jnp.float32)
        acc = acc + t_ref[...]                          # folded gamma*b + beta
        if has_res:
            acc = acc + rest[0][...]                    # fused residual add (f32)
        o_ref[...] = acc.astype(o_ref.dtype)
    return kernel


def pallas_matmul_affine(x, w, shift, residual=None, act_in=False):
    """out = [leaky](x) @ w + shift [+ residual].

    x: (M, K) bf16, w: (K, N) bf16 (gamma pre-folded), shift: (N,) f32,
    residual: optional (M, N) f32.  Returns (M, N) f32.
    """
    M, K = x.shape
    N = w.shape[1]
    has_res = residual is not None

    # Pad M only to the 8-sublane granule (tiny); ragged tiles beyond that are
    # handled by Pallas' masked edge blocks.
    Mp = _round_up(M, 8)
    if Mp != M:
        x = jnp.pad(x, ((0, Mp - M), (0, 0)))
        if has_res:
            residual = jnp.pad(residual, ((0, Mp - M), (0, 0)))

    TM = min(TM_MAX, Mp)
    TN = min(TN_MAX, N)
    grid = (pl.cdiv(Mp, TM), pl.cdiv(N, TN))

    in_specs = [
        pl.BlockSpec((TM, K), lambda i, j: (i, 0)),
        pl.BlockSpec((K, TN), lambda i, j: (0, j)),
        pl.BlockSpec((1, TN), lambda i, j: (0, j)),
    ]
    inputs = [x, w, shift.reshape(1, N)]
    if has_res:
        in_specs.append(pl.BlockSpec((TM, TN), lambda i, j: (i, j)))
        inputs.append(residual)

    # Explicit VMEM budget: double-buffered tiles + headroom (v7x only has 64 MiB).
    tile_bytes = 2 * (TM * K * 2 + K * TN * 2 + TN * 4
                      + (TM * TN * 4 if has_res else 0) + TM * TN * 4)
    vmem_limit = int(min(48 * 1024 * 1024, max(16 * 1024 * 1024, 2 * tile_bytes)))

    out = pl.pallas_call(
        _make_mm_kernel(act_in, has_res),
        out_shape=jax.ShapeDtypeStruct((Mp, N), jnp.float32),
        grid=grid,
        in_specs=in_specs,
        out_specs=pl.BlockSpec((TM, TN), lambda i, j: (i, j)),
        compiler_params=pltpu.CompilerParams(
            dimension_semantics=("parallel", "parallel"),
            vmem_limit_bytes=vmem_limit),
    )(*inputs)
    return out[:M] if Mp != M else out


# --------------------------------------------------------------------------
# Conv layers (NormConv2d) on top of the Pallas GEMM
# --------------------------------------------------------------------------
def _im2col(x, kh, kw, stride, pad):
    B, H, W, C = x.shape
    if pad:
        x = jnp.pad(x, ((0, 0), (pad, pad), (pad, pad), (0, 0)))
    Ho = (H + 2 * pad - kh) // stride + 1
    Wo = (W + 2 * pad - kw) // stride + 1
    cols = []
    for dy in range(kh):
        for dx in range(kw):
            cols.append(x[:, dy:dy + stride * Ho:stride, dx:dx + stride * Wo:stride, :])
    patches = jnp.concatenate(cols, axis=-1)               # (B,Ho,Wo, kh*kw*C)
    return patches.reshape(B * Ho * Wo, kh * kw * C), (B, Ho, Wo)


def norm_conv(x, p, stride=1, act_in=False, residual=None):
    """NormConv2d: gamma * (conv([leaky]x) + b) + beta [+ residual].

    gamma is folded into the weight columns and gamma*b + beta into one shift,
    so the kernel epilogue is a single add.  (weight_norm at deterministic init
    is an identity reparameterisation, so w is used directly.)"""
    kh, kw, cin, cout = p["w"].shape
    pad = (kh - 1) // 2
    K = kh * kw * cin
    w2 = p["w"].reshape(K, cout) * p["gamma"][None, :]
    shift = p["gamma"] * p["b"] + p["beta"]

    if K < SMALL_K:
        # Pathological tiny-K conv (3-channel nin): pure launch overhead for a
        # dedicated kernel -> let XLA fuse it with the surrounding glue.
        xa = jnp.where(x >= 0, x, LEAK * x) if act_in else x
        patches, (B, Ho, Wo) = _im2col(xa, kh, kw, stride, pad)
        out = patches @ w2 + shift
        if residual is not None:
            out = out + residual.reshape(B * Ho * Wo, cout)
        return out.reshape(B, Ho, Wo, cout)

    # bf16 patches: half the im2col HBM bytes; GEMM runs on the bf16 MXU with
    # f32 accumulation inside the kernel.
    patches, (B, Ho, Wo) = _im2col(x.astype(jnp.bfloat16), kh, kw, stride, pad)
    res2d = residual.reshape(B * Ho * Wo, cout) if residual is not None else None
    out = pallas_matmul_affine(patches, w2.astype(jnp.bfloat16), shift,
                               residual=res2d, act_in=act_in)
    return out.reshape(B, Ho, Wo, cout)


# --------------------------------------------------------------------------
# Space/Depth shuffles (block_size = 2), NHWC; channel order (dy, dx, c)
# --------------------------------------------------------------------------
def space_to_depth(x):
    B, H, W, C = x.shape
    x = x.reshape(B, H // 2, 2, W // 2, 2, C).transpose(0, 1, 3, 2, 4, 5)
    return x.reshape(B, H // 2, W // 2, 4 * C)


def depth_to_space(x):
    B, H, W, C = x.shape
    c = C // 4
    x = x.reshape(B, H, W, 2, 2, c).transpose(0, 1, 3, 2, 4, 5)
    return x.reshape(B, 2 * H, 2 * W, c)


# --------------------------------------------------------------------------
# Parameter construction (deterministic)
# --------------------------------------------------------------------------
class KeyGen:
    def __init__(self, seed):
        self._key = jax.random.PRNGKey(seed)

    def __call__(self):
        self._key, sub = jax.random.split(self._key)
        return sub


def conv_param(kg, cin, cout, k):
    fan_in = cin * k * k
    w = jax.random.normal(kg(), (k, k, cin, cout), jnp.float32) / np.sqrt(fan_in)
    b = jax.random.uniform(kg(), (cout,), jnp.float32,
                           -1.0 / np.sqrt(fan_in), 1.0 / np.sqrt(fan_in))
    return {"w": w, "b": b,
            "gamma": jnp.ones((cout,), jnp.float32),
            "beta": jnp.zeros((cout,), jnp.float32)}


def make_rnb(kg, channels, a_channels=0, residual=False):
    p = {"residual": residual}
    if residual:
        p["nin"] = conv_param(kg, a_channels, channels, 1)
        in_c = 2 * channels
    else:
        in_c = channels
    p["conv"] = conv_param(kg, in_c, channels, 3)
    return p


def vunet_rnb(x, p, a=None):
    h = x
    if a is not None:
        a_p = norm_conv(a, p["nin"], act_in=True)          # nin(act(a))
        h = jnp.concatenate([h, a_p], axis=-1)
    # conv(act(h)) with the residual add (x + r) fused into the GEMM epilogue.
    return norm_conv(h, p["conv"], act_in=True, residual=x)  # dropout_prob == 0.0


def make_upsample(kg, cin, cout):
    return {"conv": conv_param(kg, cin, 4 * cout, 3)}       # subpixel only


def upsample(x, p):
    return depth_to_space(norm_conv(x, p["conv"]))


def make_downsample(kg, cin, cout):
    return {"conv": conv_param(kg, cin, cout, 3)}


def downsample(x, p):
    return norm_conv(x, p["conv"], stride=2)


# --------------------------------------------------------------------------
# Sub-networks
# --------------------------------------------------------------------------
def make_enc_up(kg, n_scales, n_filters, max_filters, nf_in=3):
    p = {"nin": conv_param(kg, nf_in, n_filters, 1), "blocks": [], "downs": []}
    nf = n_filters
    for i in range(n_scales):
        for _ in range(2):
            p["blocks"].append(make_rnb(kg, nf))
        if i + 1 < n_scales:
            out_c = min(2 * nf, max_filters)
            p["downs"].append(make_downsample(kg, nf, out_c))
            nf = out_c
    return p


def enc_up_forward(p, x, n_scales):          # also used for DecUp (identical)
    hs = []
    h = norm_conv(x, p["nin"])
    for i in range(n_scales):
        for n in range(2):
            h = vunet_rnb(h, p["blocks"][2 * i + n])
            hs.append(h)
        if i + 1 < n_scales:
            h = downsample(h, p["downs"][i])
    return hs


def make_enc_down(kg, n_filters, nf_in, n_scales=2):
    p = {"nin": conv_param(kg, nf_in, n_filters, 1),
         "blocks": [], "ups": [], "mlp": []}
    nf = n_filters
    for _ in range(n_scales):
        p["blocks"].append(make_rnb(kg, nf, nf, True))
        p["mlp"].append(conv_param(kg, nf, nf, 3))
        p["blocks"].append(make_rnb(kg, nf, 2 * nf, True))
        p["ups"].append(make_upsample(kg, nf, nf))
    p["fin"] = make_rnb(kg, nf, nf, True)
    return p


def enc_down_forward(p, gs, key, n_scales=2):
    gs = list(gs)
    hs, qs, zs = [], [], []
    h = norm_conv(gs[-1], p["nin"])
    for i in range(n_scales):
        h = vunet_rnb(h, p["blocks"][2 * i], a=gs.pop())
        hs.append(h)
        q = norm_conv(h, p["mlp"][i])
        qs.append(q)
        key, sub = jax.random.split(key)
        z = q + jax.random.normal(sub, q.shape, q.dtype)   # latent_sample
        zs.append(z)
        gz = jnp.concatenate([gs.pop(), z], axis=-1)
        h = vunet_rnb(h, p["blocks"][2 * i + 1], a=gz)
        hs.append(h)
        h = upsample(h, p["ups"][i])
    h = vunet_rnb(h, p["fin"], a=gs.pop())
    hs.append(h)
    return hs, qs, zs


def make_dec_down(kg, n_scales, nf_in, nf_last, nf_out, n_latent_scales=2):
    p = {"nin": conv_param(kg, nf_in, nf_in, 1),
         "out_conv": conv_param(kg, nf_last, nf_out, 3),
         "blocks": [], "ups": [],
         "latent_nins": {}, "auto_lp": {}, "auto_blocks": {}}
    nf_h = nf_in
    nf = nf_in
    for i in range(n_scales):
        p["blocks"].append(make_rnb(kg, nf, nf, True))
        if i < n_latent_scales:
            scale = f"l_{i}"
            p["latent_nins"][scale] = conv_param(kg, 2 * nf_h, nf_h, 1)
            clp, cb = [], []
            for l in range(4):
                clp.append(conv_param(kg, 4 * nf_h, nf_h, 3))
                if l == 0:
                    cb.append(make_rnb(kg, nf_h))
                else:
                    cb.append(make_rnb(kg, 4 * nf_h, nf_h, True))
            p["auto_lp"][scale] = clp
            p["auto_blocks"][scale] = cb
        p["blocks"].append(make_rnb(kg, nf, nf, True))
        if i + 1 < n_scales:
            out_c = min(nf_in, nf_last * 2 ** (n_scales - (i + 2)))
            p["ups"].append(make_upsample(kg, nf, out_c))
            nf = out_c
    return p


def _split_groups(x):
    sec = x.shape[-1]
    s = space_to_depth(x)
    return [s[..., j * sec:(j + 1) * sec] for j in range(4)]


def _merge_groups(groups):
    return depth_to_space(jnp.concatenate(groups, axis=-1))


def dec_down_forward(p, gs, zs_posterior, training, key, n_scales, n_latent_scales=2):
    gs = list(gs)
    zs_posterior = list(zs_posterior)
    hs, ps, zs = [], [], []
    h = norm_conv(gs[-1], p["nin"])
    for i in range(n_scales):
        h = vunet_rnb(h, p["blocks"][2 * i], a=gs.pop())
        hs.append(h)
        if i < n_latent_scales:
            scale = f"l_{i}"
            if training:
                zs_posterior_groups = _split_groups(zs_posterior[0])
            p_groups, z_groups = [], []
            pre = vunet_rnb(h, p["auto_blocks"][scale][0])
            p_features = space_to_depth(pre)
            for l in range(4):
                p_group = norm_conv(p_features, p["auto_lp"][scale][l])
                p_groups.append(p_group)
                key, sub = jax.random.split(key)
                z_group = p_group + jax.random.normal(sub, p_group.shape, p_group.dtype)
                z_groups.append(z_group)
                feedback = zs_posterior_groups.pop(0) if training else z_group
                if l + 1 < 4:
                    p_features = vunet_rnb(p_features, p["auto_blocks"][scale][l + 1],
                                           a=feedback)
            if training:
                assert not zs_posterior_groups
            ps.append(_merge_groups(p_groups))
            z_prior = _merge_groups(z_groups)
            zs.append(z_prior)
            z = zs_posterior.pop(0) if training else z_prior
            h = jnp.concatenate([h, z], axis=-1)
            h = norm_conv(h, p["latent_nins"][scale])
            h = vunet_rnb(h, p["blocks"][2 * i + 1], a=gs.pop())
            hs.append(h)
        else:
            h = vunet_rnb(h, p["blocks"][2 * i + 1], a=gs.pop())
            hs.append(h)
        if i + 1 < n_scales:
            h = upsample(h, p["ups"][i])
    assert not gs
    if training:
        assert not zs_posterior
    params_out = norm_conv(hs[-1], p["out_conv"])
    return params_out, hs, ps, zs


# --------------------------------------------------------------------------
# VunetOrg
# --------------------------------------------------------------------------
def make_vunet(kg, *, spatial_size, n_scales, bottleneck_factor, box_factor,
               nf_start, nf_max, n_latent_scales, n_channels_x=3,
               conv_layer_type="l1", subpixel_upsampling=True, dropout_prob=0.0):
    assert conv_layer_type == "l1"  # TODO(synk): L2NormConv2d path not implemented
    ns = (1 + int(np.round(np.log2(spatial_size))) - bottleneck_factor
          if n_scales < 6 else n_scales)
    ns_x = ns - box_factor if n_channels_x > 3 else ns
    params = {
        "eu": make_enc_up(kg, ns_x, nf_start, nf_max, n_channels_x),
        "ed": make_enc_down(kg, nf_max, nf_max, n_latent_scales),
        "du": make_enc_up(kg, ns, nf_start, nf_max, 3),   # DecUp == EncUp structure
        "dd": make_dec_down(kg, ns, nf_max, nf_start, 3, n_latent_scales),
    }
    meta = {"n_scales": ns, "n_scales_x": ns_x, "n_latent_scales": n_latent_scales}
    return params, meta


def vunet_forward(params, meta, x_nchw, c_nchw, key):
    # layout: NCHW at the PyTorch-facing boundary, NHWC internally.
    x = jnp.transpose(x_nchw, (0, 2, 3, 1)).astype(jnp.float32)
    c = jnp.transpose(c_nchw, (0, 2, 3, 1)).astype(jnp.float32)
    k1, k2 = jax.random.split(key)
    hs = enc_up_forward(params["eu"], x, meta["n_scales_x"])
    _, qs, zs_posterior = enc_down_forward(params["ed"], hs, k1,
                                           meta["n_latent_scales"])
    gs = enc_up_forward(params["du"], c, meta["n_scales"])
    imgs, ds, ps, _ = dec_down_forward(params["dd"], gs, zs_posterior, True, k2,
                                       meta["n_scales"], meta["n_latent_scales"])
    activations = (hs, qs, gs, ds)   # NHWC feature maps
    imgs = jnp.transpose(imgs, (0, 3, 1, 2))
    qs = [jnp.transpose(q, (0, 3, 1, 2)) for q in qs]
    ps = [jnp.transpose(pp, (0, 3, 1, 2)) for pp in ps]
    return imgs, qs, ps, activations


if __name__ == "__main__":
    cfg = dict(spatial_size=16, n_scales=0, bottleneck_factor=1, box_factor=0,
               nf_start=16, nf_max=32, n_latent_scales=2,
               conv_layer_type="l1", subpixel_upsampling=True, dropout_prob=0.0)

    kg = KeyGen(0)                         # deterministic parameter init
    params, meta = make_vunet(kg, **cfg)

    key = jax.random.PRNGKey(0)
    kx, kc, knoise = jax.random.split(key, 3)
    B, C, S = 2, 3, cfg["spatial_size"]
    x = jax.random.normal(kx, (B, C, S, S), jnp.float32)   # appearance image
    c = jax.random.normal(kc, (B, C, S, S), jnp.float32)   # shape/stickman cond

    fwd = jax.jit(lambda pr, xx, cc, kk: vunet_forward(pr, meta, xx, cc, kk))
    imgs, qs, ps, activations = fwd(params, x, c, knoise)
    jax.block_until_ready(imgs)

    assert imgs.shape == (B, 3, S, S), imgs.shape
    assert len(qs) == 2 and len(ps) == 2
    assert bool(jnp.isfinite(imgs).all())
    print("KERNEL_OK")
</pallas_src>

<mosaic_0001>
module attributes {stable_mosaic.version = 11 : i64} {
  func.func @kernel(%arg0: i32, %arg1: i32, %arg2: memref<256x144xbf16, #tpu.memory_space<vmem>>, %arg3: memref<144x16xbf16, #tpu.memory_space<vmem>>, %arg4: memref<1x16xf32, #tpu.memory_space<vmem>>, %arg5: memref<256x16xf32, #tpu.memory_space<vmem>>, %arg6: memref<256x16xf32, #tpu.memory_space<vmem>>) attributes {dimension_semantics = [#tpu.dimension_semantics<parallel>, #tpu.dimension_semantics<parallel>], iteration_bounds = array<i64: 2, 1>, scalar_prefetch = 0 : i64, scratch_operands = 0 : i64, tpu.core_type = #tpu.core_type<tc>, window_params = [{transform_indices = @transform_0, window_bounds = array<i64: 256, 144>}, {transform_indices = @transform_1, window_bounds = array<i64: 144, 16>}, {transform_indices = @transform_2, window_bounds = array<i64: 1, 16>}, {transform_indices = @transform_3, window_bounds = array<i64: 256, 16>}, {transform_indices = @transform_4, window_bounds = array<i64: 256, 16>}]} {
    %c0 = arith.constant 0 : index
    %c0_0 = arith.constant 0 : index
    %0 = vector.load %arg2[%c0, %c0_0] : memref<256x144xbf16, #tpu.memory_space<vmem>>, vector<256x144xbf16>
    %1 = arith.extf %0 : vector<256x144xbf16> to vector<256x144xf32>
    %cst = arith.constant 0.000000e+00 : f32
    %2 = vector.broadcast %cst : f32 to vector<256x144xf32>
    %3 = arith.cmpf oge, %1, %2 : vector<256x144xf32>
    %cst_1 = arith.constant 0.00999999977 : f32
    %4 = vector.broadcast %cst_1 : f32 to vector<256x144xf32>
    %5 = arith.mulf %4, %1 : vector<256x144xf32>
    %6 = arith.select %3, %1, %5 : vector<256x144xi1>, vector<256x144xf32>
    %7 = arith.truncf %6 : vector<256x144xf32> to vector<256x144xbf16>
    %c0_2 = arith.constant 0 : index
    %c0_3 = arith.constant 0 : index
    %8 = vector.load %arg3[%c0_2, %c0_3] : memref<144x16xbf16, #tpu.memory_space<vmem>>, vector<144x16xbf16>
    %cst_4 = arith.constant dense<0.000000e+00> : vector<256x16xf32>
    %9 = tpu.matmul %7, %8, %cst_4 {dimension_numbers = #tpu.dot_dimension_numbers<[1], [0], [0], [1], [0, 0, 1, 1], [], []>} : vector<256x144xbf16>, vector<144x16xbf16>, vector<256x16xf32> -> vector<256x16xf32>
    %c0_5 = arith.constant 0 : index
    %c0_6 = arith.constant 0 : index
    %10 = vector.load %arg4[%c0_5, %c0_6] : memref<1x16xf32, #tpu.memory_space<vmem>>, vector<1x16xf32>
    %11 = vector.broadcast %10 : vector<1x16xf32> to vector<256x16xf32>
    %12 = arith.addf %9, %11 : vector<256x16xf32>
    %c0_7 = arith.constant 0 : index
    %c0_8 = arith.constant 0 : index
    %13 = vector.load %arg5[%c0_7, %c0_8] : memref<256x16xf32, #tpu.memory_space<vmem>>, vector<256x16xf32>
    %14 = arith.addf %12, %13 : vector<256x16xf32>
    %c0_9 = arith.constant 0 : index
    %c0_10 = arith.constant 0 : index
    %15 = vector.load %arg6[%c0_9, %c0_10] : memref<256x16xf32, #tpu.memory_space<vmem>>, vector<256x16xf32>
    tpu.vector_store %arg6[%c0_9, %c0_10], %14 {strides = array<i32>} : memref<256x16xf32, #tpu.memory_space<vmem>>, vector<256x16xf32>,
    return
  }
  func.func @transform_0(%arg0: i32, %arg1: i32) -> (i32, i32) {
    %c0_i32 = arith.constant 0 : i32
    %c0_i32_0 = arith.constant 0 : i32
    return %arg0, %c0_i32 : i32, i32
  }
  func.func @transform_1(%arg0: i32, %arg1: i32) -> (i32, i32) {
    %c0_i32 = arith.constant 0 : i32
    %c0_i32_0 = arith.constant 0 : i32
    return %c0_i32, %arg1 : i32, i32
  }
  func.func @transform_2(%arg0: i32, %arg1: i32) -> (i32, i32) {
    %c0_i32 = arith.constant 0 : i32
    %c0_i32_0 = arith.constant 0 : i32
    return %c0_i32, %arg1 : i32, i32
  }
  func.func @transform_3(%arg0: i32, %arg1: i32) -> (i32, i32) {
    %c0_i32 = arith.constant 0 : i32
    return %arg0, %arg1 : i32, i32
  }
  func.func @transform_4(%arg0: i32, %arg1: i32) -> (i32, i32) {
    %c0_i32 = arith.constant 0 : i32
    return %arg0, %arg1 : i32, i32
  }
}

module attributes {stable_mosaic.version = 11 : i64} {
  func.func @kernel(%arg0: i32, %arg1: i32, %arg2: memref<128x144xbf16, #tpu.memory_space<vmem>>, %arg3: memref<144x32xbf16, #tpu.memory_space<vmem>>, %arg4: memref<1x32xf32, #tpu.memory_space<vmem>>, %arg5: memref<128x32xf32, #tpu.memory_space<vmem>>) attributes {dimension_semantics = [#tpu.dimension_semantics<parallel>, #tpu.dimension_semantics<parallel>], iteration_bounds = array<i64: 1, 1>, scalar_prefetch = 0 : i64, scratch_operands = 0 : i64, tpu.core_type = #tpu.core_type<tc>, window_params = [{transform_indices = @transform_0, window_bounds = array<i64: 128, 144>}, {transform_indices = @transform_1, window_bounds = array<i64: 144, 32>}, {transform_indices = @transform_2, window_bounds = array<i64: 1, 32>}, {transform_indices = @transform_3, window_bounds = array<i64: 128, 32>}]} {
    %c0 = arith.constant 0 : index
    %c0_0 = arith.constant 0 : index
    %0 = vector.load %arg2[%c0, %c0_0] : memref<128x144xbf16, #tpu.memory_space<vmem>>, vector<128x144xbf16>
    %c0_1 = arith.constant 0 : index
    %c0_2 = arith.constant 0 : index
    %1 = vector.load %arg3[%c0_1, %c0_2] : memref<144x32xbf16, #tpu.memory_space<vmem>>, vector<144x32xbf16>
    %cst = arith.constant dense<0.000000e+00> : vector<128x32xf32>
    %2 = tpu.matmul %0, %1, %cst {dimension_numbers = #tpu.dot_dimension_numbers<[1], [0], [0], [1], [0, 0, 1, 1], [], []>} : vector<128x144xbf16>, vector<144x32xbf16>, vector<128x32xf32> -> vector<128x32xf32>
    %c0_3 = arith.constant 0 : index
    %c0_4 = arith.constant 0 : index
    %3 = vector.load %arg4[%c0_3, %c0_4] : memref<1x32xf32, #tpu.memory_space<vmem>>, vector<1x32xf32>
    %4 = vector.broadcast %3 : vector<1x32xf32> to vector<128x32xf32>
    %5 = arith.addf %2, %4 : vector<128x32xf32>
    %c0_5 = arith.constant 0 : index
    %c0_6 = arith.constant 0 : index
    %6 = vector.load %arg5[%c0_5, %c0_6] : memref<128x32xf32, #tpu.memory_space<vmem>>, vector<128x32xf32>
    tpu.vector_store %arg5[%c0_5, %c0_6], %5 {strides = array<i32>} : memref<128x32xf32, #tpu.memory_space<vmem>>, vector<128x32xf32>,
    return
  }
  func.func @transform_0(%arg0: i32, %arg1: i32) -> (i32, i32) {
    %c0_i32 = arith.constant 0 : i32
    %c0_i32_0 = arith.constant 0 : i32
    return %arg0, %c0_i32 : i32, i32
  }
  func.func @transform_1(%arg0: i32, %arg1: i32) -> (i32, i32) {
    %c0_i32 = arith.constant 0 : i32
    %c0_i32_0 = arith.constant 0 : i32
    return %c0_i32, %arg1 : i32, i32
  }
  func.func @transform_2(%arg0: i32, %arg1: i32) -> (i32, i32) {
    %c0_i32 = arith.constant 0 : i32
    %c0_i32_0 = arith.constant 0 : i32
    return %c0_i32, %arg1 : i32, i32
  }
  func.func @transform_3(%arg0: i32, %arg1: i32) -> (i32, i32) {
    %c0_i32 = arith.constant 0 : i32
    return %arg0, %arg1 : i32, i32
  }
}

module attributes {stable_mosaic.version = 11 : i64} {
  func.func @kernel(%arg0: i32, %arg1: i32, %arg2: memref<128x288xbf16, #tpu.memory_space<vmem>>, %arg3: memref<288x32xbf16, #tpu.memory_space<vmem>>, %arg4: memref<1x32xf32, #tpu.memory_space<vmem>>, %arg5: memref<128x32xf32, #tpu.memory_space<vmem>>, %arg6: memref<128x32xf32, #tpu.memory_space<vmem>>) attributes {dimension_semantics = [#tpu.dimension_semantics<parallel>, #tpu.dimension_semantics<parallel>], iteration_bounds = array<i64: 1, 1>, scalar_prefetch = 0 : i64, scratch_operands = 0 : i64, tpu.core_type = #tpu.core_type<tc>, window_params = [{transform_indices = @transform_0, window_bounds = array<i64: 128, 288>}, {transform_indices = @transform_1, window_bounds = array<i64: 288, 32>}, {transform_indices = @transform_2, window_bounds = array<i64: 1, 32>}, {transform_indices = @transform_3, window_bounds = array<i64: 128, 32>}, {transform_indices = @transform_4, window_bounds = array<i64: 128, 32>}]} {
    %c0 = arith.constant 0 : index
    %c0_0 = arith.constant 0 : index
    %0 = vector.load %arg2[%c0, %c0_0] : memref<128x288xbf16, #tpu.memory_space<vmem>>, vector<128x288xbf16>
    %1 = arith.extf %0 : vector<128x288xbf16> to vector<128x288xf32>
    %cst = arith.constant 0.000000e+00 : f32
    %2 = vector.broadcast %cst : f32 to vector<128x288xf32>
    %3 = arith.cmpf oge, %1, %2 : vector<128x288xf32>
    %cst_1 = arith.constant 0.00999999977 : f32
    %4 = vector.broadcast %cst_1 : f32 to vector<128x288xf32>
    %5 = arith.mulf %4, %1 : vector<128x288xf32>
    %6 = arith.select %3, %1, %5 : vector<128x288xi1>, vector<128x288xf32>
    %7 = arith.truncf %6 : vector<128x288xf32> to vector<128x288xbf16>
    %c0_2 = arith.constant 0 : index
    %c0_3 = arith.constant 0 : index
    %8 = vector.load %arg3[%c0_2, %c0_3] : memref<288x32xbf16, #tpu.memory_space<vmem>>, vector<288x32xbf16>
    %cst_4 = arith.constant dense<0.000000e+00> : vector<128x32xf32>
    %9 = tpu.matmul %7, %8, %cst_4 {dimension_numbers = #tpu.dot_dimension_numbers<[1], [0], [0], [1], [0, 0, 1, 1], [], []>} : vector<128x288xbf16>, vector<288x32xbf16>, vector<128x32xf32> -> vector<128x32xf32>
    %c0_5 = arith.constant 0 : index
    %c0_6 = arith.constant 0 : index
    %10 = vector.load %arg4[%c0_5, %c0_6] : memref<1x32xf32, #tpu.memory_space<vmem>>, vector<1x32xf32>
    %11 = vector.broadcast %10 : vector<1x32xf32> to vector<128x32xf32>
    %12 = arith.addf %9, %11 : vector<128x32xf32>
    %c0_7 = arith.constant 0 : index
    %c0_8 = arith.constant 0 : index
    %13 = vector.load %arg5[%c0_7, %c0_8] : memref<128x32xf32, #tpu.memory_space<vmem>>, vector<128x32xf32>
    %14 = arith.addf %12, %13 : vector<128x32xf32>
    %c0_9 = arith.constant 0 : index
    %c0_10 = arith.constant 0 : index
    %15 = vector.load %arg6[%c0_9, %c0_10] : memref<128x32xf32, #tpu.memory_space<vmem>>, vector<128x32xf32>
    tpu.vector_store %arg6[%c0_9, %c0_10], %14 {strides = array<i32>} : memref<128x32xf32, #tpu.memory_space<vmem>>, vector<128x32xf32>,
    return
  }
  func.func @transform_0(%arg0: i32, %arg1: i32) -> (i32, i32) {
    %c0_i32 = arith.constant 0 : i32
    %c0_i32_0 = arith.constant 0 : i32
    return %arg0, %c0_i32 : i32, i32
  }
  func.func @transform_1(%arg0: i32, %arg1: i32) -> (i32, i32) {
    %c0_i32 = arith.constant 0 : i32
    %c0_i32_0 = arith.constant 0 : i32
    return %c0_i32, %arg1 : i32, i32
  }
  func.func @transform_2(%arg0: i32, %arg1: i32) -> (i32, i32) {
    %c0_i32 = arith.constant 0 : i32
    %c0_i32_0 = arith.constant 0 : i32
    return %c0_i32, %arg1 : i32, i32
  }
  func.func @transform_3(%arg0: i32, %arg1: i32) -> (i32, i32) {
    %c0_i32 = arith.constant 0 : i32
    return %arg0, %arg1 : i32, i32
  }
  func.func @transform_4(%arg0: i32, %arg1: i32) -> (i32, i32) {
    %c0_i32 = arith.constant 0 : i32
    return %arg0, %arg1 : i32, i32
  }
}

module attributes {stable_mosaic.version = 11 : i64} {
  func.func @kernel(%arg0: i32, %arg1: i32, %arg2: memref<32x288xbf16, #tpu.memory_space<vmem>>, %arg3: memref<288x32xbf16, #tpu.memory_space<vmem>>, %arg4: memref<1x32xf32, #tpu.memory_space<vmem>>, %arg5: memref<32x32xf32, #tpu.memory_space<vmem>>) attributes {dimension_semantics = [#tpu.dimension_semantics<parallel>, #tpu.dimension_semantics<parallel>], iteration_bounds = array<i64: 1, 1>, scalar_prefetch = 0 : i64, scratch_operands = 0 : i64, tpu.core_type = #tpu.core_type<tc>, window_params = [{transform_indices = @transform_0, window_bounds = array<i64: 32, 288>}, {transform_indices = @transform_1, window_bounds = array<i64: 288, 32>}, {transform_indices = @transform_2, window_bounds = array<i64: 1, 32>}, {transform_indices = @transform_3, window_bounds = array<i64: 32, 32>}]} {
    %c0 = arith.constant 0 : index
    %c0_0 = arith.constant 0 : index
    %0 = vector.load %arg2[%c0, %c0_0] : memref<32x288xbf16, #tpu.memory_space<vmem>>, vector<32x288xbf16>
    %c0_1 = arith.constant 0 : index
    %c0_2 = arith.constant 0 : index
    %1 = vector.load %arg3[%c0_1, %c0_2] : memref<288x32xbf16, #tpu.memory_space<vmem>>, vector<288x32xbf16>
    %cst = arith.constant dense<0.000000e+00> : vector<32x32xf32>
    %2 = tpu.matmul %0, %1, %cst {dimension_numbers = #tpu.dot_dimension_numbers<[1], [0], [0], [1], [0, 0, 1, 1], [], []>} : vector<32x288xbf16>, vector<288x32xbf16>, vector<32x32xf32> -> vector<32x32xf32>
    %c0_3 = arith.constant 0 : index
    %c0_4 = arith.constant 0 : index
    %3 = vector.load %arg4[%c0_3, %c0_4] : memref<1x32xf32, #tpu.memory_space<vmem>>, vector<1x32xf32>
    %4 = vector.broadcast %3 : vector<1x32xf32> to vector<32x32xf32>
    %5 = arith.addf %2, %4 : vector<32x32xf32>
    %c0_5 = arith.constant 0 : index
    %c0_6 = arith.constant 0 : index
    %6 = vector.load %arg5[%c0_5, %c0_6] : memref<32x32xf32, #tpu.memory_space<vmem>>, vector<32x32xf32>
    tpu.vector_store %arg5[%c0_5, %c0_6], %5 {strides = array<i32>} : memref<32x32xf32, #tpu.memory_space<vmem>>, vector<32x32xf32>,
    return
  }
  func.func @transform_0(%arg0: i32, %arg1: i32) -> (i32, i32) {
    %c0_i32 = arith.constant 0 : i32
    %c0_i32_0 = arith.constant 0 : i32
    return %arg0, %c0_i32 : i32, i32
  }
  func.func @transform_1(%arg0: i32, %arg1: i32) -> (i32, i32) {
    %c0_i32 = arith.constant 0 : i32
    %c0_i32_0 = arith.constant 0 : i32
    return %c0_i32, %arg1 : i32, i32
  }
  func.func @transform_2(%arg0: i32, %arg1: i32) -> (i32, i32) {
    %c0_i32 = arith.constant 0 : i32
    %c0_i32_0 = arith.constant 0 : i32
    return %c0_i32, %arg1 : i32, i32
  }
  func.func @transform_3(%arg0: i32, %arg1: i32) -> (i32, i32) {
    %c0_i32 = arith.constant 0 : i32
    return %arg0, %arg1 : i32, i32
  }
}

module attributes {stable_mosaic.version = 11 : i64} {
  func.func @kernel(%arg0: i32, %arg1: i32, %arg2: memref<32x288xbf16, #tpu.memory_space<vmem>>, %arg3: memref<288x32xbf16, #tpu.memory_space<vmem>>, %arg4: memref<1x32xf32, #tpu.memory_space<vmem>>, %arg5: memref<32x32xf32, #tpu.memory_space<vmem>>, %arg6: memref<32x32xf32, #tpu.memory_space<vmem>>) attributes {dimension_semantics = [#tpu.dimension_semantics<parallel>, #tpu.dimension_semantics<parallel>], iteration_bounds = array<i64: 1, 1>, scalar_prefetch = 0 : i64, scratch_operands = 0 : i64, tpu.core_type = #tpu.core_type<tc>, window_params = [{transform_indices = @transform_0, window_bounds = array<i64: 32, 288>}, {transform_indices = @transform_1, window_bounds = array<i64: 288, 32>}, {transform_indices = @transform_2, window_bounds = array<i64: 1, 32>}, {transform_indices = @transform_3, window_bounds = array<i64: 32, 32>}, {transform_indices = @transform_4, window_bounds = array<i64: 32, 32>}]} {
    %c0 = arith.constant 0 : index
    %c0_0 = arith.constant 0 : index
    %0 = vector.load %arg2[%c0, %c0_0] : memref<32x288xbf16, #tpu.memory_space<vmem>>, vector<32x288xbf16>
    %1 = arith.extf %0 : vector<32x288xbf16> to vector<32x288xf32>
    %cst = arith.constant 0.000000e+00 : f32
    %2 = vector.broadcast %cst : f32 to vector<32x288xf32>
    %3 = arith.cmpf oge, %1, %2 : vector<32x288xf32>
    %cst_1 = arith.constant 0.00999999977 : f32
    %4 = vector.broadcast %cst_1 : f32 to vector<32x288xf32>
    %5 = arith.mulf %4, %1 : vector<32x288xf32>
    %6 = arith.select %3, %1, %5 : vector<32x288xi1>, vector<32x288xf32>
    %7 = arith.truncf %6 : vector<32x288xf32> to vector<32x288xbf16>
    %c0_2 = arith.constant 0 : index
    %c0_3 = arith.constant 0 : index
    %8 = vector.load %arg3[%c0_2, %c0_3] : memref<288x32xbf16, #tpu.memory_space<vmem>>, vector<288x32xbf16>
    %cst_4 = arith.constant dense<0.000000e+00> : vector<32x32xf32>
    %9 = tpu.matmul %7, %8, %cst_4 {dimension_numbers = #tpu.dot_dimension_numbers<[1], [0], [0], [1], [0, 0, 1, 1], [], []>} : vector<32x288xbf16>, vector<288x32xbf16>, vector<32x32xf32> -> vector<32x32xf32>
    %c0_5 = arith.constant 0 : index
    %c0_6 = arith.constant 0 : index
    %10 = vector.load %arg4[%c0_5, %c0_6] : memref<1x32xf32, #tpu.memory_space<vmem>>, vector<1x32xf32>
    %11 = vector.broadcast %10 : vector<1x32xf32> to vector<32x32xf32>
    %12 = arith.addf %9, %11 : vector<32x32xf32>
    %c0_7 = arith.constant 0 : index
    %c0_8 = arith.constant 0 : index
    %13 = vector.load %arg5[%c0_7, %c0_8] : memref<32x32xf32, #tpu.memory_space<vmem>>, vector<32x32xf32>
    %14 = arith.addf %12, %13 : vector<32x32xf32>
    %c0_9 = arith.constant 0 : index
    %c0_10 = arith.constant 0 : index
    %15 = vector.load %arg6[%c0_9, %c0_10] : memref<32x32xf32, #tpu.memory_space<vmem>>, vector<32x32xf32>
    tpu.vector_store %arg6[%c0_9, %c0_10], %14 {strides = array<i32>} : memref<32x32xf32, #tpu.memory_space<vmem>>, vector<32x32xf32>,
    return
  }
  func.func @transform_0(%arg0: i32, %arg1: i32) -> (i32, i32) {
    %c0_i32 = arith.constant 0 : i32
    %c0_i32_0 = arith.constant 0 : i32
    return %arg0, %c0_i32 : i32, i32
  }
  func.func @transform_1(%arg0: i32, %arg1: i32) -> (i32, i32) {
    %c0_i32 = arith.constant 0 : i32
    %c0_i32_0 = arith.constant 0 : i32
    return %c0_i32, %arg1 : i32, i32
  }
  func.func @transform_2(%arg0: i32, %arg1: i32) -> (i32, i32) {
    %c0_i32 = arith.constant 0 : i32
    %c0_i32_0 = arith.constant 0 : i32
    return %c0_i32, %arg1 : i32, i32
  }
  func.func @transform_3(%arg0: i32, %arg1: i32) -> (i32, i32) {
    %c0_i32 = arith.constant 0 : i32
    return %arg0, %arg1 : i32, i32
  }
  func.func @transform_4(%arg0: i32, %arg1: i32) -> (i32, i32) {
    %c0_i32 = arith.constant 0 : i32
    return %arg0, %arg1 : i32, i32
  }
}

module attributes {stable_mosaic.version = 11 : i64} {
  func.func @kernel(%arg0: i32, %arg1: i32, %arg2: memref<8x288xbf16, #tpu.memory_space<vmem>>, %arg3: memref<288x32xbf16, #tpu.memory_space<vmem>>, %arg4: memref<1x32xf32, #tpu.memory_space<vmem>>, %arg5: memref<8x32xf32, #tpu.memory_space<vmem>>, %arg6: memref<8x32xf32, #tpu.memory_space<vmem>>) attributes {dimension_semantics = [#tpu.dimension_semantics<parallel>, #tpu.dimension_semantics<parallel>], iteration_bounds = array<i64: 1, 1>, scalar_prefetch = 0 : i64, scratch_operands = 0 : i64, tpu.core_type = #tpu.core_type<tc>, window_params = [{transform_indices = @transform_0, window_bounds = array<i64: 8, 288>}, {transform_indices = @transform_1, window_bounds = array<i64: 288, 32>}, {transform_indices = @transform_2, window_bounds = array<i64: 1, 32>}, {transform_indices = @transform_3, window_bounds = array<i64: 8, 32>}, {transform_indices = @transform_4, window_bounds = array<i64: 8, 32>}]} {
    %c0 = arith.constant 0 : index
    %c0_0 = arith.constant 0 : index
    %0 = vector.load %arg2[%c0, %c0_0] : memref<8x288xbf16, #tpu.memory_space<vmem>>, vector<8x288xbf16>
    %1 = arith.extf %0 : vector<8x288xbf16> to vector<8x288xf32>
    %cst = arith.constant 0.000000e+00 : f32
    %2 = vector.broadcast %cst : f32 to vector<8x288xf32>
    %3 = arith.cmpf oge, %1, %2 : vector<8x288xf32>
    %cst_1 = arith.constant 0.00999999977 : f32
    %4 = vector.broadcast %cst_1 : f32 to vector<8x288xf32>
    %5 = arith.mulf %4, %1 : vector<8x288xf32>
    %6 = arith.select %3, %1, %5 : vector<8x288xi1>, vector<8x288xf32>
    %7 = arith.truncf %6 : vector<8x288xf32> to vector<8x288xbf16>
    %c0_2 = arith.constant 0 : index
    %c0_3 = arith.constant 0 : index
    %8 = vector.load %arg3[%c0_2, %c0_3] : memref<288x32xbf16, #tpu.memory_space<vmem>>, vector<288x32xbf16>
    %cst_4 = arith.constant dense<0.000000e+00> : vector<8x32xf32>
    %9 = tpu.matmul %7, %8, %cst_4 {dimension_numbers = #tpu.dot_dimension_numbers<[1], [0], [0], [1], [0, 0, 1, 1], [], []>} : vector<8x288xbf16>, vector<288x32xbf16>, vector<8x32xf32> -> vector<8x32xf32>
    %c0_5 = arith.constant 0 : index
    %c0_6 = arith.constant 0 : index
    %10 = vector.load %arg4[%c0_5, %c0_6] : memref<1x32xf32, #tpu.memory_space<vmem>>, vector<1x32xf32>
    %11 = vector.broadcast %10 : vector<1x32xf32> to vector<8x32xf32>
    %12 = arith.addf %9, %11 : vector<8x32xf32>
    %c0_7 = arith.constant 0 : index
    %c0_8 = arith.constant 0 : index
    %13 = vector.load %arg5[%c0_7, %c0_8] : memref<8x32xf32, #tpu.memory_space<vmem>>, vector<8x32xf32>
    %14 = arith.addf %12, %13 : vector<8x32xf32>
    %c0_9 = arith.constant 0 : index
    %c0_10 = arith.constant 0 : index
    %15 = vector.load %arg6[%c0_9, %c0_10] : memref<8x32xf32, #tpu.memory_space<vmem>>, vector<8x32xf32>
    tpu.vector_store %arg6[%c0_9, %c0_10], %14 {strides = array<i32>} : memref<8x32xf32, #tpu.memory_space<vmem>>, vector<8x32xf32>,
    return
  }
  func.func @transform_0(%arg0: i32, %arg1: i32) -> (i32, i32) {
    %c0_i32 = arith.constant 0 : i32
    %c0_i32_0 = arith.constant 0 : i32
    return %arg0, %c0_i32 : i32, i32
  }
  func.func @transform_1(%arg0: i32, %arg1: i32) -> (i32, i32) {
    %c0_i32 = arith.constant 0 : i32
    %c0_i32_0 = arith.constant 0 : i32
    return %c0_i32, %arg1 : i32, i32
  }
  func.func @transform_2(%arg0: i32, %arg1: i32) -> (i32, i32) {
    %c0_i32 = arith.constant 0 : i32
    %c0_i32_0 = arith.constant 0 : i32
    return %c0_i32, %arg1 : i32, i32
  }
  func.func @transform_3(%arg0: i32, %arg1: i32) -> (i32, i32) {
    %c0_i32 = arith.constant 0 : i32
    return %arg0, %arg1 : i32, i32
  }
  func.func @transform_4(%arg0: i32, %arg1: i32) -> (i32, i32) {
    %c0_i32 = arith.constant 0 : i32
    return %arg0, %arg1 : i32, i32
  }
}

module attributes {stable_mosaic.version = 11 : i64} {
  func.func @kernel(%arg0: i32, %arg1: i32, %arg2: memref<8x288xbf16, #tpu.memory_space<vmem>>, %arg3: memref<288x32xbf16, #tpu.memory_space<vmem>>, %arg4: memref<1x32xf32, #tpu.memory_space<vmem>>, %arg5: memref<8x32xf32, #tpu.memory_space<vmem>>) attributes {dimension_semantics = [#tpu.dimension_semantics<parallel>, #tpu.dimension_semantics<parallel>], iteration_bounds = array<i64: 1, 1>, scalar_prefetch = 0 : i64, scratch_operands = 0 : i64, tpu.core_type = #tpu.core_type<tc>, window_params = [{transform_indices = @transform_0, window_bounds = array<i64: 8, 288>}, {transform_indices = @transform_1, window_bounds = array<i64: 288, 32>}, {transform_indices = @transform_2, window_bounds = array<i64: 1, 32>}, {transform_indices = @transform_3, window_bounds = array<i64: 8, 32>}]} {
    %c0 = arith.constant 0 : index
    %c0_0 = arith.constant 0 : index
    %0 = vector.load %arg2[%c0, %c0_0] : memref<8x288xbf16, #tpu.memory_space<vmem>>, vector<8x288xbf16>
    %c0_1 = arith.constant 0 : index
    %c0_2 = arith.constant 0 : index
    %1 = vector.load %arg3[%c0_1, %c0_2] : memref<288x32xbf16, #tpu.memory_space<vmem>>, vector<288x32xbf16>
    %cst = arith.constant dense<0.000000e+00> : vector<8x32xf32>
    %2 = tpu.matmul %0, %1, %cst {dimension_numbers = #tpu.dot_dimension_numbers<[1], [0], [0], [1], [0, 0, 1, 1], [], []>} : vector<8x288xbf16>, vector<288x32xbf16>, vector<8x32xf32> -> vector<8x32xf32>
    %c0_3 = arith.constant 0 : index
    %c0_4 = arith.constant 0 : index
    %3 = vector.load %arg4[%c0_3, %c0_4] : memref<1x32xf32, #tpu.memory_space<vmem>>, vector<1x32xf32>
    %4 = vector.broadcast %3 : vector<1x32xf32> to vector<8x32xf32>
    %5 = arith.addf %2, %4 : vector<8x32xf32>
    %c0_5 = arith.constant 0 : index
    %c0_6 = arith.constant 0 : index
    %6 = vector.load %arg5[%c0_5, %c0_6] : memref<8x32xf32, #tpu.memory_space<vmem>>, vector<8x32xf32>
    tpu.vector_store %arg5[%c0_5, %c0_6], %5 {strides = array<i32>} : memref<8x32xf32, #tpu.memory_space<vmem>>, vector<8x32xf32>,
    return
  }
  func.func @transform_0(%arg0: i32, %arg1: i32) -> (i32, i32) {
    %c0_i32 = arith.constant 0 : i32
    %c0_i32_0 = arith.constant 0 : i32
    return %arg0, %c0_i32 : i32, i32
  }
  func.func @transform_1(%arg0: i32, %arg1: i32) -> (i32, i32) {
    %c0_i32 = arith.constant 0 : i32
    %c0_i32_0 = arith.constant 0 : i32
    return %c0_i32, %arg1 : i32, i32
  }
  func.func @transform_2(%arg0: i32, %arg1: i32) -> (i32, i32) {
    %c0_i32 = arith.constant 0 : i32
    %c0_i32_0 = arith.constant 0 : i32
    return %c0_i32, %arg1 : i32, i32
  }
  func.func @transform_3(%arg0: i32, %arg1: i32) -> (i32, i32) {
    %c0_i32 = arith.constant 0 : i32
    return %arg0, %arg1 : i32, i32
  }
}

module attributes {stable_mosaic.version = 11 : i64} {
  func.func @kernel(%arg0: i32, %arg1: i32, %arg2: memref<8x32xbf16, #tpu.memory_space<vmem>>, %arg3: memref<32x32xbf16, #tpu.memory_space<vmem>>, %arg4: memref<1x32xf32, #tpu.memory_space<vmem>>, %arg5: memref<8x32xf32, #tpu.memory_space<vmem>>) attributes {dimension_semantics = [#tpu.dimension_semantics<parallel>, #tpu.dimension_semantics<parallel>], iteration_bounds = array<i64: 1, 1>, scalar_prefetch = 0 : i64, scratch_operands = 0 : i64, tpu.core_type = #tpu.core_type<tc>, window_params = [{transform_indices = @transform_0, window_bounds = array<i64: 8, 32>}, {transform_indices = @transform_1, window_bounds = array<i64: 32, 32>}, {transform_indices = @transform_2, window_bounds = array<i64: 1, 32>}, {transform_indices = @transform_3, window_bounds = array<i64: 8, 32>}]} {
    %c0 = arith.constant 0 : index
    %c0_0 = arith.constant 0 : index
    %0 = vector.load %arg2[%c0, %c0_0] : memref<8x32xbf16, #tpu.memory_space<vmem>>, vector<8x32xbf16>
    %c0_1 = arith.constant 0 : index
    %c0_2 = arith.constant 0 : index
    %1 = vector.load %arg3[%c0_1, %c0_2] : memref<32x32xbf16, #tpu.memory_space<vmem>>, vector<32x32xbf16>
    %cst = arith.constant dense<0.000000e+00> : vector<8x32xf32>
    %2 = tpu.matmul %0, %1, %cst {dimension_numbers = #tpu.dot_dimension_numbers<[1], [0], [0], [1], [0, 0, 1, 1], [], []>} : vector<8x32xbf16>, vector<32x32xbf16>, vector<8x32xf32> -> vector<8x32xf32>
    %c0_3 = arith.constant 0 : index
    %c0_4 = arith.constant 0 : index
    %3 = vector.load %arg4[%c0_3, %c0_4] : memref<1x32xf32, #tpu.memory_space<vmem>>, vector<1x32xf32>
    %4 = vector.broadcast %3 : vector<1x32xf32> to vector<8x32xf32>
    %5 = arith.addf %2, %4 : vector<8x32xf32>
    %c0_5 = arith.constant 0 : index
    %c0_6 = arith.constant 0 : index
    %6 = vector.load %arg5[%c0_5, %c0_6] : memref<8x32xf32, #tpu.memory_space<vmem>>, vector<8x32xf32>
    tpu.vector_store %arg5[%c0_5, %c0_6], %5 {strides = array<i32>} : memref<8x32xf32, #tpu.memory_space<vmem>>, vector<8x32xf32>,
    return
  }
  func.func @transform_0(%arg0: i32, %arg1: i32) -> (i32, i32) {
    %c0_i32 = arith.constant 0 : i32
    %c0_i32_0 = arith.constant 0 : i32
    return %arg0, %c0_i32 : i32, i32
  }
  func.func @transform_1(%arg0: i32, %arg1: i32) -> (i32, i32) {
    %c0_i32 = arith.constant 0 : i32
    %c0_i32_0 = arith.constant 0 : i32
    return %c0_i32, %arg1 : i32, i32
  }
  func.func @transform_2(%arg0: i32, %arg1: i32) -> (i32, i32) {
    %c0_i32 = arith.constant 0 : i32
    %c0_i32_0 = arith.constant 0 : i32
    return %c0_i32, %arg1 : i32, i32
  }
  func.func @transform_3(%arg0: i32, %arg1: i32) -> (i32, i32) {
    %c0_i32 = arith.constant 0 : i32
    return %arg0, %arg1 : i32, i32
  }
}

module attributes {stable_mosaic.version = 11 : i64} {
  func.func @kernel(%arg0: i32, %arg1: i32, %arg2: memref<8x32xbf16, #tpu.memory_space<vmem>>, %arg3: memref<32x32xbf16, #tpu.memory_space<vmem>>, %arg4: memref<1x32xf32, #tpu.memory_space<vmem>>, %arg5: memref<8x32xf32, #tpu.memory_space<vmem>>) attributes {dimension_semantics = [#tpu.dimension_semantics<parallel>, #tpu.dimension_semantics<parallel>], iteration_bounds = array<i64: 1, 1>, scalar_prefetch = 0 : i64, scratch_operands = 0 : i64, tpu.core_type = #tpu.core_type<tc>, window_params = [{transform_indices = @transform_0, window_bounds = array<i64: 8, 32>}, {transform_indices = @transform_1, window_bounds = array<i64: 32, 32>}, {transform_indices = @transform_2, window_bounds = array<i64: 1, 32>}, {transform_indices = @transform_3, window_bounds = array<i64: 8, 32>}]} {
    %c0 = arith.constant 0 : index
    %c0_0 = arith.constant 0 : index
    %0 = vector.load %arg2[%c0, %c0_0] : memref<8x32xbf16, #tpu.memory_space<vmem>>, vector<8x32xbf16>
    %1 = arith.extf %0 : vector<8x32xbf16> to vector<8x32xf32>
    %cst = arith.constant 0.000000e+00 : f32
    %2 = vector.broadcast %cst : f32 to vector<8x32xf32>
    %3 = arith.cmpf oge, %1, %2 : vector<8x32xf32>
    %cst_1 = arith.constant 0.00999999977 : f32
    %4 = vector.broadcast %cst_1 : f32 to vector<8x32xf32>
    %5 = arith.mulf %4, %1 : vector<8x32xf32>
    %6 = arith.select %3, %1, %5 : vector<8x32xi1>, vector<8x32xf32>
    %7 = arith.truncf %6 : vector<8x32xf32> to vector<8x32xbf16>
    %c0_2 = arith.constant 0 : index
    %c0_3 = arith.constant 0 : index
    %8 = vector.load %arg3[%c0_2, %c0_3] : memref<32x32xbf16, #tpu.memory_space<vmem>>, vector<32x32xbf16>
    %cst_4 = arith.constant dense<0.000000e+00> : vector<8x32xf32>
    %9 = tpu.matmul %7, %8, %cst_4 {dimension_numbers = #tpu.dot_dimension_numbers<[1], [0], [0], [1], [0, 0, 1, 1], [], []>} : vector<8x32xbf16>, vector<32x32xbf16>, vector<8x32xf32> -> vector<8x32xf32>
    %c0_5 = arith.constant 0 : index
    %c0_6 = arith.constant 0 : index
    %10 = vector.load %arg4[%c0_5, %c0_6] : memref<1x32xf32, #tpu.memory_space<vmem>>, vector<1x32xf32>
    %11 = vector.broadcast %10 : vector<1x32xf32> to vector<8x32xf32>
    %12 = arith.addf %9, %11 : vector<8x32xf32>
    %c0_7 = arith.constant 0 : index
    %c0_8 = arith.constant 0 : index
    %13 = vector.load %arg5[%c0_7, %c0_8] : memref<8x32xf32, #tpu.memory_space<vmem>>, vector<8x32xf32>
    tpu.vector_store %arg5[%c0_7, %c0_8], %12 {strides = array<i32>} : memref<8x32xf32, #tpu.memory_space<vmem>>, vector<8x32xf32>,
    return
  }
  func.func @transform_0(%arg0: i32, %arg1: i32) -> (i32, i32) {
    %c0_i32 = arith.constant 0 : i32
    %c0_i32_0 = arith.constant 0 : i32
    return %arg0, %c0_i32 : i32, i32
  }
  func.func @transform_1(%arg0: i32, %arg1: i32) -> (i32, i32) {
    %c0_i32 = arith.constant 0 : i32
    %c0_i32_0 = arith.constant 0 : i32
    return %c0_i32, %arg1 : i32, i32
  }
  func.func @transform_2(%arg0: i32, %arg1: i32) -> (i32, i32) {
    %c0_i32 = arith.constant 0 : i32
    %c0_i32_0 = arith.constant 0 : i32
    return %c0_i32, %arg1 : i32, i32
  }
  func.func @transform_3(%arg0: i32, %arg1: i32) -> (i32, i32) {
    %c0_i32 = arith.constant 0 : i32
    return %arg0, %arg1 : i32, i32
  }
}

module attributes {stable_mosaic.version = 11 : i64} {
  func.func @kernel(%arg0: i32, %arg1: i32, %arg2: memref<8x576xbf16, #tpu.memory_space<vmem>>, %arg3: memref<576x32xbf16, #tpu.memory_space<vmem>>, %arg4: memref<1x32xf32, #tpu.memory_space<vmem>>, %arg5: memref<8x32xf32, #tpu.memory_space<vmem>>, %arg6: memref<8x32xf32, #tpu.memory_space<vmem>>) attributes {dimension_semantics = [#tpu.dimension_semantics<parallel>, #tpu.dimension_semantics<parallel>], iteration_bounds = array<i64: 1, 1>, scalar_prefetch = 0 : i64, scratch_operands = 0 : i64, tpu.core_type = #tpu.core_type<tc>, window_params = [{transform_indices = @transform_0, window_bounds = array<i64: 8, 576>}, {transform_indices = @transform_1, window_bounds = array<i64: 576, 32>}, {transform_indices = @transform_2, window_bounds = array<i64: 1, 32>}, {transform_indices = @transform_3, window_bounds = array<i64: 8, 32>}, {transform_indices = @transform_4, window_bounds = array<i64: 8, 32>}]} {
    %c0 = arith.constant 0 : index
    %c0_0 = arith.constant 0 : index
    %0 = vector.load %arg2[%c0, %c0_0] : memref<8x576xbf16, #tpu.memory_space<vmem>>, vector<8x576xbf16>
    %1 = arith.extf %0 : vector<8x576xbf16> to vector<8x576xf32>
    %cst = arith.constant 0.000000e+00 : f32
    %2 = vector.broadcast %cst : f32 to vector<8x576xf32>
    %3 = arith.cmpf oge, %1, %2 : vector<8x576xf32>
    %cst_1 = arith.constant 0.00999999977 : f32
    %4 = vector.broadcast %cst_1 : f32 to vector<8x576xf32>
    %5 = arith.mulf %4, %1 : vector<8x576xf32>
    %6 = arith.select %3, %1, %5 : vector<8x576xi1>, vector<8x576xf32>
    %7 = arith.truncf %6 : vector<8x576xf32> to vector<8x576xbf16>
    %c0_2 = arith.constant 0 : index
    %c0_3 = arith.constant 0 : index
    %8 = vector.load %arg3[%c0_2, %c0_3] : memref<576x32xbf16, #tpu.memory_space<vmem>>, vector<576x32xbf16>
    %cst_4 = arith.constant dense<0.000000e+00> : vector<8x32xf32>
    %9 = tpu.matmul %7, %8, %cst_4 {dimension_numbers = #tpu.dot_dimension_numbers<[1], [0], [0], [1], [0, 0, 1, 1], [], []>} : vector<8x576xbf16>, vector<576x32xbf16>, vector<8x32xf32> -> vector<8x32xf32>
    %c0_5 = arith.constant 0 : index
    %c0_6 = arith.constant 0 : index
    %10 = vector.load %arg4[%c0_5, %c0_6] : memref<1x32xf32, #tpu.memory_space<vmem>>, vector<1x32xf32>
    %11 = vector.broadcast %10 : vector<1x32xf32> to vector<8x32xf32>
    %12 = arith.addf %9, %11 : vector<8x32xf32>
    %c0_7 = arith.constant 0 : index
    %c0_8 = arith.constant 0 : index
    %13 = vector.load %arg5[%c0_7, %c0_8] : memref<8x32xf32, #tpu.memory_space<vmem>>, vector<8x32xf32>
    %14 = arith.addf %12, %13 : vector<8x32xf32>
    %c0_9 = arith.constant 0 : index
    %c0_10 = arith.constant 0 : index
    %15 = vector.load %arg6[%c0_9, %c0_10] : memref<8x32xf32, #tpu.memory_space<vmem>>, vector<8x32xf32>
    tpu.vector_store %arg6[%c0_9, %c0_10], %14 {strides = array<i32>} : memref<8x32xf32, #tpu.memory_space<vmem>>, vector<8x32xf32>,
    return
  }
  func.func @transform_0(%arg0: i32, %arg1: i32) -> (i32, i32) {
    %c0_i32 = arith.constant 0 : i32
    %c0_i32_0 = arith.constant 0 : i32
    return %arg0, %c0_i32 : i32, i32
  }
  func.func @transform_1(%arg0: i32, %arg1: i32) -> (i32, i32) {
    %c0_i32 = arith.constant 0 : i32
    %c0_i32_0 = arith.constant 0 : i32
    return %c0_i32, %arg1 : i32, i32
  }
  func.func @transform_2(%arg0: i32, %arg1: i32) -> (i32, i32) {
    %c0_i32 = arith.constant 0 : i32
    %c0_i32_0 = arith.constant 0 : i32
    return %c0_i32, %arg1 : i32, i32
  }
  func.func @transform_3(%arg0: i32, %arg1: i32) -> (i32, i32) {
    %c0_i32 = arith.constant 0 : i32
    return %arg0, %arg1 : i32, i32
  }
  func.func @transform_4(%arg0: i32, %arg1: i32) -> (i32, i32) {
    %c0_i32 = arith.constant 0 : i32
    return %arg0, %arg1 : i32, i32
  }
}

module attributes {stable_mosaic.version = 11 : i64} {
  func.func @kernel(%arg0: i32, %arg1: i32, %arg2: memref<8x64xbf16, #tpu.memory_space<vmem>>, %arg3: memref<64x32xbf16, #tpu.memory_space<vmem>>, %arg4: memref<1x32xf32, #tpu.memory_space<vmem>>, %arg5: memref<8x32xf32, #tpu.memory_space<vmem>>) attributes {dimension_semantics = [#tpu.dimension_semantics<parallel>, #tpu.dimension_semantics<parallel>], iteration_bounds = array<i64: 1, 1>, scalar_prefetch = 0 : i64, scratch_operands = 0 : i64, tpu.core_type = #tpu.core_type<tc>, window_params = [{transform_indices = @transform_0, window_bounds = array<i64: 8, 64>}, {transform_indices = @transform_1, window_bounds = array<i64: 64, 32>}, {transform_indices = @transform_2, window_bounds = array<i64: 1, 32>}, {transform_indices = @transform_3, window_bounds = array<i64: 8, 32>}]} {
    %c0 = arith.constant 0 : index
    %c0_0 = arith.constant 0 : index
    %0 = vector.load %arg2[%c0, %c0_0] : memref<8x64xbf16, #tpu.memory_space<vmem>>, vector<8x64xbf16>
    %c0_1 = arith.constant 0 : index
    %c0_2 = arith.constant 0 : index
    %1 = vector.load %arg3[%c0_1, %c0_2] : memref<64x32xbf16, #tpu.memory_space<vmem>>, vector<64x32xbf16>
    %cst = arith.constant dense<0.000000e+00> : vector<8x32xf32>
    %2 = tpu.matmul %0, %1, %cst {dimension_numbers = #tpu.dot_dimension_numbers<[1], [0], [0], [1], [0, 0, 1, 1], [], []>} : vector<8x64xbf16>, vector<64x32xbf16>, vector<8x32xf32> -> vector<8x32xf32>
    %c0_3 = arith.constant 0 : index
    %c0_4 = arith.constant 0 : index
    %3 = vector.load %arg4[%c0_3, %c0_4] : memref<1x32xf32, #tpu.memory_space<vmem>>, vector<1x32xf32>
    %4 = vector.broadcast %3 : vector<1x32xf32> to vector<8x32xf32>
    %5 = arith.addf %2, %4 : vector<8x32xf32>
    %c0_5 = arith.constant 0 : index
    %c0_6 = arith.constant 0 : index
    %6 = vector.load %arg5[%c0_5, %c0_6] : memref<8x32xf32, #tpu.memory_space<vmem>>, vector<8x32xf32>
    tpu.vector_store %arg5[%c0_5, %c0_6], %5 {strides = array<i32>} : memref<8x32xf32, #tpu.memory_space<vmem>>, vector<8x32xf32>,
    return
  }
  func.func @transform_0(%arg0: i32, %arg1: i32) -> (i32, i32) {
    %c0_i32 = arith.constant 0 : i32
    %c0_i32_0 = arith.constant 0 : i32
    return %arg0, %c0_i32 : i32, i32
  }
  func.func @transform_1(%arg0: i32, %arg1: i32) -> (i32, i32) {
    %c0_i32 = arith.constant 0 : i32
    %c0_i32_0 = arith.constant 0 : i32
    return %c0_i32, %arg1 : i32, i32
  }
  func.func @transform_2(%arg0: i32, %arg1: i32) -> (i32, i32) {
    %c0_i32 = arith.constant 0 : i32
    %c0_i32_0 = arith.constant 0 : i32
    return %c0_i32, %arg1 : i32, i32
  }
  func.func @transform_3(%arg0: i32, %arg1: i32) -> (i32, i32) {
    %c0_i32 = arith.constant 0 : i32
    return %arg0, %arg1 : i32, i32
  }
}

module attributes {stable_mosaic.version = 11 : i64} {
  func.func @kernel(%arg0: i32, %arg1: i32, %arg2: memref<8x288xbf16, #tpu.memory_space<vmem>>, %arg3: memref<288x128xbf16, #tpu.memory_space<vmem>>, %arg4: memref<1x128xf32, #tpu.memory_space<vmem>>, %arg5: memref<8x128xf32, #tpu.memory_space<vmem>>) attributes {dimension_semantics = [#tpu.dimension_semantics<parallel>, #tpu.dimension_semantics<parallel>], iteration_bounds = array<i64: 1, 1>, scalar_prefetch = 0 : i64, scratch_operands = 0 : i64, tpu.core_type = #tpu.core_type<tc>, window_params = [{transform_indices = @transform_0, window_bounds = array<i64: 8, 288>}, {transform_indices = @transform_1, window_bounds = array<i64: 288, 128>}, {transform_indices = @transform_2, window_bounds = array<i64: 1, 128>}, {transform_indices = @transform_3, window_bounds = array<i64: 8, 128>}]} {
    %c0 = arith.constant 0 : index
    %c0_0 = arith.constant 0 : index
    %0 = vector.load %arg2[%c0, %c0_0] : memref<8x288xbf16, #tpu.memory_space<vmem>>, vector<8x288xbf16>
    %c0_1 = arith.constant 0 : index
    %c0_2 = arith.constant 0 : index
    %1 = vector.load %arg3[%c0_1, %c0_2] : memref<288x128xbf16, #tpu.memory_space<vmem>>, vector<288x128xbf16>
    %cst = arith.constant dense<0.000000e+00> : vector<8x128xf32>
    %2 = tpu.matmul %0, %1, %cst {dimension_numbers = #tpu.dot_dimension_numbers<[1], [0], [0], [1], [0, 0, 1, 1], [], []>} : vector<8x288xbf16>, vector<288x128xbf16>, vector<8x128xf32> -> vector<8x128xf32>
    %c0_3 = arith.constant 0 : index
    %c0_4 = arith.constant 0 : index
    %3 = vector.load %arg4[%c0_3, %c0_4] : memref<1x128xf32, #tpu.memory_space<vmem>>, vector<1x128xf32>
    %4 = vector.broadcast %3 : vector<1x128xf32> to vector<8x128xf32>
    %5 = arith.addf %2, %4 : vector<8x128xf32>
    %c0_5 = arith.constant 0 : index
    %c0_6 = arith.constant 0 : index
    %6 = vector.load %arg5[%c0_5, %c0_6] : memref<8x128xf32, #tpu.memory_space<vmem>>, vector<8x128xf32>
    tpu.vector_store %arg5[%c0_5, %c0_6], %5 {strides = array<i32>} : memref<8x128xf32, #tpu.memory_space<vmem>>, vector<8x128xf32>,
    return
  }
  func.func @transform_0(%arg0: i32, %arg1: i32) -> (i32, i32) {
    %c0_i32 = arith.constant 0 : i32
    %c0_i32_0 = arith.constant 0 : i32
    return %arg0, %c0_i32 : i32, i32
  }
  func.func @transform_1(%arg0: i32, %arg1: i32) -> (i32, i32) {
    %c0_i32 = arith.constant 0 : i32
    %c0_i32_0 = arith.constant 0 : i32
    return %c0_i32, %arg1 : i32, i32
  }
  func.func @transform_2(%arg0: i32, %arg1: i32) -> (i32, i32) {
    %c0_i32 = arith.constant 0 : i32
    %c0_i32_0 = arith.constant 0 : i32
    return %c0_i32, %arg1 : i32, i32
  }
  func.func @transform_3(%arg0: i32, %arg1: i32) -> (i32, i32) {
    %c0_i32 = arith.constant 0 : i32
    return %arg0, %arg1 : i32, i32
  }
}

module attributes {stable_mosaic.version = 11 : i64} {
  func.func @kernel(%arg0: i32, %arg1: i32, %arg2: memref<32x32xbf16, #tpu.memory_space<vmem>>, %arg3: memref<32x32xbf16, #tpu.memory_space<vmem>>, %arg4: memref<1x32xf32, #tpu.memory_space<vmem>>, %arg5: memref<32x32xf32, #tpu.memory_space<vmem>>) attributes {dimension_semantics = [#tpu.dimension_semantics<parallel>, #tpu.dimension_semantics<parallel>], iteration_bounds = array<i64: 1, 1>, scalar_prefetch = 0 : i64, scratch_operands = 0 : i64, tpu.core_type = #tpu.core_type<tc>, window_params = [{transform_indices = @transform_0, window_bounds = array<i64: 32, 32>}, {transform_indices = @transform_1, window_bounds = array<i64: 32, 32>}, {transform_indices = @transform_2, window_bounds = array<i64: 1, 32>}, {transform_indices = @transform_3, window_bounds = array<i64: 32, 32>}]} {
    %c0 = arith.constant 0 : index
    %c0_0 = arith.constant 0 : index
    %0 = vector.load %arg2[%c0, %c0_0] : memref<32x32xbf16, #tpu.memory_space<vmem>>, vector<32x32xbf16>
    %1 = arith.extf %0 : vector<32x32xbf16> to vector<32x32xf32>
    %cst = arith.constant 0.000000e+00 : f32
    %2 = vector.broadcast %cst : f32 to vector<32x32xf32>
    %3 = arith.cmpf oge, %1, %2 : vector<32x32xf32>
    %cst_1 = arith.constant 0.00999999977 : f32
    %4 = vector.broadcast %cst_1 : f32 to vector<32x32xf32>
    %5 = arith.mulf %4, %1 : vector<32x32xf32>
    %6 = arith.select %3, %1, %5 : vector<32x32xi1>, vector<32x32xf32>
    %7 = arith.truncf %6 : vector<32x32xf32> to vector<32x32xbf16>
    %c0_2 = arith.constant 0 : index
    %c0_3 = arith.constant 0 : index
    %8 = vector.load %arg3[%c0_2, %c0_3] : memref<32x32xbf16, #tpu.memory_space<vmem>>, vector<32x32xbf16>
    %cst_4 = arith.constant dense<0.000000e+00> : vector<32x32xf32>
    %9 = tpu.matmul %7, %8, %cst_4 {dimension_numbers = #tpu.dot_dimension_numbers<[1], [0], [0], [1], [0, 0, 1, 1], [], []>} : vector<32x32xbf16>, vector<32x32xbf16>, vector<32x32xf32> -> vector<32x32xf32>
    %c0_5 = arith.constant 0 : index
    %c0_6 = arith.constant 0 : index
    %10 = vector.load %arg4[%c0_5, %c0_6] : memref<1x32xf32, #tpu.memory_space<vmem>>, vector<1x32xf32>
    %11 = vector.broadcast %10 : vector<1x32xf32> to vector<32x32xf32>
    %12 = arith.addf %9, %11 : vector<32x32xf32>
    %c0_7 = arith.constant 0 : index
    %c0_8 = arith.constant 0 : index
    %13 = vector.load %arg5[%c0_7, %c0_8] : memref<32x32xf32, #tpu.memory_space<vmem>>, vector<32x32xf32>
    tpu.vector_store %arg5[%c0_7, %c0_8], %12 {strides = array<i32>} : memref<32x32xf32, #tpu.memory_space<vmem>>, vector<32x32xf32>,
    return
  }
  func.func @transform_0(%arg0: i32, %arg1: i32) -> (i32, i32) {
    %c0_i32 = arith.constant 0 : i32
    %c0_i32_0 = arith.constant 0 : i32
    return %arg0, %c0_i32 : i32, i32
  }
  func.func @transform_1(%arg0: i32, %arg1: i32) -> (i32, i32) {
    %c0_i32 = arith.constant 0 : i32
    %c0_i32_0 = arith.constant 0 : i32
    return %c0_i32, %arg1 : i32, i32
  }
  func.func @transform_2(%arg0: i32, %arg1: i32) -> (i32, i32) {
    %c0_i32 = arith.constant 0 : i32
    %c0_i32_0 = arith.constant 0 : i32
    return %c0_i32, %arg1 : i32, i32
  }
  func.func @transform_3(%arg0: i32, %arg1: i32) -> (i32, i32) {
    %c0_i32 = arith.constant 0 : i32
    return %arg0, %arg1 : i32, i32
  }
}

module attributes {stable_mosaic.version = 11 : i64} {
  func.func @kernel(%arg0: i32, %arg1: i32, %arg2: memref<32x576xbf16, #tpu.memory_space<vmem>>, %arg3: memref<576x32xbf16, #tpu.memory_space<vmem>>, %arg4: memref<1x32xf32, #tpu.memory_space<vmem>>, %arg5: memref<32x32xf32, #tpu.memory_space<vmem>>, %arg6: memref<32x32xf32, #tpu.memory_space<vmem>>) attributes {dimension_semantics = [#tpu.dimension_semantics<parallel>, #tpu.dimension_semantics<parallel>], iteration_bounds = array<i64: 1, 1>, scalar_prefetch = 0 : i64, scratch_operands = 0 : i64, tpu.core_type = #tpu.core_type<tc>, window_params = [{transform_indices = @transform_0, window_bounds = array<i64: 32, 576>}, {transform_indices = @transform_1, window_bounds = array<i64: 576, 32>}, {transform_indices = @transform_2, window_bounds = array<i64: 1, 32>}, {transform_indices = @transform_3, window_bounds = array<i64: 32, 32>}, {transform_indices = @transform_4, window_bounds = array<i64: 32, 32>}]} {
    %c0 = arith.constant 0 : index
    %c0_0 = arith.constant 0 : index
    %0 = vector.load %arg2[%c0, %c0_0] : memref<32x576xbf16, #tpu.memory_space<vmem>>, vector<32x576xbf16>
    %1 = arith.extf %0 : vector<32x576xbf16> to vector<32x576xf32>
    %cst = arith.constant 0.000000e+00 : f32
    %2 = vector.broadcast %cst : f32 to vector<32x576xf32>
    %3 = arith.cmpf oge, %1, %2 : vector<32x576xf32>
    %cst_1 = arith.constant 0.00999999977 : f32
    %4 = vector.broadcast %cst_1 : f32 to vector<32x576xf32>
    %5 = arith.mulf %4, %1 : vector<32x576xf32>
    %6 = arith.select %3, %1, %5 : vector<32x576xi1>, vector<32x576xf32>
    %7 = arith.truncf %6 : vector<32x576xf32> to vector<32x576xbf16>
    %c0_2 = arith.constant 0 : index
    %c0_3 = arith.constant 0 : index
    %8 = vector.load %arg3[%c0_2, %c0_3] : memref<576x32xbf16, #tpu.memory_space<vmem>>, vector<576x32xbf16>
    %cst_4 = arith.constant dense<0.000000e+00> : vector<32x32xf32>
    %9 = tpu.matmul %7, %8, %cst_4 {dimension_numbers = #tpu.dot_dimension_numbers<[1], [0], [0], [1], [0, 0, 1, 1], [], []>} : vector<32x576xbf16>, vector<576x32xbf16>, vector<32x32xf32> -> vector<32x32xf32>
    %c0_5 = arith.constant 0 : index
    %c0_6 = arith.constant 0 : index
    %10 = vector.load %arg4[%c0_5, %c0_6] : memref<1x32xf32, #tpu.memory_space<vmem>>, vector<1x32xf32>
    %11 = vector.broadcast %10 : vector<1x32xf32> to vector<32x32xf32>
    %12 = arith.addf %9, %11 : vector<32x32xf32>
    %c0_7 = arith.constant 0 : index
    %c0_8 = arith.constant 0 : index
    %13 = vector.load %arg5[%c0_7, %c0_8] : memref<32x32xf32, #tpu.memory_space<vmem>>, vector<32x32xf32>
    %14 = arith.addf %12, %13 : vector<32x32xf32>
    %c0_9 = arith.constant 0 : index
    %c0_10 = arith.constant 0 : index
    %15 = vector.load %arg6[%c0_9, %c0_10] : memref<32x32xf32, #tpu.memory_space<vmem>>, vector<32x32xf32>
    tpu.vector_store %arg6[%c0_9, %c0_10], %14 {strides = array<i32>} : memref<32x32xf32, #tpu.memory_space<vmem>>, vector<32x32xf32>,
    return
  }
  func.func @transform_0(%arg0: i32, %arg1: i32) -> (i32, i32) {
    %c0_i32 = arith.constant 0 : i32
    %c0_i32_0 = arith.constant 0 : i32
    return %arg0, %c0_i32 : i32, i32
  }
  func.func @transform_1(%arg0: i32, %arg1: i32) -> (i32, i32) {
    %c0_i32 = arith.constant 0 : i32
    %c0_i32_0 = arith.constant 0 : i32
    return %c0_i32, %arg1 : i32, i32
  }
  func.func @transform_2(%arg0: i32, %arg1: i32) -> (i32, i32) {
    %c0_i32 = arith.constant 0 : i32
    %c0_i32_0 = arith.constant 0 : i32
    return %c0_i32, %arg1 : i32, i32
  }
  func.func @transform_3(%arg0: i32, %arg1: i32) -> (i32, i32) {
    %c0_i32 = arith.constant 0 : i32
    return %arg0, %arg1 : i32, i32
  }
  func.func @transform_4(%arg0: i32, %arg1: i32) -> (i32, i32) {
    %c0_i32 = arith.constant 0 : i32
    return %arg0, %arg1 : i32, i32
  }
}

module attributes {stable_mosaic.version = 11 : i64} {
  func.func @kernel(%arg0: i32, %arg1: i32, %arg2: memref<8x64xbf16, #tpu.memory_space<vmem>>, %arg3: memref<64x32xbf16, #tpu.memory_space<vmem>>, %arg4: memref<1x32xf32, #tpu.memory_space<vmem>>, %arg5: memref<8x32xf32, #tpu.memory_space<vmem>>) attributes {dimension_semantics = [#tpu.dimension_semantics<parallel>, #tpu.dimension_semantics<parallel>], iteration_bounds = array<i64: 1, 1>, scalar_prefetch = 0 : i64, scratch_operands = 0 : i64, tpu.core_type = #tpu.core_type<tc>, window_params = [{transform_indices = @transform_0, window_bounds = array<i64: 8, 64>}, {transform_indices = @transform_1, window_bounds = array<i64: 64, 32>}, {transform_indices = @transform_2, window_bounds = array<i64: 1, 32>}, {transform_indices = @transform_3, window_bounds = array<i64: 8, 32>}]} {
    %c0 = arith.constant 0 : index
    %c0_0 = arith.constant 0 : index
    %0 = vector.load %arg2[%c0, %c0_0] : memref<8x64xbf16, #tpu.memory_space<vmem>>, vector<8x64xbf16>
    %1 = arith.extf %0 : vector<8x64xbf16> to vector<8x64xf32>
    %cst = arith.constant 0.000000e+00 : f32
    %2 = vector.broadcast %cst : f32 to vector<8x64xf32>
    %3 = arith.cmpf oge, %1, %2 : vector<8x64xf32>
    %cst_1 = arith.constant 0.00999999977 : f32
    %4 = vector.broadcast %cst_1 : f32 to vector<8x64xf32>
    %5 = arith.mulf %4, %1 : vector<8x64xf32>
    %6 = arith.select %3, %1, %5 : vector<8x64xi1>, vector<8x64xf32>
    %7 = arith.truncf %6 : vector<8x64xf32> to vector<8x64xbf16>
    %c0_2 = arith.constant 0 : index
    %c0_3 = arith.constant 0 : index
    %8 = vector.load %arg3[%c0_2, %c0_3] : memref<64x32xbf16, #tpu.memory_space<vmem>>, vector<64x32xbf16>
    %cst_4 = arith.constant dense<0.000000e+00> : vector<8x32xf32>
    %9 = tpu.matmul %7, %8, %cst_4 {dimension_numbers = #tpu.dot_dimension_numbers<[1], [0], [0], [1], [0, 0, 1, 1], [], []>} : vector<8x64xbf16>, vector<64x32xbf16>, vector<8x32xf32> -> vector<8x32xf32>
    %c0_5 = arith.constant 0 : index
    %c0_6 = arith.constant 0 : index
    %10 = vector.load %arg4[%c0_5, %c0_6] : memref<1x32xf32, #tpu.memory_space<vmem>>, vector<1x32xf32>
    %11 = vector.broadcast %10 : vector<1x32xf32> to vector<8x32xf32>
    %12 = arith.addf %9, %11 : vector<8x32xf32>
    %c0_7 = arith.constant 0 : index
    %c0_8 = arith.constant 0 : index
    %13 = vector.load %arg5[%c0_7, %c0_8] : memref<8x32xf32, #tpu.memory_space<vmem>>, vector<8x32xf32>
    tpu.vector_store %arg5[%c0_7, %c0_8], %12 {strides = array<i32>} : memref<8x32xf32, #tpu.memory_space<vmem>>, vector<8x32xf32>,
    return
  }
  func.func @transform_0(%arg0: i32, %arg1: i32) -> (i32, i32) {
    %c0_i32 = arith.constant 0 : i32
    %c0_i32_0 = arith.constant 0 : i32
    return %arg0, %c0_i32 : i32, i32
  }
  func.func @transform_1(%arg0: i32, %arg1: i32) -> (i32, i32) {
    %c0_i32 = arith.constant 0 : i32
    %c0_i32_0 = arith.constant 0 : i32
    return %c0_i32, %arg1 : i32, i32
  }
  func.func @transform_2(%arg0: i32, %arg1: i32) -> (i32, i32) {
    %c0_i32 = arith.constant 0 : i32
    %c0_i32_0 = arith.constant 0 : i32
    return %c0_i32, %arg1 : i32, i32
  }
  func.func @transform_3(%arg0: i32, %arg1: i32) -> (i32, i32) {
    %c0_i32 = arith.constant 0 : i32
    return %arg0, %arg1 : i32, i32
  }
}

module attributes {stable_mosaic.version = 11 : i64} {
  func.func @kernel(%arg0: i32, %arg1: i32, %arg2: memref<8x32xbf16, #tpu.memory_space<vmem>>, %arg3: memref<32x128xbf16, #tpu.memory_space<vmem>>, %arg4: memref<1x128xf32, #tpu.memory_space<vmem>>, %arg5: memref<8x128xf32, #tpu.memory_space<vmem>>) attributes {dimension_semantics = [#tpu.dimension_semantics<parallel>, #tpu.dimension_semantics<parallel>], iteration_bounds = array<i64: 1, 1>, scalar_prefetch = 0 : i64, scratch_operands = 0 : i64, tpu.core_type = #tpu.core_type<tc>, window_params = [{transform_indices = @transform_0, window_bounds = array<i64: 8, 32>}, {transform_indices = @transform_1, window_bounds = array<i64: 32, 128>}, {transform_indices = @transform_2, window_bounds = array<i64: 1, 128>}, {transform_indices = @transform_3, window_bounds = array<i64: 8, 128>}]} {
    %c0 = arith.constant 0 : index
    %c0_0 = arith.constant 0 : index
    %0 = vector.load %arg2[%c0, %c0_0] : memref<8x32xbf16, #tpu.memory_space<vmem>>, vector<8x32xbf16>
    %1 = arith.extf %0 : vector<8x32xbf16> to vector<8x32xf32>
    %cst = arith.constant 0.000000e+00 : f32
    %2 = vector.broadcast %cst : f32 to vector<8x32xf32>
    %3 = arith.cmpf oge, %1, %2 : vector<8x32xf32>
    %cst_1 = arith.constant 0.00999999977 : f32
    %4 = vector.broadcast %cst_1 : f32 to vector<8x32xf32>
    %5 = arith.mulf %4, %1 : vector<8x32xf32>
    %6 = arith.select %3, %1, %5 : vector<8x32xi1>, vector<8x32xf32>
    %7 = arith.truncf %6 : vector<8x32xf32> to vector<8x32xbf16>
    %c0_2 = arith.constant 0 : index
    %c0_3 = arith.constant 0 : index
    %8 = vector.load %arg3[%c0_2, %c0_3] : memref<32x128xbf16, #tpu.memory_space<vmem>>, vector<32x128xbf16>
    %cst_4 = arith.constant dense<0.000000e+00> : vector<8x128xf32>
    %9 = tpu.matmul %7, %8, %cst_4 {dimension_numbers = #tpu.dot_dimension_numbers<[1], [0], [0], [1], [0, 0, 1, 1], [], []>} : vector<8x32xbf16>, vector<32x128xbf16>, vector<8x128xf32> -> vector<8x128xf32>
    %c0_5 = arith.constant 0 : index
    %c0_6 = arith.constant 0 : index
    %10 = vector.load %arg4[%c0_5, %c0_6] : memref<1x128xf32, #tpu.memory_space<vmem>>, vector<1x128xf32>
    %11 = vector.broadcast %10 : vector<1x128xf32> to vector<8x128xf32>
    %12 = arith.addf %9, %11 : vector<8x128xf32>
    %c0_7 = arith.constant 0 : index
    %c0_8 = arith.constant 0 : index
    %13 = vector.load %arg5[%c0_7, %c0_8] : memref<8x128xf32, #tpu.memory_space<vmem>>, vector<8x128xf32>
    tpu.vector_store %arg5[%c0_7, %c0_8], %12 {strides = array<i32>} : memref<8x128xf32, #tpu.memory_space<vmem>>, vector<8x128xf32>,
    return
  }
  func.func @transform_0(%arg0: i32, %arg1: i32) -> (i32, i32) {
    %c0_i32 = arith.constant 0 : i32
    %c0_i32_0 = arith.constant 0 : i32
    return %arg0, %c0_i32 : i32, i32
  }
  func.func @transform_1(%arg0: i32, %arg1: i32) -> (i32, i32) {
    %c0_i32 = arith.constant 0 : i32
    %c0_i32_0 = arith.constant 0 : i32
    return %c0_i32, %arg1 : i32, i32
  }
  func.func @transform_2(%arg0: i32, %arg1: i32) -> (i32, i32) {
    %c0_i32 = arith.constant 0 : i32
    %c0_i32_0 = arith.constant 0 : i32
    return %c0_i32, %arg1 : i32, i32
  }
  func.func @transform_3(%arg0: i32, %arg1: i32) -> (i32, i32) {
    %c0_i32 = arith.constant 0 : i32
    return %arg0, %arg1 : i32, i32
  }
}

module attributes {stable_mosaic.version = 11 : i64} {
  func.func @kernel(%arg0: i32, %arg1: i32, %arg2: memref<8x2304xbf16, #tpu.memory_space<vmem>>, %arg3: memref<2304x128xbf16, #tpu.memory_space<vmem>>, %arg4: memref<1x128xf32, #tpu.memory_space<vmem>>, %arg5: memref<8x128xf32, #tpu.memory_space<vmem>>, %arg6: memref<8x128xf32, #tpu.memory_space<vmem>>) attributes {dimension_semantics = [#tpu.dimension_semantics<parallel>, #tpu.dimension_semantics<parallel>], iteration_bounds = array<i64: 1, 1>, scalar_prefetch = 0 : i64, scratch_operands = 0 : i64, tpu.core_type = #tpu.core_type<tc>, window_params = [{transform_indices = @transform_0, window_bounds = array<i64: 8, 2304>}, {transform_indices = @transform_1, window_bounds = array<i64: 2304, 128>}, {transform_indices = @transform_2, window_bounds = array<i64: 1, 128>}, {transform_indices = @transform_3, window_bounds = array<i64: 8, 128>}, {transform_indices = @transform_4, window_bounds = array<i64: 8, 128>}]} {
    %c0 = arith.constant 0 : index
    %c0_0 = arith.constant 0 : index
    %0 = vector.load %arg2[%c0, %c0_0] : memref<8x2304xbf16, #tpu.memory_space<vmem>>, vector<8x2304xbf16>
    %1 = arith.extf %0 : vector<8x2304xbf16> to vector<8x2304xf32>
    %cst = arith.constant 0.000000e+00 : f32
    %2 = vector.broadcast %cst : f32 to vector<8x2304xf32>
    %3 = arith.cmpf oge, %1, %2 : vector<8x2304xf32>
    %cst_1 = arith.constant 0.00999999977 : f32
    %4 = vector.broadcast %cst_1 : f32 to vector<8x2304xf32>
    %5 = arith.mulf %4, %1 : vector<8x2304xf32>
    %6 = arith.select %3, %1, %5 : vector<8x2304xi1>, vector<8x2304xf32>
    %7 = arith.truncf %6 : vector<8x2304xf32> to vector<8x2304xbf16>
    %c0_2 = arith.constant 0 : index
    %c0_3 = arith.constant 0 : index
    %8 = vector.load %arg3[%c0_2, %c0_3] : memref<2304x128xbf16, #tpu.memory_space<vmem>>, vector<2304x128xbf16>
    %cst_4 = arith.constant dense<0.000000e+00> : vector<8x128xf32>
    %9 = tpu.matmul %7, %8, %cst_4 {dimension_numbers = #tpu.dot_dimension_numbers<[1], [0], [0], [1], [0, 0, 1, 1], [], []>} : vector<8x2304xbf16>, vector<2304x128xbf16>, vector<8x128xf32> -> vector<8x128xf32>
    %c0_5 = arith.constant 0 : index
    %c0_6 = arith.constant 0 : index
    %10 = vector.load %arg4[%c0_5, %c0_6] : memref<1x128xf32, #tpu.memory_space<vmem>>, vector<1x128xf32>
    %11 = vector.broadcast %10 : vector<1x128xf32> to vector<8x128xf32>
    %12 = arith.addf %9, %11 : vector<8x128xf32>
    %c0_7 = arith.constant 0 : index
    %c0_8 = arith.constant 0 : index
    %13 = vector.load %arg5[%c0_7, %c0_8] : memref<8x128xf32, #tpu.memory_space<vmem>>, vector<8x128xf32>
    %14 = arith.addf %12, %13 : vector<8x128xf32>
    %c0_9 = arith.constant 0 : index
    %c0_10 = arith.constant 0 : index
    %15 = vector.load %arg6[%c0_9, %c0_10] : memref<8x128xf32, #tpu.memory_space<vmem>>, vector<8x128xf32>
    tpu.vector_store %arg6[%c0_9, %c0_10], %14 {strides = array<i32>} : memref<8x128xf32, #tpu.memory_space<vmem>>, vector<8x128xf32>,
    return
  }
  func.func @transform_0(%arg0: i32, %arg1: i32) -> (i32, i32) {
    %c0_i32 = arith.constant 0 : i32
    %c0_i32_0 = arith.constant 0 : i32
    return %arg0, %c0_i32 : i32, i32
  }
  func.func @transform_1(%arg0: i32, %arg1: i32) -> (i32, i32) {
    %c0_i32 = arith.constant 0 : i32
    %c0_i32_0 = arith.constant 0 : i32
    return %c0_i32, %arg1 : i32, i32
  }
  func.func @transform_2(%arg0: i32, %arg1: i32) -> (i32, i32) {
    %c0_i32 = arith.constant 0 : i32
    %c0_i32_0 = arith.constant 0 : i32
    return %c0_i32, %arg1 : i32, i32
  }
  func.func @transform_3(%arg0: i32, %arg1: i32) -> (i32, i32) {
    %c0_i32 = arith.constant 0 : i32
    return %arg0, %arg1 : i32, i32
  }
  func.func @transform_4(%arg0: i32, %arg1: i32) -> (i32, i32) {
    %c0_i32 = arith.constant 0 : i32
    return %arg0, %arg1 : i32, i32
  }
}

module attributes {stable_mosaic.version = 11 : i64} {
  func.func @kernel(%arg0: i32, %arg1: i32, %arg2: memref<8x1152xbf16, #tpu.memory_space<vmem>>, %arg3: memref<1152x32xbf16, #tpu.memory_space<vmem>>, %arg4: memref<1x32xf32, #tpu.memory_space<vmem>>, %arg5: memref<8x32xf32, #tpu.memory_space<vmem>>) attributes {dimension_semantics = [#tpu.dimension_semantics<parallel>, #tpu.dimension_semantics<parallel>], iteration_bounds = array<i64: 1, 1>, scalar_prefetch = 0 : i64, scratch_operands = 0 : i64, tpu.core_type = #tpu.core_type<tc>, window_params = [{transform_indices = @transform_0, window_bounds = array<i64: 8, 1152>}, {transform_indices = @transform_1, window_bounds = array<i64: 1152, 32>}, {transform_indices = @transform_2, window_bounds = array<i64: 1, 32>}, {transform_indices = @transform_3, window_bounds = array<i64: 8, 32>}]} {
    %c0 = arith.constant 0 : index
    %c0_0 = arith.constant 0 : index
    %0 = vector.load %arg2[%c0, %c0_0] : memref<8x1152xbf16, #tpu.memory_space<vmem>>, vector<8x1152xbf16>
    %c0_1 = arith.constant 0 : index
    %c0_2 = arith.constant 0 : index
    %1 = vector.load %arg3[%c0_1, %c0_2] : memref<1152x32xbf16, #tpu.memory_space<vmem>>, vector<1152x32xbf16>
    %cst = arith.constant dense<0.000000e+00> : vector<8x32xf32>
    %2 = tpu.matmul %0, %1, %cst {dimension_numbers = #tpu.dot_dimension_numbers<[1], [0], [0], [1], [0, 0, 1, 1], [], []>} : vector<8x1152xbf16>, vector<1152x32xbf16>, vector<8x32xf32> -> vector<8x32xf32>
    %c0_3 = arith.constant 0 : index
    %c0_4 = arith.constant 0 : index
    %3 = vector.load %arg4[%c0_3, %c0_4] : memref<1x32xf32, #tpu.memory_space<vmem>>, vector<1x32xf32>
    %4 = vector.broadcast %3 : vector<1x32xf32> to vector<8x32xf32>
    %5 = arith.addf %2, %4 : vector<8x32xf32>
    %c0_5 = arith.constant 0 : index
    %c0_6 = arith.constant 0 : index
    %6 = vector.load %arg5[%c0_5, %c0_6] : memref<8x32xf32, #tpu.memory_space<vmem>>, vector<8x32xf32>
    tpu.vector_store %arg5[%c0_5, %c0_6], %5 {strides = array<i32>} : memref<8x32xf32, #tpu.memory_space<vmem>>, vector<8x32xf32>,
    return
  }
  func.func @transform_0(%arg0: i32, %arg1: i32) -> (i32, i32) {
    %c0_i32 = arith.constant 0 : i32
    %c0_i32_0 = arith.constant 0 : i32
    return %arg0, %c0_i32 : i32, i32
  }
  func.func @transform_1(%arg0: i32, %arg1: i32) -> (i32, i32) {
    %c0_i32 = arith.constant 0 : i32
    %c0_i32_0 = arith.constant 0 : i32
    return %c0_i32, %arg1 : i32, i32
  }
  func.func @transform_2(%arg0: i32, %arg1: i32) -> (i32, i32) {
    %c0_i32 = arith.constant 0 : i32
    %c0_i32_0 = arith.constant 0 : i32
    return %c0_i32, %arg1 : i32, i32
  }
  func.func @transform_3(%arg0: i32, %arg1: i32) -> (i32, i32) {
    %c0_i32 = arith.constant 0 : i32
    return %arg0, %arg1 : i32, i32
  }
}

module attributes {stable_mosaic.version = 11 : i64} {
  func.func @kernel(%arg0: i32, %arg1: i32, %arg2: memref<32x288xbf16, #tpu.memory_space<vmem>>, %arg3: memref<288x128xbf16, #tpu.memory_space<vmem>>, %arg4: memref<1x128xf32, #tpu.memory_space<vmem>>, %arg5: memref<32x128xf32, #tpu.memory_space<vmem>>) attributes {dimension_semantics = [#tpu.dimension_semantics<parallel>, #tpu.dimension_semantics<parallel>], iteration_bounds = array<i64: 1, 1>, scalar_prefetch = 0 : i64, scratch_operands = 0 : i64, tpu.core_type = #tpu.core_type<tc>, window_params = [{transform_indices = @transform_0, window_bounds = array<i64: 32, 288>}, {transform_indices = @transform_1, window_bounds = array<i64: 288, 128>}, {transform_indices = @transform_2, window_bounds = array<i64: 1, 128>}, {transform_indices = @transform_3, window_bounds = array<i64: 32, 128>}]} {
    %c0 = arith.constant 0 : index
    %c0_0 = arith.constant 0 : index
    %0 = vector.load %arg2[%c0, %c0_0] : memref<32x288xbf16, #tpu.memory_space<vmem>>, vector<32x288xbf16>
    %c0_1 = arith.constant 0 : index
    %c0_2 = arith.constant 0 : index
    %1 = vector.load %arg3[%c0_1, %c0_2] : memref<288x128xbf16, #tpu.memory_space<vmem>>, vector<288x128xbf16>
    %cst = arith.constant dense<0.000000e+00> : vector<32x128xf32>
    %2 = tpu.matmul %0, %1, %cst {dimension_numbers = #tpu.dot_dimension_numbers<[1], [0], [0], [1], [0, 0, 1, 1], [], []>} : vector<32x288xbf16>, vector<288x128xbf16>, vector<32x128xf32> -> vector<32x128xf32>
    %c0_3 = arith.constant 0 : index
    %c0_4 = arith.constant 0 : index
    %3 = vector.load %arg4[%c0_3, %c0_4] : memref<1x128xf32, #tpu.memory_space<vmem>>, vector<1x128xf32>
    %4 = vector.broadcast %3 : vector<1x128xf32> to vector<32x128xf32>
    %5 = arith.addf %2, %4 : vector<32x128xf32>
    %c0_5 = arith.constant 0 : index
    %c0_6 = arith.constant 0 : index
    %6 = vector.load %arg5[%c0_5, %c0_6] : memref<32x128xf32, #tpu.memory_space<vmem>>, vector<32x128xf32>
    tpu.vector_store %arg5[%c0_5, %c0_6], %5 {strides = array<i32>} : memref<32x128xf32, #tpu.memory_space<vmem>>, vector<32x128xf32>,
    return
  }
  func.func @transform_0(%arg0: i32, %arg1: i32) -> (i32, i32) {
    %c0_i32 = arith.constant 0 : i32
    %c0_i32_0 = arith.constant 0 : i32
    return %arg0, %c0_i32 : i32, i32
  }
  func.func @transform_1(%arg0: i32, %arg1: i32) -> (i32, i32) {
    %c0_i32 = arith.constant 0 : i32
    %c0_i32_0 = arith.constant 0 : i32
    return %c0_i32, %arg1 : i32, i32
  }
  func.func @transform_2(%arg0: i32, %arg1: i32) -> (i32, i32) {
    %c0_i32 = arith.constant 0 : i32
    %c0_i32_0 = arith.constant 0 : i32
    return %c0_i32, %arg1 : i32, i32
  }
  func.func @transform_3(%arg0: i32, %arg1: i32) -> (i32, i32) {
    %c0_i32 = arith.constant 0 : i32
    return %arg0, %arg1 : i32, i32
  }
}

module attributes {stable_mosaic.version = 11 : i64} {
  func.func @kernel(%arg0: i32, %arg1: i32, %arg2: memref<128x32xbf16, #tpu.memory_space<vmem>>, %arg3: memref<32x32xbf16, #tpu.memory_space<vmem>>, %arg4: memref<1x32xf32, #tpu.memory_space<vmem>>, %arg5: memref<128x32xf32, #tpu.memory_space<vmem>>) attributes {dimension_semantics = [#tpu.dimension_semantics<parallel>, #tpu.dimension_semantics<parallel>], iteration_bounds = array<i64: 1, 1>, scalar_prefetch = 0 : i64, scratch_operands = 0 : i64, tpu.core_type = #tpu.core_type<tc>, window_params = [{transform_indices = @transform_0, window_bounds = array<i64: 128, 32>}, {transform_indices = @transform_1, window_bounds = array<i64: 32, 32>}, {transform_indices = @transform_2, window_bounds = array<i64: 1, 32>}, {transform_indices = @transform_3, window_bounds = array<i64: 128, 32>}]} {
    %c0 = arith.constant 0 : index
    %c0_0 = arith.constant 0 : index
    %0 = vector.load %arg2[%c0, %c0_0] : memref<128x32xbf16, #tpu.memory_space<vmem>>, vector<128x32xbf16>
    %1 = arith.extf %0 : vector<128x32xbf16> to vector<128x32xf32>
    %cst = arith.constant 0.000000e+00 : f32
    %2 = vector.broadcast %cst : f32 to vector<128x32xf32>
    %3 = arith.cmpf oge, %1, %2 : vector<128x32xf32>
    %cst_1 = arith.constant 0.00999999977 : f32
    %4 = vector.broadcast %cst_1 : f32 to vector<128x32xf32>
    %5 = arith.mulf %4, %1 : vector<128x32xf32>
    %6 = arith.select %3, %1, %5 : vector<128x32xi1>, vector<128x32xf32>
    %7 = arith.truncf %6 : vector<128x32xf32> to vector<128x32xbf16>
    %c0_2 = arith.constant 0 : index
    %c0_3 = arith.constant 0 : index
    %8 = vector.load %arg3[%c0_2, %c0_3] : memref<32x32xbf16, #tpu.memory_space<vmem>>, vector<32x32xbf16>
    %cst_4 = arith.constant dense<0.000000e+00> : vector<128x32xf32>
    %9 = tpu.matmul %7, %8, %cst_4 {dimension_numbers = #tpu.dot_dimension_numbers<[1], [0], [0], [1], [0, 0, 1, 1], [], []>} : vector<128x32xbf16>, vector<32x32xbf16>, vector<128x32xf32> -> vector<128x32xf32>
    %c0_5 = arith.constant 0 : index
    %c0_6 = arith.constant 0 : index
    %10 = vector.load %arg4[%c0_5, %c0_6] : memref<1x32xf32, #tpu.memory_space<vmem>>, vector<1x32xf32>
    %11 = vector.broadcast %10 : vector<1x32xf32> to vector<128x32xf32>
    %12 = arith.addf %9, %11 : vector<128x32xf32>
    %c0_7 = arith.constant 0 : index
    %c0_8 = arith.constant 0 : index
    %13 = vector.load %arg5[%c0_7, %c0_8] : memref<128x32xf32, #tpu.memory_space<vmem>>, vector<128x32xf32>
    tpu.vector_store %arg5[%c0_7, %c0_8], %12 {strides = array<i32>} : memref<128x32xf32, #tpu.memory_space<vmem>>, vector<128x32xf32>,
    return
  }
  func.func @transform_0(%arg0: i32, %arg1: i32) -> (i32, i32) {
    %c0_i32 = arith.constant 0 : i32
    %c0_i32_0 = arith.constant 0 : i32
    return %arg0, %c0_i32 : i32, i32
  }
  func.func @transform_1(%arg0: i32, %arg1: i32) -> (i32, i32) {
    %c0_i32 = arith.constant 0 : i32
    %c0_i32_0 = arith.constant 0 : i32
    return %c0_i32, %arg1 : i32, i32
  }
  func.func @transform_2(%arg0: i32, %arg1: i32) -> (i32, i32) {
    %c0_i32 = arith.constant 0 : i32
    %c0_i32_0 = arith.constant 0 : i32
    return %c0_i32, %arg1 : i32, i32
  }
  func.func @transform_3(%arg0: i32, %arg1: i32) -> (i32, i32) {
    %c0_i32 = arith.constant 0 : i32
    return %arg0, %arg1 : i32, i32
  }
}

module attributes {stable_mosaic.version = 11 : i64} {
  func.func @kernel(%arg0: i32, %arg1: i32, %arg2: memref<32x64xbf16, #tpu.memory_space<vmem>>, %arg3: memref<64x32xbf16, #tpu.memory_space<vmem>>, %arg4: memref<1x32xf32, #tpu.memory_space<vmem>>, %arg5: memref<32x32xf32, #tpu.memory_space<vmem>>) attributes {dimension_semantics = [#tpu.dimension_semantics<parallel>, #tpu.dimension_semantics<parallel>], iteration_bounds = array<i64: 1, 1>, scalar_prefetch = 0 : i64, scratch_operands = 0 : i64, tpu.core_type = #tpu.core_type<tc>, window_params = [{transform_indices = @transform_0, window_bounds = array<i64: 32, 64>}, {transform_indices = @transform_1, window_bounds = array<i64: 64, 32>}, {transform_indices = @transform_2, window_bounds = array<i64: 1, 32>}, {transform_indices = @transform_3, window_bounds = array<i64: 32, 32>}]} {
    %c0 = arith.constant 0 : index
    %c0_0 = arith.constant 0 : index
    %0 = vector.load %arg2[%c0, %c0_0] : memref<32x64xbf16, #tpu.memory_space<vmem>>, vector<32x64xbf16>
    %c0_1 = arith.constant 0 : index
    %c0_2 = arith.constant 0 : index
    %1 = vector.load %arg3[%c0_1, %c0_2] : memref<64x32xbf16, #tpu.memory_space<vmem>>, vector<64x32xbf16>
    %cst = arith.constant dense<0.000000e+00> : vector<32x32xf32>
    %2 = tpu.matmul %0, %1, %cst {dimension_numbers = #tpu.dot_dimension_numbers<[1], [0], [0], [1], [0, 0, 1, 1], [], []>} : vector<32x64xbf16>, vector<64x32xbf16>, vector<32x32xf32> -> vector<32x32xf32>
    %c0_3 = arith.constant 0 : index
    %c0_4 = arith.constant 0 : index
    %3 = vector.load %arg4[%c0_3, %c0_4] : memref<1x32xf32, #tpu.memory_space<vmem>>, vector<1x32xf32>
    %4 = vector.broadcast %3 : vector<1x32xf32> to vector<32x32xf32>
    %5 = arith.addf %2, %4 : vector<32x32xf32>
    %c0_5 = arith.constant 0 : index
    %c0_6 = arith.constant 0 : index
    %6 = vector.load %arg5[%c0_5, %c0_6] : memref<32x32xf32, #tpu.memory_space<vmem>>, vector<32x32xf32>
    tpu.vector_store %arg5[%c0_5, %c0_6], %5 {strides = array<i32>} : memref<32x32xf32, #tpu.memory_space<vmem>>, vector<32x32xf32>,
    return
  }
  func.func @transform_0(%arg0: i32, %arg1: i32) -> (i32, i32) {
    %c0_i32 = arith.constant 0 : i32
    %c0_i32_0 = arith.constant 0 : i32
    return %arg0, %c0_i32 : i32, i32
  }
  func.func @transform_1(%arg0: i32, %arg1: i32) -> (i32, i32) {
    %c0_i32 = arith.constant 0 : i32
    %c0_i32_0 = arith.constant 0 : i32
    return %c0_i32, %arg1 : i32, i32
  }
  func.func @transform_2(%arg0: i32, %arg1: i32) -> (i32, i32) {
    %c0_i32 = arith.constant 0 : i32
    %c0_i32_0 = arith.constant 0 : i32
    return %c0_i32, %arg1 : i32, i32
  }
  func.func @transform_3(%arg0: i32, %arg1: i32) -> (i32, i32) {
    %c0_i32 = arith.constant 0 : i32
    return %arg0, %arg1 : i32, i32
  }
}

module attributes {stable_mosaic.version = 11 : i64} {
  func.func @kernel(%arg0: i32, %arg1: i32, %arg2: memref<128x576xbf16, #tpu.memory_space<vmem>>, %arg3: memref<576x32xbf16, #tpu.memory_space<vmem>>, %arg4: memref<1x32xf32, #tpu.memory_space<vmem>>, %arg5: memref<128x32xf32, #tpu.memory_space<vmem>>, %arg6: memref<128x32xf32, #tpu.memory_space<vmem>>) attributes {dimension_semantics = [#tpu.dimension_semantics<parallel>, #tpu.dimension_semantics<parallel>], iteration_bounds = array<i64: 1, 1>, scalar_prefetch = 0 : i64, scratch_operands = 0 : i64, tpu.core_type = #tpu.core_type<tc>, window_params = [{transform_indices = @transform_0, window_bounds = array<i64: 128, 576>}, {transform_indices = @transform_1, window_bounds = array<i64: 576, 32>}, {transform_indices = @transform_2, window_bounds = array<i64: 1, 32>}, {transform_indices = @transform_3, window_bounds = array<i64: 128, 32>}, {transform_indices = @transform_4, window_bounds = array<i64: 128, 32>}]} {
    %c0 = arith.constant 0 : index
    %c0_0 = arith.constant 0 : index
    %0 = vector.load %arg2[%c0, %c0_0] : memref<128x576xbf16, #tpu.memory_space<vmem>>, vector<128x576xbf16>
    %1 = arith.extf %0 : vector<128x576xbf16> to vector<128x576xf32>
    %cst = arith.constant 0.000000e+00 : f32
    %2 = vector.broadcast %cst : f32 to vector<128x576xf32>
    %3 = arith.cmpf oge, %1, %2 : vector<128x576xf32>
    %cst_1 = arith.constant 0.00999999977 : f32
    %4 = vector.broadcast %cst_1 : f32 to vector<128x576xf32>
    %5 = arith.mulf %4, %1 : vector<128x576xf32>
    %6 = arith.select %3, %1, %5 : vector<128x576xi1>, vector<128x576xf32>
    %7 = arith.truncf %6 : vector<128x576xf32> to vector<128x576xbf16>
    %c0_2 = arith.constant 0 : index
    %c0_3 = arith.constant 0 : index
    %8 = vector.load %arg3[%c0_2, %c0_3] : memref<576x32xbf16, #tpu.memory_space<vmem>>, vector<576x32xbf16>
    %cst_4 = arith.constant dense<0.000000e+00> : vector<128x32xf32>
    %9 = tpu.matmul %7, %8, %cst_4 {dimension_numbers = #tpu.dot_dimension_numbers<[1], [0], [0], [1], [0, 0, 1, 1], [], []>} : vector<128x576xbf16>, vector<576x32xbf16>, vector<128x32xf32> -> vector<128x32xf32>
    %c0_5 = arith.constant 0 : index
    %c0_6 = arith.constant 0 : index
    %10 = vector.load %arg4[%c0_5, %c0_6] : memref<1x32xf32, #tpu.memory_space<vmem>>, vector<1x32xf32>
    %11 = vector.broadcast %10 : vector<1x32xf32> to vector<128x32xf32>
    %12 = arith.addf %9, %11 : vector<128x32xf32>
    %c0_7 = arith.constant 0 : index
    %c0_8 = arith.constant 0 : index
    %13 = vector.load %arg5[%c0_7, %c0_8] : memref<128x32xf32, #tpu.memory_space<vmem>>, vector<128x32xf32>
    %14 = arith.addf %12, %13 : vector<128x32xf32>
    %c0_9 = arith.constant 0 : index
    %c0_10 = arith.constant 0 : index
    %15 = vector.load %arg6[%c0_9, %c0_10] : memref<128x32xf32, #tpu.memory_space<vmem>>, vector<128x32xf32>
    tpu.vector_store %arg6[%c0_9, %c0_10], %14 {strides = array<i32>} : memref<128x32xf32, #tpu.memory_space<vmem>>, vector<128x32xf32>,
    return
  }
  func.func @transform_0(%arg0: i32, %arg1: i32) -> (i32, i32) {
    %c0_i32 = arith.constant 0 : i32
    %c0_i32_0 = arith.constant 0 : i32
    return %arg0, %c0_i32 : i32, i32
  }
  func.func @transform_1(%arg0: i32, %arg1: i32) -> (i32, i32) {
    %c0_i32 = arith.constant 0 : i32
    %c0_i32_0 = arith.constant 0 : i32
    return %c0_i32, %arg1 : i32, i32
  }
  func.func @transform_2(%arg0: i32, %arg1: i32) -> (i32, i32) {
    %c0_i32 = arith.constant 0 : i32
    %c0_i32_0 = arith.constant 0 : i32
    return %c0_i32, %arg1 : i32, i32
  }
  func.func @transform_3(%arg0: i32, %arg1: i32) -> (i32, i32) {
    %c0_i32 = arith.constant 0 : i32
    return %arg0, %arg1 : i32, i32
  }
  func.func @transform_4(%arg0: i32, %arg1: i32) -> (i32, i32) {
    %c0_i32 = arith.constant 0 : i32
    return %arg0, %arg1 : i32, i32
  }
}

module attributes {stable_mosaic.version = 11 : i64} {
  func.func @kernel(%arg0: i32, %arg1: i32, %arg2: memref<128x288xbf16, #tpu.memory_space<vmem>>, %arg3: memref<288x64xbf16, #tpu.memory_space<vmem>>, %arg4: memref<1x64xf32, #tpu.memory_space<vmem>>, %arg5: memref<128x64xf32, #tpu.memory_space<vmem>>) attributes {dimension_semantics = [#tpu.dimension_semantics<parallel>, #tpu.dimension_semantics<parallel>], iteration_bounds = array<i64: 1, 1>, scalar_prefetch = 0 : i64, scratch_operands = 0 : i64, tpu.core_type = #tpu.core_type<tc>, window_params = [{transform_indices = @transform_0, window_bounds = array<i64: 128, 288>}, {transform_indices = @transform_1, window_bounds = array<i64: 288, 64>}, {transform_indices = @transform_2, window_bounds = array<i64: 1, 64>}, {transform_indices = @transform_3, window_bounds = array<i64: 128, 64>}]} {
    %c0 = arith.constant 0 : index
    %c0_0 = arith.constant 0 : index
    %0 = vector.load %arg2[%c0, %c0_0] : memref<128x288xbf16, #tpu.memory_space<vmem>>, vector<128x288xbf16>
    %c0_1 = arith.constant 0 : index
    %c0_2 = arith.constant 0 : index
    %1 = vector.load %arg3[%c0_1, %c0_2] : memref<288x64xbf16, #tpu.memory_space<vmem>>, vector<288x64xbf16>
    %cst = arith.constant dense<0.000000e+00> : vector<128x64xf32>
    %2 = tpu.matmul %0, %1, %cst {dimension_numbers = #tpu.dot_dimension_numbers<[1], [0], [0], [1], [0, 0, 1, 1], [], []>} : vector<128x288xbf16>, vector<288x64xbf16>, vector<128x64xf32> -> vector<128x64xf32>
    %c0_3 = arith.constant 0 : index
    %c0_4 = arith.constant 0 : index
    %3 = vector.load %arg4[%c0_3, %c0_4] : memref<1x64xf32, #tpu.memory_space<vmem>>, vector<1x64xf32>
    %4 = vector.broadcast %3 : vector<1x64xf32> to vector<128x64xf32>
    %5 = arith.addf %2, %4 : vector<128x64xf32>
    %c0_5 = arith.constant 0 : index
    %c0_6 = arith.constant 0 : index
    %6 = vector.load %arg5[%c0_5, %c0_6] : memref<128x64xf32, #tpu.memory_space<vmem>>, vector<128x64xf32>
    tpu.vector_store %arg5[%c0_5, %c0_6], %5 {strides = array<i32>} : memref<128x64xf32, #tpu.memory_space<vmem>>, vector<128x64xf32>,
    return
  }
  func.func @transform_0(%arg0: i32, %arg1: i32) -> (i32, i32) {
    %c0_i32 = arith.constant 0 : i32
    %c0_i32_0 = arith.constant 0 : i32
    return %arg0, %c0_i32 : i32, i32
  }
  func.func @transform_1(%arg0: i32, %arg1: i32) -> (i32, i32) {
    %c0_i32 = arith.constant 0 : i32
    %c0_i32_0 = arith.constant 0 : i32
    return %c0_i32, %arg1 : i32, i32
  }
  func.func @transform_2(%arg0: i32, %arg1: i32) -> (i32, i32) {
    %c0_i32 = arith.constant 0 : i32
    %c0_i32_0 = arith.constant 0 : i32
    return %c0_i32, %arg1 : i32, i32
  }
  func.func @transform_3(%arg0: i32, %arg1: i32) -> (i32, i32) {
    %c0_i32 = arith.constant 0 : i32
    return %arg0, %arg1 : i32, i32
  }
}

module attributes {stable_mosaic.version = 11 : i64} {
  func.func @kernel(%arg0: i32, %arg1: i32, %arg2: memref<256x16xbf16, #tpu.memory_space<vmem>>, %arg3: memref<16x16xbf16, #tpu.memory_space<vmem>>, %arg4: memref<1x16xf32, #tpu.memory_space<vmem>>, %arg5: memref<256x16xf32, #tpu.memory_space<vmem>>) attributes {dimension_semantics = [#tpu.dimension_semantics<parallel>, #tpu.dimension_semantics<parallel>], iteration_bounds = array<i64: 2, 1>, scalar_prefetch = 0 : i64, scratch_operands = 0 : i64, tpu.core_type = #tpu.core_type<tc>, window_params = [{transform_indices = @transform_0, window_bounds = array<i64: 256, 16>}, {transform_indices = @transform_1, window_bounds = array<i64: 16, 16>}, {transform_indices = @transform_2, window_bounds = array<i64: 1, 16>}, {transform_indices = @transform_3, window_bounds = array<i64: 256, 16>}]} {
    %c0 = arith.constant 0 : index
    %c0_0 = arith.constant 0 : index
    %0 = vector.load %arg2[%c0, %c0_0] : memref<256x16xbf16, #tpu.memory_space<vmem>>, vector<256x16xbf16>
    %1 = arith.extf %0 : vector<256x16xbf16> to vector<256x16xf32>
    %cst = arith.constant 0.000000e+00 : f32
    %2 = vector.broadcast %cst : f32 to vector<256x16xf32>
    %3 = arith.cmpf oge, %1, %2 : vector<256x16xf32>
    %cst_1 = arith.constant 0.00999999977 : f32
    %4 = vector.broadcast %cst_1 : f32 to vector<256x16xf32>
    %5 = arith.mulf %4, %1 : vector<256x16xf32>
    %6 = arith.select %3, %1, %5 : vector<256x16xi1>, vector<256x16xf32>
    %7 = arith.truncf %6 : vector<256x16xf32> to vector<256x16xbf16>
    %c0_2 = arith.constant 0 : index
    %c0_3 = arith.constant 0 : index
    %8 = vector.load %arg3[%c0_2, %c0_3] : memref<16x16xbf16, #tpu.memory_space<vmem>>, vector<16x16xbf16>
    %cst_4 = arith.constant dense<0.000000e+00> : vector<256x16xf32>
    %9 = tpu.matmul %7, %8, %cst_4 {dimension_numbers = #tpu.dot_dimension_numbers<[1], [0], [0], [1], [0, 0, 1, 1], [], []>} : vector<256x16xbf16>, vector<16x16xbf16>, vector<256x16xf32> -> vector<256x16xf32>
    %c0_5 = arith.constant 0 : index
    %c0_6 = arith.constant 0 : index
    %10 = vector.load %arg4[%c0_5, %c0_6] : memref<1x16xf32, #tpu.memory_space<vmem>>, vector<1x16xf32>
    %11 = vector.broadcast %10 : vector<1x16xf32> to vector<256x16xf32>
    %12 = arith.addf %9, %11 : vector<256x16xf32>
    %c0_7 = arith.constant 0 : index
    %c0_8 = arith.constant 0 : index
    %13 = vector.load %arg5[%c0_7, %c0_8] : memref<256x16xf32, #tpu.memory_space<vmem>>, vector<256x16xf32>
    tpu.vector_store %arg5[%c0_7, %c0_8], %12 {strides = array<i32>} : memref<256x16xf32, #tpu.memory_space<vmem>>, vector<256x16xf32>,
    return
  }
  func.func @transform_0(%arg0: i32, %arg1: i32) -> (i32, i32) {
    %c0_i32 = arith.constant 0 : i32
    %c0_i32_0 = arith.constant 0 : i32
    return %arg0, %c0_i32 : i32, i32
  }
  func.func @transform_1(%arg0: i32, %arg1: i32) -> (i32, i32) {
    %c0_i32 = arith.constant 0 : i32
    %c0_i32_0 = arith.constant 0 : i32
    return %c0_i32, %arg1 : i32, i32
  }
  func.func @transform_2(%arg0: i32, %arg1: i32) -> (i32, i32) {
    %c0_i32 = arith.constant 0 : i32
    %c0_i32_0 = arith.constant 0 : i32
    return %c0_i32, %arg1 : i32, i32
  }
  func.func @transform_3(%arg0: i32, %arg1: i32) -> (i32, i32) {
    %c0_i32 = arith.constant 0 : i32
    return %arg0, %arg1 : i32, i32
  }
}

module attributes {stable_mosaic.version = 11 : i64} {
  func.func @kernel(%arg0: i32, %arg1: i32, %arg2: memref<256x288xbf16, #tpu.memory_space<vmem>>, %arg3: memref<288x16xbf16, #tpu.memory_space<vmem>>, %arg4: memref<1x16xf32, #tpu.memory_space<vmem>>, %arg5: memref<256x16xf32, #tpu.memory_space<vmem>>, %arg6: memref<256x16xf32, #tpu.memory_space<vmem>>) attributes {dimension_semantics = [#tpu.dimension_semantics<parallel>, #tpu.dimension_semantics<parallel>], iteration_bounds = array<i64: 2, 1>, scalar_prefetch = 0 : i64, scratch_operands = 0 : i64, tpu.core_type = #tpu.core_type<tc>, window_params = [{transform_indices = @transform_0, window_bounds = array<i64: 256, 288>}, {transform_indices = @transform_1, window_bounds = array<i64: 288, 16>}, {transform_indices = @transform_2, window_bounds = array<i64: 1, 16>}, {transform_indices = @transform_3, window_bounds = array<i64: 256, 16>}, {transform_indices = @transform_4, window_bounds = array<i64: 256, 16>}]} {
    %c0 = arith.constant 0 : index
    %c0_0 = arith.constant 0 : index
    %0 = vector.load %arg2[%c0, %c0_0] : memref<256x288xbf16, #tpu.memory_space<vmem>>, vector<256x288xbf16>
    %1 = arith.extf %0 : vector<256x288xbf16> to vector<256x288xf32>
    %cst = arith.constant 0.000000e+00 : f32
    %2 = vector.broadcast %cst : f32 to vector<256x288xf32>
    %3 = arith.cmpf oge, %1, %2 : vector<256x288xf32>
    %cst_1 = arith.constant 0.00999999977 : f32
    %4 = vector.broadcast %cst_1 : f32 to vector<256x288xf32>
    %5 = arith.mulf %4, %1 : vector<256x288xf32>
    %6 = arith.select %3, %1, %5 : vector<256x288xi1>, vector<256x288xf32>
    %7 = arith.truncf %6 : vector<256x288xf32> to vector<256x288xbf16>
    %c0_2 = arith.constant 0 : index
    %c0_3 = arith.constant 0 : index
    %8 = vector.load %arg3[%c0_2, %c0_3] : memref<288x16xbf16, #tpu.memory_space<vmem>>, vector<288x16xbf16>
    %cst_4 = arith.constant dense<0.000000e+00> : vector<256x16xf32>
    %9 = tpu.matmul %7, %8, %cst_4 {dimension_numbers = #tpu.dot_dimension_numbers<[1], [0], [0], [1], [0, 0, 1, 1], [], []>} : vector<256x288xbf16>, vector<288x16xbf16>, vector<256x16xf32> -> vector<256x16xf32>
    %c0_5 = arith.constant 0 : index
    %c0_6 = arith.constant 0 : index
    %10 = vector.load %arg4[%c0_5, %c0_6] : memref<1x16xf32, #tpu.memory_space<vmem>>, vector<1x16xf32>
    %11 = vector.broadcast %10 : vector<1x16xf32> to vector<256x16xf32>
    %12 = arith.addf %9, %11 : vector<256x16xf32>
    %c0_7 = arith.constant 0 : index
    %c0_8 = arith.constant 0 : index
    %13 = vector.load %arg5[%c0_7, %c0_8] : memref<256x16xf32, #tpu.memory_space<vmem>>, vector<256x16xf32>
    %14 = arith.addf %12, %13 : vector<256x16xf32>
    %c0_9 = arith.constant 0 : index
    %c0_10 = arith.constant 0 : index
    %15 = vector.load %arg6[%c0_9, %c0_10] : memref<256x16xf32, #tpu.memory_space<vmem>>, vector<256x16xf32>
    tpu.vector_store %arg6[%c0_9, %c0_10], %14 {strides = array<i32>} : memref<256x16xf32, #tpu.memory_space<vmem>>, vector<256x16xf32>,
    return
  }
  func.func @transform_0(%arg0: i32, %arg1: i32) -> (i32, i32) {
    %c0_i32 = arith.constant 0 : i32
    %c0_i32_0 = arith.constant 0 : i32
    return %arg0, %c0_i32 : i32, i32
  }
  func.func @transform_1(%arg0: i32, %arg1: i32) -> (i32, i32) {
    %c0_i32 = arith.constant 0 : i32
    %c0_i32_0 = arith.constant 0 : i32
    return %c0_i32, %arg1 : i32, i32
  }
  func.func @transform_2(%arg0: i32, %arg1: i32) -> (i32, i32) {
    %c0_i32 = arith.constant 0 : i32
    %c0_i32_0 = arith.constant 0 : i32
    return %c0_i32, %arg1 : i32, i32
  }
  func.func @transform_3(%arg0: i32, %arg1: i32) -> (i32, i32) {
    %c0_i32 = arith.constant 0 : i32
    return %arg0, %arg1 : i32, i32
  }
  func.func @transform_4(%arg0: i32, %arg1: i32) -> (i32, i32) {
    %c0_i32 = arith.constant 0 : i32
    return %arg0, %arg1 : i32, i32
  }
}

module attributes {stable_mosaic.version = 11 : i64} {
  func.func @kernel(%arg0: i32, %arg1: i32, %arg2: memref<256x144xbf16, #tpu.memory_space<vmem>>, %arg3: memref<144x3xbf16, #tpu.memory_space<vmem>>, %arg4: memref<1x3xf32, #tpu.memory_space<vmem>>, %arg5: memref<256x3xf32, #tpu.memory_space<vmem>>) attributes {dimension_semantics = [#tpu.dimension_semantics<parallel>, #tpu.dimension_semantics<parallel>], iteration_bounds = array<i64: 2, 1>, scalar_prefetch = 0 : i64, scratch_operands = 0 : i64, tpu.core_type = #tpu.core_type<tc>, window_params = [{transform_indices = @transform_0, window_bounds = array<i64: 256, 144>}, {transform_indices = @transform_1, window_bounds = array<i64: 144, 3>}, {transform_indices = @transform_2, window_bounds = array<i64: 1, 3>}, {transform_indices = @transform_3, window_bounds = array<i64: 256, 3>}]} {
    %c0 = arith.constant 0 : index
    %c0_0 = arith.constant 0 : index
    %0 = vector.load %arg2[%c0, %c0_0] : memref<256x144xbf16, #tpu.memory_space<vmem>>, vector<256x144xbf16>
    %c0_1 = arith.constant 0 : index
    %c0_2 = arith.constant 0 : index
    %1 = vector.load %arg3[%c0_1, %c0_2] : memref<144x3xbf16, #tpu.memory_space<vmem>>, vector<144x3xbf16>
    %cst = arith.constant dense<0.000000e+00> : vector<256x3xf32>
    %2 = tpu.matmul %0, %1, %cst {dimension_numbers = #tpu.dot_dimension_numbers<[1], [0], [0], [1], [0, 0, 1, 1], [], []>} : vector<256x144xbf16>, vector<144x3xbf16>, vector<256x3xf32> -> vector<256x3xf32>
    %c0_3 = arith.constant 0 : index
    %c0_4 = arith.constant 0 : index
    %3 = vector.load %arg4[%c0_3, %c0_4] : memref<1x3xf32, #tpu.memory_space<vmem>>, vector<1x3xf32>
    %4 = vector.broadcast %3 : vector<1x3xf32> to vector<256x3xf32>
    %5 = arith.addf %2, %4 : vector<256x3xf32>
    %c0_5 = arith.constant 0 : index
    %c0_6 = arith.constant 0 : index
    %6 = vector.load %arg5[%c0_5, %c0_6] : memref<256x3xf32, #tpu.memory_space<vmem>>, vector<256x3xf32>
    tpu.vector_store %arg5[%c0_5, %c0_6], %5 {strides = array<i32>} : memref<256x3xf32, #tpu.memory_space<vmem>>, vector<256x3xf32>,
    return
  }
  func.func @transform_0(%arg0: i32, %arg1: i32) -> (i32, i32) {
    %c0_i32 = arith.constant 0 : i32
    %c0_i32_0 = arith.constant 0 : i32
    return %arg0, %c0_i32 : i32, i32
  }
  func.func @transform_1(%arg0: i32, %arg1: i32) -> (i32, i32) {
    %c0_i32 = arith.constant 0 : i32
    %c0_i32_0 = arith.constant 0 : i32
    return %c0_i32, %arg1 : i32, i32
  }
  func.func @transform_2(%arg0: i32, %arg1: i32) -> (i32, i32) {
    %c0_i32 = arith.constant 0 : i32
    %c0_i32_0 = arith.constant 0 : i32
    return %c0_i32, %arg1 : i32, i32
  }
  func.func @transform_3(%arg0: i32, %arg1: i32) -> (i32, i32) {
    %c0_i32 = arith.constant 0 : i32
    return %arg0, %arg1 : i32, i32
  }
}

</mosaic_0001>

<bundles_post_ra>
// kernel: _lambda_.91
= control target key start
LH: loop header
LB: loop body
LE: loop exit
PB: predicated region body
PF: predicated region fallthrough
CT: control target
= control target key end

     0   :  { %s1256_s15 = smov 0   ;;  %s1258_s16 = smov 0   ;;  %s1642_s0 = inlined_call_operand.vmem [shape: bf16[512,144], index: 0, kind: input, shape index: {}]   ;;  %s1643_s1 = inlined_call_operand.vmem [shape: bf16[144,16], index: 1, kind: input, shape index: {}]   ;;  %s1644_s2 = inlined_call_operand.vmem [shape: f32[1,16], index: 2, kind: input, shape index: {}]   ;;  %s1645_s3 = inlined_call_operand.vmem [shape: f32[512,16], index: 3, kind: input, shape index: {}]   ;;  %s1646_s4 = inlined_call_operand.vmem [shape: f32[512,16], index: 4, kind: output, shape index: {}]  }
   0x1   :  { %s1260_s17 = smov 0  }
   0x2 LB: > { %s26_s18 = sadd.s32 1, %s1224_s16  ;;  %p1117_p0 = scmp.ge.s32.totalorder %s1228_s17, 1  ;;  %s1228_s17 = sphi %s1260_s17, %s14_s17   ;;  %s1224_s16 = sphi %s1258_s16, %s1648_s16   ;;  %s1220_s15 = sphi %s1256_s15, %s1647_s15  }
   0x3   : > { %p28_p1 = scmp.ge.s32.totalorder %s26_s18, 2  ;;  %p211_p2 = scmp.lt.s32.totalorder %s1228_s17, 3 }
   0x5   : > { %s1650_s18 = smov (%p28_p1, %s26_s18), 0  ;;  %p212_p3 = pnand %p1117_p0, %p211_p2 }
   0x6   : > { %s1118_s21 = sshll.u32 (!%p212_p3), %s1220_s15, 5 }
   0x7   : > { %215 = sbr.rel (%p212_p3) target bundleno = 307 (0x133), region = 36  ;;  %p257_p4 = scmp.lt.s32.totalorder (!%p212_p3), %s1118_s21, 63 }
   0xc   : > { %v1197_v0 = vld [vmem:[%s1643_s1 + $0x38] sm:$0xff]   ;;  %v1230_v1 = vmov 0   ;;  %v1198_v2 = vld [vmem:[%s1643_s1 + $0x30] sm:$0xff]   ;;  %s1652_s21 = smov (!%p257_p4, %s1118_s21), 63  ;;  %v1199_v3 = vld [vmem:[%s1643_s1 + $0x28] sm:$0xff]   ;;  %vm688_vm0 = vcmask 130048  }
   0xd   : > { %737 = vmatprep.subr.bf16.mxu0 %v1230_v1  ;;  %1154 = vmatprep.subr.bf16.mxu1 %v1230_v1  ;;  %s1287_s26 = sshll.u32 %s1652_s21, 3  ;;  %v1200_v7 = vld [vmem:[%s1643_s1 + $0x20] sm:$0xff]   ;;  %v1201_v21 = vld [vmem:[%s1643_s1 + $0x18] sm:$0xff]   ;;  %v1202_v37 = vld [vmem:[%s1643_s1 + $0x10] sm:$0xff]  }
   0xe   : > { %738 = vmatpush1.bf16.msra.mxu0 %v1197_v0  ;;  %1163 = vmatpush1.bf16.msra.mxu1 %v1197_v0  ;;  %s1295_s29 = scalar_lea.vmem %s1642_s0, %s1287_s26  ;;  %v1203_v48 = vld [vmem:[%s1643_s1 + $0x8] sm:$0xff]   ;;  %s1492_s21 = scalar_lea.vmem %s1645_s3, %s1287_s26 }
   0xf   : > { %739 = vmatprep.subr.bf16.mxu0 %v1230_v1  ;;  %1155 = vmatprep.subr.bf16.mxu1 %v1230_v1  ;;  %v289_v4 = vld [vmem:[%s1295_s29] sm:$0xff]  ;;  %v290_v5 = vld [vmem:[%s1295_s29 + $0x8] sm:$0xff]  ;;  %v291_v24 = vld [vmem:[%s1295_s29 + $0x10] sm:$0xff]  ;;  %s1507_s27 = scalar_lea.vmem %s1646_s4, %s1287_s26 }
  0x10   : > { %v305_v6 = vld [vmem:[%s1295_s29 + $0x80] sm:$0xff]  ;;  %v321_v8 = vunpack.c.l.bf16 %v289_v4  ;;  %v322_v9 = vunpack.c.h.bf16 %v289_v4  ;;  %v323_v10 = vunpack.c.l.bf16 %v290_v5  ;;  %v324_v11 = vunpack.c.h.bf16 %v290_v5  ;;  %v306_v12 = vld [vmem:[%s1295_s29 + $0x88] sm:$0xff]  ;;  %v292_v29 = vld [vmem:[%s1295_s29 + $0x18] sm:$0xff] }
  0x11   : > { %v353_v13 = vunpack.c.l.bf16 %v305_v6  ;;  %v354_v14 = vunpack.c.h.bf16 %v305_v6  ;;  %v355_v15 = vunpack.c.l.bf16 %v306_v12  ;;  %v356_v16 = vunpack.c.h.bf16 %v306_v12  ;;  %v307_v30 = vld [vmem:[%s1295_s29 + $0x90] sm:$0xff]  ;;  %v308_v33 = vld [vmem:[%s1295_s29 + $0x98] sm:$0xff]  ;;  %v293_v56 = vld [vmem:[%s1295_s29 + $0x20] sm:$0xff] }
  0x12   : > { %740 = vmatpush1.bf16.msra.mxu0 %v1198_v2  ;;  %1164 = vmatpush1.bf16.msra.mxu1 %v1198_v2  ;;  %vm386_vm1 = vcmp.ge.f32.partialorder %v322_v9, 0.0  ;;  %vm388_vm2 = vcmp.ge.f32.partialorder %v324_v11, 0.0  ;;  %v450_v17 = vmul.f32 0.01, %v322_v9  ;;  %v452_v18 = vmul.f32 0.01, %v324_v11 }
  0x13   : > { %741 = vmatprep.subr.bf16.mxu0 %v1230_v1  ;;  %1156 = vmatprep.subr.bf16.mxu1 %v1230_v1  ;;  %vm418_vm3 = vcmp.ge.f32.partialorder %v354_v14, 0.0  ;;  %vm420_vm4 = vcmp.ge.f32.partialorder %v356_v16, 0.0  ;;  %v482_v19 = vmul.f32 0.01, %v354_v14  ;;  %v484_v20 = vmul.f32 0.01, %v356_v16 }
  0x14   : > { %v514_v22 = vsel %vm386_vm1, %v322_v9, %v450_v17  ;;  %v516_v23 = vsel %vm388_vm2, %v324_v11, %v452_v18  ;;  %vm385_vm5 = vcmp.ge.f32.partialorder %v321_v8, 0.0  ;;  %vm387_vm6 = vcmp.ge.f32.partialorder %v323_v10, 0.0  ;;  %v294_v57 = vld [vmem:[%s1295_s29 + $0x28] sm:$0xff]  ;;  %v309_v58 = vld [vmem:[%s1295_s29 + $0xa0] sm:$0xff] }
  0x15   : > { %v578_v25 = vpack.c.bf16 %v516_v23, %v514_v22  ;;  %v546_v26 = vsel %vm418_vm3, %v354_v14, %v482_v19  ;;  %v548_v27 = vsel %vm420_vm4, %v356_v16, %v484_v20  ;;  %v449_v28 = vmul.f32 0.01, %v321_v8  ;;  %v1204_v2 = vld [vmem:[%s1643_s1] sm:$0xff]   ;;  %v310_v5 = vld [vmem:[%s1295_s29 + $0xa8] sm:$0xff]  ;;  %v295_v23 = vld [vmem:[%s1295_s29 + $0x30] sm:$0xff] }
  0x16   : > { %742 = vmatpush1.bf16.msra.mxu0 %v1199_v3  ;;  %1165 = vmatpush1.bf16.msra.mxu1 %v1199_v3  ;;  %v594_v31 = vpack.c.bf16 %v548_v27, %v546_v26  ;;  %v451_v32 = vmul.f32 0.01, %v323_v10  ;;  %vm417_vm7 = vcmp.ge.f32.partialorder %v353_v13, 0.0  ;;  %vm419_vm8 = vcmp.ge.f32.partialorder %v355_v15, 0.0  ;;  %v1205_v16 = vld [vmem:[%s1643_s1 + $0x40] sm:$0xff]  }
  0x17   : > { %743 = vmatprep.subr.bf16.mxu0 %v1230_v1  ;;  %1157 = vmatprep.subr.bf16.mxu1 %v1230_v1  ;;  %v481_v34 = vmul.f32 0.01, %v353_v13  ;;  %v483_v35 = vmul.f32 0.01, %v355_v15  ;;  %v326_v36 = vunpack.c.h.bf16 %v291_v24  ;;  %v1320_v38 = vsel %vm385_vm5, %v321_v8, %v449_v28  ;;  %v296_v28 = vld [vmem:[%s1295_s29 + $0x38] sm:$0xff] }
  0x18   : > { %1135 = vmatprep.mubr.msk.bf16.mxu0 %vm688_vm0, %v578_v25  ;;  %v328_v39 = vunpack.c.h.bf16 %v292_v29  ;;  %v358_v40 = vunpack.c.h.bf16 %v307_v30  ;;  %v1325_v41 = vsel %vm387_vm6, %v323_v10, %v451_v32  ;;  %v360_v44 = vunpack.c.h.bf16 %v308_v33  ;;  %1143 = vmatprep.mubr.msk.bf16.mxu1 %vm688_vm0, %v594_v31 }
  0x19   : > { %v1328_v42 = vsel %vm417_vm7, %v353_v13, %v481_v34  ;;  %v1331_v43 = vsel %vm419_vm8, %v355_v15, %v483_v35  ;;  %vm390_vm9 = vcmp.ge.f32.partialorder %v326_v36, 0.0  ;;  %v454_v45 = vmul.f32 0.01, %v326_v36  ;;  %v311_v35 = vld [vmem:[%s1295_s29 + $0xb0] sm:$0xff] }
  0x1a   : > { %744 = vmatpush1.bf16.msra.mxu0 %v1200_v7  ;;  %1166 = vmatpush1.bf16.msra.mxu1 %v1200_v7  ;;  %v456_v46 = vmul.f32 0.01, %v328_v39  ;;  %vm392_vm10 = vcmp.ge.f32.partialorder %v328_v39, 0.0  ;;  %vm422_vm11 = vcmp.ge.f32.partialorder %v358_v40, 0.0  ;;  %v486_v47 = vmul.f32 0.01, %v358_v40 }
  0x1b   : > { %745 = vmatprep.subr.bf16.mxu0 %v1230_v1  ;;  %1158 = vmatprep.subr.bf16.mxu1 %v1230_v1  ;;  %v577_v49 = vpack.c.bf16 %v1325_v41, %v1320_v38  ;;  %v593_v50 = vpack.c.bf16 %v1331_v43, %v1328_v42  ;;  %v325_v51 = vunpack.c.l.bf16 %v291_v24  ;;  %v327_v52 = vunpack.c.l.bf16 %v292_v29 }
  0x1c   : > { %v1343_v53 = vsel %vm390_vm9, %v326_v36, %v454_v45  ;;  %vm424_vm12 = vcmp.ge.f32.partialorder %v360_v44, 0.0  ;;  %v488_v54 = vmul.f32 0.01, %v360_v44  ;;  %v357_v55 = vunpack.c.l.bf16 %v307_v30 }
  0x1d   : > { %v1349_v59 = vsel %vm392_vm10, %v328_v39, %v456_v46  ;;  %v1352_v60 = vsel %vm422_vm11, %v358_v40, %v486_v47  ;;  %vm389_vm13 = vcmp.ge.f32.partialorder %v325_v51, 0.0  ;;  %v453_v61 = vmul.f32 0.01, %v325_v51  ;;  %v312_v40 = vld [vmem:[%s1295_s29 + $0xb8] sm:$0xff] }
  0x1e   : > { %746 = vmatpush1.bf16.msra.mxu0 %v1201_v21  ;;  %1167 = vmatpush1.bf16.msra.mxu1 %v1201_v21  ;;  %vm391_vm14 = vcmp.ge.f32.partialorder %v327_v52, 0.0  ;;  %v455_v62 = vmul.f32 0.01, %v327_v52  ;;  %v359_v63 = vunpack.c.l.bf16 %v308_v33  ;;  %v485_v0 = vmul.f32 0.01, %v357_v55 }
  0x1f   : > { %747 = vmatprep.subr.bf16.mxu0 %v1230_v1  ;;  %1159 = vmatprep.subr.bf16.mxu1 %v1230_v1  ;;  %vm421_vm15 = vcmp.ge.f32.partialorder %v357_v55, 0.0  ;;  %v330_v3 = vunpack.c.h.bf16 %v293_v56  ;;  %v332_v4 = vunpack.c.h.bf16 %v294_v57  ;;  %v362_v6 = vunpack.c.h.bf16 %v309_v58 }
  0x20   : > { %v552_v7 = vsel %vm424_vm12, %v360_v44, %v488_v54  ;;  %v1362_v8 = vsel %vm389_vm13, %v325_v51, %v453_v61  ;;  %vm423_vm1 = vcmp.ge.f32.partialorder %v359_v63, 0.0  ;;  %v487_v9 = vmul.f32 0.01, %v359_v63 }
  0x21   : > { %v1365_v10 = vsel %vm391_vm14, %v327_v52, %v455_v62  ;;  %vm394_vm2 = vcmp.ge.f32.partialorder %v330_v3, 0.0  ;;  %vm396_vm3 = vcmp.ge.f32.partialorder %v332_v4, 0.0  ;;  %v458_v11 = vmul.f32 0.01, %v330_v3 }
  0x22   : > { %748 = vmatpush1.bf16.msra.mxu0 %v1202_v37  ;;  %1168 = vmatpush1.bf16.msra.mxu1 %v1202_v37  ;;  %v1367_v12 = vsel %vm421_vm15, %v357_v55, %v485_v0  ;;  %v1369_v13 = vsel %vm423_vm1, %v359_v63, %v487_v9  ;;  %v460_v14 = vmul.f32 0.01, %v332_v4  ;;  %v364_v15 = vunpack.c.h.bf16 %v310_v5  ;;  %v297_v55 = vld [vmem:[%s1295_s29 + $0x40] sm:$0xff]  ;;  %v314_v9 = vld [vmem:[%s1295_s29 + $0xc8] sm:$0xff] }
  0x23   : > { %749 = vmatprep.subr.bf16.mxu0 %v1230_v1  ;;  %1160 = vmatprep.subr.bf16.mxu1 %v1230_v1  ;;  %v1374_v17 = vsel %vm394_vm2, %v330_v3, %v458_v11  ;;  %vm426_vm4 = vcmp.ge.f32.partialorder %v362_v6, 0.0  ;;  %v490_v18 = vmul.f32 0.01, %v362_v6  ;;  %v329_v19 = vunpack.c.l.bf16 %v293_v56  ;;  %v298_v56 = vld [vmem:[%s1295_s29 + $0x48] sm:$0xff]  ;;  %v313_v3 = vld [vmem:[%s1295_s29 + $0xc0] sm:$0xff] }
  0x24   : > { %v1378_v20 = vsel %vm396_vm3, %v332_v4, %v460_v14  ;;  %vm428_vm5 = vcmp.ge.f32.partialorder %v364_v15, 0.0  ;;  %v492_v21 = vmul.f32 0.01, %v364_v15  ;;  %v331_v22 = vunpack.c.l.bf16 %v294_v57 }
  0x25   : > { %v580_v24 = vpack.c.bf16 %v1349_v59, %v1343_v53  ;;  %v596_v25 = vpack.c.bf16 %v552_v7, %v1352_v60  ;;  %v579_v26 = vpack.c.bf16 %v1365_v10, %v1362_v8  ;;  %v595_v27 = vpack.c.bf16 %v1369_v13, %v1367_v12 }
  0x26   : > { %750 = vmatpush1.bf16.msra.mxu0 %v1203_v48  ;;  %1169 = vmatpush1.bf16.msra.mxu1 %v1203_v48  ;;  %v1392_v29 = vsel %vm426_vm4, %v362_v6, %v490_v18  ;;  %v1394_v30 = vsel %vm428_vm5, %v364_v15, %v492_v21  ;;  %v361_v31 = vunpack.c.l.bf16 %v309_v58  ;;  %vm393_vm6 = vcmp.ge.f32.partialorder %v329_v19, 0.0 }
  0x27   : > { %751 = vmatprep.subr.bf16.mxu0 %v1230_v1  ;;  %1161 = vmatprep.subr.bf16.mxu1 %v1230_v1  ;;  %v457_v32 = vmul.f32 0.01, %v329_v19  ;;  %v363_v33 = vunpack.c.l.bf16 %v310_v5  ;;  %v334_v34 = vunpack.c.h.bf16 %v295_v23  ;;  %vm395_vm7 = vcmp.ge.f32.partialorder %v331_v22, 0.0 }
  0x28   : > { %v459_v36 = vmul.f32 0.01, %v331_v22  ;;  %v489_v37 = vmul.f32 0.01, %v361_v31  ;;  %v336_v39 = vunpack.c.h.bf16 %v296_v28  ;;  %v598_v44 = vpack.c.bf16 %v1394_v30, %v1392_v29  ;;  %v300_v30 = vld [vmem:[%s1295_s29 + $0x58] sm:$0xff] }
  0x29   : > { %vm425_vm8 = vcmp.ge.f32.partialorder %v361_v31, 0.0  ;;  %vm427_vm9 = vcmp.ge.f32.partialorder %v363_v33, 0.0  ;;  %v491_v45 = vmul.f32 0.01, %v363_v33  ;;  %vm398_vm10 = vcmp.ge.f32.partialorder %v334_v34, 0.0 }
  0x2a   : > { %752 = vmatpush1.bf16.msra.mxu0 %v1204_v2  ;;  %1170 = vmatpush1.bf16.msra.mxu1 %v1204_v2  ;;  %vm400_vm11 = vcmp.ge.f32.partialorder %v336_v39, 0.0  ;;  %v462_v46 = vmul.f32 0.01, %v334_v34  ;;  %v464_v47 = vmul.f32 0.01, %v336_v39  ;;  %v1409_v48 = vsel %vm393_vm6, %v329_v19, %v457_v32 }
  0x2b   : > { %767 = vmatprep.subr.bf16.mxu0 %v1230_v1  ;;  %1162 = vmatprep.subr.bf16.mxu1 %v1230_v1  ;;  %v582_v1 = vpack.c.bf16 %v1378_v20, %v1374_v17  ;;  %v366_v51 = vunpack.c.h.bf16 %v311_v35  ;;  %v368_v38 = vunpack.c.h.bf16 %v312_v40  ;;  %v333_v41 = vunpack.c.l.bf16 %v295_v23  ;;  %v299_v23 = vld [vmem:[%s1295_s29 + $0x50] sm:$0xff] }
  0x2c   : > { %v1415_v42 = vsel %vm425_vm8, %v361_v31, %v489_v37  ;;  %v1418_v43 = vsel %vm427_vm9, %v363_v33, %v491_v45  ;;  %v1420_v52 = vsel %vm398_vm10, %v334_v34, %v462_v46  ;;  %v1422_v53 = vsel %vm400_vm11, %v336_v39, %v464_v47  ;;  %v315_v34 = vld [vmem:[%s1295_s29 + $0xd0] sm:$0xff] }
  0x2d   : > { %vm430_vm12 = vcmp.ge.f32.partialorder %v366_v51, 0.0  ;;  %v494_v54 = vmul.f32 0.01, %v366_v51  ;;  %vm432_vm13 = vcmp.ge.f32.partialorder %v368_v38, 0.0  ;;  %v496_v57 = vmul.f32 0.01, %v368_v38 }
  0x2e   : > { %768 = vmatpush2.bf16.msra.mxu0 %v1205_v16  ;;  %1171 = vmatpush2.bf16.msra.mxu1 %v1205_v16  ;;  %vm397_vm14 = vcmp.ge.f32.partialorder %v333_v41, 0.0  ;;  %v461_v58 = vmul.f32 0.01, %v333_v41  ;;  %v597_v60 = vpack.c.bf16 %v1418_v43, %v1415_v42  ;;  %v365_v61 = vunpack.c.l.bf16 %v311_v35 }
  0x2f   : > { %v367_v62 = vunpack.c.l.bf16 %v312_v40  ;;  %v584_v63 = vpack.c.bf16 %v1422_v53, %v1420_v52  ;;  %v338_v0 = vunpack.c.h.bf16 %v297_v55  ;;  %v340_v2 = vunpack.c.h.bf16 %v298_v56 }
  0x30   : > { %v558_v4 = vsel %vm430_vm12, %v366_v51, %v494_v54  ;;  %v560_v5 = vsel %vm432_vm13, %v368_v38, %v496_v57  ;;  %v1434_v7 = vsel %vm397_vm14, %v333_v41, %v461_v58  ;;  %vm429_vm1 = vcmp.ge.f32.partialorder %v365_v61, 0.0 }
  0x31   : > { %770 = vmatmul.mubr.bf16.vlgmr.msra.gmra.mxu0 %v577_v49  ;;  %834 = vmatmul.mubr.bf16.vlgmr.msra.gmra.mxu1 %v593_v50  ;;  %v1412_v49 = vsel %vm395_vm7, %v331_v22, %v459_v36  ;;  %v335_v50 = vunpack.c.l.bf16 %v296_v28  ;;  %vm431_vm2 = vcmp.ge.f32.partialorder %v367_v62, 0.0  ;;  %v493_v11 = vmul.f32 0.01, %v365_v61 }
  0x32   : > { %1136 = vmatprep.mubr.msk.bf16.mxu0 %vm688_vm0, %v580_v24  ;;  %1144 = vmatprep.mubr.msk.bf16.mxu1 %vm688_vm0, %v596_v25  ;;  %v581_v59 = vpack.c.bf16 %v1412_v49, %v1409_v48  ;;  %v495_v12 = vmul.f32 0.01, %v367_v62  ;;  %vm402_vm3 = vcmp.ge.f32.partialorder %v338_v0, 0.0  ;;  %v466_v13 = vmul.f32 0.01, %v338_v0 }
  0x33   : > { %vm399_vm15 = vcmp.ge.f32.partialorder %v335_v50, 0.0  ;;  %v463_v6 = vmul.f32 0.01, %v335_v50  ;;  %v468_v14 = vmul.f32 0.01, %v340_v2  ;;  %v370_v15 = vunpack.c.h.bf16 %v313_v3 }
  0x34   : > { %v600_v16 = vpack.c.bf16 %v560_v5, %v558_v4  ;;  %vm404_vm4 = vcmp.ge.f32.partialorder %v340_v2, 0.0  ;;  %v372_v8 = vunpack.c.h.bf16 %v314_v9  ;;  %v337_v10 = vunpack.c.l.bf16 %v297_v55  ;;  %v318_v4 = vld [vmem:[%s1295_s29 + $0xe8] sm:$0xff] }
  0x35   : > { %v527_v18 = vsel %vm399_vm15, %v335_v50, %v463_v6  ;;  %v557_v19 = vsel %vm429_vm1, %v365_v61, %v493_v11  ;;  %v559_v21 = vsel %vm431_vm2, %v367_v62, %v495_v12  ;;  %vm434_vm5 = vcmp.ge.f32.partialorder %v370_v15, 0.0  ;;  %v301_v61 = vld [vmem:[%s1295_s29 + $0x60] sm:$0xff]  ;;  %v302_v62 = vld [vmem:[%s1295_s29 + $0x68] sm:$0xff] }
  0x36   : > { %v1446_v17 = vsel %vm402_vm3, %v338_v0, %v466_v13  ;;  %vm436_vm6 = vcmp.ge.f32.partialorder %v372_v8, 0.0  ;;  %v498_v20 = vmul.f32 0.01, %v370_v15  ;;  %v500_v22 = vmul.f32 0.01, %v372_v8 }
  0x37   : > { %v532_v24 = vsel %vm404_vm4, %v340_v2, %v468_v14  ;;  %v339_v25 = vunpack.c.l.bf16 %v298_v56  ;;  %vm401_vm7 = vcmp.ge.f32.partialorder %v337_v10, 0.0  ;;  %v371_v29 = vunpack.c.l.bf16 %v314_v9 }
  0x38   : > { %v562_v28 = vsel %vm434_vm5, %v370_v15, %v498_v20  ;;  %v583_v31 = vpack.c.bf16 %v527_v18, %v1434_v7  ;;  %v342_v33 = vunpack.c.h.bf16 %v299_v23  ;;  %v599_v35 = vpack.c.bf16 %v559_v21, %v557_v19 }
  0x39   : > { %778 = vmatmul.mubr.bf16.gmra.mxu0 %v579_v26  ;;  %842 = vmatmul.mubr.bf16.gmra.mxu1 %v595_v27  ;;  %v465_v26 = vmul.f32 0.01, %v337_v10  ;;  %v369_v27 = vunpack.c.l.bf16 %v313_v3  ;;  %vm403_vm8 = vcmp.ge.f32.partialorder %v339_v25, 0.0  ;;  %v467_v32 = vmul.f32 0.01, %v339_v25 }
  0x3a   : > { %1137 = vmatprep.mubr.msk.bf16.mxu0 %vm688_vm0, %v582_v1  ;;  %1145 = vmatprep.mubr.msk.bf16.mxu1 %vm688_vm0, %v598_v44  ;;  %v564_v1 = vsel %vm436_vm6, %v372_v8, %v500_v22  ;;  %v586_v36 = vpack.c.bf16 %v532_v24, %v1446_v17  ;;  %vm435_vm10 = vcmp.ge.f32.partialorder %v371_v29, 0.0  ;;  %v344_v40 = vunpack.c.h.bf16 %v300_v30  ;;  %v316_v44 = vld [vmem:[%s1295_s29 + $0xd8] sm:$0xff] }
  0x3b   : > { %v602_v37 = vpack.c.bf16 %v564_v1, %v562_v28  ;;  %v1455_v39 = vsel %vm401_vm7, %v337_v10, %v465_v26  ;;  %vm433_vm9 = vcmp.ge.f32.partialorder %v369_v27, 0.0  ;;  %v1459_v45 = vsel %vm403_vm8, %v339_v25, %v467_v32  ;;  %v304_v24 = vld [vmem:[%s1295_s29 + $0x78] sm:$0xff]  ;;  %v319_v1 = vld [vmem:[%s1295_s29 + $0xf0] sm:$0xff] }
  0x3c   : > { %v497_v46 = vmul.f32 0.01, %v369_v27  ;;  %v499_v47 = vmul.f32 0.01, %v371_v29  ;;  %v374_v48 = vunpack.c.h.bf16 %v315_v34  ;;  %vm406_vm11 = vcmp.ge.f32.partialorder %v342_v33, 0.0 }
  0x3d   : > { %vm408_vm12 = vcmp.ge.f32.partialorder %v344_v40, 0.0  ;;  %v470_v51 = vmul.f32 0.01, %v342_v33  ;;  %v472_v38 = vmul.f32 0.01, %v344_v40  ;;  %v376_v41 = vunpack.c.h.bf16 %v316_v44 }
  0x3e   : > { %vm438_vm13 = vcmp.ge.f32.partialorder %v374_v48, 0.0  ;;  %v502_v49 = vmul.f32 0.01, %v374_v48  ;;  %v341_v42 = vunpack.c.l.bf16 %v299_v23  ;;  %v585_v43 = vpack.c.bf16 %v1459_v45, %v1455_v39  ;;  %v303_v23 = vld [vmem:[%s1295_s29 + $0x70] sm:$0xff] }
  0x3f   : > { %v343_v50 = vunpack.c.l.bf16 %v300_v30  ;;  %v373_v52 = vunpack.c.l.bf16 %v315_v34  ;;  %v375_v53 = vunpack.c.l.bf16 %v316_v44  ;;  %v561_v54 = vsel %vm433_vm9, %v369_v27, %v497_v46 }
  0x40   : > { %v563_v55 = vsel %vm435_vm10, %v371_v29, %v499_v47  ;;  %vm440_vm14 = vcmp.ge.f32.partialorder %v376_v41, 0.0  ;;  %v504_v56 = vmul.f32 0.01, %v376_v41  ;;  %v534_v57 = vsel %vm406_vm11, %v342_v33, %v470_v51 }
  0x41   : > { %786 = vmatmul.mubr.bf16.gmra.mxu0 %v581_v59  ;;  %850 = vmatmul.mubr.bf16.gmra.mxu1 %v597_v60  ;;  %v536_v58 = vsel %vm408_vm12, %v344_v40, %v472_v38  ;;  %v566_v59 = vsel %vm438_vm13, %v374_v48, %v502_v49  ;;  %v469_v60 = vmul.f32 0.01, %v341_v42  ;;  %vm405_vm15 = vcmp.ge.f32.partialorder %v341_v42, 0.0 }
  0x42   : > { %1138 = vmatprep.mubr.msk.bf16.mxu0 %vm688_vm0, %v584_v63  ;;  %1146 = vmatprep.mubr.msk.bf16.mxu1 %vm688_vm0, %v600_v16  ;;  %v317_v63 = vld [vmem:[%s1295_s29 + $0xe0] sm:$0xff]  ;;  %v568_v0 = vsel %vm440_vm14, %v376_v41, %v504_v56  ;;  %v471_v2 = vmul.f32 0.01, %v343_v50  ;;  %v501_v3 = vmul.f32 0.01, %v373_v52  ;;  %vm407_vm1 = vcmp.ge.f32.partialorder %v343_v50, 0.0 }
  0x43   : > { %vm437_vm2 = vcmp.ge.f32.partialorder %v373_v52, 0.0  ;;  %vm439_vm3 = vcmp.ge.f32.partialorder %v375_v53, 0.0  ;;  %v503_v5 = vmul.f32 0.01, %v375_v53  ;;  %v601_v6 = vpack.c.bf16 %v563_v55, %v561_v54 }
  0x44   : > { %v588_v7 = vpack.c.bf16 %v536_v58, %v534_v57  ;;  %v346_v9 = vunpack.c.h.bf16 %v301_v61  ;;  %v348_v11 = vunpack.c.h.bf16 %v302_v62  ;;  %v604_v12 = vpack.c.bf16 %v568_v0, %v566_v59 }
  0x45   : > { %v533_v13 = vsel %vm405_vm15, %v341_v42, %v469_v60  ;;  %v378_v14 = vunpack.c.h.bf16 %v317_v63  ;;  %v380_v15 = vunpack.c.h.bf16 %v318_v4  ;;  %v535_v16 = vsel %vm407_vm1, %v343_v50, %v471_v2 }
  0x46   : > { %v565_v8 = vsel %vm437_vm2, %v373_v52, %v501_v3  ;;  %v567_v10 = vsel %vm439_vm3, %v375_v53, %v503_v5  ;;  %v474_v18 = vmul.f32 0.01, %v346_v9  ;;  %vm410_vm4 = vcmp.ge.f32.partialorder %v346_v9, 0.0 }
  0x47   : > { %vm412_vm5 = vcmp.ge.f32.partialorder %v348_v11, 0.0  ;;  %v476_v19 = vmul.f32 0.01, %v348_v11  ;;  %v506_v21 = vmul.f32 0.01, %v378_v14  ;;  %vm442_vm6 = vcmp.ge.f32.partialorder %v378_v14, 0.0 }
  0x48   : > { %vm444_vm7 = vcmp.ge.f32.partialorder %v380_v15, 0.0  ;;  %v508_v17 = vmul.f32 0.01, %v380_v15  ;;  %v345_v20 = vunpack.c.l.bf16 %v301_v61  ;;  %v347_v22 = vunpack.c.l.bf16 %v302_v62 }
  0x49   : > { %794 = vmatmul.mubr.bf16.gmra.mxu0 %v583_v31  ;;  %858 = vmatmul.mubr.bf16.gmra.mxu1 %v599_v35  ;;  %v587_v25 = vpack.c.bf16 %v535_v16, %v533_v13  ;;  %v538_v26 = vsel %vm410_vm4, %v346_v9, %v474_v18  ;;  %v540_v27 = vsel %vm412_vm5, %v348_v11, %v476_v19  ;;  %v377_v28 = vunpack.c.l.bf16 %v317_v63  ;;  %v1497_v13 = vld [vmem:[%s1644_s2] ss:$0 sm:$0xff] }
  0x4a   : > { %1139 = vmatprep.mubr.msk.bf16.mxu0 %vm688_vm0, %v586_v36  ;;  %1147 = vmatprep.mubr.msk.bf16.mxu1 %vm688_vm0, %v602_v37  ;;  %v603_v29 = vpack.c.bf16 %v567_v10, %v565_v8  ;;  %v570_v30 = vsel %vm442_vm6, %v378_v14, %v506_v21  ;;  %v572_v31 = vsel %vm444_vm7, %v380_v15, %v508_v17  ;;  %v379_v32 = vunpack.c.l.bf16 %v318_v4  ;;  %v320_v36 = vld [vmem:[%s1295_s29 + $0xf8] sm:$0xff]  ;;  %v898_v15 = vld [vmem:[%s1492_s21] sm:$0xff] }
  0x4b   : > { %vm409_vm8 = vcmp.ge.f32.partialorder %v345_v20, 0.0  ;;  %v473_v33 = vmul.f32 0.01, %v345_v20  ;;  %v350_v34 = vunpack.c.h.bf16 %v303_v23  ;;  %v352_v35 = vunpack.c.h.bf16 %v304_v24  ;;  %v914_v8 = vld [vmem:[%s1492_s21 + $0x80] sm:$0xff] }
  0x4c   : > { %v590_v37 = vpack.c.bf16 %v540_v27, %v538_v26  ;;  %vm411_vm9 = vcmp.ge.f32.partialorder %v347_v22, 0.0  ;;  %v475_v39 = vmul.f32 0.01, %v347_v22  ;;  %v382_v40 = vunpack.c.h.bf16 %v319_v1 }
  0x4d   : > { %v606_v44 = vpack.c.bf16 %v572_v31, %v570_v30  ;;  %vm441_vm10 = vcmp.ge.f32.partialorder %v377_v28, 0.0  ;;  %v505_v45 = vmul.f32 0.01, %v377_v28  ;;  %v507_v46 = vmul.f32 0.01, %v379_v32 }
  0x4e   : > { %vm443_vm11 = vcmp.ge.f32.partialorder %v379_v32, 0.0  ;;  %v478_v47 = vmul.f32 0.01, %v350_v34  ;;  %v480_v48 = vmul.f32 0.01, %v352_v35  ;;  %v384_v51 = vunpack.c.h.bf16 %v320_v36 }
  0x4f   : > { %vm414_vm12 = vcmp.ge.f32.partialorder %v350_v34, 0.0  ;;  %vm416_vm13 = vcmp.ge.f32.partialorder %v352_v35, 0.0  ;;  %v510_v38 = vmul.f32 0.01, %v382_v40  ;;  %v537_v41 = vsel %vm409_vm8, %v345_v20, %v473_v33 }
  0x50   : > { %vm446_vm14 = vcmp.ge.f32.partialorder %v382_v40, 0.0  ;;  %vm448_vm15 = vcmp.ge.f32.partialorder %v384_v51, 0.0  ;;  %v512_v49 = vmul.f32 0.01, %v384_v51  ;;  %v539_v42 = vsel %vm411_vm9, %v347_v22, %v475_v39 }
  0x51   : > { %802 = vmatmul.mubr.bf16.gmra.mxu0 %v585_v43  ;;  %866 = vmatmul.mubr.bf16.gmra.mxu1 %v601_v6  ;;  %v569_v43 = vsel %vm441_vm10, %v377_v28, %v505_v45  ;;  %v571_v50 = vsel %vm443_vm11, %v379_v32, %v507_v46  ;;  %v349_v52 = vunpack.c.l.bf16 %v303_v23  ;;  %v542_v53 = vsel %vm414_vm12, %v350_v34, %v478_v47  ;;  %v899_v23 = vld [vmem:[%s1492_s21 + $0x8] sm:$0xff]  ;;  %v900_v32 = vld [vmem:[%s1492_s21 + $0x10] sm:$0xff]  ;;  %v901_v46 = vld [vmem:[%s1492_s21 + $0x18] sm:$0xff] }
  0x52   : > { %1140 = vmatprep.mubr.msk.bf16.mxu0 %vm688_vm0, %v588_v7  ;;  %1148 = vmatprep.mubr.msk.bf16.mxu1 %vm688_vm0, %v604_v12  ;;  %v544_v54 = vsel %vm416_vm13, %v352_v35, %v480_v48  ;;  %v351_v55 = vunpack.c.l.bf16 %v304_v24  ;;  %v381_v56 = vunpack.c.l.bf16 %v319_v1  ;;  %v574_v57 = vsel %vm446_vm14, %v382_v40, %v510_v38  ;;  %v916_v34 = vld [vmem:[%s1492_s21 + $0x90] sm:$0xff]  ;;  %v917_v48 = vld [vmem:[%s1492_s21 + $0x98] sm:$0xff] }
  0x53   : > { %v576_v58 = vsel %vm448_vm15, %v384_v51, %v512_v49  ;;  %v383_v59 = vunpack.c.l.bf16 %v320_v36  ;;  %v589_v60 = vpack.c.bf16 %v539_v42, %v537_v41  ;;  %v605_v61 = vpack.c.bf16 %v571_v50, %v569_v43 }
  0x54   : > { %v592_v62 = vpack.c.bf16 %v544_v54, %v542_v53  ;;  %vm413_vm1 = vcmp.ge.f32.partialorder %v349_v52, 0.0  ;;  %v477_v63 = vmul.f32 0.01, %v349_v52  ;;  %v608_v0 = vpack.c.bf16 %v576_v58, %v574_v57  ;;  %v918_v54 = vld [vmem:[%s1492_s21 + $0xa0] sm:$0xff] }
  0x55   : > { %v479_v2 = vmul.f32 0.01, %v351_v55  ;;  %v509_v3 = vmul.f32 0.01, %v381_v56  ;;  %v511_v4 = vmul.f32 0.01, %v383_v59 }
  0x56   : > { %vm415_vm2 = vcmp.ge.f32.partialorder %v351_v55, 0.0  ;;  %vm445_vm3 = vcmp.ge.f32.partialorder %v381_v56, 0.0  ;;  %vm447_vm4 = vcmp.ge.f32.partialorder %v383_v59, 0.0  ;;  %v541_v5 = vsel %vm413_vm1, %v349_v52, %v477_v63  ;;  %v902_v52 = vld [vmem:[%s1492_s21 + $0x20] sm:$0xff] }
  0x57   : > { %v543_v6 = vsel %vm415_vm2, %v351_v55, %v479_v2  ;;  %v573_v7 = vsel %vm445_vm3, %v381_v56, %v509_v3  ;;  %v575_v9 = vsel %vm447_vm4, %v383_v59, %v511_v4 }
  0x58   : > { %v591_v11 = vpack.c.bf16 %v543_v6, %v541_v5  ;;  %v607_v12 = vpack.c.bf16 %v575_v9, %v573_v7 }
  0x59   : > { %810 = vmatmul.mubr.bf16.gmra.mxu0 %v587_v25  ;;  %874 = vmatmul.mubr.bf16.gmra.mxu1 %v603_v29  ;;  %v915_v25 = vld [vmem:[%s1492_s21 + $0x88] sm:$0xff] }
  0x5a   : > { %1141 = vmatprep.mubr.msk.bf16.mxu0 %vm688_vm0, %v590_v37  ;;  %1149 = vmatprep.mubr.msk.bf16.mxu1 %vm688_vm0, %v606_v44 }
  0x61   : > { %818 = vmatmul.mubr.bf16.gmra.mxu0 %v589_v60  ;;  %882 = vmatmul.mubr.bf16.gmra.mxu1 %v605_v61 }
  0x62   : > { %1142 = vmatprep.mubr.msk.bf16.mxu0 %vm688_vm0, %v592_v62  ;;  %1150 = vmatprep.mubr.msk.bf16.mxu1 %vm688_vm0, %v608_v0  ;;  %v903_v62 = vld [vmem:[%s1492_s21 + $0x28] sm:$0xff] }
  0x63   : > { %v919_v0 = vld [vmem:[%s1492_s21 + $0xa8] sm:$0xff] }
  0x69   : > { %826 = vmatmul.mubr.bf16.gmra.mxu0 %v591_v11  ;;  %890 = vmatmul.mubr.bf16.gmra.mxu1 %v607_v12  ;;  %v904_v11 = vld [vmem:[%s1492_s21 + $0x30] sm:$0xff] }
  0xf1   : > { %v771_v14 = vpop.f32.mrf.mxu0  ;;  %v835_v16 = vpop.f32.mrf.mxu1 }
  0xf2   : > { %v772_v10 = vadd.f32 %v1497_v13, %v771_v14  ;;  %v836_v18 = vadd.f32 %v1497_v13, %v835_v16  ;;  %v920_v14 = vld [vmem:[%s1492_s21 + $0xb0] sm:$0xff] }
  0xf3   : > { %v773_v19 = vpop.f32.mrf.mxu0  ;;  %v837_v21 = vpop.f32.mrf.mxu1 }
  0xf4   : > { %v930_v17 = vadd.f32 %v898_v15, %v772_v10  ;;  %v946_v20 = vadd.f32 %v914_v8, %v836_v18 }
  0xf5   : > { %v774_v22 = vpop.f32.mrf.mxu0  ;;  %v838_v24 = vpop.f32.mrf.mxu1 }
  0xf6   : > { %962 = vst.msk [vmem:[%s1507_s27] sm:$0xff] %vm688_vm0, %v930_v17  ;;  %978 = vst.msk [vmem:[%s1507_s27 + $0x80] sm:$0xff] %vm688_vm0, %v946_v20  ;;  %v775_v26 = vadd.f32 %v1497_v13, %v774_v22  ;;  %v839_v27 = vadd.f32 %v1497_v13, %v838_v24  ;;  %v905_v17 = vld [vmem:[%s1492_s21 + $0x38] sm:$0xff] }
  0xf7   : > { %v776_v28 = vpop.f32.mrf.mxu0  ;;  %v840_v1 = vpop.f32.mrf.mxu1  ;;  %v921_v22 = vld [vmem:[%s1492_s21 + $0xb8] sm:$0xff] }
  0xf8   : > { %v931_v29 = vadd.f32 %v899_v23, %v775_v26  ;;  %v947_v30 = vadd.f32 %v915_v25, %v839_v27 }
  0xf9   : > { %v779_v31 = vpop.f32.mrf.mxu0  ;;  %v843_v33 = vpop.f32.mrf.mxu1 }
  0xfa   : > { %963 = vst.msk [vmem:[%s1507_s27 + $0x8] sm:$0xff] %vm688_vm0, %v931_v29  ;;  %979 = vst.msk [vmem:[%s1507_s27 + $0x88] sm:$0xff] %vm688_vm0, %v947_v30  ;;  %v780_v35 = vadd.f32 %v1497_v13, %v779_v31  ;;  %v844_v36 = vadd.f32 %v1497_v13, %v843_v33  ;;  %v906_v29 = vld [vmem:[%s1492_s21 + $0x40] sm:$0xff] }
  0xfb   : > { %v781_v37 = vpop.f32.mrf.mxu0  ;;  %v845_v39 = vpop.f32.mrf.mxu1  ;;  %v922_v31 = vld [vmem:[%s1492_s21 + $0xc0] sm:$0xff] }
  0xfc   : > { %v932_v40 = vadd.f32 %v900_v32, %v780_v35  ;;  %v948_v44 = vadd.f32 %v916_v34, %v844_v36 }
  0xfd   : > { %v782_v45 = vpop.f32.mrf.mxu0  ;;  %v846_v47 = vpop.f32.mrf.mxu1 }
  0xfe   : > { %964 = vst.msk [vmem:[%s1507_s27 + $0x10] sm:$0xff] %vm688_vm0, %v932_v40  ;;  %980 = vst.msk [vmem:[%s1507_s27 + $0x90] sm:$0xff] %vm688_vm0, %v948_v44  ;;  %v783_v51 = vadd.f32 %v1497_v13, %v782_v45  ;;  %v847_v38 = vadd.f32 %v1497_v13, %v846_v47  ;;  %v907_v40 = vld [vmem:[%s1492_s21 + $0x48] sm:$0xff] }
  0xff   : > { %v784_v41 = vpop.f32.mrf.mxu0  ;;  %v848_v49 = vpop.f32.mrf.mxu1  ;;  %v923_v45 = vld [vmem:[%s1492_s21 + $0xc8] sm:$0xff] }
 0x100   : > { %v933_v42 = vadd.f32 %v901_v46, %v783_v51  ;;  %v949_v43 = vadd.f32 %v917_v48, %v847_v38 }
 0x101   : > { %v787_v50 = vpop.f32.mrf.mxu0  ;;  %v851_v53 = vpop.f32.mrf.mxu1 }
 0x102   : > { %965 = vst.msk [vmem:[%s1507_s27 + $0x18] sm:$0xff] %vm688_vm0, %v933_v42  ;;  %981 = vst.msk [vmem:[%s1507_s27 + $0x98] sm:$0xff] %vm688_vm0, %v949_v43  ;;  %v788_v55 = vadd.f32 %v1497_v13, %v787_v50  ;;  %v852_v56 = vadd.f32 %v1497_v13, %v851_v53  ;;  %v908_v42 = vld [vmem:[%s1492_s21 + $0x50] sm:$0xff] }
 0x103   : > { %v789_v57 = vpop.f32.mrf.mxu0  ;;  %v853_v58 = vpop.f32.mrf.mxu1  ;;  %v924_v50 = vld [vmem:[%s1492_s21 + $0xd0] sm:$0xff] }
 0x104   : > { %v934_v59 = vadd.f32 %v902_v52, %v788_v55  ;;  %v950_v60 = vadd.f32 %v918_v54, %v852_v56 }
 0x105   : > { %v790_v61 = vpop.f32.mrf.mxu0  ;;  %v854_v63 = vpop.f32.mrf.mxu1 }
 0x106   : > { %966 = vst.msk [vmem:[%s1507_s27 + $0x20] sm:$0xff] %vm688_vm0, %v934_v59  ;;  %982 = vst.msk [vmem:[%s1507_s27 + $0xa0] sm:$0xff] %vm688_vm0, %v950_v60  ;;  %v791_v2 = vadd.f32 %v1497_v13, %v790_v61  ;;  %v855_v3 = vadd.f32 %v1497_v13, %v854_v63  ;;  %v909_v59 = vld [vmem:[%s1492_s21 + $0x58] sm:$0xff] }
 0x107   : > { %v792_v4 = vpop.f32.mrf.mxu0  ;;  %v856_v5 = vpop.f32.mrf.mxu1  ;;  %v925_v61 = vld [vmem:[%s1492_s21 + $0xd8] sm:$0xff] }
 0x108   : > { %v935_v6 = vadd.f32 %v903_v62, %v791_v2  ;;  %v951_v7 = vadd.f32 %v919_v0, %v855_v3 }
 0x109   : > { %v795_v9 = vpop.f32.mrf.mxu0  ;;  %v859_v12 = vpop.f32.mrf.mxu1 }
 0x10a   : > { %967 = vst.msk [vmem:[%s1507_s27 + $0x28] sm:$0xff] %vm688_vm0, %v935_v6  ;;  %983 = vst.msk [vmem:[%s1507_s27 + $0xa8] sm:$0xff] %vm688_vm0, %v951_v7  ;;  %v796_v15 = vadd.f32 %v1497_v13, %v795_v9  ;;  %v860_v16 = vadd.f32 %v1497_v13, %v859_v12  ;;  %v910_v6 = vld [vmem:[%s1492_s21 + $0x60] sm:$0xff] }
 0x10b   : > { %v797_v8 = vpop.f32.mrf.mxu0  ;;  %v861_v10 = vpop.f32.mrf.mxu1  ;;  %v926_v9 = vld [vmem:[%s1492_s21 + $0xe0] sm:$0xff] }
 0x10c   : > { %v936_v18 = vadd.f32 %v904_v11, %v796_v15  ;;  %v952_v19 = vadd.f32 %v920_v14, %v860_v16 }
 0x10d   : > { %v798_v21 = vpop.f32.mrf.mxu0  ;;  %v862_v20 = vpop.f32.mrf.mxu1 }
 0x10e   : > { %968 = vst.msk [vmem:[%s1507_s27 + $0x30] sm:$0xff] %vm688_vm0, %v936_v18  ;;  %984 = vst.msk [vmem:[%s1507_s27 + $0xb0] sm:$0xff] %vm688_vm0, %v952_v19  ;;  %v799_v23 = vadd.f32 %v1497_v13, %v798_v21  ;;  %v863_v24 = vadd.f32 %v1497_v13, %v862_v20  ;;  %v911_v18 = vld [vmem:[%s1492_s21 + $0x68] sm:$0xff] }
 0x10f   : > { %v800_v25 = vpop.f32.mrf.mxu0  ;;  %v864_v26 = vpop.f32.mrf.mxu1  ;;  %v927_v21 = vld [vmem:[%s1492_s21 + $0xe8] sm:$0xff] }
 0x110   : > { %v937_v27 = vadd.f32 %v905_v17, %v799_v23  ;;  %v953_v28 = vadd.f32 %v921_v22, %v863_v24 }
 0x111   : > { %v803_v1 = vpop.f32.mrf.mxu0  ;;  %v867_v30 = vpop.f32.mrf.mxu1 }
 0x112   : > { %969 = vst.msk [vmem:[%s1507_s27 + $0x38] sm:$0xff] %vm688_vm0, %v937_v27  ;;  %985 = vst.msk [vmem:[%s1507_s27 + $0xb8] sm:$0xff] %vm688_vm0, %v953_v28  ;;  %v804_v32 = vadd.f32 %v1497_v13, %v803_v1  ;;  %v868_v33 = vadd.f32 %v1497_v13, %v867_v30  ;;  %v912_v27 = vld [vmem:[%s1492_s21 + $0x70] sm:$0xff] }
 0x113   : > { %v805_v34 = vpop.f32.mrf.mxu0  ;;  %v869_v35 = vpop.f32.mrf.mxu1  ;;  %v928_v1 = vld [vmem:[%s1492_s21 + $0xf0] sm:$0xff] }
 0x114   : > { %v938_v36 = vadd.f32 %v906_v29, %v804_v32  ;;  %v954_v37 = vadd.f32 %v922_v31, %v868_v33 }
 0x115   : > { %v806_v39 = vpop.f32.mrf.mxu0  ;;  %v870_v44 = vpop.f32.mrf.mxu1 }
 0x116   : > { %970 = vst.msk [vmem:[%s1507_s27 + $0x40] sm:$0xff] %vm688_vm0, %v938_v36  ;;  %986 = vst.msk [vmem:[%s1507_s27 + $0xc0] sm:$0xff] %vm688_vm0, %v954_v37  ;;  %v807_v46 = vadd.f32 %v1497_v13, %v806_v39  ;;  %v871_v47 = vadd.f32 %v1497_v13, %v870_v44  ;;  %v913_v36 = vld [vmem:[%s1492_s21 + $0x78] sm:$0xff] }
 0x117   : > { %v808_v48 = vpop.f32.mrf.mxu0  ;;  %v872_v51 = vpop.f32.mrf.mxu1  ;;  %v929_v39 = vld [vmem:[%s1492_s21 + $0xf8] sm:$0xff] }
 0x118   : > { %v939_v38 = vadd.f32 %v907_v40, %v807_v46  ;;  %v955_v41 = vadd.f32 %v923_v45, %v871_v47 }
 0x119   : > { %v811_v49 = vpop.f32.mrf.mxu0  ;;  %v875_v43 = vpop.f32.mrf.mxu1 }
 0x11a   : > { %971 = vst.msk [vmem:[%s1507_s27 + $0x48] sm:$0xff] %vm688_vm0, %v939_v38  ;;  %987 = vst.msk [vmem:[%s1507_s27 + $0xc8] sm:$0xff] %vm688_vm0, %v955_v41  ;;  %v812_v52 = vadd.f32 %v1497_v13, %v811_v49  ;;  %v876_v53 = vadd.f32 %v1497_v13, %v875_v43 }
 0x11b   : > { %v813_v54 = vpop.f32.mrf.mxu0  ;;  %v877_v55 = vpop.f32.mrf.mxu1 }
 0x11c   : > { %v940_v56 = vadd.f32 %v908_v42, %v812_v52  ;;  %v956_v57 = vadd.f32 %v924_v50, %v876_v53 }
 0x11d   : > { %v814_v58 = vpop.f32.mrf.mxu0  ;;  %v878_v60 = vpop.f32.mrf.mxu1 }
 0x11e   : > { %972 = vst.msk [vmem:[%s1507_s27 + $0x50] sm:$0xff] %vm688_vm0, %v940_v56  ;;  %988 = vst.msk [vmem:[%s1507_s27 + $0xd0] sm:$0xff] %vm688_vm0, %v956_v57  ;;  %v815_v62 = vadd.f32 %v1497_v13, %v814_v58  ;;  %v879_v63 = vadd.f32 %v1497_v13, %v878_v60 }
 0x11f   : > { %v816_v0 = vpop.f32.mrf.mxu0  ;;  %v880_v2 = vpop.f32.mrf.mxu1 }
 0x120   : > { %v941_v3 = vadd.f32 %v909_v59, %v815_v62  ;;  %v957_v4 = vadd.f32 %v925_v61, %v879_v63 }
 0x121   : > { %v819_v5 = vpop.f32.mrf.mxu0  ;;  %v883_v7 = vpop.f32.mrf.mxu1 }
 0x122   : > { %973 = vst.msk [vmem:[%s1507_s27 + $0x58] sm:$0xff] %vm688_vm0, %v941_v3  ;;  %989 = vst.msk [vmem:[%s1507_s27 + $0xd8] sm:$0xff] %vm688_vm0, %v957_v4  ;;  %v820_v11 = vadd.f32 %v1497_v13, %v819_v5  ;;  %v884_v12 = vadd.f32 %v1497_v13, %v883_v7 }
 0x123   : > { %v821_v14 = vpop.f32.mrf.mxu0  ;;  %v885_v15 = vpop.f32.mrf.mxu1 }
 0x124   : > { %v942_v16 = vadd.f32 %v910_v6, %v820_v11  ;;  %v958_v8 = vadd.f32 %v926_v9, %v884_v12 }
 0x125   : > { %v822_v10 = vpop.f32.mrf.mxu0  ;;  %v886_v19 = vpop.f32.mrf.mxu1 }
 0x126   : > { %974 = vst.msk [vmem:[%s1507_s27 + $0x60] sm:$0xff] %vm688_vm0, %v942_v16  ;;  %990 = vst.msk [vmem:[%s1507_s27 + $0xe0] sm:$0xff] %vm688_vm0, %v958_v8  ;;  %v823_v17 = vadd.f32 %v1497_v13, %v822_v10  ;;  %v887_v20 = vadd.f32 %v1497_v13, %v886_v19 }
 0x127   : > { %v824_v22 = vpop.f32.mrf.mxu0  ;;  %v888_v23 = vpop.f32.mrf.mxu1 }
 0x128   : > { %v943_v24 = vadd.f32 %v911_v18, %v823_v17  ;;  %v959_v25 = vadd.f32 %v927_v21, %v887_v20 }
 0x129   : > { %v827_v26 = vpop.f32.mrf.mxu0  ;;  %v891_v28 = vpop.f32.mrf.mxu1 }
 0x12a   : > { %975 = vst.msk [vmem:[%s1507_s27 + $0x68] sm:$0xff] %vm688_vm0, %v943_v24  ;;  %991 = vst.msk [vmem:[%s1507_s27 + $0xe8] sm:$0xff] %vm688_vm0, %v959_v25  ;;  %v828_v29 = vadd.f32 %v1497_v13, %v827_v26  ;;  %v892_v30 = vadd.f32 %v1497_v13, %v891_v28 }
 0x12b   : > { %v829_v31 = vpop.f32.mrf.mxu0  ;;  %v893_v32 = vpop.f32.mrf.mxu1 }
 0x12c   : > { %v944_v33 = vadd.f32 %v912_v27, %v828_v29  ;;  %v960_v34 = vadd.f32 %v928_v1, %v892_v30 }
 0x12d   : > { %v830_v35 = vpop.f32.mrf.mxu0  ;;  %v894_v37 = vpop.f32.mrf.mxu1 }
 0x12e   : > { %976 = vst.msk [vmem:[%s1507_s27 + $0x70] sm:$0xff] %vm688_vm0, %v944_v33  ;;  %992 = vst.msk [vmem:[%s1507_s27 + $0xf0] sm:$0xff] %vm688_vm0, %v960_v34  ;;  %v831_v40 = vadd.f32 %v1497_v13, %v830_v35  ;;  %v895_v44 = vadd.f32 %v1497_v13, %v894_v37 }
 0x12f   : > { %v832_v45 = vpop.f32.mrf.mxu0  ;;  %v896_v46 = vpop.f32.mrf.mxu1 }
 0x130   : > { %v945_v47 = vadd.f32 %v913_v36, %v831_v40  ;;  %v961_v48 = vadd.f32 %v929_v39, %v895_v44 }
 0x132   : > { %977 = vst.msk [vmem:[%s1507_s27 + $0x78] sm:$0xff] %vm688_vm0, %v945_v47  ;;  %993 = vst.msk [vmem:[%s1507_s27 + $0xf8] sm:$0xff] %vm688_vm0, %v961_v48 }
 0x133 PF: > { %s14_s17 = sadd.s32 1, %s1228_s17   ;;  %s1647_s15 = smov %s1224_s16 }
 0x134   : > { %p11_p5 = scmp.ge.s32.totalorder %s14_s17, 4   ;;  %s1648_s16 = smov %s1650_s18 }
 0x136   :  { %13 = sbr.rel (!%p11_p5) target bundleno = 2 (0x2), region = 75 }

// kernel: _lambda_.93
= control target key start
LH: loop header
LB: loop body
LE: loop exit
PB: predicated region body
PF: predicated region fallthrough
CT: control target
= control target key end

     0   :  { %v411_v0 = vmov 0   ;;  %vm182_vm0 = vcmask 130048   ;;  %vm304_vm1 = vcmask 261120   ;;  %s582_s1 = inlined_call_operand.vmem [shape: bf16[144,32], index: 1, kind: input, shape index: {}]   ;;  %s583_s0 = inlined_call_operand.vmem [shape: bf16[128,144], index: 0, kind: input, shape index: {}]   ;;  %s584_s2 = inlined_call_operand.vmem [shape: f32[1,32], index: 2, kind: input, shape index: {}]   ;;  %s585_s3 = inlined_call_operand.vmem [shape: f32[128,32], index: 3, kind: output, shape index: {}]  }
   0x1   :  { %207 = vmatprep.subr.bf16.mxu0 %v411_v0  ;;  %359 = vmatprep.subr.bf16.mxu1 %v411_v0  ;;  %v378_v1 = vld [vmem:[%s582_s1 + $0x38] sm:$0xff]   ;;  %v379_v2 = vld [vmem:[%s582_s1 + $0x30] sm:$0xff]   ;;  %v380_v3 = vld [vmem:[%s582_s1 + $0x28] sm:$0xff]  }
   0x2   :  { %208 = vmatpush1.bf16.msra.mxu0 %v378_v1  ;;  %368 = vmatpush1.bf16.msra.mxu1 %v378_v1  ;;  %v381_v4 = vld [vmem:[%s582_s1 + $0x20] sm:$0xff]   ;;  %v382_v7 = vld [vmem:[%s582_s1 + $0x18] sm:$0xff]   ;;  %v383_v8 = vld [vmem:[%s582_s1 + $0x10] sm:$0xff]  }
   0x3   :  { %209 = vmatprep.subr.bf16.mxu0 %v411_v0  ;;  %360 = vmatprep.subr.bf16.mxu1 %v411_v0  ;;  %v389_v5 = vld [vmem:[%s583_s0 + $0x4] ss:$8 sps:$4 sm:$0xff]   ;;  %v387_v12 = vld [vmem:[%s583_s0] ss:$8 sps:$4 sm:$0xff]   ;;  %v393_v14 = vld [vmem:[%s583_s0 + $0x14] ss:$8 sps:$4 sm:$0xff]  }
   0x4   :  { %v392_v6 = vld [vmem:[%s583_s0 + $0x44] ss:$8 sps:$4 sm:$0xff]   ;;  %351 = vmatprep.mubr.msk.bf16.mxu0 %vm182_vm0, %v389_v5  ;;  %v390_v13 = vld [vmem:[%s583_s0 + $0x40] ss:$8 sps:$4 sm:$0xff]   ;;  %v395_v15 = vld [vmem:[%s583_s0 + $0x54] ss:$8 sps:$4 sm:$0xff]  }
   0x5   :  { %355 = vmatprep.mubr.msk.bf16.mxu1 %vm182_vm0, %v392_v6  ;;  %v384_v9 = vld [vmem:[%s582_s1 + $0x8] sm:$0xff]   ;;  %v385_v10 = vld [vmem:[%s582_s1] sm:$0xff]   ;;  %v397_v16 = vld [vmem:[%s583_s0 + $0x10] ss:$8 sps:$4 sm:$0xff]  }
   0x6   :  { %210 = vmatpush1.bf16.msra.mxu0 %v379_v2  ;;  %369 = vmatpush1.bf16.msra.mxu1 %v379_v2  ;;  %v386_v11 = vld [vmem:[%s582_s1 + $0x40] sm:$0xff]   ;;  %v398_v17 = vld [vmem:[%s583_s0 + $0x50] ss:$8 sps:$4 sm:$0xff]   ;;  %v405_v22 = vld [vmem:[%s583_s0 + $0x34] ss:$8 sps:$4 sm:$0xff]  }
   0x7   :  { %211 = vmatprep.subr.bf16.mxu0 %v411_v0  ;;  %361 = vmatprep.subr.bf16.mxu1 %v411_v0  ;;  %v399_v18 = vld [vmem:[%s583_s0 + $0x24] ss:$8 sps:$4 sm:$0xff]   ;;  %v403_v20 = vld [vmem:[%s583_s0 + $0x20] ss:$8 sps:$4 sm:$0xff]   ;;  %v407_v23 = vld [vmem:[%s583_s0 + $0x74] ss:$8 sps:$4 sm:$0xff]  }
   0x8   :  { %v401_v19 = vld [vmem:[%s583_s0 + $0x64] ss:$8 sps:$4 sm:$0xff]   ;;  %v404_v21 = vld [vmem:[%s583_s0 + $0x60] ss:$8 sps:$4 sm:$0xff]   ;;  %v409_v24 = vld [vmem:[%s583_s0 + $0x30] ss:$8 sps:$4 sm:$0xff]  }
   0x9   :  { %v410_v25 = vld [vmem:[%s583_s0 + $0x70] ss:$8 sps:$4 sm:$0xff]   ;;  %v325_v26 = vld [vmem:[%s584_s2] ss:$0 sm:$0xff] }
   0xa   :  { %212 = vmatpush1.bf16.msra.mxu0 %v380_v3  ;;  %370 = vmatpush1.bf16.msra.mxu1 %v380_v3 }
   0xb   :  { %213 = vmatprep.subr.bf16.mxu0 %v411_v0  ;;  %362 = vmatprep.subr.bf16.mxu1 %v411_v0 }
   0xe   :  { %214 = vmatpush1.bf16.msra.mxu0 %v381_v4  ;;  %371 = vmatpush1.bf16.msra.mxu1 %v381_v4 }
   0xf   :  { %215 = vmatprep.subr.bf16.mxu0 %v411_v0  ;;  %363 = vmatprep.subr.bf16.mxu1 %v411_v0 }
  0x12   :  { %216 = vmatpush1.bf16.msra.mxu0 %v382_v7  ;;  %372 = vmatpush1.bf16.msra.mxu1 %v382_v7 }
  0x13   :  { %217 = vmatprep.subr.bf16.mxu0 %v411_v0  ;;  %364 = vmatprep.subr.bf16.mxu1 %v411_v0 }
  0x16   :  { %218 = vmatpush1.bf16.msra.mxu0 %v383_v8  ;;  %373 = vmatpush1.bf16.msra.mxu1 %v383_v8 }
  0x17   :  { %219 = vmatprep.subr.bf16.mxu0 %v411_v0  ;;  %365 = vmatprep.subr.bf16.mxu1 %v411_v0 }
  0x1a   :  { %220 = vmatpush1.bf16.msra.mxu0 %v384_v9  ;;  %374 = vmatpush1.bf16.msra.mxu1 %v384_v9 }
  0x1b   :  { %221 = vmatprep.subr.bf16.mxu0 %v411_v0  ;;  %366 = vmatprep.subr.bf16.mxu1 %v411_v0 }
  0x1e   :  { %222 = vmatpush1.bf16.msra.mxu0 %v385_v10  ;;  %375 = vmatpush1.bf16.msra.mxu1 %v385_v10 }
  0x1f   :  { %237 = vmatprep.subr.bf16.mxu0 %v411_v0  ;;  %367 = vmatprep.subr.bf16.mxu1 %v411_v0 }
  0x22   :  { %238 = vmatpush2.bf16.msra.mxu0 %v386_v11  ;;  %376 = vmatpush2.bf16.msra.mxu1 %v386_v11 }
  0x25   :  { %240 = vmatmul.mubr.bf16.vlgmr.msra.gmra.mxu0 %v387_v12  ;;  %272 = vmatmul.mubr.bf16.vlgmr.msra.gmra.mxu1 %v390_v13 }
  0x26   :  { %352 = vmatprep.mubr.msk.bf16.mxu0 %vm182_vm0, %v393_v14  ;;  %356 = vmatprep.mubr.msk.bf16.mxu1 %vm182_vm0, %v395_v15 }
  0x2d   :  { %248 = vmatmul.mubr.bf16.gmra.mxu0 %v397_v16  ;;  %280 = vmatmul.mubr.bf16.gmra.mxu1 %v398_v17 }
  0x2e   :  { %353 = vmatprep.mubr.msk.bf16.mxu0 %vm182_vm0, %v399_v18  ;;  %357 = vmatprep.mubr.msk.bf16.mxu1 %vm182_vm0, %v401_v19 }
  0x35   :  { %256 = vmatmul.mubr.bf16.gmra.mxu0 %v403_v20  ;;  %288 = vmatmul.mubr.bf16.gmra.mxu1 %v404_v21 }
  0x36   :  { %354 = vmatprep.mubr.msk.bf16.mxu0 %vm182_vm0, %v405_v22  ;;  %358 = vmatprep.mubr.msk.bf16.mxu1 %vm182_vm0, %v407_v23 }
  0x3d   :  { %264 = vmatmul.mubr.bf16.gmra.mxu0 %v409_v24  ;;  %296 = vmatmul.mubr.bf16.gmra.mxu1 %v410_v25 }
  0xe5   :  { %v241_v27 = vpop.f32.mrf.mxu0  ;;  %v273_v28 = vpop.f32.mrf.mxu1 }
  0xe6   :  { %v242_v29 = vadd.f32 %v325_v26, %v241_v27  ;;  %v274_v30 = vadd.f32 %v325_v26, %v273_v28 }
  0xe7   :  { %v243_v31 = vpop.f32.mrf.mxu0  ;;  %v275_v32 = vpop.f32.mrf.mxu1 }
  0xe8   :  { %305 = vst.msk [vmem:[%s585_s3] sm:$0xff] %vm304_vm1, %v242_v29  ;;  %313 = vst.msk [vmem:[%s585_s3 + $0x40] sm:$0xff] %vm304_vm1, %v274_v30 }
  0xe9   :  { %v244_v33 = vpop.f32.mrf.mxu0  ;;  %v276_v34 = vpop.f32.mrf.mxu1 }
  0xea   :  { %v245_v35 = vadd.f32 %v325_v26, %v244_v33  ;;  %v277_v36 = vadd.f32 %v325_v26, %v276_v34 }
  0xeb   :  { %v246_v37 = vpop.f32.mrf.mxu0  ;;  %v278_v38 = vpop.f32.mrf.mxu1 }
  0xec   :  { %306 = vst.msk [vmem:[%s585_s3 + $0x8] sm:$0xff] %vm304_vm1, %v245_v35  ;;  %314 = vst.msk [vmem:[%s585_s3 + $0x48] sm:$0xff] %vm304_vm1, %v277_v36 }
  0xed   :  { %v249_v39 = vpop.f32.mrf.mxu0  ;;  %v281_v40 = vpop.f32.mrf.mxu1 }
  0xee   :  { %v250_v41 = vadd.f32 %v325_v26, %v249_v39  ;;  %v282_v42 = vadd.f32 %v325_v26, %v281_v40 }
  0xef   :  { %v251_v43 = vpop.f32.mrf.mxu0  ;;  %v283_v44 = vpop.f32.mrf.mxu1 }
  0xf0   :  { %307 = vst.msk [vmem:[%s585_s3 + $0x10] sm:$0xff] %vm304_vm1, %v250_v41  ;;  %315 = vst.msk [vmem:[%s585_s3 + $0x50] sm:$0xff] %vm304_vm1, %v282_v42 }
  0xf1   :  { %v252_v45 = vpop.f32.mrf.mxu0  ;;  %v284_v46 = vpop.f32.mrf.mxu1 }
  0xf2   :  { %v253_v47 = vadd.f32 %v325_v26, %v252_v45  ;;  %v285_v48 = vadd.f32 %v325_v26, %v284_v46 }
  0xf3   :  { %v254_v49 = vpop.f32.mrf.mxu0  ;;  %v286_v50 = vpop.f32.mrf.mxu1 }
  0xf4   :  { %308 = vst.msk [vmem:[%s585_s3 + $0x18] sm:$0xff] %vm304_vm1, %v253_v47  ;;  %316 = vst.msk [vmem:[%s585_s3 + $0x58] sm:$0xff] %vm304_vm1, %v285_v48 }
  0xf5   :  { %v257_v51 = vpop.f32.mrf.mxu0  ;;  %v289_v52 = vpop.f32.mrf.mxu1 }
  0xf6   :  { %v258_v53 = vadd.f32 %v325_v26, %v257_v51  ;;  %v290_v54 = vadd.f32 %v325_v26, %v289_v52 }
  0xf7   :  { %v259_v55 = vpop.f32.mrf.mxu0  ;;  %v291_v56 = vpop.f32.mrf.mxu1 }
  0xf8   :  { %309 = vst.msk [vmem:[%s585_s3 + $0x20] sm:$0xff] %vm304_vm1, %v258_v53  ;;  %317 = vst.msk [vmem:[%s585_s3 + $0x60] sm:$0xff] %vm304_vm1, %v290_v54 }
  0xf9   :  { %v260_v57 = vpop.f32.mrf.mxu0  ;;  %v292_v58 = vpop.f32.mrf.mxu1 }
  0xfa   :  { %v261_v59 = vadd.f32 %v325_v26, %v260_v57  ;;  %v293_v60 = vadd.f32 %v325_v26, %v292_v58 }
  0xfb   :  { %v262_v61 = vpop.f32.mrf.mxu0  ;;  %v294_v62 = vpop.f32.mrf.mxu1 }
  0xfc   :  { %310 = vst.msk [vmem:[%s585_s3 + $0x28] sm:$0xff] %vm304_vm1, %v261_v59  ;;  %318 = vst.msk [vmem:[%s585_s3 + $0x68] sm:$0xff] %vm304_vm1, %v293_v60 }
  0xfd   :  { %v265_v63 = vpop.f32.mrf.mxu0  ;;  %v297_v0 = vpop.f32.mrf.mxu1 }
  0xfe   :  { %v266_v1 = vadd.f32 %v325_v26, %v265_v63  ;;  %v298_v2 = vadd.f32 %v325_v26, %v297_v0 }
  0xff   :  { %v267_v3 = vpop.f32.mrf.mxu0  ;;  %v299_v4 = vpop.f32.mrf.mxu1 }
 0x100   :  { %311 = vst.msk [vmem:[%s585_s3 + $0x30] sm:$0xff] %vm304_vm1, %v266_v1  ;;  %319 = vst.msk [vmem:[%s585_s3 + $0x70] sm:$0xff] %vm304_vm1, %v298_v2 }
 0x101   :  { %v268_v5 = vpop.f32.mrf.mxu0  ;;  %v300_v6 = vpop.f32.mrf.mxu1 }
 0x102   :  { %v269_v7 = vadd.f32 %v325_v26, %v268_v5  ;;  %v301_v8 = vadd.f32 %v325_v26, %v300_v6 }
 0x103   :  { %v270_v9 = vpop.f32.mrf.mxu0  ;;  %v302_v10 = vpop.f32.mrf.mxu1 }
 0x104   :  { %312 = vst.msk [vmem:[%s585_s3 + $0x38] sm:$0xff] %vm304_vm1, %v269_v7  ;;  %320 = vst.msk [vmem:[%s585_s3 + $0x78] sm:$0xff] %vm304_vm1, %v301_v8 }

// kernel: _lambda_.94
= control target key start
LH: loop header
LB: loop body
LE: loop exit
PB: predicated region body
PF: predicated region fallthrough
CT: control target
= control target key end

     0   :  { %vm417_vm15 = vcmask 261120   ;;  %s1163_s1 = inlined_call_operand.vmem [shape: bf16[288,32], index: 1, kind: input, shape index: {}]   ;;  %s1164_s0 = inlined_call_operand.vmem [shape: bf16[128,288], index: 0, kind: input, shape index: {}]   ;;  %s1165_s2 = inlined_call_operand.vmem [shape: f32[1,32], index: 2, kind: input, shape index: {}]   ;;  %s1166_s3 = inlined_call_operand.vmem [shape: f32[128,32], index: 3, kind: input, shape index: {}]   ;;  %s1167_s4 = inlined_call_operand.vmem [shape: f32[128,32], index: 4, kind: output, shape index: {}]  }
   0x1   :  { %v825_v0 = vld [vmem:[%s1163_s1 + $0x78] sm:$0xff]   ;;  %v827_v2 = vld [vmem:[%s1163_s1 + $0x70] sm:$0xff]   ;;  %v829_v4 = vld [vmem:[%s1163_s1 + $0x68] sm:$0xff]  }
   0x2   :  { %v826_v1 = vld [vmem:[%s1163_s1 + $0x38] sm:$0xff]   ;;  %715 = vmatprep.subr.bf16.mxu0 %v825_v0  ;;  %809 = vmatprep.subr.bf16.mxu1 %v825_v0  ;;  %v828_v3 = vld [vmem:[%s1163_s1 + $0x30] sm:$0xff]   ;;  %v830_v5 = vld [vmem:[%s1163_s1 + $0x28] sm:$0xff]  }
   0x3   :  { %716 = vmatpush3.bf16.msra.mxu0 %v826_v1  ;;  %817 = vmatpush3.bf16.msra.mxu1 %v826_v1  ;;  %v831_v6 = vld [vmem:[%s1163_s1 + $0x60] sm:$0xff]   ;;  %v833_v8 = vld [vmem:[%s1163_s1 + $0x58] sm:$0xff]   ;;  %v835_v10 = vld [vmem:[%s1163_s1 + $0x50] sm:$0xff]  }
   0x4   :  { %717 = vmatprep.subr.bf16.mxu0 %v827_v2  ;;  %810 = vmatprep.subr.bf16.mxu1 %v827_v2  ;;  %v832_v7 = vld [vmem:[%s1163_s1 + $0x20] sm:$0xff]   ;;  %v834_v9 = vld [vmem:[%s1163_s1 + $0x18] sm:$0xff]   ;;  %v20_v12 = vld [vmem:[%s1164_s0 + $0xc] sm:$0xff] }
   0x5   :  { %v18_v11 = vld [vmem:[%s1164_s0] sm:$0xff]  ;;  %v42_v13 = vld [vmem:[%s1164_s0 + $0x90] sm:$0xff]  ;;  %v53_v16 = vunpack.c.l.bf16 %v20_v12  ;;  %v54_v17 = vunpack.c.h.bf16 %v20_v12  ;;  %v837_v20 = vld [vmem:[%s1163_s1 + $0x48] sm:$0xff]  }
   0x6   :  { %v50_v14 = vunpack.c.l.bf16 %v18_v11  ;;  %v51_v15 = vunpack.c.h.bf16 %v18_v11  ;;  %v44_v18 = vld [vmem:[%s1164_s0 + $0x9c] sm:$0xff]  ;;  %v836_v19 = vld [vmem:[%s1163_s1 + $0x10] sm:$0xff]   ;;  %v86_v21 = vunpack.c.l.bf16 %v42_v13  ;;  %v87_v22 = vunpack.c.h.bf16 %v42_v13  ;;  %v24_v32 = vld [vmem:[%s1164_s0 + $0x24] sm:$0xff] }
   0x7   :  { %718 = vmatpush3.bf16.msra.mxu0 %v828_v3  ;;  %818 = vmatpush3.bf16.msra.mxu1 %v828_v3  ;;  %v89_v23 = vunpack.c.l.bf16 %v44_v18  ;;  %v90_v24 = vunpack.c.h.bf16 %v44_v18  ;;  %vm102_vm1 = vcmp.ge.f32.partialorder %v54_v17, 0.0  ;;  %v150_v26 = vmul.f32 0.01, %v54_v17  ;;  %v22_v31 = vld [vmem:[%s1164_s0 + $0x18] sm:$0xff]  ;;  %v46_v37 = vld [vmem:[%s1164_s0 + $0xa8] sm:$0xff]  ;;  %v839_v42 = vld [vmem:[%s1163_s1 + $0x40] sm:$0xff]  }
   0x8   :  { %719 = vmatprep.subr.bf16.mxu0 %v829_v4  ;;  %811 = vmatprep.subr.bf16.mxu1 %v829_v4  ;;  %vm99_vm0 = vcmp.ge.f32.partialorder %v51_v15, 0.0  ;;  %v147_v25 = vmul.f32 0.01, %v51_v15  ;;  %vm135_vm2 = vcmp.ge.f32.partialorder %v87_v22, 0.0  ;;  %v183_v27 = vmul.f32 0.01, %v87_v22 }
   0x9   :  { %vm138_vm3 = vcmp.ge.f32.partialorder %v90_v24, 0.0  ;;  %v186_v28 = vmul.f32 0.01, %v90_v24  ;;  %v198_v30 = vsel %vm102_vm1, %v54_v17, %v150_v26  ;;  %vm98_vm4 = vcmp.ge.f32.partialorder %v50_v14, 0.0  ;;  %v48_v38 = vld [vmem:[%s1164_s0 + $0xb4] sm:$0xff]  ;;  %v838_v39 = vld [vmem:[%s1163_s1 + $0x8] sm:$0xff]  }
   0xa   :  { %v195_v29 = vsel %vm99_vm0, %v51_v15, %v147_v25  ;;  %vm101_vm5 = vcmp.ge.f32.partialorder %v53_v16, 0.0  ;;  %v231_v34 = vsel %vm135_vm2, %v87_v22, %v183_v27  ;;  %v146_v36 = vmul.f32 0.01, %v50_v14  ;;  %v840_v51 = vld [vmem:[%s1163_s1] sm:$0xff]   ;;  %v841_v56 = vld [vmem:[%s1163_s1 + $0x88] sm:$0xff]  }
   0xb   :  { %720 = vmatpush3.bf16.msra.mxu0 %v830_v5  ;;  %819 = vmatpush3.bf16.msra.mxu1 %v830_v5  ;;  %v243_v33 = vpack.c.bf16 %v198_v30, %v195_v29  ;;  %v234_v35 = vsel %vm138_vm3, %v90_v24, %v186_v28  ;;  %v149_v41 = vmul.f32 0.01, %v53_v16  ;;  %vm134_vm6 = vcmp.ge.f32.partialorder %v86_v21, 0.0  ;;  %v26_v5 = vld [vmem:[%s1164_s0 + $0x30] sm:$0xff]  ;;  %v842_v13 = vld [vmem:[%s1163_s1 + $0x80] sm:$0xff]  }
   0xc   :  { %721 = vmatprep.subr.bf16.mxu0 %v831_v6  ;;  %812 = vmatprep.subr.bf16.mxu1 %v831_v6  ;;  %v261_v40 = vpack.c.bf16 %v234_v35, %v231_v34  ;;  %vm137_vm7 = vcmp.ge.f32.partialorder %v89_v23, 0.0  ;;  %v194_v43 = vsel %vm98_vm4, %v50_v14, %v146_v36  ;;  %v182_v44 = vmul.f32 0.01, %v86_v21  ;;  %v28_v6 = vld [vmem:[%s1164_s0 + $0x3c] sm:$0xff]  ;;  %v30_v34 = vld [vmem:[%s1164_s0 + $0x48] sm:$0xff] }
   0xd   :  { %v185_v45 = vmul.f32 0.01, %v89_v23  ;;  %v57_v46 = vunpack.c.h.bf16 %v22_v31  ;;  %474 = vmatprep.mubr.bf16.mxu0 %v243_v33  ;;  %v197_v47 = vsel %vm101_vm5, %v53_v16, %v149_v41  ;;  %v60_v48 = vunpack.c.h.bf16 %v24_v32  ;;  %v23_v30 = vld [vmem:[%s1164_s0 + $0x20] ss:$12 sps:$4 sm:$0xff]  }
   0xe   :  { %522 = vmatprep.mubr.bf16.mxu1 %v261_v40  ;;  %v93_v49 = vunpack.c.h.bf16 %v46_v37  ;;  %v96_v50 = vunpack.c.h.bf16 %v48_v38  ;;  %v242_v52 = vpack.c.bf16 %v197_v47, %v194_v43  ;;  %v230_v53 = vsel %vm134_vm6, %v86_v21, %v182_v44 }
   0xf   :  { %722 = vmatpush3.bf16.msra.mxu0 %v832_v7  ;;  %820 = vmatpush3.bf16.msra.mxu1 %v832_v7  ;;  %v233_v54 = vsel %vm137_vm7, %v89_v23, %v185_v45  ;;  %vm105_vm8 = vcmp.ge.f32.partialorder %v57_v46, 0.0  ;;  %vm108_vm9 = vcmp.ge.f32.partialorder %v60_v48, 0.0  ;;  %v153_v57 = vmul.f32 0.01, %v57_v46  ;;  %v19_v7 = vld [vmem:[%s1164_s0 + $0x8] ss:$12 sps:$4 sm:$0xff]  }
  0x10   :  { %723 = vmatprep.subr.bf16.mxu0 %v833_v8  ;;  %813 = vmatprep.subr.bf16.mxu1 %v833_v8  ;;  %v260_v55 = vpack.c.bf16 %v233_v54, %v230_v53  ;;  %v156_v58 = vmul.f32 0.01, %v60_v48  ;;  %vm141_vm10 = vcmp.ge.f32.partialorder %v93_v49, 0.0  ;;  %vm144_vm11 = vcmp.ge.f32.partialorder %v96_v50, 0.0 }
  0x11   :  { %v189_v59 = vmul.f32 0.01, %v93_v49  ;;  %v192_v60 = vmul.f32 0.01, %v96_v50  ;;  %v201_v61 = vsel %vm105_vm8, %v57_v46, %v153_v57  ;;  %v56_v63 = vunpack.c.l.bf16 %v22_v31 }
  0x12   :  { %v204_v62 = vsel %vm108_vm9, %v60_v48, %v156_v58  ;;  %v59_v0 = vunpack.c.l.bf16 %v24_v32  ;;  %v92_v4 = vunpack.c.l.bf16 %v46_v37  ;;  %v95_v11 = vunpack.c.l.bf16 %v48_v38  ;;  %v32_v38 = vld [vmem:[%s1164_s0 + $0x54] sm:$0xff] }
  0x13   :  { %724 = vmatpush3.bf16.msra.mxu0 %v834_v9  ;;  %821 = vmatpush3.bf16.msra.mxu1 %v834_v9  ;;  %v246_v1 = vpack.c.bf16 %v204_v62, %v201_v61  ;;  %v237_v2 = vsel %vm141_vm10, %v93_v49, %v189_v59  ;;  %v240_v3 = vsel %vm144_vm11, %v96_v50, %v192_v60  ;;  %vm104_vm12 = vcmp.ge.f32.partialorder %v56_v63, 0.0  ;;  %v27_v49 = vld [vmem:[%s1164_s0 + $0x38] ss:$12 sps:$4 sm:$0xff]  }
  0x14   :  { %725 = vmatprep.subr.bf16.mxu0 %v835_v10  ;;  %814 = vmatprep.subr.bf16.mxu1 %v835_v10  ;;  %v264_v8 = vpack.c.bf16 %v240_v3, %v237_v2  ;;  %vm107_vm13 = vcmp.ge.f32.partialorder %v59_v0, 0.0  ;;  %v152_v9 = vmul.f32 0.01, %v56_v63  ;;  %v155_v10 = vmul.f32 0.01, %v59_v0  ;;  %v34_v2 = vld [vmem:[%s1164_s0 + $0x60] sm:$0xff] }
  0x15   :  { %vm140_vm14 = vcmp.ge.f32.partialorder %v92_v4, 0.0  ;;  %v188_v12 = vmul.f32 0.01, %v92_v4  ;;  %v63_v15 = vunpack.c.h.bf16 %v26_v5  ;;  %v66_v16 = vunpack.c.h.bf16 %v28_v6  ;;  %v36_v3 = vld [vmem:[%s1164_s0 + $0x6c] sm:$0xff] }
  0x16   :  { %v200_v14 = vsel %vm104_vm12, %v56_v63, %v152_v9  ;;  %v52_v17 = vunpack.c.l.bf16 %v19_v7  ;;  %v203_v18 = vsel %vm107_vm13, %v59_v0, %v155_v10  ;;  %vm143_vm0 = vcmp.ge.f32.partialorder %v95_v11, 0.0  ;;  %v31_v63 = vld [vmem:[%s1164_s0 + $0x50] ss:$12 sps:$4 sm:$0xff]  }
  0x17   :  { %726 = vmatpush3.bf16.msra.mxu0 %v836_v19  ;;  %822 = vmatpush3.bf16.msra.mxu1 %v836_v19  ;;  %v191_v19 = vmul.f32 0.01, %v95_v11  ;;  %v245_v21 = vpack.c.bf16 %v203_v18, %v200_v14  ;;  %vm111_vm1 = vcmp.ge.f32.partialorder %v63_v15, 0.0  ;;  %vm114_vm2 = vcmp.ge.f32.partialorder %v66_v16, 0.0  ;;  %v35_v14 = vld [vmem:[%s1164_s0 + $0x68] ss:$12 sps:$4 sm:$0xff]  }
  0x18   :  { %727 = vmatprep.subr.bf16.mxu0 %v837_v20  ;;  %815 = vmatprep.subr.bf16.mxu1 %v837_v20  ;;  %v236_v20 = vsel %vm140_vm14, %v92_v4, %v188_v12  ;;  %v159_v22 = vmul.f32 0.01, %v63_v15  ;;  %v162_v24 = vmul.f32 0.01, %v66_v16  ;;  %v55_v25 = vunpack.c.h.bf16 %v19_v7 }
  0x19   :  { %v239_v23 = vsel %vm143_vm0, %v95_v11, %v191_v19  ;;  %vm100_vm3 = vcmp.ge.f32.partialorder %v52_v17, 0.0  ;;  %v148_v28 = vmul.f32 0.01, %v52_v17  ;;  %v62_v29 = vunpack.c.l.bf16 %v26_v5 }
  0x1a   :  { %v263_v26 = vpack.c.bf16 %v239_v23, %v236_v20  ;;  %v207_v27 = vsel %vm111_vm1, %v63_v15, %v159_v22  ;;  %v210_v31 = vsel %vm114_vm2, %v66_v16, %v162_v24  ;;  %vm103_vm4 = vcmp.ge.f32.partialorder %v55_v25, 0.0 }
  0x1b   :  { %728 = vmatpush3.bf16.msra.mxu0 %v838_v39  ;;  %823 = vmatpush3.bf16.msra.mxu1 %v838_v39  ;;  %v151_v32 = vmul.f32 0.01, %v55_v25  ;;  %v65_v33 = vunpack.c.l.bf16 %v28_v6  ;;  %v249_v35 = vpack.c.bf16 %v210_v31, %v207_v27  ;;  %v196_v36 = vsel %vm100_vm3, %v52_v17, %v148_v28  ;;  %v39_v27 = vld [vmem:[%s1164_s0 + $0x80] ss:$12 sps:$4 sm:$0xff]   ;;  %v38_v31 = vld [vmem:[%s1164_s0 + $0x78] sm:$0xff] }
  0x1c   :  { %729 = vmatprep.subr.bf16.mxu0 %v839_v42  ;;  %816 = vmatprep.subr.bf16.mxu1 %v839_v42  ;;  %vm110_vm5 = vcmp.ge.f32.partialorder %v62_v29, 0.0  ;;  %v158_v37 = vmul.f32 0.01, %v62_v29  ;;  %v58_v41 = vunpack.c.l.bf16 %v23_v30  ;;  %v61_v44 = vunpack.c.h.bf16 %v23_v30 }
  0x1d   :  { %v199_v39 = vsel %vm103_vm4, %v55_v25, %v151_v32  ;;  %vm113_vm6 = vcmp.ge.f32.partialorder %v65_v33, 0.0  ;;  %v161_v40 = vmul.f32 0.01, %v65_v33  ;;  %v69_v45 = vunpack.c.h.bf16 %v30_v34 }
  0x1e   :  { %v244_v42 = vpack.c.bf16 %v199_v39, %v196_v36  ;;  %v206_v43 = vsel %vm110_vm5, %v62_v29, %v158_v37  ;;  %vm106_vm7 = vcmp.ge.f32.partialorder %v58_v41, 0.0  ;;  %v154_v47 = vmul.f32 0.01, %v58_v41 }
  0x1f   :  { %730 = vmatpush3.bf16.msra.mxu0 %v840_v51  ;;  %824 = vmatpush3.bf16.msra.mxu1 %v840_v51  ;;  %v209_v46 = vsel %vm113_vm6, %v65_v33, %v161_v40  ;;  %v72_v48 = vunpack.c.h.bf16 %v32_v38  ;;  %vm109_vm8 = vcmp.ge.f32.partialorder %v61_v44, 0.0  ;;  %v157_v51 = vmul.f32 0.01, %v61_v44 }
  0x20   :  { %789 = vmatprep.subr.bf16.mxu1 %v841_v56  ;;  %v248_v50 = vpack.c.bf16 %v209_v46, %v206_v43  ;;  %vm117_vm9 = vcmp.ge.f32.partialorder %v69_v45, 0.0  ;;  %v165_v53 = vmul.f32 0.01, %v69_v45  ;;  %v67_v57 = vunpack.c.h.bf16 %v27_v49  ;;  %v43_v46 = vld [vmem:[%s1164_s0 + $0x98] ss:$12 sps:$4 sm:$0xff]  }
  0x21   :  { %vm120_vm10 = vcmp.ge.f32.partialorder %v72_v48, 0.0  ;;  %v168_v54 = vmul.f32 0.01, %v72_v48  ;;  %v68_v58 = vunpack.c.l.bf16 %v30_v34  ;;  %v71_v62 = vunpack.c.l.bf16 %v32_v38 }
  0x22   :  { %475 = vmatmul.mubr.bf16.vlgmr.msra.gmra.mxu0 %v242_v52  ;;  %523 = vmatmul.mubr.bf16.vlgmr.msra.gmra.mxu1 %v260_v55  ;;  %v202_v52 = vsel %vm106_vm7, %v58_v41, %v154_v47  ;;  %v205_v55 = vsel %vm109_vm8, %v61_v44, %v157_v51  ;;  %v213_v60 = vsel %vm117_vm9, %v69_v45, %v165_v53  ;;  %vm115_vm12 = vcmp.ge.f32.partialorder %v67_v57, 0.0  ;;  %v40_v41 = vld [vmem:[%s1164_s0 + $0x84] sm:$0xff] }
  0x23   :  { %790 = vmatpush3.bf16.msra.mxu1 %v841_v56  ;;  %482 = vmatprep.mubr.bf16.mxu0 %v246_v1  ;;  %v64_v56 = vunpack.c.l.bf16 %v27_v49  ;;  %v247_v59 = vpack.c.bf16 %v205_v55, %v202_v52  ;;  %v216_v61 = vsel %vm120_vm10, %v72_v48, %v168_v54  ;;  %v163_v4 = vmul.f32 0.01, %v67_v57 }
  0x24   :  { %530 = vmatprep.mubr.bf16.mxu1 %v264_v8  ;;  %791 = vmatprep.subr.bf16.mxu1 %v842_v13  ;;  %v252_v0 = vpack.c.bf16 %v216_v61, %v213_v60  ;;  %vm116_vm13 = vcmp.ge.f32.partialorder %v68_v58, 0.0  ;;  %vm119_vm14 = vcmp.ge.f32.partialorder %v71_v62, 0.0  ;;  %v164_v5 = vmul.f32 0.01, %v68_v58 }
  0x25   :  { %vm112_vm11 = vcmp.ge.f32.partialorder %v64_v56, 0.0  ;;  %v160_v1 = vmul.f32 0.01, %v64_v56  ;;  %v167_v7 = vmul.f32 0.01, %v71_v62  ;;  %v70_v8 = vunpack.c.l.bf16 %v31_v63 }
  0x26   :  { %v73_v9 = vunpack.c.h.bf16 %v31_v63  ;;  %v211_v10 = vsel %vm115_vm12, %v67_v57, %v163_v4  ;;  %v212_v11 = vsel %vm116_vm13, %v68_v58, %v164_v5  ;;  %v75_v12 = vunpack.c.h.bf16 %v34_v2 }
  0x27   :  { %792 = vmatpush3.bf16.msra.mxu1 %v842_v13  ;;  %v208_v6 = vsel %vm112_vm11, %v64_v56, %v160_v1  ;;  %v78_v13 = vunpack.c.h.bf16 %v36_v3  ;;  %v215_v16 = vsel %vm119_vm14, %v71_v62, %v167_v7  ;;  %vm118_vm0 = vcmp.ge.f32.partialorder %v70_v8, 0.0  ;;  %v47_v56 = vld [vmem:[%s1164_s0 + $0xb0] ss:$12 sps:$4 sm:$0xff]  }
  0x28   :  { %v250_v15 = vpack.c.bf16 %v211_v10, %v208_v6  ;;  %vm121_vm1 = vcmp.ge.f32.partialorder %v73_v9, 0.0  ;;  %v251_v17 = vpack.c.bf16 %v215_v16, %v212_v11  ;;  %v166_v18 = vmul.f32 0.01, %v70_v8 }
  0x29   :  { %v169_v19 = vmul.f32 0.01, %v73_v9  ;;  %vm123_vm2 = vcmp.ge.f32.partialorder %v75_v12, 0.0  ;;  %vm126_vm3 = vcmp.ge.f32.partialorder %v78_v13, 0.0  ;;  %v171_v20 = vmul.f32 0.01, %v75_v12 }
  0x2a   :  { %483 = vmatmul.mubr.bf16.gmra.mxu0 %v245_v21  ;;  %531 = vmatmul.mubr.bf16.gmra.mxu1 %v263_v26  ;;  %v174_v21 = vmul.f32 0.01, %v78_v13  ;;  %v76_v22 = vunpack.c.l.bf16 %v35_v14  ;;  %v214_v23 = vsel %vm118_vm0, %v70_v8, %v166_v18  ;;  %v79_v25 = vunpack.c.h.bf16 %v35_v14 }
  0x2b   :  { %490 = vmatprep.mubr.bf16.mxu0 %v249_v35  ;;  %793 = vmatprep.mubr.msk.bf16.mxu1 %vm417_vm15, %v244_v42  ;;  %v217_v24 = vsel %vm121_vm1, %v73_v9, %v169_v19  ;;  %v74_v26 = vunpack.c.l.bf16 %v34_v2  ;;  %v219_v29 = vsel %vm123_vm2, %v75_v12, %v171_v20  ;;  %v77_v35 = vunpack.c.l.bf16 %v36_v3 }
  0x2c   :  { %v253_v28 = vpack.c.bf16 %v217_v24, %v214_v23  ;;  %v222_v30 = vsel %vm126_vm3, %v78_v13, %v174_v21  ;;  %vm124_vm4 = vcmp.ge.f32.partialorder %v76_v22, 0.0  ;;  %vm127_vm5 = vcmp.ge.f32.partialorder %v79_v25, 0.0 }
  0x2d   :  { %v255_v32 = vpack.c.bf16 %v222_v30, %v219_v29  ;;  %v172_v33 = vmul.f32 0.01, %v76_v22  ;;  %v175_v34 = vmul.f32 0.01, %v79_v25  ;;  %vm122_vm6 = vcmp.ge.f32.partialorder %v74_v26, 0.0 }
  0x2e   :  { %v170_v36 = vmul.f32 0.01, %v74_v26  ;;  %v82_v37 = vunpack.c.l.bf16 %v39_v27  ;;  %v85_v40 = vunpack.c.h.bf16 %v39_v27  ;;  %v81_v42 = vunpack.c.h.bf16 %v38_v31 }
  0x2f   :  { %v220_v38 = vsel %vm124_vm4, %v76_v22, %v172_v33  ;;  %v223_v39 = vsel %vm127_vm5, %v79_v25, %v175_v34  ;;  %vm125_vm7 = vcmp.ge.f32.partialorder %v77_v35, 0.0  ;;  %v173_v44 = vmul.f32 0.01, %v77_v35 }
  0x30   :  { %v256_v43 = vpack.c.bf16 %v223_v39, %v220_v38  ;;  %v218_v45 = vsel %vm122_vm6, %v74_v26, %v170_v36  ;;  %vm130_vm8 = vcmp.ge.f32.partialorder %v82_v37, 0.0  ;;  %vm133_vm9 = vcmp.ge.f32.partialorder %v85_v40, 0.0  ;;  %v1025_v36 = vld [vmem:[%s1165_s2] ss:$0 sm:$0xff] }
  0x31   :  { %v178_v47 = vmul.f32 0.01, %v82_v37  ;;  %v181_v48 = vmul.f32 0.01, %v85_v40  ;;  %v221_v49 = vsel %vm125_vm7, %v77_v35, %v173_v44  ;;  %vm129_vm10 = vcmp.ge.f32.partialorder %v81_v42, 0.0 }
  0x32   :  { %491 = vmatmul.mubr.bf16.gmra.mxu0 %v248_v50  ;;  %794 = vmatmul.mubr.msk.bf16.vlgmr.msra.gmra.mxu1 %vm417_vm15, %v247_v59  ;;  %v84_v50 = vunpack.c.h.bf16 %v40_v41  ;;  %v177_v51 = vmul.f32 0.01, %v81_v42  ;;  %v254_v52 = vpack.c.bf16 %v221_v49, %v218_v45  ;;  %v88_v55 = vunpack.c.l.bf16 %v43_v46 }
  0x33   :  { %498 = vmatprep.mubr.bf16.mxu0 %v252_v0  ;;  %797 = vmatprep.mubr.msk.bf16.mxu1 %vm417_vm15, %v250_v15  ;;  %v226_v53 = vsel %vm130_vm8, %v82_v37, %v178_v47  ;;  %v229_v54 = vsel %vm133_vm9, %v85_v40, %v181_v48  ;;  %v91_v60 = vunpack.c.h.bf16 %v43_v46  ;;  %v80_v62 = vunpack.c.l.bf16 %v38_v31  ;;  %v636_v47 = vld [vmem:[%s1166_s3] sm:$0xff] }
  0x34   :  { %v259_v57 = vpack.c.bf16 %v229_v54, %v226_v53  ;;  %vm132_vm11 = vcmp.ge.f32.partialorder %v84_v50, 0.0  ;;  %v180_v58 = vmul.f32 0.01, %v84_v50  ;;  %v225_v59 = vsel %vm129_vm10, %v81_v42, %v177_v51  ;;  %v639_v53 = vld [vmem:[%s1166_s3 + $0x18] sm:$0xff] }
  0x35   :  { %vm136_vm12 = vcmp.ge.f32.partialorder %v88_v55, 0.0  ;;  %v184_v61 = vmul.f32 0.01, %v88_v55  ;;  %v83_v0 = vunpack.c.l.bf16 %v40_v41  ;;  %v94_v1 = vunpack.c.l.bf16 %v47_v56  ;;  %v638_v41 = vld [vmem:[%s1166_s3 + $0x10] sm:$0xff] }
  0x36   :  { %v228_v63 = vsel %vm132_vm11, %v84_v50, %v180_v58  ;;  %v97_v2 = vunpack.c.h.bf16 %v47_v56  ;;  %vm139_vm13 = vcmp.ge.f32.partialorder %v91_v60, 0.0  ;;  %v187_v4 = vmul.f32 0.01, %v91_v60 }
  0x37   :  { %v258_v3 = vpack.c.bf16 %v228_v63, %v225_v59  ;;  %v232_v5 = vsel %vm136_vm12, %v88_v55, %v184_v61  ;;  %vm128_vm14 = vcmp.ge.f32.partialorder %v80_v62, 0.0  ;;  %vm131_vm0 = vcmp.ge.f32.partialorder %v83_v0, 0.0 }
  0x38   :  { %v176_v6 = vmul.f32 0.01, %v80_v62  ;;  %v179_v7 = vmul.f32 0.01, %v83_v0  ;;  %v235_v8 = vsel %vm139_vm13, %v91_v60, %v187_v4  ;;  %vm142_vm1 = vcmp.ge.f32.partialorder %v94_v1, 0.0  ;;  %v637_v60 = vld [vmem:[%s1166_s3 + $0x8] sm:$0xff] }
  0x39   :  { %vm145_vm2 = vcmp.ge.f32.partialorder %v97_v2, 0.0  ;;  %v190_v9 = vmul.f32 0.01, %v94_v1  ;;  %v262_v10 = vpack.c.bf16 %v235_v8, %v232_v5  ;;  %v193_v13 = vmul.f32 0.01, %v97_v2 }
  0x3a   :  { %499 = vmatmul.mubr.bf16.gmra.mxu0 %v251_v17  ;;  %798 = vmatmul.mubr.msk.bf16.gmra.mxu1 %vm417_vm15, %v253_v28  ;;  %v224_v11 = vsel %vm128_vm14, %v80_v62, %v176_v6  ;;  %v227_v12 = vsel %vm131_vm0, %v83_v0, %v179_v7  ;;  %v640_v6 = vld [vmem:[%s1166_s3 + $0x20] sm:$0xff] }
  0x3b   :  { %506 = vmatprep.mubr.bf16.mxu0 %v255_v32  ;;  %801 = vmatprep.mubr.msk.bf16.mxu1 %vm417_vm15, %v256_v43  ;;  %v257_v14 = vpack.c.bf16 %v227_v12, %v224_v11  ;;  %v238_v15 = vsel %vm142_vm1, %v94_v1, %v190_v9  ;;  %v241_v16 = vsel %vm145_vm2, %v97_v2, %v193_v13 }
  0x3c   :  { %v265_v17 = vpack.c.bf16 %v241_v16, %v238_v15 }
  0x42   :  { %507 = vmatmul.mubr.bf16.gmra.mxu0 %v254_v52  ;;  %802 = vmatmul.mubr.msk.bf16.gmra.mxu1 %vm417_vm15, %v259_v57 }
  0x43   :  { %514 = vmatprep.mubr.bf16.mxu0 %v258_v3  ;;  %805 = vmatprep.mubr.msk.bf16.mxu1 %vm417_vm15, %v262_v10 }
  0x4a   :  { %515 = vmatmul.mubr.bf16.gmra.mxu0 %v257_v14  ;;  %806 = vmatmul.mubr.msk.bf16.gmra.mxu1 %vm417_vm15, %v265_v17  ;;  %v642_v14 = vld [vmem:[%s1166_s3 + $0x30] sm:$0xff]  ;;  %v641_v17 = vld [vmem:[%s1166_s3 + $0x28] sm:$0xff] }
  0xe2   :  { %v731_v18 = vpop.f32.mrf.mxu0  ;;  %v1006_v19 = vpop.f32.mrf.mxu1 }
  0xe4   :  { %v732_v20 = vpop.f32.mrf.mxu0  ;;  %v1008_v21 = vpop.f32.mrf.mxu1 }
  0xe5   :  { %v733_v33 = vadd.f32 %v732_v20, %v731_v18 }
  0xe6   :  { %v734_v22 = vpop.f32.mrf.mxu0  ;;  %v1010_v23 = vpop.f32.mrf.mxu1 }
  0xe7   :  { %v477_v44 = vadd.f32 %v733_v33, %v1025_v36  ;;  %v643_v33 = vld [vmem:[%s1166_s3 + $0x38] sm:$0xff] }
  0xe8   :  { %v735_v24 = vpop.f32.mrf.mxu0  ;;  %v1012_v25 = vpop.f32.mrf.mxu1 }
  0xe9   :  { %v736_v42 = vadd.f32 %v735_v24, %v734_v22 }
  0xea   :  { %v737_v26 = vpop.f32.mrf.mxu0  ;;  %v1014_v27 = vpop.f32.mrf.mxu1 }
  0xeb   :  { %v480_v57 = vadd.f32 %v736_v42, %v1025_v36 }
  0xec   :  { %v738_v28 = vpop.f32.mrf.mxu0  ;;  %v1016_v29 = vpop.f32.mrf.mxu1 }
  0xed   :  { %v739_v30 = vadd.f32 %v738_v28, %v737_v26 }
  0xee   :  { %v740_v31 = vpop.f32.mrf.mxu0  ;;  %v1018_v32 = vpop.f32.mrf.mxu1 }
  0xef   :  { %v485_v38 = vadd.f32 %v739_v30, %v1025_v36 }
  0xf0   :  { %v741_v34 = vpop.f32.mrf.mxu0  ;;  %v1020_v35 = vpop.f32.mrf.mxu1 }
  0xf1   :  { %v742_v37 = vadd.f32 %v741_v34, %v740_v31 }
  0xf2   :  { %v743_v39 = vpop.f32.mrf.mxu0  ;;  %v795_v40 = vpop.f32.mrf.mxu1 }
  0xf3   :  { %v582_v43 = vadd.f32 %v795_v40, %v485_v38  ;;  %v488_v50 = vadd.f32 %v742_v37, %v1025_v36  ;;  %v775_v38 = vadd.f32 %v1016_v29, %v1014_v27  ;;  %v778_v29 = vadd.f32 %v1020_v35, %v1018_v32  ;;  %v650_v35 = vld [vmem:[%s1166_s3 + $0x70] sm:$0xff] }
  0xf4   :  { %v744_v45 = vpop.f32.mrf.mxu0  ;;  %v573_v46 = vpop.f32.mrf.mxu1 }
  0xf5   :  { %v654_v48 = vadd.f32 %v638_v41, %v582_v43  ;;  %v574_v49 = vadd.f32 %v573_v46, %v477_v44  ;;  %v745_v54 = vadd.f32 %v744_v45, %v743_v39  ;;  %v769_v43 = vadd.f32 %v1008_v21, %v1006_v19  ;;  %v644_v45 = vld [vmem:[%s1166_s3 + $0x40] sm:$0xff] }
  0xf6   :  { %v746_v51 = vpop.f32.mrf.mxu0  ;;  %v796_v52 = vpop.f32.mrf.mxu1  ;;  %v533_v19 = vadd.f32 %v775_v38, %v1025_v36  ;;  %v772_v21 = vadd.f32 %v1012_v25, %v1010_v23  ;;  %v648_v23 = vld [vmem:[%s1166_s3 + $0x60] sm:$0xff]  ;;  %v536_v25 = vadd.f32 %v778_v29, %v1025_v36 }
  0xf7   :  { %670 = vst.msk [vmem:[%s1167_s4 + $0x10] sm:$0xff] %vm417_vm15, %v654_v48  ;;  %v652_v55 = vadd.f32 %v636_v47, %v574_v49  ;;  %v585_v56 = vadd.f32 %v796_v52, %v488_v50  ;;  %v493_v3 = vadd.f32 %v745_v54, %v1025_v36  ;;  %v525_v54 = vadd.f32 %v769_v43, %v1025_v36 }
  0xf8   :  { %v747_v58 = vpop.f32.mrf.mxu0  ;;  %v576_v59 = vpop.f32.mrf.mxu1 }
  0xf9   :  { %668 = vst.msk [vmem:[%s1167_s4] sm:$0xff] %vm417_vm15, %v652_v55  ;;  %v655_v61 = vadd.f32 %v639_v53, %v585_v56  ;;  %v577_v62 = vadd.f32 %v576_v59, %v480_v57  ;;  %v748_v1 = vadd.f32 %v747_v58, %v746_v51  ;;  %v645_v55 = vld [vmem:[%s1166_s3 + $0x48] sm:$0xff] }
  0xfa   :  { %v749_v63 = vpop.f32.mrf.mxu0  ;;  %v799_v0 = vpop.f32.mrf.mxu1 }
  0xfb   :  { %671 = vst.msk [vmem:[%s1167_s4 + $0x18] sm:$0xff] %vm417_vm15, %v655_v61  ;;  %v653_v2 = vadd.f32 %v637_v60, %v577_v62  ;;  %v496_v13 = vadd.f32 %v748_v1, %v1025_v36  ;;  %v528_v1 = vadd.f32 %v772_v21, %v1025_v36 }
  0xfc   :  { %v750_v4 = vpop.f32.mrf.mxu0  ;;  %v589_v5 = vpop.f32.mrf.mxu1 }
  0xfd   :  { %669 = vst.msk [vmem:[%s1167_s4 + $0x8] sm:$0xff] %vm417_vm15, %v653_v2  ;;  %v751_v7 = vadd.f32 %v750_v4, %v749_v63  ;;  %v590_v8 = vadd.f32 %v589_v5, %v493_v3 }
  0xfe   :  { %v752_v9 = vpop.f32.mrf.mxu0  ;;  %v800_v10 = vpop.f32.mrf.mxu1 }
  0xff   :  { %v501_v11 = vadd.f32 %v751_v7, %v1025_v36  ;;  %v656_v12 = vadd.f32 %v640_v6, %v590_v8  ;;  %v646_v6 = vld [vmem:[%s1166_s3 + $0x50] sm:$0xff] }
 0x100   :  { %v753_v15 = vpop.f32.mrf.mxu0  ;;  %v592_v16 = vpop.f32.mrf.mxu1 }
 0x101   :  { %v598_v18 = vadd.f32 %v799_v0, %v501_v11  ;;  %672 = vst.msk [vmem:[%s1167_s4 + $0x20] sm:$0xff] %vm417_vm15, %v656_v12  ;;  %v754_v20 = vadd.f32 %v753_v15, %v752_v9  ;;  %v593_v22 = vadd.f32 %v592_v16, %v496_v13  ;;  %v651_v0 = vld [vmem:[%s1166_s3 + $0x78] sm:$0xff]  ;;  %v649_v9 = vld [vmem:[%s1166_s3 + $0x68] sm:$0xff] }
 0x102   :  { %v755_v24 = vpop.f32.mrf.mxu0  ;;  %v803_v26 = vpop.f32.mrf.mxu1 }
 0x103   :  { %v658_v28 = vadd.f32 %v642_v14, %v598_v18  ;;  %v504_v30 = vadd.f32 %v754_v20, %v1025_v36  ;;  %v657_v31 = vadd.f32 %v641_v17, %v593_v22  ;;  %v647_v17 = vld [vmem:[%s1166_s3 + $0x58] sm:$0xff] }
 0x104   :  { %v756_v34 = vpop.f32.mrf.mxu0  ;;  %v605_v37 = vpop.f32.mrf.mxu1 }
 0x105   :  { %674 = vst.msk [vmem:[%s1167_s4 + $0x30] sm:$0xff] %vm417_vm15, %v658_v28  ;;  %v601_v39 = vadd.f32 %v800_v10, %v504_v30  ;;  %673 = vst.msk [vmem:[%s1167_s4 + $0x28] sm:$0xff] %vm417_vm15, %v657_v31  ;;  %v757_v40 = vadd.f32 %v756_v34, %v755_v24 }
 0x106   :  { %v758_v41 = vpop.f32.mrf.mxu0  ;;  %v804_v42 = vpop.f32.mrf.mxu1 }
 0x107   :  { %v659_v44 = vadd.f32 %v643_v33, %v601_v39  ;;  %v509_v27 = vadd.f32 %v757_v40, %v1025_v36 }
 0x108   :  { %v759_v46 = vpop.f32.mrf.mxu0  ;;  %v608_v47 = vpop.f32.mrf.mxu1 }
 0x109   :  { %675 = vst.msk [vmem:[%s1167_s4 + $0x38] sm:$0xff] %vm417_vm15, %v659_v44  ;;  %v606_v48 = vadd.f32 %v605_v37, %v509_v27  ;;  %v760_v49 = vadd.f32 %v759_v46, %v758_v41 }
 0x10a   :  { %v761_v50 = vpop.f32.mrf.mxu0  ;;  %v807_v32 = vpop.f32.mrf.mxu1 }
 0x10b   :  { %v660_v51 = vadd.f32 %v644_v45, %v606_v48  ;;  %v512_v52 = vadd.f32 %v760_v49, %v1025_v36  ;;  %v630_v53 = vadd.f32 %v807_v32, %v533_v19 }
 0x10c   :  { %v762_v56 = vpop.f32.mrf.mxu0  ;;  %v621_v57 = vpop.f32.mrf.mxu1 }
 0x10d   :  { %676 = vst.msk [vmem:[%s1167_s4 + $0x40] sm:$0xff] %vm417_vm15, %v660_v51  ;;  %v609_v58 = vadd.f32 %v608_v47, %v512_v52  ;;  %v666_v59 = vadd.f32 %v650_v35, %v630_v53  ;;  %v763_v60 = vadd.f32 %v762_v56, %v761_v50  ;;  %v622_v61 = vadd.f32 %v621_v57, %v525_v54 }
 0x10e   :  { %v764_v62 = vpop.f32.mrf.mxu0  ;;  %v808_v63 = vpop.f32.mrf.mxu1 }
 0x10f   :  { %v661_v2 = vadd.f32 %v645_v55, %v609_v58  ;;  %682 = vst.msk [vmem:[%s1167_s4 + $0x70] sm:$0xff] %vm417_vm15, %v666_v59  ;;  %v517_v3 = vadd.f32 %v763_v60, %v1025_v36  ;;  %v664_v4 = vadd.f32 %v648_v23, %v622_v61  ;;  %v633_v5 = vadd.f32 %v808_v63, %v536_v25 }
 0x110   :  { %v765_v7 = vpop.f32.mrf.mxu0  ;;  %v624_v8 = vpop.f32.mrf.mxu1 }
 0x111   :  { %677 = vst.msk [vmem:[%s1167_s4 + $0x48] sm:$0xff] %vm417_vm15, %v661_v2  ;;  %v614_v10 = vadd.f32 %v803_v26, %v517_v3  ;;  %680 = vst.msk [vmem:[%s1167_s4 + $0x60] sm:$0xff] %vm417_vm15, %v664_v4  ;;  %v667_v11 = vadd.f32 %v651_v0, %v633_v5  ;;  %v766_v12 = vadd.f32 %v765_v7, %v764_v62 }
 0x112   :  { %v625_v13 = vadd.f32 %v624_v8, %v528_v1 }
 0x113   :  { %v662_v14 = vadd.f32 %v646_v6, %v614_v10  ;;  %683 = vst.msk [vmem:[%s1167_s4 + $0x78] sm:$0xff] %vm417_vm15, %v667_v11  ;;  %v520_v15 = vadd.f32 %v766_v12, %v1025_v36 }
 0x114   :  { %v665_v16 = vadd.f32 %v649_v9, %v625_v13 }
 0x115   :  { %678 = vst.msk [vmem:[%s1167_s4 + $0x50] sm:$0xff] %vm417_vm15, %v662_v14  ;;  %v617_v18 = vadd.f32 %v804_v42, %v520_v15 }
 0x116   :  { %681 = vst.msk [vmem:[%s1167_s4 + $0x68] sm:$0xff] %vm417_vm15, %v665_v16 }
 0x117   :  { %v663_v20 = vadd.f32 %v647_v17, %v617_v18 }
 0x119   :  { %679 = vst.msk [vmem:[%s1167_s4 + $0x58] sm:$0xff] %vm417_vm15, %v663_v20 }

// kernel: _lambda_.96
= control target key start
LH: loop header
LB: loop body
LE: loop exit
PB: predicated region body
PF: predicated region fallthrough
CT: control target
= control target key end

     0   :  { %vm204_vm0 = vcmask 261120   ;;  %s523_s1 = inlined_call_operand.vmem [shape: bf16[288,32], index: 1, kind: input, shape index: {}]   ;;  %s524_s0 = inlined_call_operand.vmem [shape: bf16[32,288], index: 0, kind: input, shape index: {}]   ;;  %s525_s2 = inlined_call_operand.vmem [shape: f32[1,32], index: 2, kind: input, shape index: {}]   ;;  %s526_s3 = inlined_call_operand.vmem [shape: f32[32,32], index: 3, kind: output, shape index: {}]  }
   0x1   :  { %v384_v0 = vld [vmem:[%s523_s1 + $0x78] sm:$0xff]   ;;  %v386_v2 = vld [vmem:[%s523_s1 + $0x70] sm:$0xff]   ;;  %v388_v4 = vld [vmem:[%s523_s1 + $0x68] sm:$0xff]  }
   0x2   :  { %v385_v1 = vld [vmem:[%s523_s1 + $0x38] sm:$0xff]   ;;  %344 = vmatprep.subr.bf16.mxu0 %v384_v0  ;;  %v387_v3 = vld [vmem:[%s523_s1 + $0x30] sm:$0xff]   ;;  %v389_v5 = vld [vmem:[%s523_s1 + $0x28] sm:$0xff]  }
   0x3   :  { %345 = vmatpush3.bf16.msra.mxu0 %v385_v1  ;;  %v390_v6 = vld [vmem:[%s523_s1 + $0x60] sm:$0xff]   ;;  %v392_v8 = vld [vmem:[%s523_s1 + $0x58] sm:$0xff]   ;;  %v399_v10 = vld [vmem:[%s523_s1 + $0x88] sm:$0xff]  }
   0x4   :  { %346 = vmatprep.subr.bf16.mxu0 %v386_v2  ;;  %v391_v7 = vld [vmem:[%s523_s1 + $0x20] sm:$0xff]   ;;  %v393_v9 = vld [vmem:[%s523_s1 + $0x18] sm:$0xff]   ;;  %v394_v11 = vld [vmem:[%s523_s1 + $0x50] sm:$0xff]   ;;  %376 = vmatprep.subr.bf16.mxu1 %v399_v10 }
   0x5   :  { %v395_v12 = vld [vmem:[%s523_s1 + $0x10] sm:$0xff]   ;;  %v396_v13 = vld [vmem:[%s523_s1 + $0x48] sm:$0xff]   ;;  %377 = vmatpush3.bf16.msra.mxu1 %v399_v10  ;;  %v404_v15 = vld [vmem:[%s523_s1 + $0x80] sm:$0xff]  }
   0x6   :  { %v403_v14 = vld [vmem:[%s524_s0 + $0x4] ss:$12 sps:$4 sm:$0xff]   ;;  %v405_v16 = vld [vmem:[%s524_s0 + $0x8] ss:$12 sps:$4 sm:$0xff]   ;;  %378 = vmatprep.subr.bf16.mxu1 %v404_v15  ;;  %v406_v17 = vld [vmem:[%s524_s0 + $0x20] ss:$12 sps:$4 sm:$0xff]  }
   0x7   :  { %347 = vmatpush3.bf16.msra.mxu0 %v387_v3  ;;  %243 = vmatprep.mubr.bf16.mxu0 %v403_v14  ;;  %v397_v18 = vld [vmem:[%s523_s1 + $0x8] sm:$0xff]   ;;  %v398_v19 = vld [vmem:[%s523_s1 + $0x40] sm:$0xff]  }
   0x8   :  { %348 = vmatprep.subr.bf16.mxu0 %v388_v4  ;;  %380 = vmatprep.mubr.msk.bf16.mxu1 %vm204_vm0, %v405_v16  ;;  %v400_v20 = vld [vmem:[%s523_s1] sm:$0xff]   ;;  %v407_v22 = vld [vmem:[%s524_s0 + $0x1c] ss:$12 sps:$4 sm:$0xff]  }
   0x9   :  { %379 = vmatpush3.bf16.msra.mxu1 %v404_v15  ;;  %v401_v21 = vld [vmem:[%s524_s0] ss:$12 sps:$4 sm:$0xff]   ;;  %v409_v23 = vld [vmem:[%s524_s0 + $0x18] ss:$12 sps:$4 sm:$0xff]  }
   0xa   :  { %v317_v28 = vld [vmem:[%s525_s2] ss:$0 sm:$0xff] }
   0xb   :  { %349 = vmatpush3.bf16.msra.mxu0 %v389_v5 }
   0xc   :  { %350 = vmatprep.subr.bf16.mxu0 %v390_v6  ;;  %381 = vmatmul.mubr.msk.bf16.vlgmr.msra.gmra.mxu1 %vm204_vm0, %v406_v17 }
   0xf   :  { %351 = vmatpush3.bf16.msra.mxu0 %v391_v7 }
  0x10   :  { %352 = vmatprep.subr.bf16.mxu0 %v392_v8 }
  0x13   :  { %353 = vmatpush3.bf16.msra.mxu0 %v393_v9 }
  0x14   :  { %354 = vmatprep.subr.bf16.mxu0 %v394_v11 }
  0x17   :  { %355 = vmatpush3.bf16.msra.mxu0 %v395_v12 }
  0x18   :  { %356 = vmatprep.subr.bf16.mxu0 %v396_v13 }
  0x1b   :  { %357 = vmatpush3.bf16.msra.mxu0 %v397_v18 }
  0x1c   :  { %358 = vmatprep.subr.bf16.mxu0 %v398_v19 }
  0x1f   :  { %359 = vmatpush3.bf16.msra.mxu0 %v400_v20 }
  0x22   :  { %244 = vmatmul.mubr.bf16.vlgmr.msra.gmra.mxu0 %v401_v21 }
  0x23   :  { %251 = vmatprep.mubr.bf16.mxu0 %v407_v22 }
  0x2a   :  { %252 = vmatmul.mubr.bf16.gmra.mxu0 %v409_v23 }
  0xcc   :  { %v382_v24 = vpop.f32.mrf.mxu1 }
  0xce   :  { %v294_v26 = vpop.f32.mrf.mxu1 }
  0xd0   :  { %v383_v31 = vpop.f32.mrf.mxu1 }
  0xd2   :  { %v297_v37 = vpop.f32.mrf.mxu1 }
  0xe2   :  { %v360_v25 = vpop.f32.mrf.mxu0 }
  0xe4   :  { %v361_v27 = vpop.f32.mrf.mxu0 }
  0xe5   :  { %v362_v29 = vadd.f32 %v361_v27, %v360_v25 }
  0xe6   :  { %v363_v30 = vpop.f32.mrf.mxu0 }
  0xe7   :  { %v246_v32 = vadd.f32 %v362_v29, %v317_v28 }
  0xe8   :  { %v364_v33 = vpop.f32.mrf.mxu0 }
  0xe9   :  { %v365_v34 = vadd.f32 %v364_v33, %v363_v30  ;;  %v295_v35 = vadd.f32 %v294_v26, %v246_v32 }
  0xea   :  { %v366_v36 = vpop.f32.mrf.mxu0 }
  0xeb   :  { %309 = vst.msk [vmem:[%s526_s3] sm:$0xff] %vm204_vm0, %v295_v35  ;;  %v249_v38 = vadd.f32 %v365_v34, %v317_v28 }
  0xec   :  { %v367_v39 = vpop.f32.mrf.mxu0 }
  0xed   :  { %v368_v40 = vadd.f32 %v367_v39, %v366_v36  ;;  %v298_v41 = vadd.f32 %v297_v37, %v249_v38 }
  0xee   :  { %v369_v42 = vpop.f32.mrf.mxu0 }
  0xef   :  { %v254_v43 = vadd.f32 %v368_v40, %v317_v28  ;;  %310 = vst.msk [vmem:[%s526_s3 + $0x8] sm:$0xff] %vm204_vm0, %v298_v41 }
  0xf0   :  { %v370_v44 = vpop.f32.mrf.mxu0 }
  0xf1   :  { %v303_v45 = vadd.f32 %v382_v24, %v254_v43  ;;  %v371_v46 = vadd.f32 %v370_v44, %v369_v42 }
  0xf3   :  { %311 = vst.msk [vmem:[%s526_s3 + $0x10] sm:$0xff] %vm204_vm0, %v303_v45  ;;  %v257_v47 = vadd.f32 %v371_v46, %v317_v28 }
  0xf5   :  { %v306_v48 = vadd.f32 %v383_v31, %v257_v47 }
  0xf7   :  { %312 = vst.msk [vmem:[%s526_s3 + $0x18] sm:$0xff] %vm204_vm0, %v306_v48 }

// kernel: _lambda_.97
= control target key start
LH: loop header
LB: loop body
LE: loop exit
PB: predicated region body
PF: predicated region fallthrough
CT: control target
= control target key end

     0   :  { %vm231_vm5 = vcmask 261120   ;;  %s563_s1 = inlined_call_operand.vmem [shape: bf16[288,32], index: 1, kind: input, shape index: {}]   ;;  %s564_s0 = inlined_call_operand.vmem [shape: bf16[32,288], index: 0, kind: input, shape index: {}]   ;;  %s565_s2 = inlined_call_operand.vmem [shape: f32[1,32], index: 2, kind: input, shape index: {}]   ;;  %s566_s3 = inlined_call_operand.vmem [shape: f32[32,32], index: 3, kind: input, shape index: {}]   ;;  %s567_s4 = inlined_call_operand.vmem [shape: f32[32,32], index: 4, kind: output, shape index: {}]  }
   0x1   :  { %v413_v0 = vld [vmem:[%s563_s1 + $0x78] sm:$0xff]   ;;  %v415_v2 = vld [vmem:[%s563_s1 + $0x70] sm:$0xff]   ;;  %v417_v4 = vld [vmem:[%s563_s1 + $0x68] sm:$0xff]  }
   0x2   :  { %v414_v1 = vld [vmem:[%s563_s1 + $0x38] sm:$0xff]   ;;  %373 = vmatprep.subr.bf16.mxu0 %v413_v0  ;;  %v416_v3 = vld [vmem:[%s563_s1 + $0x30] sm:$0xff]   ;;  %v418_v5 = vld [vmem:[%s563_s1 + $0x28] sm:$0xff]  }
   0x3   :  { %374 = vmatpush3.bf16.msra.mxu0 %v414_v1  ;;  %v419_v6 = vld [vmem:[%s563_s1 + $0x60] sm:$0xff]   ;;  %v421_v8 = vld [vmem:[%s563_s1 + $0x58] sm:$0xff]   ;;  %v428_v10 = vld [vmem:[%s563_s1 + $0x88] sm:$0xff]  }
   0x4   :  { %375 = vmatprep.subr.bf16.mxu0 %v415_v2  ;;  %v420_v7 = vld [vmem:[%s563_s1 + $0x20] sm:$0xff]   ;;  %v422_v9 = vld [vmem:[%s563_s1 + $0x18] sm:$0xff]   ;;  %v423_v11 = vld [vmem:[%s563_s1 + $0x50] sm:$0xff]   ;;  %405 = vmatprep.subr.bf16.mxu1 %v428_v10 }
   0x5   :  { %v18_v12 = vld [vmem:[%s564_s0] sm:$0xff]  ;;  %v20_v13 = vld [vmem:[%s564_s0 + $0xc] sm:$0xff]  ;;  %406 = vmatpush3.bf16.msra.mxu1 %v428_v10  ;;  %v19_v19 = vld [vmem:[%s564_s0 + $0x8] ss:$12 sps:$4 sm:$0xff]  }
   0x6   :  { %v26_v14 = vunpack.c.l.bf16 %v18_v12  ;;  %v27_v15 = vunpack.c.h.bf16 %v18_v12  ;;  %v29_v16 = vunpack.c.l.bf16 %v20_v13  ;;  %v30_v17 = vunpack.c.h.bf16 %v20_v13  ;;  %v430_v18 = vld [vmem:[%s563_s1 + $0x80] sm:$0xff]   ;;  %v424_v20 = vld [vmem:[%s563_s1 + $0x10] sm:$0xff]   ;;  %v425_v21 = vld [vmem:[%s563_s1 + $0x48] sm:$0xff]  }
   0x7   :  { %376 = vmatpush3.bf16.msra.mxu0 %v416_v3  ;;  %v28_v22 = vunpack.c.l.bf16 %v19_v19  ;;  %v31_v23 = vunpack.c.h.bf16 %v19_v19  ;;  %v23_v24 = vld [vmem:[%s564_s0 + $0x20] ss:$12 sps:$4 sm:$0xff]   ;;  %407 = vmatprep.subr.bf16.mxu1 %v430_v18  ;;  %v22_v31 = vld [vmem:[%s564_s0 + $0x18] sm:$0xff]  ;;  %v24_v32 = vld [vmem:[%s564_s0 + $0x24] sm:$0xff] }
   0x8   :  { %377 = vmatprep.subr.bf16.mxu0 %v417_v4  ;;  %vm39_vm0 = vcmp.ge.f32.partialorder %v27_v15, 0.0  ;;  %vm42_vm1 = vcmp.ge.f32.partialorder %v30_v17, 0.0  ;;  %v51_v25 = vmul.f32 0.01, %v27_v15  ;;  %v54_v26 = vmul.f32 0.01, %v30_v17 }
   0x9   :  { %vm38_vm2 = vcmp.ge.f32.partialorder %v26_v14, 0.0  ;;  %vm41_vm3 = vcmp.ge.f32.partialorder %v29_v16, 0.0  ;;  %v50_v27 = vmul.f32 0.01, %v26_v14  ;;  %v53_v28 = vmul.f32 0.01, %v29_v16  ;;  %408 = vmatpush3.bf16.msra.mxu1 %v430_v18 }
   0xa   :  { %v63_v29 = vsel %vm39_vm0, %v27_v15, %v51_v25  ;;  %v66_v30 = vsel %vm42_vm1, %v30_v17, %v54_v26  ;;  %vm40_vm4 = vcmp.ge.f32.partialorder %v28_v22, 0.0  ;;  %v426_v33 = vld [vmem:[%s563_s1 + $0x8] sm:$0xff]   ;;  %vm43_vm6 = vcmp.ge.f32.partialorder %v31_v23, 0.0  ;;  %v427_v37 = vld [vmem:[%s563_s1 + $0x40] sm:$0xff]   ;;  %v338_v26 = vld [vmem:[%s566_s3 + $0x10] sm:$0xff] }
   0xb   :  { %378 = vmatpush3.bf16.msra.mxu0 %v418_v5  ;;  %v75_v34 = vpack.c.bf16 %v66_v30, %v63_v29  ;;  %v62_v35 = vsel %vm38_vm2, %v26_v14, %v50_v27  ;;  %v52_v36 = vmul.f32 0.01, %v28_v22  ;;  %v65_v38 = vsel %vm41_vm3, %v29_v16, %v53_v28  ;;  %v429_v48 = vld [vmem:[%s563_s1] sm:$0xff]  }
   0xc   :  { %379 = vmatprep.subr.bf16.mxu0 %v419_v6  ;;  %v55_v39 = vmul.f32 0.01, %v31_v23  ;;  %v34_v40 = vunpack.c.l.bf16 %v23_v24  ;;  %v37_v41 = vunpack.c.h.bf16 %v23_v24  ;;  %v33_v43 = vunpack.c.h.bf16 %v22_v31  ;;  %v352_v6 = vld [vmem:[%s565_s2] ss:$0 sm:$0xff] }
   0xd   :  { %270 = vmatprep.mubr.bf16.mxu0 %v75_v34  ;;  %v64_v42 = vsel %vm40_vm4, %v28_v22, %v52_v36  ;;  %v36_v44 = vunpack.c.h.bf16 %v24_v32  ;;  %v32_v45 = vunpack.c.l.bf16 %v22_v31  ;;  %v35_v54 = vunpack.c.l.bf16 %v24_v32  ;;  %v336_v12 = vld [vmem:[%s566_s3] sm:$0xff]  ;;  %v339_v32 = vld [vmem:[%s566_s3 + $0x18] sm:$0xff] }
   0xe   :  { %v67_v46 = vsel %vm43_vm6, %v31_v23, %v55_v39  ;;  %vm46_vm7 = vcmp.ge.f32.partialorder %v34_v40, 0.0  ;;  %vm49_vm8 = vcmp.ge.f32.partialorder %v37_v41, 0.0  ;;  %v58_v47 = vmul.f32 0.01, %v34_v40 }
   0xf   :  { %380 = vmatpush3.bf16.msra.mxu0 %v420_v7  ;;  %v76_v49 = vpack.c.bf16 %v67_v46, %v64_v42  ;;  %v61_v50 = vmul.f32 0.01, %v37_v41  ;;  %vm45_vm9 = vcmp.ge.f32.partialorder %v33_v43, 0.0  ;;  %vm48_vm10 = vcmp.ge.f32.partialorder %v36_v44, 0.0 }
  0x10   :  { %381 = vmatprep.subr.bf16.mxu0 %v421_v8  ;;  %v70_v51 = vsel %vm46_vm7, %v34_v40, %v58_v47  ;;  %v57_v52 = vmul.f32 0.01, %v33_v43  ;;  %v60_v53 = vmul.f32 0.01, %v36_v44  ;;  %v74_v56 = vpack.c.bf16 %v65_v38, %v62_v35 }
  0x11   :  { %409 = vmatprep.mubr.msk.bf16.mxu1 %vm231_vm5, %v76_v49  ;;  %v73_v55 = vsel %vm49_vm8, %v37_v41, %v61_v50  ;;  %v56_v61 = vmul.f32 0.01, %v32_v45  ;;  %v59_v62 = vmul.f32 0.01, %v35_v54  ;;  %vm44_vm11 = vcmp.ge.f32.partialorder %v32_v45, 0.0 }
  0x12   :  { %v79_v57 = vpack.c.bf16 %v73_v55, %v70_v51  ;;  %v69_v58 = vsel %vm45_vm9, %v33_v43, %v57_v52  ;;  %v72_v59 = vsel %vm48_vm10, %v36_v44, %v60_v53  ;;  %vm47_vm12 = vcmp.ge.f32.partialorder %v35_v54, 0.0 }
  0x13   :  { %382 = vmatpush3.bf16.msra.mxu0 %v422_v9  ;;  %v78_v60 = vpack.c.bf16 %v72_v59, %v69_v58  ;;  %v68_v63 = vsel %vm44_vm11, %v32_v45, %v56_v61  ;;  %v71_v0 = vsel %vm47_vm12, %v35_v54, %v59_v62 }
  0x14   :  { %383 = vmatprep.subr.bf16.mxu0 %v423_v11  ;;  %410 = vmatmul.mubr.msk.bf16.vlgmr.msra.gmra.mxu1 %vm231_vm5, %v79_v57  ;;  %v77_v1 = vpack.c.bf16 %v71_v0, %v68_v63 }
  0x17   :  { %384 = vmatpush3.bf16.msra.mxu0 %v424_v20  ;;  %v337_v20 = vld [vmem:[%s566_s3 + $0x8] sm:$0xff] }
  0x18   :  { %385 = vmatprep.subr.bf16.mxu0 %v425_v21 }
  0x1b   :  { %386 = vmatpush3.bf16.msra.mxu0 %v426_v33 }
  0x1c   :  { %387 = vmatprep.subr.bf16.mxu0 %v427_v37 }
  0x1f   :  { %388 = vmatpush3.bf16.msra.mxu0 %v429_v48 }
  0x22   :  { %271 = vmatmul.mubr.bf16.vlgmr.msra.gmra.mxu0 %v74_v56 }
  0x23   :  { %278 = vmatprep.mubr.bf16.mxu0 %v78_v60 }
  0x2a   :  { %279 = vmatmul.mubr.bf16.gmra.mxu0 %v77_v1 }
  0xd4   :  { %v411_v2 = vpop.f32.mrf.mxu1 }
  0xd6   :  { %v321_v4 = vpop.f32.mrf.mxu1 }
  0xd8   :  { %v412_v9 = vpop.f32.mrf.mxu1 }
  0xda   :  { %v324_v16 = vpop.f32.mrf.mxu1 }
  0xe2   :  { %v389_v3 = vpop.f32.mrf.mxu0 }
  0xe4   :  { %v390_v5 = vpop.f32.mrf.mxu0 }
  0xe5   :  { %v391_v7 = vadd.f32 %v390_v5, %v389_v3 }
  0xe6   :  { %v392_v8 = vpop.f32.mrf.mxu0 }
  0xe7   :  { %v273_v10 = vadd.f32 %v391_v7, %v352_v6 }
  0xe8   :  { %v393_v11 = vpop.f32.mrf.mxu0 }
  0xe9   :  { %v394_v13 = vadd.f32 %v393_v11, %v392_v8  ;;  %v322_v14 = vadd.f32 %v321_v4, %v273_v10 }
  0xea   :  { %v395_v15 = vpop.f32.mrf.mxu0 }
  0xeb   :  { %v340_v17 = vadd.f32 %v336_v12, %v322_v14  ;;  %v276_v18 = vadd.f32 %v394_v13, %v352_v6 }
  0xec   :  { %v396_v19 = vpop.f32.mrf.mxu0 }
  0xed   :  { %344 = vst.msk [vmem:[%s567_s4] sm:$0xff] %vm231_vm5, %v340_v17  ;;  %v397_v21 = vadd.f32 %v396_v19, %v395_v15  ;;  %v325_v22 = vadd.f32 %v324_v16, %v276_v18 }
  0xee   :  { %v398_v23 = vpop.f32.mrf.mxu0 }
  0xef   :  { %v281_v24 = vadd.f32 %v397_v21, %v352_v6  ;;  %v341_v25 = vadd.f32 %v337_v20, %v325_v22 }
  0xf0   :  { %v399_v27 = vpop.f32.mrf.mxu0 }
  0xf1   :  { %v330_v28 = vadd.f32 %v411_v2, %v281_v24  ;;  %345 = vst.msk [vmem:[%s567_s4 + $0x8] sm:$0xff] %vm231_vm5, %v341_v25  ;;  %v400_v29 = vadd.f32 %v399_v27, %v398_v23 }
  0xf3   :  { %v342_v30 = vadd.f32 %v338_v26, %v330_v28  ;;  %v284_v31 = vadd.f32 %v400_v29, %v352_v6 }
  0xf5   :  { %346 = vst.msk [vmem:[%s567_s4 + $0x10] sm:$0xff] %vm231_vm5, %v342_v30  ;;  %v333_v33 = vadd.f32 %v412_v9, %v284_v31 }
  0xf7   :  { %v343_v34 = vadd.f32 %v339_v32, %v333_v33 }
  0xf9   :  { %347 = vst.msk [vmem:[%s567_s4 + $0x18] sm:$0xff] %vm231_vm5, %v343_v34 }

// kernel: _lambda_.100
= control target key start
LH: loop header
LB: loop body
LE: loop exit
PB: predicated region body
PF: predicated region fallthrough
CT: control target
= control target key end

     0   :  { %v350_v1 = vmov 0.0   ;;  %vm351_vm0 = vmmov 0   ;;  %vm186_vm3 = vcmask 261120   ;;  %s448_s1 = inlined_call_operand.vmem [shape: bf16[288,32], index: 1, kind: input, shape index: {}]   ;;  %s449_s0 = inlined_call_operand.vmem [shape: bf16[8,288], index: 0, kind: input, shape index: {}]   ;;  %s450_s2 = inlined_call_operand.vmem [shape: f32[1,32], index: 2, kind: input, shape index: {}]   ;;  %s451_s3 = inlined_call_operand.vmem [shape: f32[8,32], index: 3, kind: input, shape index: {}]   ;;  %s452_s4 = inlined_call_operand.vmem [shape: f32[8,32], index: 4, kind: output, shape index: {}]  }
   0x1   :  { %v332_v0 = vld [vmem:[%s448_s1 + $0x78] sm:$0xff]   ;;  %322 = vmatprep.subr.bf16.mxu1 %v350_v1  ;;  %326 = vmatprep.mubr.msk.bf16.mxu1 %vm351_vm0, %v350_v1  ;;  %v334_v3 = vld [vmem:[%s448_s1 + $0x70] sm:$0xff]   ;;  %v336_v5 = vld [vmem:[%s448_s1 + $0x68] sm:$0xff]  }
   0x2   :  { %v333_v2 = vld [vmem:[%s448_s1 + $0x38] sm:$0xff]   ;;  %297 = vmatprep.subr.bf16.mxu0 %v332_v0  ;;  %v335_v4 = vld [vmem:[%s448_s1 + $0x30] sm:$0xff]   ;;  %v337_v6 = vld [vmem:[%s448_s1 + $0x28] sm:$0xff]  }
   0x3   :  { %298 = vmatpush3.bf16.msra.mxu0 %v333_v2  ;;  %v338_v7 = vld [vmem:[%s448_s1 + $0x60] sm:$0xff]   ;;  %v340_v9 = vld [vmem:[%s448_s1 + $0x58] sm:$0xff]   ;;  %v345_v10 = vld [vmem:[%s448_s1 + $0x88] sm:$0xff]  }
   0x4   :  { %299 = vmatprep.subr.bf16.mxu0 %v334_v3  ;;  %v339_v8 = vld [vmem:[%s448_s1 + $0x20] sm:$0xff]   ;;  %v341_v11 = vld [vmem:[%s448_s1 + $0x18] sm:$0xff]   ;;  %v342_v12 = vld [vmem:[%s448_s1 + $0x50] sm:$0xff]   ;;  %323 = vmatpush3.bf16.msra.mxu1 %v345_v10 }
   0x5   :  { %324 = vmatprep.subr.bf16.mxu1 %v350_v1  ;;  %v348_v13 = vld [vmem:[%s448_s1 + $0x80] sm:$0xff]   ;;  %v19_v15 = vld [vmem:[%s449_s0 + $0x8] sm:$0xf]  ;;  %v343_v16 = vld [vmem:[%s448_s1 + $0x10] sm:$0xff]  }
   0x6   :  { %v18_v14 = vld [vmem:[%s449_s0] sm:$0xff]  ;;  %v22_v19 = vunpack.c.l.bf16 %v19_v15  ;;  %v344_v20 = vld [vmem:[%s448_s1 + $0x48] sm:$0xff]  }
   0x7   :  { %300 = vmatpush3.bf16.msra.mxu0 %v335_v4  ;;  %v20_v17 = vunpack.c.l.bf16 %v18_v14  ;;  %v21_v18 = vunpack.c.h.bf16 %v18_v14  ;;  %v346_v23 = vld [vmem:[%s448_s1 + $0x8] sm:$0xff]   ;;  %v347_v27 = vld [vmem:[%s448_s1 + $0x40] sm:$0xff]  }
   0x8   :  { %301 = vmatprep.subr.bf16.mxu0 %v336_v5  ;;  %325 = vmatpush3.bf16.msra.mxu1 %v348_v13  ;;  %vm25_vm2 = vcmp.ge.f32.partialorder %v22_v19, 0.0  ;;  %v28_v22 = vmul.f32 0.01, %v22_v19  ;;  %v349_v30 = vld [vmem:[%s448_s1] sm:$0xff]  }
   0x9   :  { %vm24_vm1 = vcmp.ge.f32.partialorder %v21_v18, 0.0  ;;  %v27_v21 = vmul.f32 0.01, %v21_v18  ;;  %v26_v26 = vmul.f32 0.01, %v20_v17  ;;  %vm23_vm4 = vcmp.ge.f32.partialorder %v20_v17, 0.0 }
   0xa   :  { %v31_v25 = vsel %vm25_vm2, %v22_v19, %v28_v22  ;;  %v277_v38 = vld [vmem:[%s450_s2] ss:$0 sm:$0xff] }
   0xb   :  { %302 = vmatpush3.bf16.msra.mxu0 %v337_v6  ;;  %v30_v24 = vsel %vm24_vm1, %v21_v18, %v27_v21  ;;  %v34_v29 = vpack.c.bf16 %v31_v25, %v31_v25  ;;  %v29_v31 = vsel %vm23_vm4, %v20_v17, %v26_v26  ;;  %v270_v43 = vld [vmem:[%s451_s3] sm:$0xff] }
   0xc   :  { %303 = vmatprep.subr.bf16.mxu0 %v338_v7  ;;  %v33_v28 = vpack.c.bf16 %v30_v24, %v30_v24  ;;  %v32_v32 = vpack.c.bf16 %v29_v31, %v29_v31 }
   0xd   :  { %327 = vmatmul.mubr.msk.bf16.vlgmr.msra.gmra.mxu1 %vm186_vm3, %v34_v29 }
   0xe   :  { %222 = vmatprep.mubr.bf16.mxu0 %v33_v28 }
   0xf   :  { %304 = vmatpush3.bf16.msra.mxu0 %v339_v8 }
  0x10   :  { %305 = vmatprep.subr.bf16.mxu0 %v340_v9 }
  0x13   :  { %306 = vmatpush3.bf16.msra.mxu0 %v341_v11 }
  0x14   :  { %307 = vmatprep.subr.bf16.mxu0 %v342_v12 }
  0x17   :  { %308 = vmatpush3.bf16.msra.mxu0 %v343_v16 }
  0x18   :  { %309 = vmatprep.subr.bf16.mxu0 %v344_v20 }
  0x1b   :  { %310 = vmatpush3.bf16.msra.mxu0 %v346_v23 }
  0x1c   :  { %311 = vmatprep.subr.bf16.mxu0 %v347_v27 }
  0x1f   :  { %312 = vmatpush3.bf16.msra.mxu0 %v349_v30 }
  0x22   :  { %223 = vmatmul.mubr.bf16.vlgmr.msra.gmra.mxu0 %v32_v32 }
  0xcd   :  { %v264_v33 = vpop.f32.mrf.mxu1 }
  0xcf   :  { %v328_v34 = vpop.f32.mrf.mxu1 }
  0xd1   :  { %v267_v35 = vpop.f32.mrf.mxu1 }
  0xd3   :  { %v329_v36 = vpop.f32.mrf.mxu1 }
  0xe2   :  { %v313_v37 = vpop.f32.mrf.mxu0 }
  0xe4   :  { %v314_v39 = vpop.f32.mrf.mxu0 }
  0xe5   :  { %v315_v40 = vadd.f32 %v314_v39, %v313_v37 }
  0xe6   :  { %v316_v41 = vpop.f32.mrf.mxu0 }
  0xe7   :  { %v225_v42 = vadd.f32 %v315_v40, %v277_v38 }
  0xe8   :  { %v317_v44 = vpop.f32.mrf.mxu0 }
  0xe9   :  { %v265_v45 = vadd.f32 %v264_v33, %v225_v42 }
  0xeb   :  { %v271_v46 = vadd.f32 %v270_v43, %v265_v45 }
  0xed   :  { %272 = vst.msk [vmem:[%s452_s4] sm:$0xff] %vm186_vm3, %v271_v46 }

// kernel: _lambda_.99
= control target key start
LH: loop header
LB: loop body
LE: loop exit
PB: predicated region body
PF: predicated region fallthrough
CT: control target
= control target key end

     0   :  { %v346_v1 = vmov 0.0   ;;  %vm347_vm0 = vmmov 0   ;;  %vm178_vm1 = vcmask 261120   ;;  %s436_s1 = inlined_call_operand.vmem [shape: bf16[288,32], index: 1, kind: input, shape index: {}]   ;;  %s437_s0 = inlined_call_operand.vmem [shape: bf16[8,288], index: 0, kind: input, shape index: {}]   ;;  %s438_s2 = inlined_call_operand.vmem [shape: f32[1,32], index: 2, kind: input, shape index: {}]   ;;  %s439_s3 = inlined_call_operand.vmem [shape: f32[8,32], index: 3, kind: output, shape index: {}]  }
   0x1   :  { %v325_v0 = vld [vmem:[%s436_s1 + $0x78] sm:$0xff]   ;;  %315 = vmatprep.subr.bf16.mxu1 %v346_v1  ;;  %319 = vmatprep.mubr.msk.bf16.mxu1 %vm347_vm0, %v346_v1  ;;  %v327_v3 = vld [vmem:[%s436_s1 + $0x70] sm:$0xff]   ;;  %v329_v5 = vld [vmem:[%s436_s1 + $0x68] sm:$0xff]  }
   0x2   :  { %v326_v2 = vld [vmem:[%s436_s1 + $0x38] sm:$0xff]   ;;  %290 = vmatprep.subr.bf16.mxu0 %v325_v0  ;;  %v328_v4 = vld [vmem:[%s436_s1 + $0x30] sm:$0xff]   ;;  %v330_v6 = vld [vmem:[%s436_s1 + $0x28] sm:$0xff]  }
   0x3   :  { %291 = vmatpush3.bf16.msra.mxu0 %v326_v2  ;;  %v331_v7 = vld [vmem:[%s436_s1 + $0x60] sm:$0xff]   ;;  %v333_v9 = vld [vmem:[%s436_s1 + $0x58] sm:$0xff]   ;;  %v337_v10 = vld [vmem:[%s436_s1 + $0x88] sm:$0xff]  }
   0x4   :  { %292 = vmatprep.subr.bf16.mxu0 %v327_v3  ;;  %v332_v8 = vld [vmem:[%s436_s1 + $0x20] sm:$0xff]   ;;  %v334_v11 = vld [vmem:[%s436_s1 + $0x18] sm:$0xff]   ;;  %316 = vmatpush3.bf16.msra.mxu1 %v337_v10  ;;  %v335_v13 = vld [vmem:[%s436_s1 + $0x50] sm:$0xff]  }
   0x5   :  { %317 = vmatprep.subr.bf16.mxu1 %v346_v1  ;;  %v340_v12 = vld [vmem:[%s436_s1 + $0x80] sm:$0xff]   ;;  %v343_v14 = vld [vmem:[%s437_s0 + $0x8] ss:$0 sps:$4 sm:$0xff]   ;;  %v336_v16 = vld [vmem:[%s436_s1 + $0x10] sm:$0xff]  }
   0x6   :  { %v15_v15 = vld [vmem:[%s437_s0] sm:$0xff]  ;;  %v338_v18 = vld [vmem:[%s436_s1 + $0x48] sm:$0xff]  }
   0x7   :  { %293 = vmatpush3.bf16.msra.mxu0 %v328_v4  ;;  %v269_v17 = vcombine.high %v15_v15, %v15_v15  ;;  %v339_v19 = vld [vmem:[%s436_s1 + $0x8] sm:$0xff]   ;;  %v341_v20 = vld [vmem:[%s436_s1 + $0x40] sm:$0xff]   ;;  %v268_v22 = vcombine.low %v15_v15, %v15_v15 }
   0x8   :  { %294 = vmatprep.subr.bf16.mxu0 %v329_v5  ;;  %318 = vmatpush3.bf16.msra.mxu1 %v340_v12  ;;  %v342_v21 = vld [vmem:[%s436_s1] sm:$0xff]  }
   0x9   :  { %214 = vmatprep.mubr.bf16.mxu0 %v269_v17  ;;  %v267_v28 = vld [vmem:[%s438_s2] ss:$0 sm:$0xff] }
   0xb   :  { %295 = vmatpush3.bf16.msra.mxu0 %v330_v6  ;;  %320 = vmatmul.mubr.msk.bf16.vlgmr.msra.gmra.mxu1 %vm178_vm1, %v343_v14 }
   0xc   :  { %296 = vmatprep.subr.bf16.mxu0 %v331_v7 }
   0xf   :  { %297 = vmatpush3.bf16.msra.mxu0 %v332_v8 }
  0x10   :  { %298 = vmatprep.subr.bf16.mxu0 %v333_v9 }
  0x13   :  { %299 = vmatpush3.bf16.msra.mxu0 %v334_v11 }
  0x14   :  { %300 = vmatprep.subr.bf16.mxu0 %v335_v13 }
  0x17   :  { %301 = vmatpush3.bf16.msra.mxu0 %v336_v16 }
  0x18   :  { %302 = vmatprep.subr.bf16.mxu0 %v338_v18 }
  0x1b   :  { %303 = vmatpush3.bf16.msra.mxu0 %v339_v19 }
  0x1c   :  { %304 = vmatprep.subr.bf16.mxu0 %v341_v20 }
  0x1f   :  { %305 = vmatpush3.bf16.msra.mxu0 %v342_v21 }
  0x22   :  { %215 = vmatmul.mubr.bf16.vlgmr.msra.gmra.mxu0 %v268_v22 }
  0xcb   :  { %v256_v23 = vpop.f32.mrf.mxu1 }
  0xcd   :  { %v321_v24 = vpop.f32.mrf.mxu1 }
  0xcf   :  { %v259_v25 = vpop.f32.mrf.mxu1 }
  0xd1   :  { %v322_v26 = vpop.f32.mrf.mxu1 }
  0xe2   :  { %v306_v27 = vpop.f32.mrf.mxu0 }
  0xe4   :  { %v307_v29 = vpop.f32.mrf.mxu0 }
  0xe5   :  { %v308_v30 = vadd.f32 %v307_v29, %v306_v27 }
  0xe6   :  { %v309_v31 = vpop.f32.mrf.mxu0 }
  0xe7   :  { %v217_v32 = vadd.f32 %v308_v30, %v267_v28 }
  0xe8   :  { %v310_v33 = vpop.f32.mrf.mxu0 }
  0xe9   :  { %v257_v34 = vadd.f32 %v256_v23, %v217_v32 }
  0xeb   :  { %262 = vst.msk [vmem:[%s439_s3] sm:$0xff] %vm178_vm1, %v257_v34 }

// kernel: _lambda_.102
= control target key start
LH: loop header
LB: loop body
LE: loop exit
PB: predicated region body
PF: predicated region fallthrough
CT: control target
= control target key end

     0   :  { %v107_v0 = vmov 0.0   ;;  %vm108_vm0 = vmmov 0   ;;  %vm39_vm1 = vcmask 261120   ;;  %s144_s1 = inlined_call_operand.vmem [shape: bf16[32,32], index: 1, kind: input, shape index: {}]   ;;  %s145_s0 = inlined_call_operand.vmem [shape: bf16[8,32], index: 0, kind: input, shape index: {}]   ;;  %s146_s2 = inlined_call_operand.vmem [shape: f32[1,32], index: 2, kind: input, shape index: {}]   ;;  %s147_s3 = inlined_call_operand.vmem [shape: f32[8,32], index: 3, kind: output, shape index: {}]  }
   0x1   :  { %95 = vmatprep.subr.bf16.mxu0 %v107_v0  ;;  %v105_v1 = vld [vmem:[%s144_s1 + $0x8] sm:$0xff]   ;;  %99 = vmatprep.mubr.msk.bf16.mxu0 %vm108_vm0, %v107_v0  ;;  %v106_v2 = vld [vmem:[%s144_s1] sm:$0xff]  }
   0x2   :  { %96 = vmatpush3.bf16.msra.mxu0 %v105_v1  ;;  %v15_v3 = vld [vmem:[%s145_s0] sm:$0xf] }
   0x3   :  { %97 = vmatprep.subr.bf16.mxu0 %v107_v0  ;;  %v88_v4 = vld [vmem:[%s146_s2] ss:$0 sm:$0xff] }
   0x6   :  { %98 = vmatpush3.bf16.msra.mxu0 %v106_v2 }
   0x9   :  { %100 = vmatmul.mubr.msk.bf16.vlgmr.msra.gmra.mxu0 %vm39_vm1, %v15_v3 }
  0xc9   :  { %v77_v5 = vpop.f32.mrf.mxu0 }
  0xca   :  { %v78_v6 = vadd.f32 %v88_v4, %v77_v5 }
  0xcb   :  { %v101_v7 = vpop.f32.mrf.mxu0 }
  0xcc   :  { %83 = vst.msk [vmem:[%s147_s3] sm:$0xff] %vm39_vm1, %v78_v6 }
  0xcd   :  { %v80_v8 = vpop.f32.mrf.mxu0 }
  0xcf   :  { %v102_v9 = vpop.f32.mrf.mxu0 }

// kernel: _lambda_.103
= control target key start
LH: loop header
LB: loop body
LE: loop exit
PB: predicated region body
PF: predicated region fallthrough
CT: control target
= control target key end

     0   :  { %v112_v0 = vmov 0.0   ;;  %vm113_vm0 = vmmov 0   ;;  %vm44_vm2 = vcmask 261120   ;;  %s149_s1 = inlined_call_operand.vmem [shape: bf16[32,32], index: 1, kind: input, shape index: {}]   ;;  %s150_s0 = inlined_call_operand.vmem [shape: bf16[8,32], index: 0, kind: input, shape index: {}]   ;;  %s151_s2 = inlined_call_operand.vmem [shape: f32[1,32], index: 2, kind: input, shape index: {}]   ;;  %s152_s3 = inlined_call_operand.vmem [shape: f32[8,32], index: 3, kind: output, shape index: {}]  }
   0x1   :  { %100 = vmatprep.subr.bf16.mxu0 %v112_v0  ;;  %v110_v1 = vld [vmem:[%s149_s1 + $0x8] sm:$0xff]   ;;  %104 = vmatprep.mubr.msk.bf16.mxu0 %vm113_vm0, %v112_v0  ;;  %v111_v2 = vld [vmem:[%s149_s1] sm:$0xff]  }
   0x2   :  { %101 = vmatpush3.bf16.msra.mxu0 %v110_v1  ;;  %v15_v3 = vld [vmem:[%s150_s0] sm:$0xf] }
   0x3   :  { %102 = vmatprep.subr.bf16.mxu0 %v112_v0  ;;  %v16_v4 = vunpack.c.l.bf16 %v15_v3  ;;  %v93_v8 = vld [vmem:[%s151_s2] ss:$0 sm:$0xff] }
   0x5   :  { %vm17_vm1 = vcmp.ge.f32.partialorder %v16_v4, 0.0  ;;  %v18_v5 = vmul.f32 0.01, %v16_v4 }
   0x6   :  { %103 = vmatpush3.bf16.msra.mxu0 %v111_v2 }
   0x7   :  { %v19_v6 = vsel %vm17_vm1, %v16_v4, %v18_v5 }
   0x8   :  { %v20_v7 = vpack.c.bf16 %v19_v6, %v19_v6 }
   0xa   :  { %105 = vmatmul.mubr.msk.bf16.vlgmr.msra.gmra.mxu0 %vm44_vm2, %v20_v7 }
  0xca   :  { %v82_v9 = vpop.f32.mrf.mxu0 }
  0xcb   :  { %v83_v10 = vadd.f32 %v93_v8, %v82_v9 }
  0xcc   :  { %v106_v11 = vpop.f32.mrf.mxu0 }
  0xcd   :  { %88 = vst.msk [vmem:[%s152_s3] sm:$0xff] %vm44_vm2, %v83_v10 }
  0xce   :  { %v85_v12 = vpop.f32.mrf.mxu0 }
  0xd0   :  { %v107_v13 = vpop.f32.mrf.mxu0 }

// kernel: _lambda_.104
= control target key start
LH: loop header
LB: loop body
LE: loop exit
PB: predicated region body
PF: predicated region fallthrough
CT: control target
= control target key end

     0   :  { %v610_v35 = vmov 0.0   ;;  %vm611_vm4 = vmmov 0   ;;  %vm341_vm6 = vcmask 523264   ;;  %vm467_vm7 = vcmask 261120   ;;  %s763_s1 = inlined_call_operand.vmem [shape: bf16[576,32], index: 1, kind: input, shape index: {}]   ;;  %s764_s0 = inlined_call_operand.vmem [shape: bf16[8,576], index: 0, kind: input, shape index: {}]   ;;  %s765_s2 = inlined_call_operand.vmem [shape: f32[1,32], index: 2, kind: input, shape index: {}]   ;;  %s766_s3 = inlined_call_operand.vmem [shape: f32[8,32], index: 3, kind: input, shape index: {}]   ;;  %s767_s4 = inlined_call_operand.vmem [shape: f32[8,32], index: 4, kind: output, shape index: {}]  }
   0x1   :  { %v574_v0 = vld [vmem:[%s763_s1 + $0x78] sm:$0xff]   ;;  %v578_v4 = vld [vmem:[%s763_s1 + $0x70] sm:$0xff]   ;;  %v582_v8 = vld [vmem:[%s763_s1 + $0x68] sm:$0xff]  }
   0x2   :  { %v575_v1 = vld [vmem:[%s763_s1 + $0x38] sm:$0xff]   ;;  %511 = vmatprep.subr.bf16.mxu0 %v574_v0  ;;  %v579_v5 = vld [vmem:[%s763_s1 + $0x30] sm:$0xff]   ;;  %v583_v9 = vld [vmem:[%s763_s1 + $0x28] sm:$0xff]  }
   0x3   :  { %v576_v2 = vld [vmem:[%s763_s1 + $0xf8] sm:$0xff]   ;;  %512 = vmatpush3.bf16.msra.mxu0 %v575_v1  ;;  %v580_v6 = vld [vmem:[%s763_s1 + $0xf0] sm:$0xff]   ;;  %v584_v10 = vld [vmem:[%s763_s1 + $0xe8] sm:$0xff]  }
   0x4   :  { %v577_v3 = vld [vmem:[%s763_s1 + $0xb8] sm:$0xff]   ;;  %533 = vmatprep.subr.bf16.mxu1 %v576_v2  ;;  %513 = vmatprep.subr.bf16.mxu0 %v578_v4  ;;  %v581_v7 = vld [vmem:[%s763_s1 + $0xb0] sm:$0xff]   ;;  %v585_v11 = vld [vmem:[%s763_s1 + $0xa8] sm:$0xff]  }
   0x5   :  { %534 = vmatpush3.bf16.msra.mxu1 %v577_v3  ;;  %v586_v12 = vld [vmem:[%s763_s1 + $0x60] sm:$0xff]   ;;  %v590_v16 = vld [vmem:[%s763_s1 + $0x58] sm:$0xff]   ;;  %v594_v20 = vld [vmem:[%s763_s1 + $0x50] sm:$0xff]  }
   0x6   :  { %535 = vmatprep.subr.bf16.mxu1 %v580_v6  ;;  %v587_v13 = vld [vmem:[%s763_s1 + $0x20] sm:$0xff]   ;;  %v591_v17 = vld [vmem:[%s763_s1 + $0x18] sm:$0xff]   ;;  %v595_v21 = vld [vmem:[%s763_s1 + $0x10] sm:$0xff]  }
   0x7   :  { %514 = vmatpush3.bf16.msra.mxu0 %v579_v5  ;;  %v588_v14 = vld [vmem:[%s763_s1 + $0xe0] sm:$0xff]   ;;  %v592_v18 = vld [vmem:[%s763_s1 + $0xd8] sm:$0xff]   ;;  %v596_v22 = vld [vmem:[%s763_s1 + $0xd0] sm:$0xff]  }
   0x8   :  { %515 = vmatprep.subr.bf16.mxu0 %v582_v8  ;;  %v589_v15 = vld [vmem:[%s763_s1 + $0xa0] sm:$0xff]   ;;  %v593_v19 = vld [vmem:[%s763_s1 + $0x98] sm:$0xff]   ;;  %v597_v23 = vld [vmem:[%s763_s1 + $0x90] sm:$0xff]  }
   0x9   :  { %536 = vmatpush3.bf16.msra.mxu1 %v581_v7  ;;  %v598_v24 = vld [vmem:[%s763_s1 + $0x48] sm:$0xff]   ;;  %v602_v28 = vld [vmem:[%s763_s1 + $0x40] sm:$0xff]   ;;  %v606_v47 = vld [vmem:[%s763_s1 + $0x118] sm:$0xff]  }
   0xa   :  { %537 = vmatprep.subr.bf16.mxu1 %v584_v10  ;;  %v599_v25 = vld [vmem:[%s763_s1 + $0x8] sm:$0xff]   ;;  %v603_v29 = vld [vmem:[%s763_s1] sm:$0xff]   ;;  %v20_v48 = vld [vmem:[%s764_s0 + $0x10] sm:$0xf] }
   0xb   :  { %516 = vmatpush3.bf16.msra.mxu0 %v583_v9  ;;  %v600_v26 = vld [vmem:[%s763_s1 + $0xc8] sm:$0xff]   ;;  %v604_v30 = vld [vmem:[%s763_s1 + $0xc0] sm:$0xff]   ;;  %v25_v53 = vunpack.c.l.bf16 %v20_v48  ;;  %v607_v54 = vld [vmem:[%s763_s1 + $0x110] sm:$0xff]  }
   0xc   :  { %517 = vmatprep.subr.bf16.mxu0 %v586_v12  ;;  %v601_v27 = vld [vmem:[%s763_s1 + $0x88] sm:$0xff]   ;;  %v18_v31 = vld [vmem:[%s764_s0] sm:$0xff] }
   0xd   :  { %538 = vmatpush3.bf16.msra.mxu1 %v585_v11  ;;  %v21_v32 = vunpack.c.l.bf16 %v18_v31  ;;  %v22_v33 = vunpack.c.h.bf16 %v18_v31  ;;  %v605_v34 = vld [vmem:[%s763_s1 + $0x80] sm:$0xff]   ;;  %v19_v36 = vld [vmem:[%s764_s0 + $0x8] sm:$0xff]  ;;  %v35_v55 = vmul.f32 0.01, %v25_v53  ;;  %vm30_vm5 = vcmp.ge.f32.partialorder %v25_v53, 0.0 }
   0xe   :  { %539 = vmatprep.subr.bf16.mxu1 %v588_v14  ;;  %v23_v37 = vunpack.c.l.bf16 %v19_v36  ;;  %v24_v38 = vunpack.c.h.bf16 %v19_v36  ;;  %v608_v56 = vld [vmem:[%s763_s1 + $0x108] sm:$0xff]   ;;  %v609_v57 = vld [vmem:[%s763_s1 + $0x100] sm:$0xff]  }
   0xf   :  { %518 = vmatpush3.bf16.msra.mxu0 %v587_v13  ;;  %vm27_vm0 = vcmp.ge.f32.partialorder %v22_v33, 0.0  ;;  %v32_v39 = vmul.f32 0.01, %v22_v33  ;;  %vm26_vm1 = vcmp.ge.f32.partialorder %v21_v32, 0.0  ;;  %v31_v40 = vmul.f32 0.01, %v21_v32 }
  0x10   :  { %519 = vmatprep.subr.bf16.mxu0 %v590_v16  ;;  %vm29_vm2 = vcmp.ge.f32.partialorder %v24_v38, 0.0  ;;  %v34_v41 = vmul.f32 0.01, %v24_v38  ;;  %vm28_vm3 = vcmp.ge.f32.partialorder %v23_v37, 0.0  ;;  %v33_v43 = vmul.f32 0.01, %v23_v37 }
  0x11   :  { %540 = vmatpush3.bf16.msra.mxu1 %v589_v15  ;;  %v37_v42 = vsel %vm27_vm0, %v22_v33, %v32_v39  ;;  %v36_v45 = vsel %vm26_vm1, %v21_v32, %v31_v40  ;;  %v40_v58 = vsel %vm30_vm5, %v25_v53, %v35_v55  ;;  %v473_v5 = vld [vmem:[%s765_s2] ss:$0 sm:$0xff] }
  0x12   :  { %541 = vmatprep.subr.bf16.mxu1 %v592_v18  ;;  %v42_v44 = vpack.c.bf16 %v37_v42, %v37_v42  ;;  %v39_v46 = vsel %vm29_vm2, %v24_v38, %v34_v41  ;;  %v41_v49 = vpack.c.bf16 %v36_v45, %v36_v45  ;;  %v38_v51 = vsel %vm28_vm3, %v23_v37, %v33_v43  ;;  %v465_v10 = vld [vmem:[%s766_s3] sm:$0xff] }
  0x13   :  { %520 = vmatpush3.bf16.msra.mxu0 %v591_v17  ;;  %v44_v50 = vpack.c.bf16 %v39_v46, %v39_v46  ;;  %v43_v52 = vpack.c.bf16 %v38_v51, %v38_v51  ;;  %v45_v59 = vpack.c.bf16 %v40_v58, %v40_v58 }
  0x14   :  { %521 = vmatprep.subr.bf16.mxu0 %v594_v20  ;;  %377 = vmatprep.mubr.bf16.mxu0 %v42_v44 }
  0x15   :  { %542 = vmatpush3.bf16.msra.mxu1 %v593_v19  ;;  %417 = vmatprep.mubr.bf16.mxu1 %v44_v50 }
  0x16   :  { %543 = vmatprep.subr.bf16.mxu1 %v596_v22 }
  0x17   :  { %522 = vmatpush3.bf16.msra.mxu0 %v595_v21 }
  0x18   :  { %523 = vmatprep.subr.bf16.mxu0 %v598_v24 }
  0x19   :  { %544 = vmatpush3.bf16.msra.mxu1 %v597_v23 }
  0x1a   :  { %545 = vmatprep.subr.bf16.mxu1 %v600_v26 }
  0x1b   :  { %524 = vmatpush3.bf16.msra.mxu0 %v599_v25 }
  0x1c   :  { %525 = vmatprep.subr.bf16.mxu0 %v602_v28 }
  0x1d   :  { %546 = vmatpush3.bf16.msra.mxu1 %v601_v27 }
  0x1e   :  { %547 = vmatprep.subr.bf16.mxu1 %v604_v30 }
  0x1f   :  { %526 = vmatpush3.bf16.msra.mxu0 %v603_v29 }
  0x20   :  { %560 = vmatprep.subr.bf16.mxu0 %v610_v35 }
  0x21   :  { %548 = vmatpush3.bf16.msra.mxu1 %v605_v34 }
  0x22   :  { %378 = vmatmul.mubr.bf16.vlgmr.msra.gmra.mxu0 %v41_v49 }
  0x23   :  { %561 = vmatpush3.bf16.msra.mxu0 %v606_v47  ;;  %568 = vmatprep.mubr.msk.bf16.mxu0 %vm611_vm4, %v610_v35 }
  0x24   :  { %418 = vmatmul.mubr.bf16.vlgmr.msra.gmra.mxu1 %v43_v52  ;;  %562 = vmatprep.subr.bf16.mxu0 %v610_v35 }
  0x27   :  { %563 = vmatpush3.bf16.msra.mxu0 %v607_v54 }
  0x28   :  { %564 = vmatprep.subr.bf16.mxu0 %v610_v35 }
  0x2b   :  { %565 = vmatpush3.bf16.msra.mxu0 %v608_v56 }
  0x2c   :  { %566 = vmatprep.subr.bf16.mxu0 %v610_v35 }
  0x2f   :  { %567 = vmatpush3.bf16.msra.mxu0 %v609_v57 }
  0x32   :  { %569 = vmatmul.mubr.msk.bf16.vlgmr.msra.gmra.mxu0 %vm341_vm6, %v45_v59 }
  0xe2   :  { %v527_v60 = vpop.f32.mrf.mxu0 }
  0xe4   :  { %v549_v61 = vpop.f32.mrf.mxu1  ;;  %v528_v62 = vpop.f32.mrf.mxu0 }
  0xe5   :  { %v529_v3 = vadd.f32 %v528_v62, %v527_v60 }
  0xe6   :  { %v550_v63 = vpop.f32.mrf.mxu1  ;;  %v530_v0 = vpop.f32.mrf.mxu0 }
  0xe7   :  { %v380_v6 = vadd.f32 %v529_v3, %v473_v5  ;;  %v551_v7 = vadd.f32 %v550_v63, %v549_v61 }
  0xe8   :  { %v552_v1 = vpop.f32.mrf.mxu1  ;;  %v531_v2 = vpop.f32.mrf.mxu0 }
  0xe9   :  { %v420_v8 = vadd.f32 %v551_v7, %v380_v6 }
  0xea   :  { %v553_v4 = vpop.f32.mrf.mxu1 }
  0xf2   :  { %v459_v9 = vpop.f32.mrf.mxu0 }
  0xf3   :  { %v460_v11 = vadd.f32 %v459_v9, %v420_v8 }
  0xf4   :  { %v570_v12 = vpop.f32.mrf.mxu0 }
  0xf5   :  { %v466_v13 = vadd.f32 %v465_v10, %v460_v11 }
  0xf6   :  { %v462_v14 = vpop.f32.mrf.mxu0 }
  0xf7   :  { %468 = vst.msk [vmem:[%s767_s4] sm:$0xff] %vm467_vm7, %v466_v13 }
  0xf8   :  { %v571_v15 = vpop.f32.mrf.mxu0 }

// kernel: _lambda_.106
= control target key start
LH: loop header
LB: loop body
LE: loop exit
PB: predicated region body
PF: predicated region fallthrough
CT: control target
= control target key end

     0   :  { %v134_v0 = vmov 0.0   ;;  %vm135_vm0 = vmmov 0   ;;  %vm55_vm1 = vcmask 523264   ;;  %vm99_vm2 = vcmask 261120   ;;  %s177_s1 = inlined_call_operand.vmem [shape: bf16[64,32], index: 1, kind: input, shape index: {}]   ;;  %s178_s0 = inlined_call_operand.vmem [shape: bf16[8,64], index: 0, kind: input, shape index: {}]   ;;  %s179_s2 = inlined_call_operand.vmem [shape: f32[1,32], index: 2, kind: input, shape index: {}]   ;;  %s180_s3 = inlined_call_operand.vmem [shape: f32[8,32], index: 3, kind: output, shape index: {}]  }
   0x1   :  { %116 = vmatprep.subr.bf16.mxu0 %v134_v0  ;;  %v130_v1 = vld [vmem:[%s177_s1 + $0x18] sm:$0xff]   ;;  %124 = vmatprep.mubr.msk.bf16.mxu0 %vm135_vm0, %v134_v0  ;;  %v131_v2 = vld [vmem:[%s177_s1 + $0x10] sm:$0xff]   ;;  %v132_v3 = vld [vmem:[%s177_s1 + $0x8] sm:$0xff]  }
   0x2   :  { %117 = vmatpush3.bf16.msra.mxu0 %v130_v1  ;;  %v133_v4 = vld [vmem:[%s177_s1] sm:$0xff]  }
   0x3   :  { %118 = vmatprep.subr.bf16.mxu0 %v134_v0  ;;  %v15_v5 = vld [vmem:[%s178_s0] sm:$0xf] }
   0x4   :  { %v105_v6 = vld [vmem:[%s179_s2] ss:$0 sm:$0xff] }
   0x6   :  { %119 = vmatpush3.bf16.msra.mxu0 %v131_v2 }
   0x7   :  { %120 = vmatprep.subr.bf16.mxu0 %v134_v0 }
   0xa   :  { %121 = vmatpush3.bf16.msra.mxu0 %v132_v3 }
   0xb   :  { %122 = vmatprep.subr.bf16.mxu0 %v134_v0 }
   0xe   :  { %123 = vmatpush3.bf16.msra.mxu0 %v133_v4 }
  0x11   :  { %125 = vmatmul.mubr.msk.bf16.vlgmr.msra.gmra.mxu0 %vm55_vm1, %v15_v5 }
  0xd1   :  { %v93_v7 = vpop.f32.mrf.mxu0 }
  0xd2   :  { %v94_v8 = vadd.f32 %v105_v6, %v93_v7 }
  0xd3   :  { %v126_v9 = vpop.f32.mrf.mxu0 }
  0xd4   :  { %100 = vst.msk [vmem:[%s180_s3] sm:$0xff] %vm99_vm2, %v94_v8 }
  0xd5   :  { %v96_v10 = vpop.f32.mrf.mxu0 }
  0xd7   :  { %v127_v11 = vpop.f32.mrf.mxu0 }

// kernel: _lambda_.109
= control target key start
LH: loop header
LB: loop body
LE: loop exit
PB: predicated region body
PF: predicated region fallthrough
CT: control target
= control target key end

     0   :  { %v346_v1 = vmov 0.0   ;;  %vm347_vm0 = vmmov 0   ;;  %vm178_vm1 = vcmask 261120   ;;  %s434_s1 = inlined_call_operand.vmem [shape: bf16[288,128], index: 1, kind: input, shape index: {}]   ;;  %s435_s0 = inlined_call_operand.vmem [shape: bf16[8,288], index: 0, kind: input, shape index: {}]   ;;  %s436_s2 = inlined_call_operand.vmem [shape: f32[1,128], index: 2, kind: input, shape index: {}]   ;;  %s437_s3 = inlined_call_operand.vmem [shape: f32[8,128], index: 3, kind: output, shape index: {}]  }
   0x1   :  { %v325_v0 = vld [vmem:[%s434_s1 + $0x78] sm:$0xff]   ;;  %315 = vmatprep.subr.bf16.mxu1 %v346_v1  ;;  %319 = vmatprep.mubr.msk.bf16.mxu1 %vm347_vm0, %v346_v1  ;;  %v327_v3 = vld [vmem:[%s434_s1 + $0x70] sm:$0xff]   ;;  %v329_v5 = vld [vmem:[%s434_s1 + $0x68] sm:$0xff]  }
   0x2   :  { %v326_v2 = vld [vmem:[%s434_s1 + $0x38] sm:$0xff]   ;;  %290 = vmatprep.subr.bf16.mxu0 %v325_v0  ;;  %v328_v4 = vld [vmem:[%s434_s1 + $0x30] sm:$0xff]   ;;  %v330_v6 = vld [vmem:[%s434_s1 + $0x28] sm:$0xff]  }
   0x3   :  { %291 = vmatpush3.bf16.msra.mxu0 %v326_v2  ;;  %v331_v7 = vld [vmem:[%s434_s1 + $0x60] sm:$0xff]   ;;  %v333_v9 = vld [vmem:[%s434_s1 + $0x58] sm:$0xff]   ;;  %v337_v10 = vld [vmem:[%s434_s1 + $0x88] sm:$0xff]  }
   0x4   :  { %292 = vmatprep.subr.bf16.mxu0 %v327_v3  ;;  %v332_v8 = vld [vmem:[%s434_s1 + $0x20] sm:$0xff]   ;;  %v334_v11 = vld [vmem:[%s434_s1 + $0x18] sm:$0xff]   ;;  %316 = vmatpush3.bf16.msra.mxu1 %v337_v10  ;;  %v335_v13 = vld [vmem:[%s434_s1 + $0x50] sm:$0xff]  }
   0x5   :  { %317 = vmatprep.subr.bf16.mxu1 %v346_v1  ;;  %v340_v12 = vld [vmem:[%s434_s1 + $0x80] sm:$0xff]   ;;  %v343_v14 = vld [vmem:[%s435_s0 + $0x8] ss:$0 sps:$4 sm:$0xff]   ;;  %v336_v16 = vld [vmem:[%s434_s1 + $0x10] sm:$0xff]  }
   0x6   :  { %v15_v15 = vld [vmem:[%s435_s0] sm:$0xff]  ;;  %v338_v18 = vld [vmem:[%s434_s1 + $0x48] sm:$0xff]  }
   0x7   :  { %293 = vmatpush3.bf16.msra.mxu0 %v328_v4  ;;  %v269_v17 = vcombine.high %v15_v15, %v15_v15  ;;  %v339_v19 = vld [vmem:[%s434_s1 + $0x8] sm:$0xff]   ;;  %v341_v20 = vld [vmem:[%s434_s1 + $0x40] sm:$0xff]   ;;  %v268_v22 = vcombine.low %v15_v15, %v15_v15 }
   0x8   :  { %294 = vmatprep.subr.bf16.mxu0 %v329_v5  ;;  %318 = vmatpush3.bf16.msra.mxu1 %v340_v12  ;;  %v342_v21 = vld [vmem:[%s434_s1] sm:$0xff]  }
   0x9   :  { %214 = vmatprep.mubr.bf16.mxu0 %v269_v17  ;;  %v267_v28 = vld [vmem:[%s436_s2] ss:$0 sm:$0xff] }
   0xb   :  { %295 = vmatpush3.bf16.msra.mxu0 %v330_v6  ;;  %320 = vmatmul.mubr.msk.bf16.vlgmr.msra.gmra.mxu1 %vm178_vm1, %v343_v14 }
   0xc   :  { %296 = vmatprep.subr.bf16.mxu0 %v331_v7 }
   0xf   :  { %297 = vmatpush3.bf16.msra.mxu0 %v332_v8 }
  0x10   :  { %298 = vmatprep.subr.bf16.mxu0 %v333_v9 }
  0x13   :  { %299 = vmatpush3.bf16.msra.mxu0 %v334_v11 }
  0x14   :  { %300 = vmatprep.subr.bf16.mxu0 %v335_v13 }
  0x17   :  { %301 = vmatpush3.bf16.msra.mxu0 %v336_v16 }
  0x18   :  { %302 = vmatprep.subr.bf16.mxu0 %v338_v18 }
  0x1b   :  { %303 = vmatpush3.bf16.msra.mxu0 %v339_v19 }
  0x1c   :  { %304 = vmatprep.subr.bf16.mxu0 %v341_v20 }
  0x1f   :  { %305 = vmatpush3.bf16.msra.mxu0 %v342_v21 }
  0x22   :  { %215 = vmatmul.mubr.bf16.vlgmr.msra.gmra.mxu0 %v268_v22 }
  0xcb   :  { %v256_v23 = vpop.f32.mrf.mxu1 }
  0xcd   :  { %v321_v24 = vpop.f32.mrf.mxu1 }
  0xcf   :  { %v259_v25 = vpop.f32.mrf.mxu1 }
  0xd1   :  { %v322_v26 = vpop.f32.mrf.mxu1 }
  0xe2   :  { %v306_v27 = vpop.f32.mrf.mxu0 }
  0xe4   :  { %v307_v29 = vpop.f32.mrf.mxu0 }
  0xe5   :  { %v308_v30 = vadd.f32 %v307_v29, %v306_v27 }
  0xe6   :  { %v309_v31 = vpop.f32.mrf.mxu0 }
  0xe7   :  { %v217_v32 = vadd.f32 %v308_v30, %v267_v28 }
  0xe8   :  { %v310_v33 = vpop.f32.mrf.mxu0 }
  0xe9   :  { %v257_v34 = vadd.f32 %v256_v23, %v217_v32 }
  0xeb   :  { %262 = vst [vmem:[%s437_s3] sm:$0xff] %v257_v34 }

// kernel: _lambda_.110
= control target key start
LH: loop header
LB: loop body
LE: loop exit
PB: predicated region body
PF: predicated region fallthrough
CT: control target
= control target key end

     0   :  { %vm60_vm4 = vcmask 261120   ;;  %s205_s1 = inlined_call_operand.vmem [shape: bf16[32,32], index: 1, kind: input, shape index: {}]   ;;  %s206_s0 = inlined_call_operand.vmem [shape: bf16[32,32], index: 0, kind: input, shape index: {}]   ;;  %s207_s2 = inlined_call_operand.vmem [shape: f32[1,32], index: 2, kind: input, shape index: {}]   ;;  %s208_s3 = inlined_call_operand.vmem [shape: f32[32,32], index: 3, kind: output, shape index: {}]  }
   0x1   :  { %v150_v0 = vld [vmem:[%s205_s1 + $0x8] sm:$0xff]   ;;  %v151_v1 = vld [vmem:[%s205_s1] sm:$0xff]  }
   0x2   :  { %142 = vmatprep.subr.bf16.mxu0 %v150_v0  ;;  %v130_v2 = vld [vmem:[%s206_s0] sm:$0xff]   ;;  %v137_v3 = vld [vmem:[%s206_s0 + $0x8] sm:$0xff]  }
   0x3   :  { %143 = vmatpush3.bf16.msra.mxu0 %v150_v0  ;;  %v131_v4 = vunpack.c.l.bf16 %v130_v2  ;;  %v132_v5 = vunpack.c.h.bf16 %v130_v2  ;;  %v135_v6 = vunpack.c.l.bf16 %v137_v3  ;;  %v136_v7 = vunpack.c.h.bf16 %v137_v3  ;;  %v124_v18 = vld [vmem:[%s207_s2] ss:$0 sm:$0xff] }
   0x4   :  { %144 = vmatprep.subr.bf16.mxu0 %v151_v1 }
   0x5   :  { %vm23_vm0 = vcmp.ge.f32.partialorder %v131_v4, 0.0  ;;  %vm24_vm1 = vcmp.ge.f32.partialorder %v132_v5, 0.0  ;;  %v27_v8 = vmul.f32 0.01, %v131_v4  ;;  %v28_v9 = vmul.f32 0.01, %v132_v5 }
   0x6   :  { %vm25_vm2 = vcmp.ge.f32.partialorder %v135_v6, 0.0  ;;  %vm26_vm3 = vcmp.ge.f32.partialorder %v136_v7, 0.0  ;;  %v29_v10 = vmul.f32 0.01, %v135_v6  ;;  %v30_v11 = vmul.f32 0.01, %v136_v7 }
   0x7   :  { %145 = vmatpush3.bf16.msra.mxu0 %v151_v1  ;;  %v31_v12 = vsel %vm23_vm0, %v131_v4, %v27_v8  ;;  %v32_v13 = vsel %vm24_vm1, %v132_v5, %v28_v9 }
   0x8   :  { %v35_v14 = vpack.c.bf16 %v32_v13, %v31_v12  ;;  %v33_v15 = vsel %vm25_vm2, %v135_v6, %v29_v10  ;;  %v34_v16 = vsel %vm26_vm3, %v136_v7, %v30_v11 }
   0x9   :  { %v36_v17 = vpack.c.bf16 %v34_v16, %v33_v15 }
   0xa   :  { %146 = vmatprep.mubr.msk.bf16.mxu0 %vm60_vm4, %v35_v14 }
   0xb   :  { %147 = vmatmul.mubr.msk.bf16.vlgmr.msra.gmra.mxu0 %vm60_vm4, %v36_v17 }
  0xcb   :  { %v148_v19 = vpop.f32.mrf.mxu0 }
  0xcc   :  { %v110_v20 = vadd.f32 %v148_v19, %v124_v18 }
  0xcd   :  { %v101_v21 = vpop.f32.mrf.mxu0 }
  0xce   :  { %118 = vst.msk [vmem:[%s208_s3 + $0x10] sm:$0xff] %vm60_vm4, %v110_v20  ;;  %v102_v22 = vadd.f32 %v124_v18, %v101_v21 }
  0xcf   :  { %v149_v23 = vpop.f32.mrf.mxu0 }
  0xd0   :  { %116 = vst.msk [vmem:[%s208_s3] sm:$0xff] %vm60_vm4, %v102_v22  ;;  %v113_v24 = vadd.f32 %v149_v23, %v124_v18 }
  0xd1   :  { %v104_v25 = vpop.f32.mrf.mxu0 }
  0xd2   :  { %119 = vst.msk [vmem:[%s208_s3 + $0x18] sm:$0xff] %vm60_vm4, %v113_v24  ;;  %v105_v26 = vadd.f32 %v124_v18, %v104_v25 }
  0xd4   :  { %117 = vst.msk [vmem:[%s208_s3 + $0x8] sm:$0xff] %vm60_vm4, %v105_v26 }

// kernel: _lambda_.112
= control target key start
LH: loop header
LB: loop body
LE: loop exit
PB: predicated region body
PF: predicated region fallthrough
CT: control target
= control target key end

     0   :  { %v139_v0 = vmov 0.0   ;;  %vm140_vm0 = vmmov 0   ;;  %vm60_vm2 = vcmask 523264   ;;  %vm104_vm3 = vcmask 261120   ;;  %s182_s1 = inlined_call_operand.vmem [shape: bf16[64,32], index: 1, kind: input, shape index: {}]   ;;  %s183_s0 = inlined_call_operand.vmem [shape: bf16[8,64], index: 0, kind: input, shape index: {}]   ;;  %s184_s2 = inlined_call_operand.vmem [shape: f32[1,32], index: 2, kind: input, shape index: {}]   ;;  %s185_s3 = inlined_call_operand.vmem [shape: f32[8,32], index: 3, kind: output, shape index: {}]  }
   0x1   :  { %121 = vmatprep.subr.bf16.mxu0 %v139_v0  ;;  %v135_v1 = vld [vmem:[%s182_s1 + $0x18] sm:$0xff]   ;;  %129 = vmatprep.mubr.msk.bf16.mxu0 %vm140_vm0, %v139_v0  ;;  %v136_v2 = vld [vmem:[%s182_s1 + $0x10] sm:$0xff]   ;;  %v15_v3 = vld [vmem:[%s183_s0] sm:$0xf] }
   0x2   :  { %122 = vmatpush3.bf16.msra.mxu0 %v135_v1  ;;  %v16_v4 = vunpack.c.l.bf16 %v15_v3  ;;  %v137_v5 = vld [vmem:[%s182_s1 + $0x8] sm:$0xff]   ;;  %v138_v7 = vld [vmem:[%s182_s1] sm:$0xff]  }
   0x3   :  { %123 = vmatprep.subr.bf16.mxu0 %v139_v0  ;;  %v110_v10 = vld [vmem:[%s184_s2] ss:$0 sm:$0xff] }
   0x4   :  { %vm17_vm1 = vcmp.ge.f32.partialorder %v16_v4, 0.0  ;;  %v18_v6 = vmul.f32 0.01, %v16_v4 }
   0x6   :  { %124 = vmatpush3.bf16.msra.mxu0 %v136_v2  ;;  %v19_v8 = vsel %vm17_vm1, %v16_v4, %v18_v6 }
   0x7   :  { %125 = vmatprep.subr.bf16.mxu0 %v139_v0  ;;  %v20_v9 = vpack.c.bf16 %v19_v8, %v19_v8 }
   0xa   :  { %126 = vmatpush3.bf16.msra.mxu0 %v137_v5 }
   0xb   :  { %127 = vmatprep.subr.bf16.mxu0 %v139_v0 }
   0xe   :  { %128 = vmatpush3.bf16.msra.mxu0 %v138_v7 }
  0x11   :  { %130 = vmatmul.mubr.msk.bf16.vlgmr.msra.gmra.mxu0 %vm60_vm2, %v20_v9 }
  0xd1   :  { %v98_v11 = vpop.f32.mrf.mxu0 }
  0xd2   :  { %v99_v12 = vadd.f32 %v110_v10, %v98_v11 }
  0xd3   :  { %v131_v13 = vpop.f32.mrf.mxu0 }
  0xd4   :  { %105 = vst.msk [vmem:[%s185_s3] sm:$0xff] %vm104_vm3, %v99_v12 }
  0xd5   :  { %v101_v14 = vpop.f32.mrf.mxu0 }
  0xd7   :  { %v132_v15 = vpop.f32.mrf.mxu0 }

// kernel: _lambda_.111
= control target key start
LH: loop header
LB: loop body
LE: loop exit
PB: predicated region body
PF: predicated region fallthrough
CT: control target
= control target key end

     0   :  { %s930_s1 = inlined_call_operand.vmem [shape: bf16[576,32], index: 1, kind: input, shape index: {}]   ;;  %s931_s0 = inlined_call_operand.vmem [shape: bf16[32,576], index: 0, kind: input, shape index: {}]   ;;  %s932_s2 = inlined_call_operand.vmem [shape: f32[1,32], index: 2, kind: input, shape index: {}]   ;;  %s933_s3 = inlined_call_operand.vmem [shape: f32[32,32], index: 3, kind: input, shape index: {}]   ;;  %s934_s4 = inlined_call_operand.vmem [shape: f32[32,32], index: 4, kind: output, shape index: {}]  }
   0x1   :  { %v699_v0 = vld [vmem:[%s930_s1 + $0x78] sm:$0xff]   ;;  %v703_v4 = vld [vmem:[%s930_s1 + $0x70] sm:$0xff]   ;;  %v707_v8 = vld [vmem:[%s930_s1 + $0x68] sm:$0xff]  }
   0x2   :  { %v700_v1 = vld [vmem:[%s930_s1 + $0xf8] sm:$0xff]   ;;  %625 = vmatprep.subr.bf16.mxu0 %v699_v0  ;;  %v704_v5 = vld [vmem:[%s930_s1 + $0xf0] sm:$0xff]   ;;  %v708_v9 = vld [vmem:[%s930_s1 + $0xe8] sm:$0xff]  }
   0x3   :  { %v701_v2 = vld [vmem:[%s930_s1 + $0x38] sm:$0xff]   ;;  %653 = vmatprep.subr.bf16.mxu1 %v700_v1  ;;  %v705_v6 = vld [vmem:[%s930_s1 + $0x30] sm:$0xff]   ;;  %v709_v10 = vld [vmem:[%s930_s1 + $0x28] sm:$0xff]  }
   0x4   :  { %v702_v3 = vld [vmem:[%s930_s1 + $0xb8] sm:$0xff]   ;;  %626 = vmatpush3.bf16.msra.mxu0 %v701_v2  ;;  %v706_v7 = vld [vmem:[%s930_s1 + $0xb0] sm:$0xff]   ;;  %v710_v11 = vld [vmem:[%s930_s1 + $0xa8] sm:$0xff]  }
   0x5   :  { %654 = vmatpush3.bf16.msra.mxu1 %v702_v3  ;;  %627 = vmatprep.subr.bf16.mxu0 %v703_v4  ;;  %v711_v12 = vld [vmem:[%s930_s1 + $0x60] sm:$0xff]   ;;  %v715_v16 = vld [vmem:[%s930_s1 + $0x58] sm:$0xff]   ;;  %v719_v20 = vld [vmem:[%s930_s1 + $0x50] sm:$0xff]  }
   0x6   :  { %655 = vmatprep.subr.bf16.mxu1 %v704_v5  ;;  %v712_v13 = vld [vmem:[%s930_s1 + $0xe0] sm:$0xff]   ;;  %v716_v17 = vld [vmem:[%s930_s1 + $0xd8] sm:$0xff]   ;;  %v720_v21 = vld [vmem:[%s930_s1 + $0xd0] sm:$0xff]  }
   0x7   :  { %v713_v14 = vld [vmem:[%s930_s1 + $0x20] sm:$0xff]   ;;  %v717_v18 = vld [vmem:[%s930_s1 + $0x18] sm:$0xff]   ;;  %v721_v22 = vld [vmem:[%s930_s1 + $0x10] sm:$0xff]  }
   0x8   :  { %628 = vmatpush3.bf16.msra.mxu0 %v705_v6  ;;  %v714_v15 = vld [vmem:[%s930_s1 + $0xa0] sm:$0xff]   ;;  %v718_v19 = vld [vmem:[%s930_s1 + $0x98] sm:$0xff]   ;;  %v722_v23 = vld [vmem:[%s930_s1 + $0x90] sm:$0xff]  }
   0x9   :  { %656 = vmatpush3.bf16.msra.mxu1 %v706_v7  ;;  %629 = vmatprep.subr.bf16.mxu0 %v707_v8  ;;  %v723_v24 = vld [vmem:[%s930_s1 + $0x48] sm:$0xff]   ;;  %v727_v28 = vld [vmem:[%s930_s1 + $0x40] sm:$0xff]   ;;  %v21_v33 = vld [vmem:[%s931_s0 + $0x14] sm:$0xff] }
   0xa   :  { %657 = vmatprep.subr.bf16.mxu1 %v708_v9  ;;  %v724_v25 = vld [vmem:[%s930_s1 + $0xc8] sm:$0xff]   ;;  %v728_v29 = vld [vmem:[%s930_s1 + $0xc0] sm:$0xff]   ;;  %v35_v37 = vunpack.c.l.bf16 %v21_v33  ;;  %v36_v38 = vunpack.c.h.bf16 %v21_v33  ;;  %v731_v44 = vld [vmem:[%s930_s1 + $0x118] sm:$0xff]  }
   0xb   :  { %v725_v26 = vld [vmem:[%s930_s1 + $0x8] sm:$0xff]   ;;  %v729_v30 = vld [vmem:[%s930_s1] sm:$0xff]   ;;  %v25_v57 = vld [vmem:[%s931_s0 + $0x30] sm:$0xff] }
   0xc   :  { %630 = vmatpush3.bf16.msra.mxu0 %v709_v10  ;;  %v726_v27 = vld [vmem:[%s930_s1 + $0x88] sm:$0xff]   ;;  %v730_v31 = vld [vmem:[%s930_s1 + $0x80] sm:$0xff]   ;;  %vm56_vm1 = vcmp.ge.f32.partialorder %v36_v38, 0.0  ;;  %v76_v46 = vmul.f32 0.01, %v36_v38  ;;  %vm55_vm5 = vcmp.ge.f32.partialorder %v35_v37, 0.0  ;;  %v43_v3 = vunpack.c.h.bf16 %v25_v57 }
   0xd   :  { %658 = vmatpush3.bf16.msra.mxu1 %v710_v11  ;;  %631 = vmatprep.subr.bf16.mxu0 %v711_v12  ;;  %v18_v32 = vld [vmem:[%s931_s0] sm:$0xff]  ;;  %v19_v34 = vld [vmem:[%s931_s0 + $0x8] sm:$0xff]  ;;  %v75_v60 = vmul.f32 0.01, %v35_v37  ;;  %v732_v8 = vld [vmem:[%s930_s1 + $0x110] sm:$0xff]  }
   0xe   :  { %659 = vmatprep.subr.bf16.mxu1 %v712_v13  ;;  %v30_v35 = vunpack.c.l.bf16 %v18_v32  ;;  %v31_v36 = vunpack.c.h.bf16 %v18_v32  ;;  %v22_v39 = vld [vmem:[%s931_s0 + $0x1c] sm:$0xff]  ;;  %v32_v40 = vunpack.c.l.bf16 %v19_v34  ;;  %v33_v41 = vunpack.c.h.bf16 %v19_v34  ;;  %v24_v51 = vld [vmem:[%s931_s0 + $0x28] sm:$0xff] }
   0xf   :  { %v37_v42 = vunpack.c.l.bf16 %v22_v39  ;;  %v38_v43 = vunpack.c.h.bf16 %v22_v39  ;;  %v96_v50 = vsel %vm56_vm1, %v36_v38, %v76_v46  ;;  %v27_v52 = vld [vmem:[%s931_s0 + $0x3c] sm:$0xff]  ;;  %v28_v58 = vld [vmem:[%s931_s0 + $0x44] sm:$0xff]  ;;  %v41_v0 = vunpack.c.h.bf16 %v24_v51 }
  0x10   :  { %632 = vmatpush3.bf16.msra.mxu0 %v713_v14  ;;  %vm51_vm0 = vcmp.ge.f32.partialorder %v31_v36, 0.0  ;;  %v71_v45 = vmul.f32 0.01, %v31_v36  ;;  %vm53_vm2 = vcmp.ge.f32.partialorder %v33_v41, 0.0  ;;  %v73_v47 = vmul.f32 0.01, %v33_v41 }
  0x11   :  { %660 = vmatpush3.bf16.msra.mxu1 %v714_v15  ;;  %633 = vmatprep.subr.bf16.mxu0 %v715_v16  ;;  %vm58_vm3 = vcmp.ge.f32.partialorder %v38_v43, 0.0  ;;  %v78_v48 = vmul.f32 0.01, %v38_v43  ;;  %vm50_vm4 = vcmp.ge.f32.partialorder %v30_v35, 0.0  ;;  %v70_v56 = vmul.f32 0.01, %v30_v35 }
  0x12   :  { %661 = vmatprep.subr.bf16.mxu1 %v716_v17  ;;  %v91_v49 = vsel %vm51_vm0, %v31_v36, %v71_v45  ;;  %v93_v54 = vsel %vm53_vm2, %v33_v41, %v73_v47  ;;  %vm52_vm6 = vcmp.ge.f32.partialorder %v32_v40, 0.0  ;;  %vm57_vm7 = vcmp.ge.f32.partialorder %v37_v42, 0.0  ;;  %v734_v38 = vld [vmem:[%s930_s1 + $0x100] sm:$0xff]  }
  0x13   :  { %v111_v53 = vpack.c.bf16 %v96_v50, %v91_v49  ;;  %v98_v55 = vsel %vm58_vm3, %v38_v43, %v78_v48  ;;  %v90_v61 = vsel %vm50_vm4, %v30_v35, %v70_v56  ;;  %v72_v62 = vmul.f32 0.01, %v32_v40 }
  0x14   :  { %634 = vmatpush3.bf16.msra.mxu0 %v717_v18  ;;  %v113_v59 = vpack.c.bf16 %v98_v55, %v93_v54  ;;  %v77_v63 = vmul.f32 0.01, %v37_v42  ;;  %v95_v1 = vsel %vm55_vm5, %v35_v37, %v75_v60  ;;  %v46_v2 = vunpack.c.h.bf16 %v27_v52 }
  0x15   :  { %662 = vmatpush3.bf16.msra.mxu1 %v718_v19  ;;  %635 = vmatprep.subr.bf16.mxu0 %v719_v20  ;;  %v48_v4 = vunpack.c.h.bf16 %v28_v58  ;;  %v110_v5 = vpack.c.bf16 %v95_v1, %v90_v61  ;;  %v92_v6 = vsel %vm52_vm6, %v32_v40, %v72_v62  ;;  %vm61_vm8 = vcmp.ge.f32.partialorder %v41_v0, 0.0  ;;  %v586_v62 = vld [vmem:[%s932_s2] ss:$0 sm:$0xff] }
  0x16   :  { %663 = vmatprep.subr.bf16.mxu1 %v720_v21  ;;  %454 = vmatprep.mubr.bf16.mxu0 %v111_v53  ;;  %v97_v7 = vsel %vm57_vm7, %v37_v42, %v77_v63  ;;  %vm66_vm9 = vcmp.ge.f32.partialorder %v46_v2, 0.0  ;;  %v81_v10 = vmul.f32 0.01, %v41_v0  ;;  %v86_v11 = vmul.f32 0.01, %v46_v2 }
  0x17   :  { %503 = vmatprep.mubr.bf16.mxu1 %v113_v59  ;;  %v112_v9 = vpack.c.bf16 %v97_v7, %v92_v6  ;;  %vm63_vm10 = vcmp.ge.f32.partialorder %v43_v3, 0.0  ;;  %vm68_vm11 = vcmp.ge.f32.partialorder %v48_v4, 0.0  ;;  %v83_v12 = vmul.f32 0.01, %v43_v3 }
  0x18   :  { %636 = vmatpush3.bf16.msra.mxu0 %v721_v22  ;;  %v88_v13 = vmul.f32 0.01, %v48_v4  ;;  %v101_v14 = vsel %vm61_vm8, %v41_v0, %v81_v10  ;;  %v106_v15 = vsel %vm66_vm9, %v46_v2, %v86_v11  ;;  %v40_v16 = vunpack.c.l.bf16 %v24_v51  ;;  %v733_v22 = vld [vmem:[%s930_s1 + $0x108] sm:$0xff]  }
  0x19   :  { %664 = vmatpush3.bf16.msra.mxu1 %v722_v23  ;;  %637 = vmatprep.subr.bf16.mxu0 %v723_v24  ;;  %v45_v17 = vunpack.c.l.bf16 %v27_v52  ;;  %v116_v18 = vpack.c.bf16 %v106_v15, %v101_v14  ;;  %v103_v19 = vsel %vm63_vm10, %v43_v3, %v83_v12  ;;  %v42_v21 = vunpack.c.l.bf16 %v25_v57  ;;  %v20_v23 = vld [vmem:[%s931_s0 + $0x10] ss:$20 sps:$4 sm:$0xff]   ;;  %v26_v24 = vld [vmem:[%s931_s0 + $0x38] ss:$20 sps:$4 sm:$0xff]  }
  0x1a   :  { %665 = vmatprep.subr.bf16.mxu1 %v724_v25  ;;  %v108_v20 = vsel %vm68_vm11, %v48_v4, %v88_v13  ;;  %vm60_vm12 = vcmp.ge.f32.partialorder %v40_v16, 0.0  ;;  %v39_v32 = vunpack.c.h.bf16 %v20_v23  ;;  %v44_v33 = vunpack.c.l.bf16 %v26_v24  ;;  %v571_v15 = vld [vmem:[%s933_s3 + $0x10] sm:$0xff] }
  0x1b   :  { %v118_v25 = vpack.c.bf16 %v108_v20, %v103_v19  ;;  %vm65_vm13 = vcmp.ge.f32.partialorder %v45_v17, 0.0  ;;  %vm62_vm14 = vcmp.ge.f32.partialorder %v42_v21, 0.0  ;;  %v49_v42 = vunpack.c.h.bf16 %v26_v24 }
  0x1c   :  { %638 = vmatpush3.bf16.msra.mxu0 %v725_v26  ;;  %v80_v26 = vmul.f32 0.01, %v40_v16  ;;  %vm59_vm1 = vcmp.ge.f32.partialorder %v39_v32, 0.0  ;;  %v79_v41 = vmul.f32 0.01, %v39_v32  ;;  %vm64_vm2 = vcmp.ge.f32.partialorder %v44_v33, 0.0 }
  0x1d   :  { %666 = vmatpush3.bf16.msra.mxu1 %v726_v27  ;;  %639 = vmatprep.subr.bf16.mxu0 %v727_v28  ;;  %v85_v27 = vmul.f32 0.01, %v45_v17  ;;  %v47_v28 = vunpack.c.l.bf16 %v28_v58  ;;  %v84_v45 = vmul.f32 0.01, %v44_v33  ;;  %vm415_vm3 = vcmask 523264  }
  0x1e   :  { %667 = vmatprep.subr.bf16.mxu1 %v728_v29  ;;  %v82_v29 = vmul.f32 0.01, %v42_v21  ;;  %v99_v46 = vsel %vm59_vm1, %v39_v32, %v79_v41  ;;  %vm69_vm4 = vcmp.ge.f32.partialorder %v49_v42, 0.0  ;;  %v89_v47 = vmul.f32 0.01, %v49_v42 }
  0x1f   :  { %v105_v34 = vsel %vm65_vm13, %v45_v17, %v85_v27  ;;  %vm67_vm15 = vcmp.ge.f32.partialorder %v47_v28, 0.0  ;;  %v87_v35 = vmul.f32 0.01, %v47_v28  ;;  %v104_v49 = vsel %vm64_vm2, %v44_v33, %v84_v45  ;;  %v570_v33 = vld [vmem:[%s933_s3 + $0x8] sm:$0xff] }
  0x20   :  { %640 = vmatpush3.bf16.msra.mxu0 %v729_v30  ;;  %v100_v30 = vsel %vm60_vm12, %v40_v16, %v80_v26  ;;  %v102_v36 = vsel %vm62_vm14, %v42_v21, %v82_v29  ;;  %v109_v50 = vsel %vm69_vm4, %v49_v42, %v89_v47  ;;  %vm577_vm5 = vcmask 261120  }
  0x21   :  { %668 = vmatpush3.bf16.msra.mxu1 %v730_v31  ;;  %687 = vmatprep.subr.bf16.mxu0 %v731_v44  ;;  %v34_v31 = vunpack.c.l.bf16 %v20_v23  ;;  %v115_v37 = vpack.c.bf16 %v105_v34, %v100_v30  ;;  %v107_v40 = vsel %vm67_vm15, %v47_v28, %v87_v35  ;;  %v119_v51 = vpack.c.bf16 %v109_v50, %v104_v49  ;;  %v572_v28 = vld [vmem:[%s933_s3 + $0x18] sm:$0xff] }
  0x22   :  { %v117_v43 = vpack.c.bf16 %v107_v40, %v102_v36 }
  0x23   :  { %455 = vmatmul.mubr.bf16.vlgmr.msra.gmra.mxu0 %v110_v5  ;;  %vm54_vm0 = vcmp.ge.f32.partialorder %v34_v31, 0.0  ;;  %v74_v39 = vmul.f32 0.01, %v34_v31 }
  0x24   :  { %504 = vmatmul.mubr.bf16.vlgmr.msra.gmra.mxu1 %v112_v9  ;;  %688 = vmatpush3.bf16.msra.mxu0 %v731_v44 }
  0x25   :  { %689 = vmatprep.subr.bf16.mxu0 %v732_v8  ;;  %462 = vmatprep.mubr.bf16.mxu0 %v116_v18  ;;  %v94_v44 = vsel %vm54_vm0, %v34_v31, %v74_v39 }
  0x26   :  { %511 = vmatprep.mubr.bf16.mxu1 %v118_v25  ;;  %v114_v48 = vpack.c.bf16 %v99_v46, %v94_v44 }
  0x28   :  { %690 = vmatpush3.bf16.msra.mxu0 %v732_v8 }
  0x29   :  { %691 = vmatprep.subr.bf16.mxu0 %v733_v22 }
  0x2b   :  { %463 = vmatmul.mubr.bf16.gmra.mxu0 %v115_v37 }
  0x2c   :  { %692 = vmatpush3.bf16.msra.mxu0 %v733_v22  ;;  %512 = vmatmul.mubr.bf16.gmra.mxu1 %v117_v43  ;;  %v569_v22 = vld [vmem:[%s933_s3] sm:$0xff] }
  0x2d   :  { %693 = vmatprep.subr.bf16.mxu0 %v734_v38  ;;  %695 = vmatprep.mubr.msk.bf16.mxu0 %vm415_vm3, %v114_v48 }
  0x30   :  { %694 = vmatpush3.bf16.msra.mxu0 %v734_v38 }
  0x33   :  { %696 = vmatmul.mubr.msk.bf16.vlgmr.msra.gmra.mxu0 %vm415_vm3, %v119_v51 }
  0xe3   :  { %v641_v52 = vpop.f32.mrf.mxu0 }
  0xe4   :  { %v669_v53 = vpop.f32.mrf.mxu1 }
  0xe5   :  { %v642_v54 = vpop.f32.mrf.mxu0 }
  0xe6   :  { %v670_v55 = vpop.f32.mrf.mxu1  ;;  %v643_v60 = vadd.f32 %v642_v54, %v641_v52 }
  0xe7   :  { %v644_v56 = vpop.f32.mrf.mxu0  ;;  %v671_v3 = vadd.f32 %v670_v55, %v669_v53 }
  0xe8   :  { %v672_v57 = vpop.f32.mrf.mxu1  ;;  %v457_v2 = vadd.f32 %v643_v60, %v586_v62 }
  0xe9   :  { %v645_v58 = vpop.f32.mrf.mxu0 }
  0xea   :  { %v673_v59 = vpop.f32.mrf.mxu1  ;;  %v646_v6 = vadd.f32 %v645_v58, %v644_v56  ;;  %v506_v16 = vadd.f32 %v671_v3, %v457_v2 }
  0xeb   :  { %v647_v61 = vpop.f32.mrf.mxu0  ;;  %v674_v23 = vadd.f32 %v673_v59, %v672_v57 }
  0xec   :  { %v675_v63 = vpop.f32.mrf.mxu1  ;;  %v460_v17 = vadd.f32 %v646_v6, %v586_v62 }
  0xed   :  { %v648_v0 = vpop.f32.mrf.mxu0 }
  0xee   :  { %v649_v1 = vadd.f32 %v648_v0, %v647_v61  ;;  %v676_v4 = vpop.f32.mrf.mxu1  ;;  %v509_v31 = vadd.f32 %v674_v23, %v460_v17 }
  0xef   :  { %v650_v5 = vpop.f32.mrf.mxu0  ;;  %v677_v8 = vadd.f32 %v676_v4, %v675_v63 }
  0xf0   :  { %v465_v7 = vadd.f32 %v649_v1, %v586_v62  ;;  %v678_v9 = vpop.f32.mrf.mxu1 }
  0xf1   :  { %v651_v10 = vpop.f32.mrf.mxu0 }
  0xf2   :  { %v652_v11 = vadd.f32 %v651_v10, %v650_v5  ;;  %v514_v12 = vadd.f32 %v677_v8, %v465_v7  ;;  %v679_v13 = vpop.f32.mrf.mxu1 }
  0xf3   :  { %v697_v14 = vpop.f32.mrf.mxu0  ;;  %v680_v19 = vadd.f32 %v679_v13, %v678_v9 }
  0xf4   :  { %v468_v18 = vadd.f32 %v652_v11, %v586_v62  ;;  %v563_v20 = vadd.f32 %v697_v14, %v514_v12 }
  0xf5   :  { %v554_v21 = vpop.f32.mrf.mxu0 }
  0xf6   :  { %v575_v24 = vadd.f32 %v571_v15, %v563_v20  ;;  %v555_v25 = vadd.f32 %v554_v21, %v506_v16  ;;  %v517_v26 = vadd.f32 %v680_v19, %v468_v18 }
  0xf7   :  { %v698_v27 = vpop.f32.mrf.mxu0 }
  0xf8   :  { %580 = vst.msk [vmem:[%s934_s4 + $0x10] sm:$0xff] %vm577_vm5, %v575_v24  ;;  %v573_v29 = vadd.f32 %v569_v22, %v555_v25  ;;  %v566_v30 = vadd.f32 %v698_v27, %v517_v26 }
  0xf9   :  { %v557_v32 = vpop.f32.mrf.mxu0 }
  0xfa   :  { %578 = vst.msk [vmem:[%s934_s4] sm:$0xff] %vm577_vm5, %v573_v29  ;;  %v576_v34 = vadd.f32 %v572_v28, %v566_v30  ;;  %v558_v35 = vadd.f32 %v557_v32, %v509_v31 }
  0xfc   :  { %581 = vst.msk [vmem:[%s934_s4 + $0x18] sm:$0xff] %vm577_vm5, %v576_v34  ;;  %v574_v36 = vadd.f32 %v570_v33, %v558_v35 }
  0xfe   :  { %579 = vst.msk [vmem:[%s934_s4 + $0x8] sm:$0xff] %vm577_vm5, %v574_v36 }

// kernel: _lambda_.145
= control target key start
LH: loop header
LB: loop body
LE: loop exit
PB: predicated region body
PF: predicated region fallthrough
CT: control target
= control target key end

     0   :  { %v112_v0 = vmov 0.0   ;;  %vm113_vm0 = vmmov 0   ;;  %vm44_vm2 = vcmask 261120   ;;  %s149_s1 = inlined_call_operand.vmem [shape: bf16[32,128], index: 1, kind: input, shape index: {}]   ;;  %s150_s0 = inlined_call_operand.vmem [shape: bf16[8,32], index: 0, kind: input, shape index: {}]   ;;  %s151_s2 = inlined_call_operand.vmem [shape: f32[1,128], index: 2, kind: input, shape index: {}]   ;;  %s152_s3 = inlined_call_operand.vmem [shape: f32[8,128], index: 3, kind: output, shape index: {}]  }
   0x1   :  { %100 = vmatprep.subr.bf16.mxu0 %v112_v0  ;;  %v110_v1 = vld [vmem:[%s149_s1 + $0x8] sm:$0xff]   ;;  %104 = vmatprep.mubr.msk.bf16.mxu0 %vm113_vm0, %v112_v0  ;;  %v111_v2 = vld [vmem:[%s149_s1] sm:$0xff]  }
   0x2   :  { %101 = vmatpush3.bf16.msra.mxu0 %v110_v1  ;;  %v15_v3 = vld [vmem:[%s150_s0] sm:$0xf] }
   0x3   :  { %102 = vmatprep.subr.bf16.mxu0 %v112_v0  ;;  %v16_v4 = vunpack.c.l.bf16 %v15_v3  ;;  %v93_v8 = vld [vmem:[%s151_s2] ss:$0 sm:$0xff] }
   0x5   :  { %vm17_vm1 = vcmp.ge.f32.partialorder %v16_v4, 0.0  ;;  %v18_v5 = vmul.f32 0.01, %v16_v4 }
   0x6   :  { %103 = vmatpush3.bf16.msra.mxu0 %v111_v2 }
   0x7   :  { %v19_v6 = vsel %vm17_vm1, %v16_v4, %v18_v5 }
   0x8   :  { %v20_v7 = vpack.c.bf16 %v19_v6, %v19_v6 }
   0xa   :  { %105 = vmatmul.mubr.msk.bf16.vlgmr.msra.gmra.mxu0 %vm44_vm2, %v20_v7 }
  0xca   :  { %v82_v9 = vpop.f32.mrf.mxu0 }
  0xcb   :  { %v83_v10 = vadd.f32 %v93_v8, %v82_v9 }
  0xcc   :  { %v106_v11 = vpop.f32.mrf.mxu0 }
  0xcd   :  { %88 = vst [vmem:[%s152_s3] sm:$0xff] %v83_v10 }
  0xce   :  { %v85_v12 = vpop.f32.mrf.mxu0 }
  0xd0   :  { %v107_v13 = vpop.f32.mrf.mxu0 }

// kernel: _lambda_.153
= control target key start
LH: loop header
LB: loop body
LE: loop exit
PB: predicated region body
PF: predicated region fallthrough
CT: control target
= control target key end

     0   :  { %vm1124_vm0 = vmmov 0   ;;  %vm835_vm1 = vcmask 261120   ;;  %s1382_s1 = inlined_call_operand.vmem [shape: bf16[1152,32], index: 1, kind: input, shape index: {}]   ;;  %s1383_s0 = inlined_call_operand.vmem [shape: bf16[8,1152], index: 0, kind: input, shape index: {}]   ;;  %s1384_s2 = inlined_call_operand.vmem [shape: f32[1,32], index: 2, kind: input, shape index: {}]   ;;  %s1385_s3 = inlined_call_operand.vmem [shape: f32[8,32], index: 3, kind: output, shape index: {}]  }
   0x1   :  { %v1042_v0 = vld [vmem:[%s1382_s1 + $0x78] sm:$0xff]   ;;  %v1046_v4 = vld [vmem:[%s1382_s1 + $0x70] sm:$0xff]   ;;  %v1050_v8 = vld [vmem:[%s1382_s1 + $0x68] sm:$0xff]  }
   0x2   :  { %v1043_v1 = vld [vmem:[%s1382_s1 + $0x38] sm:$0xff]   ;;  %923 = vmatprep.subr.bf16.mxu0 %v1042_v0  ;;  %v1047_v5 = vld [vmem:[%s1382_s1 + $0x30] sm:$0xff]   ;;  %v1051_v9 = vld [vmem:[%s1382_s1 + $0x28] sm:$0xff]  }
   0x3   :  { %v1044_v2 = vld [vmem:[%s1382_s1 + $0xf8] sm:$0xff]   ;;  %924 = vmatpush3.bf16.msra.mxu0 %v1043_v1  ;;  %v1048_v6 = vld [vmem:[%s1382_s1 + $0xf0] sm:$0xff]   ;;  %v1052_v10 = vld [vmem:[%s1382_s1 + $0xe8] sm:$0xff]  }
   0x4   :  { %v1045_v3 = vld [vmem:[%s1382_s1 + $0xb8] sm:$0xff]   ;;  %945 = vmatprep.subr.bf16.mxu1 %v1044_v2  ;;  %925 = vmatprep.subr.bf16.mxu0 %v1046_v4  ;;  %v1049_v7 = vld [vmem:[%s1382_s1 + $0xb0] sm:$0xff]   ;;  %v1053_v11 = vld [vmem:[%s1382_s1 + $0xa8] sm:$0xff]  }
   0x5   :  { %946 = vmatpush3.bf16.msra.mxu1 %v1045_v3  ;;  %v1054_v12 = vld [vmem:[%s1382_s1 + $0x60] sm:$0xff]   ;;  %v1058_v16 = vld [vmem:[%s1382_s1 + $0x58] sm:$0xff]   ;;  %v1062_v20 = vld [vmem:[%s1382_s1 + $0x50] sm:$0xff]  }
   0x6   :  { %947 = vmatprep.subr.bf16.mxu1 %v1048_v6  ;;  %v1055_v13 = vld [vmem:[%s1382_s1 + $0x20] sm:$0xff]   ;;  %v1059_v17 = vld [vmem:[%s1382_s1 + $0x18] sm:$0xff]   ;;  %v1063_v21 = vld [vmem:[%s1382_s1 + $0x10] sm:$0xff]  }
   0x7   :  { %926 = vmatpush3.bf16.msra.mxu0 %v1047_v5  ;;  %v1056_v14 = vld [vmem:[%s1382_s1 + $0xe0] sm:$0xff]   ;;  %v1060_v18 = vld [vmem:[%s1382_s1 + $0xd8] sm:$0xff]   ;;  %v1064_v22 = vld [vmem:[%s1382_s1 + $0xd0] sm:$0xff]  }
   0x8   :  { %927 = vmatprep.subr.bf16.mxu0 %v1050_v8  ;;  %v1057_v15 = vld [vmem:[%s1382_s1 + $0xa0] sm:$0xff]   ;;  %v1061_v19 = vld [vmem:[%s1382_s1 + $0x98] sm:$0xff]   ;;  %v1065_v23 = vld [vmem:[%s1382_s1 + $0x90] sm:$0xff]  }
   0x9   :  { %948 = vmatpush3.bf16.msra.mxu1 %v1049_v7  ;;  %v1066_v24 = vld [vmem:[%s1382_s1 + $0x48] sm:$0xff]   ;;  %v1070_v28 = vld [vmem:[%s1382_s1 + $0x40] sm:$0xff]   ;;  %v1076_v35 = vld [vmem:[%s1382_s1 + $0x178] sm:$0xff]  }
   0xa   :  { %949 = vmatprep.subr.bf16.mxu1 %v1052_v10  ;;  %v1067_v25 = vld [vmem:[%s1382_s1 + $0x8] sm:$0xff]   ;;  %v1071_v29 = vld [vmem:[%s1382_s1] sm:$0xff]   ;;  %v1079_v39 = vld [vmem:[%s1382_s1 + $0x138] sm:$0xff]  }
   0xb   :  { %928 = vmatpush3.bf16.msra.mxu0 %v1051_v9  ;;  %v1068_v26 = vld [vmem:[%s1382_s1 + $0xc8] sm:$0xff]   ;;  %v1072_v30 = vld [vmem:[%s1382_s1 + $0xc0] sm:$0xff]   ;;  %v1080_v40 = vld [vmem:[%s1382_s1 + $0x1f8] sm:$0xff]   ;;  %v1123_v9 = vmov 0.0  }
   0xc   :  { %929 = vmatprep.subr.bf16.mxu0 %v1054_v12  ;;  %v1069_v27 = vld [vmem:[%s1382_s1 + $0x88] sm:$0xff]   ;;  %v15_v31 = vld [vmem:[%s1383_s0] sm:$0xff]  ;;  %v1081_v41 = vld [vmem:[%s1382_s1 + $0x1b8] sm:$0xff]  }
   0xd   :  { %950 = vmatpush3.bf16.msra.mxu1 %v1053_v11  ;;  %v842_v32 = vcombine.low %v15_v31, %v15_v31  ;;  %v843_v33 = vcombine.high %v15_v31, %v15_v31  ;;  %v1075_v34 = vld [vmem:[%s1382_s1 + $0x80] sm:$0xff]   ;;  %v16_v36 = vld [vmem:[%s1383_s0 + $0x8] sm:$0xff]  ;;  %v1082_v42 = vld [vmem:[%s1382_s1 + $0x170] sm:$0xff]  }
   0xe   :  { %951 = vmatprep.subr.bf16.mxu1 %v1056_v14  ;;  %v844_v37 = vcombine.low %v16_v36, %v16_v36  ;;  %v845_v38 = vcombine.high %v16_v36, %v16_v36  ;;  %v1083_v43 = vld [vmem:[%s1382_s1 + $0x130] sm:$0xff]   ;;  %v1086_v46 = vld [vmem:[%s1382_s1 + $0x168] sm:$0xff]   ;;  %v1090_v50 = vld [vmem:[%s1382_s1 + $0x160] sm:$0xff]  }
   0xf   :  { %930 = vmatpush3.bf16.msra.mxu0 %v1055_v13  ;;  %667 = vmatprep.mubr.bf16.mxu0 %v843_v33  ;;  %v1084_v44 = vld [vmem:[%s1382_s1 + $0x1f0] sm:$0xff]   ;;  %v1087_v47 = vld [vmem:[%s1382_s1 + $0x128] sm:$0xff]   ;;  %v1091_v51 = vld [vmem:[%s1382_s1 + $0x120] sm:$0xff]  }
  0x10   :  { %931 = vmatprep.subr.bf16.mxu0 %v1058_v16  ;;  %707 = vmatprep.mubr.bf16.mxu1 %v845_v38  ;;  %v1085_v45 = vld [vmem:[%s1382_s1 + $0x1b0] sm:$0xff]   ;;  %v1088_v48 = vld [vmem:[%s1382_s1 + $0x1e8] sm:$0xff]   ;;  %v1092_v52 = vld [vmem:[%s1382_s1 + $0x1e0] sm:$0xff]  }
  0x11   :  { %952 = vmatpush3.bf16.msra.mxu1 %v1057_v15  ;;  %v1089_v49 = vld [vmem:[%s1382_s1 + $0x1a8] sm:$0xff]   ;;  %v1093_v53 = vld [vmem:[%s1382_s1 + $0x1a0] sm:$0xff]   ;;  %v1094_v54 = vld [vmem:[%s1382_s1 + $0x158] sm:$0xff]  }
  0x12   :  { %953 = vmatprep.subr.bf16.mxu1 %v1060_v18  ;;  %v1095_v55 = vld [vmem:[%s1382_s1 + $0x118] sm:$0xff]   ;;  %v1098_v58 = vld [vmem:[%s1382_s1 + $0x150] sm:$0xff]   ;;  %v1102_v62 = vld [vmem:[%s1382_s1 + $0x148] sm:$0xff]  }
  0x13   :  { %932 = vmatpush3.bf16.msra.mxu0 %v1059_v17  ;;  %v1096_v56 = vld [vmem:[%s1382_s1 + $0x1d8] sm:$0xff]   ;;  %v1099_v59 = vld [vmem:[%s1382_s1 + $0x110] sm:$0xff]   ;;  %v1103_v63 = vld [vmem:[%s1382_s1 + $0x108] sm:$0xff]  }
  0x14   :  { %933 = vmatprep.subr.bf16.mxu0 %v1062_v20  ;;  %v1097_v57 = vld [vmem:[%s1382_s1 + $0x198] sm:$0xff]   ;;  %v1100_v60 = vld [vmem:[%s1382_s1 + $0x1d0] sm:$0xff]   ;;  %v1104_v0 = vld [vmem:[%s1382_s1 + $0x1c8] sm:$0xff]  }
  0x15   :  { %954 = vmatpush3.bf16.msra.mxu1 %v1061_v19  ;;  %v1101_v61 = vld [vmem:[%s1382_s1 + $0x190] sm:$0xff]   ;;  %v1105_v1 = vld [vmem:[%s1382_s1 + $0x188] sm:$0xff]   ;;  %v1106_v2 = vld [vmem:[%s1382_s1 + $0x140] sm:$0xff]  }
  0x16   :  { %955 = vmatprep.subr.bf16.mxu1 %v1064_v22  ;;  %v1107_v3 = vld [vmem:[%s1382_s1 + $0x100] sm:$0xff]   ;;  %v17_v5 = vld [vmem:[%s1383_s0 + $0x10] sm:$0xff]  ;;  %v18_v10 = vld [vmem:[%s1383_s0 + $0x18] sm:$0xff] }
  0x17   :  { %934 = vmatpush3.bf16.msra.mxu0 %v1063_v21  ;;  %v1108_v4 = vld [vmem:[%s1382_s1 + $0x1c0] sm:$0xff]   ;;  %v846_v6 = vcombine.low %v17_v5, %v17_v5  ;;  %v847_v7 = vcombine.high %v17_v5, %v17_v5  ;;  %v848_v11 = vcombine.low %v18_v10, %v18_v10  ;;  %v849_v12 = vcombine.high %v18_v10, %v18_v10  ;;  %v1114_v13 = vld [vmem:[%s1382_s1 + $0x238] sm:$0xff]   ;;  %v1115_v14 = vld [vmem:[%s1382_s1 + $0x230] sm:$0xff]  }
  0x18   :  { %935 = vmatprep.subr.bf16.mxu0 %v1066_v24  ;;  %v1111_v8 = vld [vmem:[%s1382_s1 + $0x180] sm:$0xff]   ;;  %v1116_v15 = vld [vmem:[%s1382_s1 + $0x228] sm:$0xff]   ;;  %v1118_v17 = vld [vmem:[%s1382_s1 + $0x218] sm:$0xff]  }
  0x19   :  { %956 = vmatpush3.bf16.msra.mxu1 %v1065_v23  ;;  %v1117_v16 = vld [vmem:[%s1382_s1 + $0x220] sm:$0xff]   ;;  %v1119_v18 = vld [vmem:[%s1382_s1 + $0x210] sm:$0xff]   ;;  %v1120_v19 = vld [vmem:[%s1382_s1 + $0x208] sm:$0xff]  }
  0x1a   :  { %957 = vmatprep.subr.bf16.mxu1 %v1068_v26  ;;  %v1121_v20 = vld [vmem:[%s1382_s1 + $0x200] sm:$0xff]  }
  0x1b   :  { %936 = vmatpush3.bf16.msra.mxu0 %v1067_v25  ;;  %v1122_v21 = vld [vmem:[%s1383_s0 + $0x20] ss:$0 sps:$4 sm:$0xff]  }
  0x1c   :  { %937 = vmatprep.subr.bf16.mxu0 %v1070_v28 }
  0x1d   :  { %958 = vmatpush3.bf16.msra.mxu1 %v1069_v27 }
  0x1e   :  { %959 = vmatprep.subr.bf16.mxu1 %v1072_v30 }
  0x1f   :  { %938 = vmatpush3.bf16.msra.mxu0 %v1071_v29 }
  0x20   :  { %967 = vmatprep.subr.bf16.mxu0 %v1076_v35 }
  0x21   :  { %960 = vmatpush3.bf16.msra.mxu1 %v1075_v34 }
  0x22   :  { %668 = vmatmul.mubr.bf16.vlgmr.msra.gmra.mxu0 %v842_v32  ;;  %989 = vmatprep.subr.bf16.mxu1 %v1080_v40 }
  0x23   :  { %968 = vmatpush3.bf16.msra.mxu0 %v1079_v39  ;;  %747 = vmatprep.mubr.bf16.mxu0 %v847_v7  ;;  %v841_v39 = vld [vmem:[%s1384_s2] ss:$0 sm:$0xff] }
  0x24   :  { %708 = vmatmul.mubr.bf16.vlgmr.msra.gmra.mxu1 %v844_v37  ;;  %969 = vmatprep.subr.bf16.mxu0 %v1082_v42 }
  0x25   :  { %990 = vmatpush3.bf16.msra.mxu1 %v1081_v41  ;;  %787 = vmatprep.mubr.bf16.mxu1 %v849_v12 }
  0x26   :  { %991 = vmatprep.subr.bf16.mxu1 %v1084_v44 }
  0x27   :  { %970 = vmatpush3.bf16.msra.mxu0 %v1083_v43 }
  0x28   :  { %971 = vmatprep.subr.bf16.mxu0 %v1086_v46 }
  0x29   :  { %992 = vmatpush3.bf16.msra.mxu1 %v1085_v45 }
  0x2a   :  { %993 = vmatprep.subr.bf16.mxu1 %v1088_v48 }
  0x2b   :  { %972 = vmatpush3.bf16.msra.mxu0 %v1087_v47 }
  0x2c   :  { %973 = vmatprep.subr.bf16.mxu0 %v1090_v50 }
  0x2d   :  { %994 = vmatpush3.bf16.msra.mxu1 %v1089_v49 }
  0x2e   :  { %995 = vmatprep.subr.bf16.mxu1 %v1092_v52 }
  0x2f   :  { %974 = vmatpush3.bf16.msra.mxu0 %v1091_v51 }
  0x30   :  { %975 = vmatprep.subr.bf16.mxu0 %v1094_v54 }
  0x31   :  { %996 = vmatpush3.bf16.msra.mxu1 %v1093_v53 }
  0x32   :  { %997 = vmatprep.subr.bf16.mxu1 %v1096_v56 }
  0x33   :  { %976 = vmatpush3.bf16.msra.mxu0 %v1095_v55 }
  0x34   :  { %977 = vmatprep.subr.bf16.mxu0 %v1098_v58 }
  0x35   :  { %998 = vmatpush3.bf16.msra.mxu1 %v1097_v57 }
  0x36   :  { %999 = vmatprep.subr.bf16.mxu1 %v1100_v60 }
  0x37   :  { %978 = vmatpush3.bf16.msra.mxu0 %v1099_v59 }
  0x38   :  { %979 = vmatprep.subr.bf16.mxu0 %v1102_v62 }
  0x39   :  { %1000 = vmatpush3.bf16.msra.mxu1 %v1101_v61 }
  0x3a   :  { %1001 = vmatprep.subr.bf16.mxu1 %v1104_v0 }
  0x3b   :  { %980 = vmatpush3.bf16.msra.mxu0 %v1103_v63 }
  0x3c   :  { %981 = vmatprep.subr.bf16.mxu0 %v1106_v2 }
  0x3d   :  { %1002 = vmatpush3.bf16.msra.mxu1 %v1105_v1 }
  0x3e   :  { %1003 = vmatprep.subr.bf16.mxu1 %v1108_v4 }
  0x3f   :  { %982 = vmatpush3.bf16.msra.mxu0 %v1107_v3 }
  0x40   :  { %1020 = vmatprep.subr.bf16.mxu0 %v1123_v9 }
  0x41   :  { %1004 = vmatpush3.bf16.msra.mxu1 %v1111_v8 }
  0x42   :  { %748 = vmatmul.mubr.bf16.vlgmr.msra.gmra.mxu0 %v846_v6 }
  0x43   :  { %1021 = vmatpush3.bf16.msra.mxu0 %v1114_v13  ;;  %1036 = vmatprep.mubr.msk.bf16.mxu0 %vm1124_vm0, %v1123_v9 }
  0x44   :  { %788 = vmatmul.mubr.bf16.vlgmr.msra.gmra.mxu1 %v848_v11  ;;  %1022 = vmatprep.subr.bf16.mxu0 %v1123_v9 }
  0x47   :  { %1023 = vmatpush3.bf16.msra.mxu0 %v1115_v14 }
  0x48   :  { %1024 = vmatprep.subr.bf16.mxu0 %v1123_v9 }
  0x4b   :  { %1025 = vmatpush3.bf16.msra.mxu0 %v1116_v15 }
  0x4c   :  { %1026 = vmatprep.subr.bf16.mxu0 %v1123_v9 }
  0x4f   :  { %1027 = vmatpush3.bf16.msra.mxu0 %v1117_v16 }
  0x50   :  { %1028 = vmatprep.subr.bf16.mxu0 %v1123_v9 }
  0x53   :  { %1029 = vmatpush3.bf16.msra.mxu0 %v1118_v17 }
  0x54   :  { %1030 = vmatprep.subr.bf16.mxu0 %v1123_v9 }
  0x57   :  { %1031 = vmatpush3.bf16.msra.mxu0 %v1119_v18 }
  0x58   :  { %1032 = vmatprep.subr.bf16.mxu0 %v1123_v9 }
  0x5b   :  { %1033 = vmatpush3.bf16.msra.mxu0 %v1120_v19 }
  0x5c   :  { %1034 = vmatprep.subr.bf16.mxu0 %v1123_v9 }
  0x5f   :  { %1035 = vmatpush3.bf16.msra.mxu0 %v1121_v20 }
  0x62   :  { %1037 = vmatmul.mubr.bf16.vlgmr.msra.gmra.mxu0 %v1122_v21 }
  0xe2   :  { %v939_v22 = vpop.f32.mrf.mxu0 }
  0xe4   :  { %v940_v23 = vpop.f32.mrf.mxu0  ;;  %v961_v24 = vpop.f32.mrf.mxu1 }
  0xe5   :  { %v941_v38 = vadd.f32 %v940_v23, %v939_v22 }
  0xe6   :  { %v942_v25 = vpop.f32.mrf.mxu0  ;;  %v962_v26 = vpop.f32.mrf.mxu1 }
  0xe7   :  { %v670_v40 = vadd.f32 %v941_v38, %v841_v39  ;;  %v963_v41 = vadd.f32 %v962_v26, %v961_v24 }
  0xe8   :  { %v943_v27 = vpop.f32.mrf.mxu0  ;;  %v964_v28 = vpop.f32.mrf.mxu1 }
  0xe9   :  { %v710_v43 = vadd.f32 %v963_v41, %v670_v40 }
  0xea   :  { %v965_v29 = vpop.f32.mrf.mxu1 }
 0x102   :  { %v983_v30 = vpop.f32.mrf.mxu0 }
 0x104   :  { %v984_v31 = vpop.f32.mrf.mxu0  ;;  %v1005_v32 = vpop.f32.mrf.mxu1 }
 0x105   :  { %v985_v42 = vadd.f32 %v984_v31, %v983_v30 }
 0x106   :  { %v986_v33 = vpop.f32.mrf.mxu0  ;;  %v1006_v34 = vpop.f32.mrf.mxu1 }
 0x107   :  { %v750_v44 = vadd.f32 %v985_v42, %v710_v43  ;;  %v1007_v45 = vadd.f32 %v1006_v34, %v1005_v32 }
 0x108   :  { %v987_v35 = vpop.f32.mrf.mxu0  ;;  %v1008_v36 = vpop.f32.mrf.mxu1 }
 0x109   :  { %v790_v46 = vadd.f32 %v1007_v45, %v750_v44 }
 0x10a   :  { %v1009_v37 = vpop.f32.mrf.mxu1 }
 0x122   :  { %v829_v47 = vpop.f32.mrf.mxu0 }
 0x123   :  { %v830_v48 = vadd.f32 %v829_v47, %v790_v46 }
 0x124   :  { %v1038_v49 = vpop.f32.mrf.mxu0 }
 0x125   :  { %836 = vst.msk [vmem:[%s1385_s3] sm:$0xff] %vm835_vm1, %v830_v48 }
 0x126   :  { %v832_v50 = vpop.f32.mrf.mxu0 }
 0x128   :  { %v1039_v51 = vpop.f32.mrf.mxu0 }

// kernel: _lambda_.146
= control target key start
LH: loop header
LB: loop body
LE: loop exit
PB: predicated region body
PF: predicated region fallthrough
CT: control target
= control target key end

     0   :  { %s2623_s1 = inlined_call_operand.vmem [shape: bf16[2304,128], index: 1, kind: input, shape index: {}]   ;;  %s2624_s0 = inlined_call_operand.vmem [shape: bf16[8,2304], index: 0, kind: input, shape index: {}]   ;;  %s2625_s2 = inlined_call_operand.vmem [shape: f32[1,128], index: 2, kind: input, shape index: {}]   ;;  %s2626_s3 = inlined_call_operand.vmem [shape: f32[8,128], index: 3, kind: input, shape index: {}]   ;;  %s2627_s4 = inlined_call_operand.vmem [shape: f32[8,128], index: 4, kind: output, shape index: {}]  }
   0x1   :  { %v1986_v0 = vld [vmem:[%s2623_s1 + $0x78] sm:$0xff]   ;;  %v1990_v4 = vld [vmem:[%s2623_s1 + $0x70] sm:$0xff]   ;;  %v1994_v8 = vld [vmem:[%s2623_s1 + $0x68] sm:$0xff]  }
   0x2   :  { %v1987_v1 = vld [vmem:[%s2623_s1 + $0x38] sm:$0xff]   ;;  %1788 = vmatprep.subr.bf16.mxu0 %v1986_v0  ;;  %v1991_v5 = vld [vmem:[%s2623_s1 + $0x30] sm:$0xff]   ;;  %v1995_v9 = vld [vmem:[%s2623_s1 + $0x28] sm:$0xff]  }
   0x3   :  { %v1988_v2 = vld [vmem:[%s2623_s1 + $0xf8] sm:$0xff]   ;;  %1789 = vmatpush3.bf16.msra.mxu0 %v1987_v1  ;;  %v1992_v6 = vld [vmem:[%s2623_s1 + $0xf0] sm:$0xff]   ;;  %v1996_v10 = vld [vmem:[%s2623_s1 + $0xe8] sm:$0xff]  }
   0x4   :  { %v1989_v3 = vld [vmem:[%s2623_s1 + $0xb8] sm:$0xff]   ;;  %1810 = vmatprep.subr.bf16.mxu1 %v1988_v2  ;;  %1790 = vmatprep.subr.bf16.mxu0 %v1990_v4  ;;  %v1993_v7 = vld [vmem:[%s2623_s1 + $0xb0] sm:$0xff]   ;;  %v1997_v11 = vld [vmem:[%s2623_s1 + $0xa8] sm:$0xff]  }
   0x5   :  { %1811 = vmatpush3.bf16.msra.mxu1 %v1989_v3  ;;  %v1998_v12 = vld [vmem:[%s2623_s1 + $0x60] sm:$0xff]   ;;  %v2002_v16 = vld [vmem:[%s2623_s1 + $0x58] sm:$0xff]   ;;  %v2006_v20 = vld [vmem:[%s2623_s1 + $0x50] sm:$0xff]  }
   0x6   :  { %1812 = vmatprep.subr.bf16.mxu1 %v1992_v6  ;;  %v1999_v13 = vld [vmem:[%s2623_s1 + $0x20] sm:$0xff]   ;;  %v2003_v17 = vld [vmem:[%s2623_s1 + $0x18] sm:$0xff]   ;;  %v2007_v21 = vld [vmem:[%s2623_s1 + $0x10] sm:$0xff]  }
   0x7   :  { %1791 = vmatpush3.bf16.msra.mxu0 %v1991_v5  ;;  %v2000_v14 = vld [vmem:[%s2623_s1 + $0xe0] sm:$0xff]   ;;  %v2004_v18 = vld [vmem:[%s2623_s1 + $0xd8] sm:$0xff]   ;;  %v2008_v22 = vld [vmem:[%s2623_s1 + $0xd0] sm:$0xff]  }
   0x8   :  { %1792 = vmatprep.subr.bf16.mxu0 %v1994_v8  ;;  %v2001_v15 = vld [vmem:[%s2623_s1 + $0xa0] sm:$0xff]   ;;  %v2005_v19 = vld [vmem:[%s2623_s1 + $0x98] sm:$0xff]   ;;  %v2009_v23 = vld [vmem:[%s2623_s1 + $0x90] sm:$0xff]  }
   0x9   :  { %1813 = vmatpush3.bf16.msra.mxu1 %v1993_v7  ;;  %v2010_v24 = vld [vmem:[%s2623_s1 + $0x48] sm:$0xff]   ;;  %v2014_v28 = vld [vmem:[%s2623_s1 + $0x40] sm:$0xff]   ;;  %v2018_v35 = vld [vmem:[%s2623_s1 + $0x178] sm:$0xff]  }
   0xa   :  { %1814 = vmatprep.subr.bf16.mxu1 %v1996_v10  ;;  %v2011_v25 = vld [vmem:[%s2623_s1 + $0x8] sm:$0xff]   ;;  %v2015_v29 = vld [vmem:[%s2623_s1] sm:$0xff]   ;;  %v2020_v43 = vld [vmem:[%s2623_s1 + $0x1f8] sm:$0xff]  }
   0xb   :  { %1793 = vmatpush3.bf16.msra.mxu0 %v1995_v9  ;;  %v2012_v26 = vld [vmem:[%s2623_s1 + $0xc8] sm:$0xff]   ;;  %v2016_v30 = vld [vmem:[%s2623_s1 + $0xc0] sm:$0xff]   ;;  %v2019_v47 = vld [vmem:[%s2623_s1 + $0x138] sm:$0xff]  }
   0xc   :  { %1794 = vmatprep.subr.bf16.mxu0 %v1998_v12  ;;  %v2013_v27 = vld [vmem:[%s2623_s1 + $0x88] sm:$0xff]   ;;  %v18_v31 = vld [vmem:[%s2624_s0] sm:$0xff]  ;;  %v2021_v49 = vld [vmem:[%s2623_s1 + $0x1b8] sm:$0xff]  }
   0xd   :  { %1815 = vmatpush3.bf16.msra.mxu1 %v1997_v11  ;;  %v27_v32 = vunpack.c.l.bf16 %v18_v31  ;;  %v28_v33 = vunpack.c.h.bf16 %v18_v31  ;;  %v2017_v34 = vld [vmem:[%s2623_s1 + $0x80] sm:$0xff]   ;;  %v19_v36 = vld [vmem:[%s2624_s0 + $0x8] sm:$0xff]  ;;  %v2022_v50 = vld [vmem:[%s2623_s1 + $0x170] sm:$0xff]  }
   0xe   :  { %1816 = vmatprep.subr.bf16.mxu1 %v2000_v14  ;;  %v29_v39 = vunpack.c.l.bf16 %v19_v36  ;;  %v30_v40 = vunpack.c.h.bf16 %v19_v36  ;;  %v2023_v54 = vld [vmem:[%s2623_s1 + $0x130] sm:$0xff]   ;;  %v2026_v58 = vld [vmem:[%s2623_s1 + $0x168] sm:$0xff]   ;;  %v2030_v62 = vld [vmem:[%s2623_s1 + $0x160] sm:$0xff]  }
   0xf   :  { %1795 = vmatpush3.bf16.msra.mxu0 %v1999_v13  ;;  %vm46_vm0 = vcmp.ge.f32.partialorder %v28_v33, 0.0  ;;  %v64_v37 = vmul.f32 0.01, %v28_v33  ;;  %vm45_vm1 = vcmp.ge.f32.partialorder %v27_v32, 0.0  ;;  %v63_v38 = vmul.f32 0.01, %v27_v32 }
  0x10   :  { %1796 = vmatprep.subr.bf16.mxu0 %v2002_v16  ;;  %vm48_vm2 = vcmp.ge.f32.partialorder %v30_v40, 0.0  ;;  %v66_v46 = vmul.f32 0.01, %v30_v40  ;;  %vm47_vm3 = vcmp.ge.f32.partialorder %v29_v39, 0.0  ;;  %v65_v48 = vmul.f32 0.01, %v29_v39 }
  0x11   :  { %1817 = vmatpush3.bf16.msra.mxu1 %v2001_v15  ;;  %v82_v41 = vsel %vm46_vm0, %v28_v33, %v64_v37  ;;  %v81_v42 = vsel %vm45_vm1, %v27_v32, %v63_v38  ;;  %v2024_v56 = vld [vmem:[%s2623_s1 + $0x1f0] sm:$0xff]   ;;  %v2027_v59 = vld [vmem:[%s2623_s1 + $0x128] sm:$0xff]   ;;  %v2031_v63 = vld [vmem:[%s2623_s1 + $0x120] sm:$0xff]  }
  0x12   :  { %1818 = vmatprep.subr.bf16.mxu1 %v2004_v18  ;;  %v100_v44 = vpack.c.bf16 %v82_v41, %v82_v41  ;;  %v99_v45 = vpack.c.bf16 %v81_v42, %v81_v42  ;;  %v84_v51 = vsel %vm48_vm2, %v30_v40, %v66_v46  ;;  %v83_v53 = vsel %vm47_vm3, %v29_v39, %v65_v48  ;;  %v2025_v57 = vld [vmem:[%s2623_s1 + $0x1b0] sm:$0xff]   ;;  %v2028_v60 = vld [vmem:[%s2623_s1 + $0x1e8] sm:$0xff]   ;;  %v2032_v0 = vld [vmem:[%s2623_s1 + $0x1e0] sm:$0xff]  }
  0x13   :  { %1797 = vmatpush3.bf16.msra.mxu0 %v2003_v17  ;;  %v102_v52 = vpack.c.bf16 %v84_v51, %v84_v51  ;;  %v101_v55 = vpack.c.bf16 %v83_v53, %v83_v53  ;;  %v2029_v61 = vld [vmem:[%s2623_s1 + $0x1a8] sm:$0xff]   ;;  %v2033_v1 = vld [vmem:[%s2623_s1 + $0x1a0] sm:$0xff]   ;;  %v2034_v2 = vld [vmem:[%s2623_s1 + $0x158] sm:$0xff]  }
  0x14   :  { %1798 = vmatprep.subr.bf16.mxu0 %v2006_v20  ;;  %1308 = vmatprep.mubr.bf16.mxu0 %v100_v44  ;;  %v2035_v3 = vld [vmem:[%s2623_s1 + $0x118] sm:$0xff]   ;;  %v2038_v6 = vld [vmem:[%s2623_s1 + $0x150] sm:$0xff]   ;;  %v2042_v10 = vld [vmem:[%s2623_s1 + $0x148] sm:$0xff]  }
  0x15   :  { %1819 = vmatpush3.bf16.msra.mxu1 %v2005_v19  ;;  %1348 = vmatprep.mubr.bf16.mxu1 %v102_v52  ;;  %v2036_v4 = vld [vmem:[%s2623_s1 + $0x1d8] sm:$0xff]   ;;  %v2039_v7 = vld [vmem:[%s2623_s1 + $0x110] sm:$0xff]   ;;  %v2043_v11 = vld [vmem:[%s2623_s1 + $0x108] sm:$0xff]  }
  0x16   :  { %1820 = vmatprep.subr.bf16.mxu1 %v2008_v22  ;;  %v2037_v5 = vld [vmem:[%s2623_s1 + $0x198] sm:$0xff]   ;;  %v2040_v8 = vld [vmem:[%s2623_s1 + $0x1d0] sm:$0xff]   ;;  %v2044_v12 = vld [vmem:[%s2623_s1 + $0x1c8] sm:$0xff]  }
  0x17   :  { %1799 = vmatpush3.bf16.msra.mxu0 %v2007_v21  ;;  %v2041_v9 = vld [vmem:[%s2623_s1 + $0x190] sm:$0xff]   ;;  %v2045_v13 = vld [vmem:[%s2623_s1 + $0x188] sm:$0xff]   ;;  %v2046_v14 = vld [vmem:[%s2623_s1 + $0x140] sm:$0xff]  }
  0x18   :  { %1800 = vmatprep.subr.bf16.mxu0 %v2010_v24  ;;  %v2047_v15 = vld [vmem:[%s2623_s1 + $0x100] sm:$0xff]   ;;  %v20_v17 = vld [vmem:[%s2624_s0 + $0x10] sm:$0xff]  ;;  %v2050_v21 = vld [vmem:[%s2623_s1 + $0x278] sm:$0xff]  }
  0x19   :  { %1821 = vmatpush3.bf16.msra.mxu1 %v2009_v23  ;;  %v2048_v16 = vld [vmem:[%s2623_s1 + $0x1c0] sm:$0xff]   ;;  %v31_v18 = vunpack.c.l.bf16 %v20_v17  ;;  %v32_v19 = vunpack.c.h.bf16 %v20_v17  ;;  %v21_v22 = vld [vmem:[%s2624_s0 + $0x18] sm:$0xff]  ;;  %v2054_v36 = vld [vmem:[%s2623_s1 + $0x270] sm:$0xff]  }
  0x1a   :  { %1822 = vmatprep.subr.bf16.mxu1 %v2012_v26  ;;  %v2049_v20 = vld [vmem:[%s2623_s1 + $0x180] sm:$0xff]   ;;  %v34_v26 = vunpack.c.h.bf16 %v21_v22  ;;  %v2051_v33 = vld [vmem:[%s2623_s1 + $0x238] sm:$0xff]   ;;  %v2055_v40 = vld [vmem:[%s2623_s1 + $0x230] sm:$0xff]  }
  0x1b   :  { %1801 = vmatpush3.bf16.msra.mxu0 %v2011_v25  ;;  %vm50_vm4 = vcmp.ge.f32.partialorder %v32_v19, 0.0  ;;  %v68_v23 = vmul.f32 0.01, %v32_v19  ;;  %vm49_vm5 = vcmp.ge.f32.partialorder %v31_v18, 0.0  ;;  %v67_v24 = vmul.f32 0.01, %v31_v18 }
  0x1c   :  { %1802 = vmatprep.subr.bf16.mxu0 %v2014_v28  ;;  %v33_v25 = vunpack.c.l.bf16 %v21_v22  ;;  %vm52_vm6 = vcmp.ge.f32.partialorder %v34_v26, 0.0  ;;  %v70_v32 = vmul.f32 0.01, %v34_v26  ;;  %v2056_v42 = vld [vmem:[%s2623_s1 + $0x2f0] sm:$0xff]   ;;  %v2058_v44 = vld [vmem:[%s2623_s1 + $0x268] sm:$0xff]   ;;  %v2062_v48 = vld [vmem:[%s2623_s1 + $0x260] sm:$0xff]  }
  0x1d   :  { %1823 = vmatpush3.bf16.msra.mxu1 %v2013_v27  ;;  %v86_v27 = vsel %vm50_vm4, %v32_v19, %v68_v23  ;;  %v85_v28 = vsel %vm49_vm5, %v31_v18, %v67_v24  ;;  %v2060_v46 = vld [vmem:[%s2623_s1 + $0x2e8] sm:$0xff]   ;;  %v2065_v51 = vld [vmem:[%s2623_s1 + $0x2a0] sm:$0xff]   ;;  %v2066_v52 = vld [vmem:[%s2623_s1 + $0x258] sm:$0xff]  }
  0x1e   :  { %1824 = vmatprep.subr.bf16.mxu1 %v2016_v30  ;;  %v104_v30 = vpack.c.bf16 %v86_v27, %v86_v27  ;;  %v103_v31 = vpack.c.bf16 %v85_v28, %v85_v28  ;;  %vm51_vm7 = vcmp.ge.f32.partialorder %v33_v25, 0.0  ;;  %v88_v37 = vsel %vm52_vm6, %v34_v26, %v70_v32  ;;  %v2067_v53 = vld [vmem:[%s2623_s1 + $0x218] sm:$0xff]   ;;  %v2086_v24 = vld [vmem:[%s2623_s1 + $0x370] sm:$0xff]   ;;  %v2092_v32 = vld [vmem:[%s2623_s1 + $0x3e8] sm:$0xff]  }
  0x1f   :  { %1803 = vmatpush3.bf16.msra.mxu0 %v2015_v29  ;;  %v2052_v29 = vld [vmem:[%s2623_s1 + $0x2f8] sm:$0xff]   ;;  %v106_v38 = vpack.c.bf16 %v88_v37, %v88_v37  ;;  %v2087_v27 = vld [vmem:[%s2623_s1 + $0x330] sm:$0xff]   ;;  %v2097_v37 = vld [vmem:[%s2623_s1 + $0x3a0] sm:$0xff]  }
  0x20   :  { %1832 = vmatprep.subr.bf16.mxu0 %v2018_v35  ;;  %v2053_v35 = vld [vmem:[%s2623_s1 + $0x2b8] sm:$0xff]   ;;  %v2088_v28 = vld [vmem:[%s2623_s1 + $0x3f0] sm:$0xff]  }
  0x21   :  { %1825 = vmatpush3.bf16.msra.mxu1 %v2017_v34  ;;  %v69_v34 = vmul.f32 0.01, %v33_v25  ;;  %v2084_v18 = vld [vmem:[%s2623_s1 + $0x3f8] sm:$0xff]  }
  0x22   :  { %1854 = vmatprep.subr.bf16.mxu1 %v2020_v43  ;;  %1309 = vmatmul.mubr.bf16.vlgmr.msra.gmra.mxu0 %v99_v45  ;;  %v2057_v43 = vld [vmem:[%s2623_s1 + $0x2b0] sm:$0xff]   ;;  %v2059_v45 = vld [vmem:[%s2623_s1 + $0x228] sm:$0xff]  }
  0x23   :  { %1833 = vmatpush3.bf16.msra.mxu0 %v2019_v47  ;;  %1388 = vmatprep.mubr.bf16.mxu0 %v104_v30  ;;  %v87_v39 = vsel %vm51_vm7, %v33_v25, %v69_v34  ;;  %v2061_v47 = vld [vmem:[%s2623_s1 + $0x2a8] sm:$0xff]   ;;  %v2094_v34 = vld [vmem:[%s2623_s1 + $0x360] sm:$0xff]  }
  0x24   :  { %1834 = vmatprep.subr.bf16.mxu0 %v2022_v50  ;;  %1349 = vmatmul.mubr.bf16.vlgmr.msra.gmra.mxu1 %v101_v55  ;;  %v105_v41 = vpack.c.bf16 %v87_v39, %v87_v39  ;;  %v2064_v50 = vld [vmem:[%s2623_s1 + $0x2e0] sm:$0xff]   ;;  %v2069_v55 = vld [vmem:[%s2623_s1 + $0x298] sm:$0xff]   ;;  %v2090_v30 = vld [vmem:[%s2623_s1 + $0x368] sm:$0xff]  }
  0x25   :  { %1855 = vmatpush3.bf16.msra.mxu1 %v2021_v49  ;;  %1428 = vmatprep.mubr.bf16.mxu1 %v106_v38  ;;  %v2063_v49 = vld [vmem:[%s2623_s1 + $0x220] sm:$0xff]   ;;  %v2098_v38 = vld [vmem:[%s2623_s1 + $0x358] sm:$0xff]  }
  0x26   :  { %1856 = vmatprep.subr.bf16.mxu1 %v2024_v56  ;;  %v2070_v56 = vld [vmem:[%s2623_s1 + $0x250] sm:$0xff]   ;;  %v2099_v39 = vld [vmem:[%s2623_s1 + $0x318] sm:$0xff]  }
  0x27   :  { %1835 = vmatpush3.bf16.msra.mxu0 %v2023_v54  ;;  %v2068_v54 = vld [vmem:[%s2623_s1 + $0x2d8] sm:$0xff]  }
  0x28   :  { %1836 = vmatprep.subr.bf16.mxu0 %v2026_v58  ;;  %v2072_v58 = vld [vmem:[%s2623_s1 + $0x2d0] sm:$0xff]  }
  0x29   :  { %1857 = vmatpush3.bf16.msra.mxu1 %v2025_v57  ;;  %v2071_v57 = vld [vmem:[%s2623_s1 + $0x210] sm:$0xff]  }
  0x2a   :  { %1858 = vmatprep.subr.bf16.mxu1 %v2028_v60  ;;  %v2074_v60 = vld [vmem:[%s2623_s1 + $0x248] sm:$0xff]  }
  0x2b   :  { %1837 = vmatpush3.bf16.msra.mxu0 %v2027_v59  ;;  %v2073_v59 = vld [vmem:[%s2623_s1 + $0x290] sm:$0xff]  }
  0x2c   :  { %1838 = vmatprep.subr.bf16.mxu0 %v2030_v62  ;;  %v2076_v62 = vld [vmem:[%s2623_s1 + $0x2c8] sm:$0xff]  }
  0x2d   :  { %1859 = vmatpush3.bf16.msra.mxu1 %v2029_v61  ;;  %v2075_v61 = vld [vmem:[%s2623_s1 + $0x208] sm:$0xff]  }
  0x2e   :  { %1860 = vmatprep.subr.bf16.mxu1 %v2032_v0  ;;  %v2078_v0 = vld [vmem:[%s2623_s1 + $0x240] sm:$0xff]  }
  0x2f   :  { %1839 = vmatpush3.bf16.msra.mxu0 %v2031_v63  ;;  %v2077_v63 = vld [vmem:[%s2623_s1 + $0x288] sm:$0xff]  }
  0x30   :  { %1840 = vmatprep.subr.bf16.mxu0 %v2034_v2  ;;  %v2080_v2 = vld [vmem:[%s2623_s1 + $0x2c0] sm:$0xff]  }
  0x31   :  { %1861 = vmatpush3.bf16.msra.mxu1 %v2033_v1  ;;  %v2079_v1 = vld [vmem:[%s2623_s1 + $0x200] sm:$0xff]  }
  0x32   :  { %1862 = vmatprep.subr.bf16.mxu1 %v2036_v4 }
  0x33   :  { %1841 = vmatpush3.bf16.msra.mxu0 %v2035_v3  ;;  %v22_v3 = vld [vmem:[%s2624_s0 + $0x20] sm:$0xff] }
  0x34   :  { %1842 = vmatprep.subr.bf16.mxu0 %v2038_v6  ;;  %v35_v4 = vunpack.c.l.bf16 %v22_v3  ;;  %v2081_v6 = vld [vmem:[%s2623_s1 + $0x280] sm:$0xff]  }
  0x35   :  { %1863 = vmatpush3.bf16.msra.mxu1 %v2037_v5  ;;  %v36_v5 = vunpack.c.h.bf16 %v22_v3 }
  0x36   :  { %1864 = vmatprep.subr.bf16.mxu1 %v2040_v8  ;;  %vm53_vm9 = vcmp.ge.f32.partialorder %v35_v4, 0.0 }
  0x37   :  { %1843 = vmatpush3.bf16.msra.mxu0 %v2039_v7  ;;  %v2082_v7 = vld [vmem:[%s2623_s1 + $0x378] sm:$0xff]   ;;  %vm54_vm8 = vcmp.ge.f32.partialorder %v36_v5, 0.0  ;;  %v72_v8 = vmul.f32 0.01, %v36_v5 }
  0x38   :  { %1844 = vmatprep.subr.bf16.mxu0 %v2042_v10  ;;  %v23_v10 = vld [vmem:[%s2624_s0 + $0x28] sm:$0xff] }
  0x39   :  { %1865 = vmatpush3.bf16.msra.mxu1 %v2041_v9  ;;  %v71_v9 = vmul.f32 0.01, %v35_v4 }
  0x3a   :  { %1866 = vmatprep.subr.bf16.mxu1 %v2044_v12 }
  0x3b   :  { %1845 = vmatpush3.bf16.msra.mxu0 %v2043_v11  ;;  %v90_v11 = vsel %vm54_vm8, %v36_v5, %v72_v8  ;;  %v89_v12 = vsel %vm53_vm9, %v35_v4, %v71_v9  ;;  %v2115_v4 = vld [vmem:[%s2623_s1 + $0x438] sm:$0xff]  }
  0x3c   :  { %1846 = vmatprep.subr.bf16.mxu0 %v2046_v14  ;;  %v38_v14 = vunpack.c.h.bf16 %v23_v10  ;;  %v107_v17 = vpack.c.bf16 %v89_v12, %v89_v12  ;;  %v2118_v12 = vld [vmem:[%s2623_s1 + $0x468] sm:$0xff]  }
  0x3d   :  { %1867 = vmatpush3.bf16.msra.mxu1 %v2045_v13  ;;  %v37_v13 = vunpack.c.l.bf16 %v23_v10 }
  0x3e   :  { %1868 = vmatprep.subr.bf16.mxu1 %v2048_v16  ;;  %v108_v16 = vpack.c.bf16 %v90_v11, %v90_v11  ;;  %vm56_vm10 = vcmp.ge.f32.partialorder %v38_v14, 0.0  ;;  %v74_v19 = vmul.f32 0.01, %v38_v14  ;;  %v2117_v11 = vld [vmem:[%s2623_s1 + $0x430] sm:$0xff]  }
  0x3f   :  { %1847 = vmatpush3.bf16.msra.mxu0 %v2047_v15  ;;  %v2083_v15 = vld [vmem:[%s2623_s1 + $0x338] sm:$0xff]   ;;  %vm55_vm11 = vcmp.ge.f32.partialorder %v37_v13, 0.0 }
  0x40   :  { %1876 = vmatprep.subr.bf16.mxu0 %v2050_v21  ;;  %v2085_v21 = vld [vmem:[%s2623_s1 + $0x3b8] sm:$0xff]   ;;  %v92_v22 = vsel %vm56_vm10, %v38_v14, %v74_v19  ;;  %v2120_v14 = vld [vmem:[%s2623_s1 + $0x460] sm:$0xff]  }
  0x41   :  { %1869 = vmatpush3.bf16.msra.mxu1 %v2049_v20  ;;  %v73_v20 = vmul.f32 0.01, %v37_v13  ;;  %v110_v25 = vpack.c.bf16 %v92_v22, %v92_v22  ;;  %v2123_v19 = vld [vmem:[%s2623_s1 + $0x418] sm:$0xff]  }
  0x42   :  { %1898 = vmatprep.subr.bf16.mxu1 %v2052_v29  ;;  %1389 = vmatmul.mubr.bf16.vlgmr.msra.gmra.mxu0 %v103_v31  ;;  %v2089_v29 = vld [vmem:[%s2623_s1 + $0x3b0] sm:$0xff]   ;;  %v2091_v31 = vld [vmem:[%s2623_s1 + $0x328] sm:$0xff]  }
  0x43   :  { %1877 = vmatpush3.bf16.msra.mxu0 %v2051_v33  ;;  %1468 = vmatprep.mubr.bf16.mxu0 %v108_v16  ;;  %v91_v23 = vsel %vm55_vm11, %v37_v13, %v73_v20  ;;  %v2093_v33 = vld [vmem:[%s2623_s1 + $0x3a8] sm:$0xff]   ;;  %v2122_v16 = vld [vmem:[%s2623_s1 + $0x458] sm:$0xff]  }
  0x44   :  { %1878 = vmatprep.subr.bf16.mxu0 %v2054_v36  ;;  %1429 = vmatmul.mubr.bf16.vlgmr.msra.gmra.mxu1 %v105_v41  ;;  %v109_v26 = vpack.c.bf16 %v91_v23, %v91_v23  ;;  %v2096_v36 = vld [vmem:[%s2623_s1 + $0x3e0] sm:$0xff]   ;;  %v2101_v41 = vld [vmem:[%s2623_s1 + $0x398] sm:$0xff]   ;;  %v2119_v13 = vld [vmem:[%s2623_s1 + $0x428] sm:$0xff]  }
  0x45   :  { %1899 = vmatpush3.bf16.msra.mxu1 %v2053_v35  ;;  %1508 = vmatprep.mubr.bf16.mxu1 %v110_v25  ;;  %v2095_v35 = vld [vmem:[%s2623_s1 + $0x320] sm:$0xff]  }
  0x46   :  { %1900 = vmatprep.subr.bf16.mxu1 %v2056_v42  ;;  %v2102_v42 = vld [vmem:[%s2623_s1 + $0x350] sm:$0xff]  }
  0x47   :  { %1879 = vmatpush3.bf16.msra.mxu0 %v2055_v40  ;;  %v2100_v40 = vld [vmem:[%s2623_s1 + $0x3d8] sm:$0xff]  }
  0x48   :  { %1880 = vmatprep.subr.bf16.mxu0 %v2058_v44  ;;  %v2104_v44 = vld [vmem:[%s2623_s1 + $0x3d0] sm:$0xff]  }
  0x49   :  { %1901 = vmatpush3.bf16.msra.mxu1 %v2057_v43  ;;  %v2103_v43 = vld [vmem:[%s2623_s1 + $0x310] sm:$0xff]  }
  0x4a   :  { %1902 = vmatprep.subr.bf16.mxu1 %v2060_v46  ;;  %v2106_v46 = vld [vmem:[%s2623_s1 + $0x348] sm:$0xff]  }
  0x4b   :  { %1881 = vmatpush3.bf16.msra.mxu0 %v2059_v45  ;;  %v2105_v45 = vld [vmem:[%s2623_s1 + $0x390] sm:$0xff]  }
  0x4c   :  { %1882 = vmatprep.subr.bf16.mxu0 %v2062_v48  ;;  %v2108_v48 = vld [vmem:[%s2623_s1 + $0x3c8] sm:$0xff]  }
  0x4d   :  { %1903 = vmatpush3.bf16.msra.mxu1 %v2061_v47  ;;  %v2107_v47 = vld [vmem:[%s2623_s1 + $0x308] sm:$0xff]  }
  0x4e   :  { %1904 = vmatprep.subr.bf16.mxu1 %v2064_v50  ;;  %v2110_v50 = vld [vmem:[%s2623_s1 + $0x340] sm:$0xff]  }
  0x4f   :  { %1883 = vmatpush3.bf16.msra.mxu0 %v2063_v49  ;;  %v2109_v49 = vld [vmem:[%s2623_s1 + $0x388] sm:$0xff]  }
  0x50   :  { %1884 = vmatprep.subr.bf16.mxu0 %v2066_v52  ;;  %v2112_v52 = vld [vmem:[%s2623_s1 + $0x3c0] sm:$0xff]  }
  0x51   :  { %1905 = vmatpush3.bf16.msra.mxu1 %v2065_v51  ;;  %v2111_v51 = vld [vmem:[%s2623_s1 + $0x300] sm:$0xff]  }
  0x52   :  { %1906 = vmatprep.subr.bf16.mxu1 %v2068_v54 }
  0x53   :  { %1885 = vmatpush3.bf16.msra.mxu0 %v2067_v53  ;;  %v24_v53 = vld [vmem:[%s2624_s0 + $0x30] sm:$0xff] }
  0x54   :  { %1886 = vmatprep.subr.bf16.mxu0 %v2070_v56  ;;  %v39_v54 = vunpack.c.l.bf16 %v24_v53  ;;  %v2113_v56 = vld [vmem:[%s2623_s1 + $0x380] sm:$0xff]  }
  0x55   :  { %1907 = vmatpush3.bf16.msra.mxu1 %v2069_v55  ;;  %v40_v55 = vunpack.c.h.bf16 %v24_v53 }
  0x56   :  { %1908 = vmatprep.subr.bf16.mxu1 %v2072_v58  ;;  %v25_v58 = vld [vmem:[%s2624_s0 + $0x38] sm:$0xff]  ;;  %vm57_vm13 = vcmp.ge.f32.partialorder %v39_v54, 0.0 }
  0x57   :  { %1887 = vmatpush3.bf16.msra.mxu0 %v2071_v57  ;;  %v2114_v57 = vld [vmem:[%s2623_s1 + $0x478] sm:$0xff]   ;;  %vm58_vm12 = vcmp.ge.f32.partialorder %v40_v55, 0.0 }
  0x58   :  { %1888 = vmatprep.subr.bf16.mxu0 %v2074_v60  ;;  %v75_v60 = vmul.f32 0.01, %v39_v54 }
  0x59   :  { %1909 = vmatpush3.bf16.msra.mxu1 %v2073_v59  ;;  %v76_v59 = vmul.f32 0.01, %v40_v55 }
  0x5a   :  { %1910 = vmatprep.subr.bf16.mxu1 %v2076_v62  ;;  %v42_v62 = vunpack.c.h.bf16 %v25_v58 }
  0x5b   :  { %1889 = vmatpush3.bf16.msra.mxu0 %v2075_v61  ;;  %v41_v61 = vunpack.c.l.bf16 %v25_v58 }
  0x5c   :  { %1890 = vmatprep.subr.bf16.mxu0 %v2078_v0  ;;  %v93_v0 = vsel %vm57_vm13, %v39_v54, %v75_v60  ;;  %vm60_vm14 = vcmp.ge.f32.partialorder %v42_v62, 0.0  ;;  %v78_v3 = vmul.f32 0.01, %v42_v62 }
  0x5d   :  { %1911 = vmatpush3.bf16.msra.mxu1 %v2077_v63  ;;  %v94_v63 = vsel %vm58_vm12, %v40_v55, %v76_v59  ;;  %vm59_vm15 = vcmp.ge.f32.partialorder %v41_v61, 0.0  ;;  %v77_v5 = vmul.f32 0.01, %v41_v61 }
  0x5e   :  { %1912 = vmatprep.subr.bf16.mxu1 %v2080_v2  ;;  %v111_v2 = vpack.c.bf16 %v93_v0, %v93_v0 }
  0x5f   :  { %1891 = vmatpush3.bf16.msra.mxu0 %v2079_v1  ;;  %v112_v1 = vpack.c.bf16 %v94_v63, %v94_v63  ;;  %v95_v9 = vsel %vm59_vm15, %v41_v61, %v77_v5 }
  0x60   :  { %1920 = vmatprep.subr.bf16.mxu0 %v2082_v7  ;;  %v96_v7 = vsel %vm60_vm14, %v42_v62, %v78_v3  ;;  %v113_v10 = vpack.c.bf16 %v95_v9, %v95_v9 }
  0x61   :  { %1913 = vmatpush3.bf16.msra.mxu1 %v2081_v6  ;;  %v2116_v6 = vld [vmem:[%s2623_s1 + $0x470] sm:$0xff]   ;;  %v114_v8 = vpack.c.bf16 %v96_v7, %v96_v7 }
  0x62   :  { %1942 = vmatprep.subr.bf16.mxu1 %v2084_v18  ;;  %1469 = vmatmul.mubr.bf16.vlgmr.msra.gmra.mxu0 %v107_v17  ;;  %v26_v17 = vld [vmem:[%s2624_s0 + $0x40] sm:$0xff] }
  0x63   :  { %1921 = vmatpush3.bf16.msra.mxu0 %v2083_v15  ;;  %1548 = vmatprep.mubr.bf16.mxu0 %v112_v1  ;;  %v2121_v15 = vld [vmem:[%s2623_s1 + $0x420] sm:$0xff]   ;;  %v44_v18 = vunpack.c.h.bf16 %v26_v17  ;;  %v43_v25 = vunpack.c.l.bf16 %v26_v17 }
  0x64   :  { %1922 = vmatprep.subr.bf16.mxu0 %v2086_v24  ;;  %1509 = vmatmul.mubr.bf16.vlgmr.msra.gmra.mxu1 %v109_v26  ;;  %v2125_v24 = vld [vmem:[%s2623_s1 + $0x410] sm:$0xff]   ;;  %v2126_v26 = vld [vmem:[%s2623_s1 + $0x448] sm:$0xff]  }
  0x65   :  { %1943 = vmatpush3.bf16.msra.mxu1 %v2085_v21  ;;  %1588 = vmatprep.mubr.bf16.mxu1 %v114_v8  ;;  %vm62_vm0 = vcmp.ge.f32.partialorder %v44_v18, 0.0  ;;  %v80_v20 = vmul.f32 0.01, %v44_v18  ;;  %v2124_v21 = vld [vmem:[%s2623_s1 + $0x450] sm:$0xff]   ;;  %vm61_vm1 = vcmp.ge.f32.partialorder %v43_v25, 0.0 }
  0x66   :  { %1944 = vmatprep.subr.bf16.mxu1 %v2088_v28  ;;  %v79_v28 = vmul.f32 0.01, %v43_v25 }
  0x67   :  { %1923 = vmatpush3.bf16.msra.mxu0 %v2087_v27  ;;  %v98_v22 = vsel %vm62_vm0, %v44_v18, %v80_v20  ;;  %v2127_v27 = vld [vmem:[%s2623_s1 + $0x408] sm:$0xff]  }
  0x68   :  { %1924 = vmatprep.subr.bf16.mxu0 %v2090_v30  ;;  %v116_v23 = vpack.c.bf16 %v98_v22, %v98_v22  ;;  %v2129_v30 = vld [vmem:[%s2623_s1 + $0x400] sm:$0xff]  }
  0x69   :  { %1945 = vmatpush3.bf16.msra.mxu1 %v2089_v29  ;;  %v2128_v29 = vld [vmem:[%s2623_s1 + $0x440] sm:$0xff]  }
  0x6a   :  { %1946 = vmatprep.subr.bf16.mxu1 %v2092_v32 }
  0x6b   :  { %1925 = vmatpush3.bf16.msra.mxu0 %v2091_v31  ;;  %v97_v31 = vsel %vm61_vm1, %v43_v25, %v79_v28 }
  0x6c   :  { %1926 = vmatprep.subr.bf16.mxu0 %v2094_v34  ;;  %v115_v32 = vpack.c.bf16 %v97_v31, %v97_v31  ;;  %v1643_v34 = vld [vmem:[%s2625_s2] ss:$0 sm:$0xff] }
  0x6d   :  { %1947 = vmatpush3.bf16.msra.mxu1 %v2093_v33 }
  0x6e   :  { %1948 = vmatprep.subr.bf16.mxu1 %v2096_v36 }
  0x6f   :  { %1927 = vmatpush3.bf16.msra.mxu0 %v2095_v35 }
  0x70   :  { %1928 = vmatprep.subr.bf16.mxu0 %v2098_v38 }
  0x71   :  { %1949 = vmatpush3.bf16.msra.mxu1 %v2097_v37 }
  0x72   :  { %1950 = vmatprep.subr.bf16.mxu1 %v2100_v40 }
  0x73   :  { %1929 = vmatpush3.bf16.msra.mxu0 %v2099_v39 }
  0x74   :  { %1930 = vmatprep.subr.bf16.mxu0 %v2102_v42 }
  0x75   :  { %1951 = vmatpush3.bf16.msra.mxu1 %v2101_v41 }
  0x76   :  { %1952 = vmatprep.subr.bf16.mxu1 %v2104_v44 }
  0x77   :  { %1931 = vmatpush3.bf16.msra.mxu0 %v2103_v43 }
  0x78   :  { %1932 = vmatprep.subr.bf16.mxu0 %v2106_v46 }
  0x79   :  { %1953 = vmatpush3.bf16.msra.mxu1 %v2105_v45 }
  0x7a   :  { %1954 = vmatprep.subr.bf16.mxu1 %v2108_v48 }
  0x7b   :  { %1933 = vmatpush3.bf16.msra.mxu0 %v2107_v47 }
  0x7c   :  { %1934 = vmatprep.subr.bf16.mxu0 %v2110_v50 }
  0x7d   :  { %1955 = vmatpush3.bf16.msra.mxu1 %v2109_v49 }
  0x7e   :  { %1956 = vmatprep.subr.bf16.mxu1 %v2112_v52 }
  0x7f   :  { %1935 = vmatpush3.bf16.msra.mxu0 %v2111_v51 }
  0x80   :  { %1964 = vmatprep.subr.bf16.mxu0 %v2114_v57 }
  0x81   :  { %1957 = vmatpush3.bf16.msra.mxu1 %v2113_v56 }
  0x82   :  { %1549 = vmatmul.mubr.bf16.vlgmr.msra.gmra.mxu0 %v111_v2 }
  0x83   :  { %1965 = vmatpush3.bf16.msra.mxu0 %v2115_v4  ;;  %1628 = vmatprep.mubr.bf16.mxu0 %v116_v23 }
  0x84   :  { %1966 = vmatprep.subr.bf16.mxu0 %v2116_v6  ;;  %1589 = vmatmul.mubr.bf16.vlgmr.msra.gmra.mxu1 %v113_v10 }
  0x87   :  { %1967 = vmatpush3.bf16.msra.mxu0 %v2117_v11 }
  0x88   :  { %1968 = vmatprep.subr.bf16.mxu0 %v2118_v12 }
  0x8b   :  { %1969 = vmatpush3.bf16.msra.mxu0 %v2119_v13 }
  0x8c   :  { %1970 = vmatprep.subr.bf16.mxu0 %v2120_v14 }
  0x8f   :  { %1971 = vmatpush3.bf16.msra.mxu0 %v2121_v15 }
  0x90   :  { %1972 = vmatprep.subr.bf16.mxu0 %v2122_v16 }
  0x93   :  { %1973 = vmatpush3.bf16.msra.mxu0 %v2123_v19 }
  0x94   :  { %1974 = vmatprep.subr.bf16.mxu0 %v2124_v21  ;;  %v1636_v21 = vld [vmem:[%s2626_s3] sm:$0xff] }
  0x97   :  { %1975 = vmatpush3.bf16.msra.mxu0 %v2125_v24 }
  0x98   :  { %1976 = vmatprep.subr.bf16.mxu0 %v2126_v26 }
  0x9b   :  { %1977 = vmatpush3.bf16.msra.mxu0 %v2127_v27 }
  0x9c   :  { %1978 = vmatprep.subr.bf16.mxu0 %v2128_v29 }
  0x9f   :  { %1979 = vmatpush3.bf16.msra.mxu0 %v2129_v30 }
  0xa2   :  { %1629 = vmatmul.mubr.bf16.vlgmr.msra.gmra.mxu0 %v115_v32 }
  0xe2   :  { %v1804_v33 = vpop.f32.mrf.mxu0 }
  0xe4   :  { %v1805_v35 = vpop.f32.mrf.mxu0  ;;  %v1826_v37 = vpop.f32.mrf.mxu1 }
  0xe5   :  { %v1806_v36 = vadd.f32 %v1805_v35, %v1804_v33 }
  0xe6   :  { %v1807_v38 = vpop.f32.mrf.mxu0  ;;  %v1827_v40 = vpop.f32.mrf.mxu1 }
  0xe7   :  { %v1311_v39 = vadd.f32 %v1806_v36, %v1643_v34  ;;  %v1828_v41 = vadd.f32 %v1827_v40, %v1826_v37 }
  0xe8   :  { %v1808_v42 = vpop.f32.mrf.mxu0  ;;  %v1829_v43 = vpop.f32.mrf.mxu1 }
  0xe9   :  { %v1351_v44 = vadd.f32 %v1828_v41, %v1311_v39 }
  0xea   :  { %v1830_v45 = vpop.f32.mrf.mxu1 }
 0x102   :  { %v1848_v46 = vpop.f32.mrf.mxu0 }
 0x104   :  { %v1849_v47 = vpop.f32.mrf.mxu0  ;;  %v1870_v49 = vpop.f32.mrf.mxu1 }
 0x105   :  { %v1850_v48 = vadd.f32 %v1849_v47, %v1848_v46 }
 0x106   :  { %v1851_v50 = vpop.f32.mrf.mxu0  ;;  %v1871_v52 = vpop.f32.mrf.mxu1 }
 0x107   :  { %v1391_v51 = vadd.f32 %v1850_v48, %v1351_v44  ;;  %v1872_v53 = vadd.f32 %v1871_v52, %v1870_v49 }
 0x108   :  { %v1852_v54 = vpop.f32.mrf.mxu0  ;;  %v1873_v55 = vpop.f32.mrf.mxu1 }
 0x109   :  { %v1431_v56 = vadd.f32 %v1872_v53, %v1391_v51 }
 0x10a   :  { %v1874_v57 = vpop.f32.mrf.mxu1 }
 0x122   :  { %v1892_v58 = vpop.f32.mrf.mxu0 }
 0x124   :  { %v1893_v59 = vpop.f32.mrf.mxu0  ;;  %v1914_v60 = vpop.f32.mrf.mxu1 }
 0x125   :  { %v1894_v10 = vadd.f32 %v1893_v59, %v1892_v58 }
 0x126   :  { %v1895_v61 = vpop.f32.mrf.mxu0  ;;  %v1915_v62 = vpop.f32.mrf.mxu1 }
 0x127   :  { %v1471_v11 = vadd.f32 %v1894_v10, %v1431_v56  ;;  %v1916_v12 = vadd.f32 %v1915_v62, %v1914_v60 }
 0x128   :  { %v1896_v63 = vpop.f32.mrf.mxu0  ;;  %v1917_v0 = vpop.f32.mrf.mxu1 }
 0x129   :  { %v1511_v14 = vadd.f32 %v1916_v12, %v1471_v11 }
 0x12a   :  { %v1918_v1 = vpop.f32.mrf.mxu1 }
 0x142   :  { %v1936_v2 = vpop.f32.mrf.mxu0 }
 0x144   :  { %v1937_v3 = vpop.f32.mrf.mxu0  ;;  %v1958_v4 = vpop.f32.mrf.mxu1 }
 0x145   :  { %v1938_v13 = vadd.f32 %v1937_v3, %v1936_v2 }
 0x146   :  { %v1939_v5 = vpop.f32.mrf.mxu0  ;;  %v1959_v6 = vpop.f32.mrf.mxu1 }
 0x147   :  { %v1551_v15 = vadd.f32 %v1938_v13, %v1511_v14  ;;  %v1960_v16 = vadd.f32 %v1959_v6, %v1958_v4 }
 0x148   :  { %v1940_v7 = vpop.f32.mrf.mxu0  ;;  %v1961_v8 = vpop.f32.mrf.mxu1 }
 0x149   :  { %v1591_v19 = vadd.f32 %v1960_v16, %v1551_v15 }
 0x14a   :  { %v1962_v9 = vpop.f32.mrf.mxu1 }
 0x162   :  { %v1980_v17 = vpop.f32.mrf.mxu0 }
 0x164   :  { %v1981_v18 = vpop.f32.mrf.mxu0 }
 0x165   :  { %v1982_v20 = vadd.f32 %v1981_v18, %v1980_v17 }
 0x166   :  { %v1983_v22 = vpop.f32.mrf.mxu0 }
 0x167   :  { %v1631_v23 = vadd.f32 %v1982_v20, %v1591_v19 }
 0x168   :  { %v1984_v24 = vpop.f32.mrf.mxu0 }
 0x169   :  { %v1637_v25 = vadd.f32 %v1636_v21, %v1631_v23 }
 0x16b   :  { %1638 = vst [vmem:[%s2627_s4] sm:$0xff] %v1637_v25 }

// kernel: _lambda_.121
= control target key start
LH: loop header
LB: loop body
LE: loop exit
PB: predicated region body
PF: predicated region fallthrough
CT: control target
= control target key end

     0   :  { %vm204_vm0 = vcmask 261120   ;;  %s517_s1 = inlined_call_operand.vmem [shape: bf16[288,128], index: 1, kind: input, shape index: {}]   ;;  %s518_s0 = inlined_call_operand.vmem [shape: bf16[32,288], index: 0, kind: input, shape index: {}]   ;;  %s519_s2 = inlined_call_operand.vmem [shape: f32[1,128], index: 2, kind: input, shape index: {}]   ;;  %s520_s3 = inlined_call_operand.vmem [shape: f32[32,128], index: 3, kind: output, shape index: {}]  }
   0x1   :  { %v384_v0 = vld [vmem:[%s517_s1 + $0x78] sm:$0xff]   ;;  %v386_v2 = vld [vmem:[%s517_s1 + $0x70] sm:$0xff]   ;;  %v388_v4 = vld [vmem:[%s517_s1 + $0x68] sm:$0xff]  }
   0x2   :  { %v385_v1 = vld [vmem:[%s517_s1 + $0x38] sm:$0xff]   ;;  %344 = vmatprep.subr.bf16.mxu0 %v384_v0  ;;  %v387_v3 = vld [vmem:[%s517_s1 + $0x30] sm:$0xff]   ;;  %v389_v5 = vld [vmem:[%s517_s1 + $0x28] sm:$0xff]  }
   0x3   :  { %345 = vmatpush3.bf16.msra.mxu0 %v385_v1  ;;  %v390_v6 = vld [vmem:[%s517_s1 + $0x60] sm:$0xff]   ;;  %v392_v8 = vld [vmem:[%s517_s1 + $0x58] sm:$0xff]   ;;  %v399_v10 = vld [vmem:[%s517_s1 + $0x88] sm:$0xff]  }
   0x4   :  { %346 = vmatprep.subr.bf16.mxu0 %v386_v2  ;;  %v391_v7 = vld [vmem:[%s517_s1 + $0x20] sm:$0xff]   ;;  %v393_v9 = vld [vmem:[%s517_s1 + $0x18] sm:$0xff]   ;;  %v394_v11 = vld [vmem:[%s517_s1 + $0x50] sm:$0xff]   ;;  %376 = vmatprep.subr.bf16.mxu1 %v399_v10 }
   0x5   :  { %v395_v12 = vld [vmem:[%s517_s1 + $0x10] sm:$0xff]   ;;  %v396_v13 = vld [vmem:[%s517_s1 + $0x48] sm:$0xff]   ;;  %377 = vmatpush3.bf16.msra.mxu1 %v399_v10  ;;  %v404_v15 = vld [vmem:[%s517_s1 + $0x80] sm:$0xff]  }
   0x6   :  { %v403_v14 = vld [vmem:[%s518_s0 + $0x4] ss:$12 sps:$4 sm:$0xff]   ;;  %v405_v16 = vld [vmem:[%s518_s0 + $0x8] ss:$12 sps:$4 sm:$0xff]   ;;  %378 = vmatprep.subr.bf16.mxu1 %v404_v15  ;;  %v406_v17 = vld [vmem:[%s518_s0 + $0x20] ss:$12 sps:$4 sm:$0xff]  }
   0x7   :  { %347 = vmatpush3.bf16.msra.mxu0 %v387_v3  ;;  %243 = vmatprep.mubr.bf16.mxu0 %v403_v14  ;;  %v397_v18 = vld [vmem:[%s517_s1 + $0x8] sm:$0xff]   ;;  %v398_v19 = vld [vmem:[%s517_s1 + $0x40] sm:$0xff]  }
   0x8   :  { %348 = vmatprep.subr.bf16.mxu0 %v388_v4  ;;  %380 = vmatprep.mubr.msk.bf16.mxu1 %vm204_vm0, %v405_v16  ;;  %v400_v20 = vld [vmem:[%s517_s1] sm:$0xff]   ;;  %v407_v22 = vld [vmem:[%s518_s0 + $0x1c] ss:$12 sps:$4 sm:$0xff]  }
   0x9   :  { %379 = vmatpush3.bf16.msra.mxu1 %v404_v15  ;;  %v401_v21 = vld [vmem:[%s518_s0] ss:$12 sps:$4 sm:$0xff]   ;;  %v409_v23 = vld [vmem:[%s518_s0 + $0x18] ss:$12 sps:$4 sm:$0xff]  }
   0xa   :  { %v317_v28 = vld [vmem:[%s519_s2] ss:$0 sm:$0xff] }
   0xb   :  { %349 = vmatpush3.bf16.msra.mxu0 %v389_v5 }
   0xc   :  { %350 = vmatprep.subr.bf16.mxu0 %v390_v6  ;;  %381 = vmatmul.mubr.msk.bf16.vlgmr.msra.gmra.mxu1 %vm204_vm0, %v406_v17 }
   0xf   :  { %351 = vmatpush3.bf16.msra.mxu0 %v391_v7 }
  0x10   :  { %352 = vmatprep.subr.bf16.mxu0 %v392_v8 }
  0x13   :  { %353 = vmatpush3.bf16.msra.mxu0 %v393_v9 }
  0x14   :  { %354 = vmatprep.subr.bf16.mxu0 %v394_v11 }
  0x17   :  { %355 = vmatpush3.bf16.msra.mxu0 %v395_v12 }
  0x18   :  { %356 = vmatprep.subr.bf16.mxu0 %v396_v13 }
  0x1b   :  { %357 = vmatpush3.bf16.msra.mxu0 %v397_v18 }
  0x1c   :  { %358 = vmatprep.subr.bf16.mxu0 %v398_v19 }
  0x1f   :  { %359 = vmatpush3.bf16.msra.mxu0 %v400_v20 }
  0x22   :  { %244 = vmatmul.mubr.bf16.vlgmr.msra.gmra.mxu0 %v401_v21 }
  0x23   :  { %251 = vmatprep.mubr.bf16.mxu0 %v407_v22 }
  0x2a   :  { %252 = vmatmul.mubr.bf16.gmra.mxu0 %v409_v23 }
  0xcc   :  { %v382_v24 = vpop.f32.mrf.mxu1 }
  0xce   :  { %v294_v26 = vpop.f32.mrf.mxu1 }
  0xd0   :  { %v383_v31 = vpop.f32.mrf.mxu1 }
  0xd2   :  { %v297_v37 = vpop.f32.mrf.mxu1 }
  0xe2   :  { %v360_v25 = vpop.f32.mrf.mxu0 }
  0xe4   :  { %v361_v27 = vpop.f32.mrf.mxu0 }
  0xe5   :  { %v362_v29 = vadd.f32 %v361_v27, %v360_v25 }
  0xe6   :  { %v363_v30 = vpop.f32.mrf.mxu0 }
  0xe7   :  { %v246_v32 = vadd.f32 %v362_v29, %v317_v28 }
  0xe8   :  { %v364_v33 = vpop.f32.mrf.mxu0 }
  0xe9   :  { %v365_v34 = vadd.f32 %v364_v33, %v363_v30  ;;  %v295_v35 = vadd.f32 %v294_v26, %v246_v32 }
  0xea   :  { %v366_v36 = vpop.f32.mrf.mxu0 }
  0xeb   :  { %309 = vst [vmem:[%s520_s3] sm:$0xff] %v295_v35  ;;  %v249_v38 = vadd.f32 %v365_v34, %v317_v28 }
  0xec   :  { %v367_v39 = vpop.f32.mrf.mxu0 }
  0xed   :  { %v368_v40 = vadd.f32 %v367_v39, %v366_v36  ;;  %v298_v41 = vadd.f32 %v297_v37, %v249_v38 }
  0xee   :  { %v369_v42 = vpop.f32.mrf.mxu0 }
  0xef   :  { %v254_v43 = vadd.f32 %v368_v40, %v317_v28  ;;  %310 = vst [vmem:[%s520_s3 + $0x8] sm:$0xff] %v298_v41 }
  0xf0   :  { %v370_v44 = vpop.f32.mrf.mxu0 }
  0xf1   :  { %v303_v45 = vadd.f32 %v382_v24, %v254_v43  ;;  %v371_v46 = vadd.f32 %v370_v44, %v369_v42 }
  0xf3   :  { %311 = vst [vmem:[%s520_s3 + $0x10] sm:$0xff] %v303_v45  ;;  %v257_v47 = vadd.f32 %v371_v46, %v317_v28 }
  0xf5   :  { %v306_v48 = vadd.f32 %v383_v31, %v257_v47 }
  0xf7   :  { %312 = vst [vmem:[%s520_s3 + $0x18] sm:$0xff] %v306_v48 }

// kernel: _lambda_.118
= control target key start
LH: loop header
LB: loop body
LE: loop exit
PB: predicated region body
PF: predicated region fallthrough
CT: control target
= control target key end

     0   :  { %vm68_vm0 = vcmask 523264   ;;  %vm124_vm1 = vcmask 261120   ;;  %s219_s1 = inlined_call_operand.vmem [shape: bf16[64,32], index: 1, kind: input, shape index: {}]   ;;  %s220_s0 = inlined_call_operand.vmem [shape: bf16[32,64], index: 0, kind: input, shape index: {}]   ;;  %s221_s2 = inlined_call_operand.vmem [shape: f32[1,32], index: 2, kind: input, shape index: {}]   ;;  %s222_s3 = inlined_call_operand.vmem [shape: f32[32,32], index: 3, kind: output, shape index: {}]  }
   0x1   :  { %v160_v0 = vld [vmem:[%s219_s1 + $0x18] sm:$0xff]   ;;  %v161_v1 = vld [vmem:[%s219_s1 + $0x10] sm:$0xff]   ;;  %v162_v2 = vld [vmem:[%s219_s1 + $0x8] sm:$0xff]  }
   0x2   :  { %148 = vmatprep.subr.bf16.mxu0 %v160_v0  ;;  %v164_v3 = vld [vmem:[%s220_s0] sm:$0xff]   ;;  %v165_v5 = vld [vmem:[%s220_s0 + $0x8] sm:$0xff]  }
   0x3   :  { %149 = vmatpush3.bf16.msra.mxu0 %v160_v0  ;;  %156 = vmatprep.mubr.msk.bf16.mxu0 %vm68_vm0, %v164_v3  ;;  %v163_v4 = vld [vmem:[%s219_s1] sm:$0xff]  }
   0x4   :  { %150 = vmatprep.subr.bf16.mxu0 %v161_v1  ;;  %v133_v6 = vld [vmem:[%s221_s2] ss:$0 sm:$0xff] }
   0x7   :  { %151 = vmatpush3.bf16.msra.mxu0 %v161_v1 }
   0x8   :  { %152 = vmatprep.subr.bf16.mxu0 %v162_v2 }
   0xb   :  { %153 = vmatpush3.bf16.msra.mxu0 %v162_v2 }
   0xc   :  { %154 = vmatprep.subr.bf16.mxu0 %v163_v4 }
   0xf   :  { %155 = vmatpush3.bf16.msra.mxu0 %v163_v4 }
  0x12   :  { %157 = vmatmul.mubr.msk.bf16.vlgmr.msra.gmra.mxu0 %vm68_vm0, %v165_v5 }
  0xd2   :  { %v158_v7 = vpop.f32.mrf.mxu0 }
  0xd3   :  { %v118_v8 = vadd.f32 %v158_v7, %v133_v6 }
  0xd4   :  { %v109_v9 = vpop.f32.mrf.mxu0 }
  0xd5   :  { %127 = vst.msk [vmem:[%s222_s3 + $0x10] sm:$0xff] %vm124_vm1, %v118_v8  ;;  %v110_v10 = vadd.f32 %v133_v6, %v109_v9 }
  0xd6   :  { %v159_v11 = vpop.f32.mrf.mxu0 }
  0xd7   :  { %125 = vst.msk [vmem:[%s222_s3] sm:$0xff] %vm124_vm1, %v110_v10  ;;  %v121_v12 = vadd.f32 %v159_v11, %v133_v6 }
  0xd8   :  { %v112_v13 = vpop.f32.mrf.mxu0 }
  0xd9   :  { %128 = vst.msk [vmem:[%s222_s3 + $0x18] sm:$0xff] %vm124_vm1, %v121_v12  ;;  %v113_v14 = vadd.f32 %v133_v6, %v112_v13 }
  0xdb   :  { %126 = vst.msk [vmem:[%s222_s3 + $0x8] sm:$0xff] %vm124_vm1, %v113_v14 }

// kernel: _lambda_.122
= control target key start
LH: loop header
LB: loop body
LE: loop exit
PB: predicated region body
PF: predicated region fallthrough
CT: control target
= control target key end

     0   :  { %vm126_vm0 = vcmask 261120   ;;  %s480_s1 = inlined_call_operand.vmem [shape: bf16[32,32], index: 1, kind: input, shape index: {}]   ;;  %s481_s0 = inlined_call_operand.vmem [shape: bf16[128,32], index: 0, kind: input, shape index: {}]   ;;  %s482_s2 = inlined_call_operand.vmem [shape: f32[1,32], index: 2, kind: input, shape index: {}]   ;;  %s483_s3 = inlined_call_operand.vmem [shape: f32[128,32], index: 3, kind: output, shape index: {}]  }
   0x1   :  { %v352_v0 = vld [vmem:[%s480_s1 + $0x8] sm:$0xff]   ;;  %v353_v1 = vld [vmem:[%s480_s1] sm:$0xff]   ;;  %v312_v20 = vld [vmem:[%s481_s0 + $0x10] sm:$0xff]  }
   0x2   :  { %328 = vmatprep.subr.bf16.mxu0 %v352_v0  ;;  %348 = vmatprep.subr.bf16.mxu1 %v352_v0  ;;  %v280_v2 = vld [vmem:[%s481_s0] sm:$0xff]   ;;  %v311_v4 = vld [vmem:[%s481_s0 + $0x8] sm:$0xff]   ;;  %v316_v25 = vld [vmem:[%s481_s0 + $0x30] sm:$0xff]   ;;  %v289_v31 = vunpack.c.l.bf16 %v312_v20  ;;  %v290_v33 = vunpack.c.h.bf16 %v312_v20 }
   0x3   :  { %v314_v3 = vld [vmem:[%s481_s0 + $0x20] sm:$0xff]   ;;  %329 = vmatpush3.bf16.msra.mxu0 %v352_v0  ;;  %350 = vmatpush3.bf16.msra.mxu1 %v352_v0  ;;  %v281_v5 = vunpack.c.l.bf16 %v280_v2  ;;  %v282_v6 = vunpack.c.h.bf16 %v280_v2  ;;  %v315_v9 = vld [vmem:[%s481_s0 + $0x28] sm:$0xff]   ;;  %v285_v10 = vunpack.c.l.bf16 %v311_v4  ;;  %v286_v11 = vunpack.c.h.bf16 %v311_v4  ;;  %v313_v39 = vld [vmem:[%s481_s0 + $0x18] sm:$0xff]  }
   0x4   :  { %v297_v7 = vunpack.c.l.bf16 %v314_v3  ;;  %v298_v8 = vunpack.c.h.bf16 %v314_v3  ;;  %330 = vmatprep.subr.bf16.mxu0 %v353_v1  ;;  %349 = vmatprep.subr.bf16.mxu1 %v353_v1  ;;  %v301_v12 = vunpack.c.l.bf16 %v315_v9  ;;  %v302_v13 = vunpack.c.h.bf16 %v315_v9  ;;  %v317_v43 = vld [vmem:[%s481_s0 + $0x38] sm:$0xff]   ;;  %v268_v2 = vld [vmem:[%s482_s2] ss:$0 sm:$0xff] }
   0x5   :  { %vm47_vm1 = vcmp.ge.f32.partialorder %v281_v5, 0.0  ;;  %vm48_vm2 = vcmp.ge.f32.partialorder %v282_v6, 0.0  ;;  %v63_v14 = vmul.f32 0.01, %v281_v5  ;;  %v64_v15 = vmul.f32 0.01, %v282_v6 }
   0x6   :  { %vm55_vm3 = vcmp.ge.f32.partialorder %v297_v7, 0.0  ;;  %vm56_vm4 = vcmp.ge.f32.partialorder %v298_v8, 0.0  ;;  %v71_v16 = vmul.f32 0.01, %v297_v7  ;;  %v72_v17 = vmul.f32 0.01, %v298_v8 }
   0x7   :  { %331 = vmatpush3.bf16.msra.mxu0 %v353_v1  ;;  %351 = vmatpush3.bf16.msra.mxu1 %v353_v1  ;;  %v79_v18 = vsel %vm47_vm1, %v281_v5, %v63_v14  ;;  %v80_v19 = vsel %vm48_vm2, %v282_v6, %v64_v15  ;;  %vm49_vm5 = vcmp.ge.f32.partialorder %v285_v10, 0.0  ;;  %vm50_vm6 = vcmp.ge.f32.partialorder %v286_v11, 0.0 }
   0x8   :  { %v95_v21 = vpack.c.bf16 %v80_v19, %v79_v18  ;;  %v87_v22 = vsel %vm55_vm3, %v297_v7, %v71_v16  ;;  %v88_v23 = vsel %vm56_vm4, %v298_v8, %v72_v17  ;;  %v65_v24 = vmul.f32 0.01, %v285_v10 }
   0x9   :  { %v99_v26 = vpack.c.bf16 %v88_v23, %v87_v22  ;;  %v66_v27 = vmul.f32 0.01, %v286_v11  ;;  %vm57_vm7 = vcmp.ge.f32.partialorder %v301_v12, 0.0  ;;  %vm58_vm8 = vcmp.ge.f32.partialorder %v302_v13, 0.0 }
   0xa   :  { %332 = vmatprep.mubr.msk.bf16.mxu0 %vm126_vm0, %v95_v21  ;;  %v81_v28 = vsel %vm49_vm5, %v285_v10, %v65_v24  ;;  %v73_v29 = vmul.f32 0.01, %v301_v12  ;;  %v74_v30 = vmul.f32 0.01, %v302_v13  ;;  %v305_v34 = vunpack.c.l.bf16 %v316_v25 }
   0xb   :  { %340 = vmatprep.mubr.msk.bf16.mxu1 %vm126_vm0, %v99_v26  ;;  %v82_v32 = vsel %vm50_vm6, %v286_v11, %v66_v27  ;;  %v306_v35 = vunpack.c.h.bf16 %v316_v25  ;;  %vm51_vm9 = vcmp.ge.f32.partialorder %v289_v31, 0.0  ;;  %vm52_vm10 = vcmp.ge.f32.partialorder %v290_v33, 0.0 }
   0xc   :  { %v96_v36 = vpack.c.bf16 %v82_v32, %v81_v28  ;;  %v89_v37 = vsel %vm57_vm7, %v301_v12, %v73_v29  ;;  %v90_v38 = vsel %vm58_vm8, %v302_v13, %v74_v30  ;;  %v67_v41 = vmul.f32 0.01, %v289_v31 }
   0xd   :  { %v100_v40 = vpack.c.bf16 %v90_v38, %v89_v37  ;;  %v68_v42 = vmul.f32 0.01, %v290_v33  ;;  %vm59_vm11 = vcmp.ge.f32.partialorder %v305_v34, 0.0  ;;  %vm60_vm12 = vcmp.ge.f32.partialorder %v306_v35, 0.0 }
   0xe   :  { %333 = vmatmul.mubr.msk.bf16.vlgmr.msra.gmra.mxu0 %vm126_vm0, %v96_v36  ;;  %v75_v44 = vmul.f32 0.01, %v305_v34  ;;  %v76_v45 = vmul.f32 0.01, %v306_v35  ;;  %v83_v46 = vsel %vm51_vm9, %v289_v31, %v67_v41  ;;  %v293_v48 = vunpack.c.l.bf16 %v313_v39 }
   0xf   :  { %341 = vmatmul.mubr.msk.bf16.vlgmr.msra.gmra.mxu1 %vm126_vm0, %v100_v40  ;;  %v84_v47 = vsel %vm52_vm10, %v290_v33, %v68_v42  ;;  %v294_v49 = vunpack.c.h.bf16 %v313_v39  ;;  %v309_v53 = vunpack.c.l.bf16 %v317_v43  ;;  %v310_v57 = vunpack.c.h.bf16 %v317_v43 }
  0x10   :  { %v97_v50 = vpack.c.bf16 %v84_v47, %v83_v46  ;;  %v91_v51 = vsel %vm59_vm11, %v305_v34, %v75_v44  ;;  %v92_v52 = vsel %vm60_vm12, %v306_v35, %v76_v45  ;;  %vm53_vm13 = vcmp.ge.f32.partialorder %v293_v48, 0.0 }
  0x11   :  { %v101_v54 = vpack.c.bf16 %v92_v52, %v91_v51  ;;  %vm54_vm14 = vcmp.ge.f32.partialorder %v294_v49, 0.0  ;;  %v69_v55 = vmul.f32 0.01, %v293_v48  ;;  %v70_v56 = vmul.f32 0.01, %v294_v49 }
  0x12   :  { %336 = vmatprep.mubr.msk.bf16.mxu0 %vm126_vm0, %v97_v50  ;;  %vm61_vm15 = vcmp.ge.f32.partialorder %v309_v53, 0.0  ;;  %v77_v58 = vmul.f32 0.01, %v309_v53  ;;  %vm62_vm1 = vcmp.ge.f32.partialorder %v310_v57, 0.0  ;;  %v78_v61 = vmul.f32 0.01, %v310_v57 }
  0x13   :  { %344 = vmatprep.mubr.msk.bf16.mxu1 %vm126_vm0, %v101_v54  ;;  %v85_v59 = vsel %vm53_vm13, %v293_v48, %v69_v55  ;;  %v86_v60 = vsel %vm54_vm14, %v294_v49, %v70_v56 }
  0x14   :  { %v93_v62 = vsel %vm61_vm15, %v309_v53, %v77_v58  ;;  %v98_v63 = vpack.c.bf16 %v86_v60, %v85_v59  ;;  %v94_v0 = vsel %vm62_vm1, %v310_v57, %v78_v61 }
  0x15   :  { %v102_v1 = vpack.c.bf16 %v94_v0, %v93_v62 }
  0x16   :  { %337 = vmatmul.mubr.msk.bf16.gmra.mxu0 %vm126_vm0, %v98_v63 }
  0x17   :  { %345 = vmatmul.mubr.msk.bf16.gmra.mxu1 %vm126_vm0, %v102_v1 }
  0xce   :  { %v334_v3 = vpop.f32.mrf.mxu0 }
  0xcf   :  { %v194_v4 = vadd.f32 %v334_v3, %v268_v2  ;;  %v342_v5 = vpop.f32.mrf.mxu1 }
  0xd0   :  { %v226_v6 = vadd.f32 %v342_v5, %v268_v2  ;;  %v185_v7 = vpop.f32.mrf.mxu0 }
  0xd1   :  { %250 = vst.msk [vmem:[%s483_s3 + $0x10] sm:$0xff] %vm126_vm0, %v194_v4  ;;  %v186_v8 = vadd.f32 %v268_v2, %v185_v7  ;;  %v217_v9 = vpop.f32.mrf.mxu1 }
  0xd2   :  { %258 = vst.msk [vmem:[%s483_s3 + $0x50] sm:$0xff] %vm126_vm0, %v226_v6  ;;  %v218_v10 = vadd.f32 %v268_v2, %v217_v9  ;;  %v335_v11 = vpop.f32.mrf.mxu0 }
  0xd3   :  { %248 = vst.msk [vmem:[%s483_s3] sm:$0xff] %vm126_vm0, %v186_v8  ;;  %v197_v12 = vadd.f32 %v335_v11, %v268_v2  ;;  %v343_v13 = vpop.f32.mrf.mxu1 }
  0xd4   :  { %256 = vst.msk [vmem:[%s483_s3 + $0x40] sm:$0xff] %vm126_vm0, %v218_v10  ;;  %v229_v14 = vadd.f32 %v343_v13, %v268_v2  ;;  %v188_v15 = vpop.f32.mrf.mxu0 }
  0xd5   :  { %251 = vst.msk [vmem:[%s483_s3 + $0x18] sm:$0xff] %vm126_vm0, %v197_v12  ;;  %v189_v16 = vadd.f32 %v268_v2, %v188_v15  ;;  %v220_v17 = vpop.f32.mrf.mxu1 }
  0xd6   :  { %259 = vst.msk [vmem:[%s483_s3 + $0x58] sm:$0xff] %vm126_vm0, %v229_v14  ;;  %v221_v18 = vadd.f32 %v268_v2, %v220_v17  ;;  %v338_v19 = vpop.f32.mrf.mxu0 }
  0xd7   :  { %249 = vst.msk [vmem:[%s483_s3 + $0x8] sm:$0xff] %vm126_vm0, %v189_v16  ;;  %v210_v20 = vadd.f32 %v338_v19, %v268_v2  ;;  %v346_v21 = vpop.f32.mrf.mxu1 }
  0xd8   :  { %257 = vst.msk [vmem:[%s483_s3 + $0x48] sm:$0xff] %vm126_vm0, %v221_v18  ;;  %v201_v22 = vpop.f32.mrf.mxu0  ;;  %v242_v23 = vadd.f32 %v346_v21, %v268_v2 }
  0xd9   :  { %254 = vst.msk [vmem:[%s483_s3 + $0x30] sm:$0xff] %vm126_vm0, %v210_v20  ;;  %v202_v24 = vadd.f32 %v268_v2, %v201_v22  ;;  %v233_v25 = vpop.f32.mrf.mxu1 }
  0xda   :  { %v339_v26 = vpop.f32.mrf.mxu0  ;;  %262 = vst.msk [vmem:[%s483_s3 + $0x70] sm:$0xff] %vm126_vm0, %v242_v23  ;;  %v234_v27 = vadd.f32 %v268_v2, %v233_v25 }
  0xdb   :  { %252 = vst.msk [vmem:[%s483_s3 + $0x20] sm:$0xff] %vm126_vm0, %v202_v24  ;;  %v213_v28 = vadd.f32 %v339_v26, %v268_v2  ;;  %v347_v29 = vpop.f32.mrf.mxu1 }
  0xdc   :  { %v204_v30 = vpop.f32.mrf.mxu0  ;;  %260 = vst.msk [vmem:[%s483_s3 + $0x60] sm:$0xff] %vm126_vm0, %v234_v27  ;;  %v245_v31 = vadd.f32 %v347_v29, %v268_v2 }
  0xdd   :  { %255 = vst.msk [vmem:[%s483_s3 + $0x38] sm:$0xff] %vm126_vm0, %v213_v28  ;;  %v205_v32 = vadd.f32 %v268_v2, %v204_v30  ;;  %v236_v33 = vpop.f32.mrf.mxu1 }
  0xde   :  { %263 = vst.msk [vmem:[%s483_s3 + $0x78] sm:$0xff] %vm126_vm0, %v245_v31  ;;  %v237_v34 = vadd.f32 %v268_v2, %v236_v33 }
  0xdf   :  { %253 = vst.msk [vmem:[%s483_s3 + $0x28] sm:$0xff] %vm126_vm0, %v205_v32 }
  0xe0   :  { %261 = vst.msk [vmem:[%s483_s3 + $0x68] sm:$0xff] %vm126_vm0, %v237_v34 }

// kernel: _lambda_.126
= control target key start
LH: loop header
LB: loop body
LE: loop exit
PB: predicated region body
PF: predicated region fallthrough
CT: control target
= control target key end

     0   :  { %vm318_vm0 = vcmask 261120   ;;  %vm537_vm1 = vcmask 523264   ;;  %s1023_s1 = inlined_call_operand.vmem [shape: bf16[288,64], index: 1, kind: input, shape index: {}]   ;;  %s1024_s0 = inlined_call_operand.vmem [shape: bf16[128,288], index: 0, kind: input, shape index: {}]   ;;  %s1025_s2 = inlined_call_operand.vmem [shape: f32[1,64], index: 2, kind: input, shape index: {}]   ;;  %s1026_s3 = inlined_call_operand.vmem [shape: f32[128,64], index: 3, kind: output, shape index: {}]  }
   0x1   :  { %v719_v0 = vld [vmem:[%s1023_s1 + $0x78] sm:$0xff]   ;;  %v721_v2 = vld [vmem:[%s1023_s1 + $0x70] sm:$0xff]   ;;  %v723_v4 = vld [vmem:[%s1023_s1 + $0x68] sm:$0xff]  }
   0x2   :  { %v720_v1 = vld [vmem:[%s1023_s1 + $0x38] sm:$0xff]   ;;  %609 = vmatprep.subr.bf16.mxu0 %v719_v0  ;;  %703 = vmatprep.subr.bf16.mxu1 %v719_v0  ;;  %v722_v3 = vld [vmem:[%s1023_s1 + $0x30] sm:$0xff]   ;;  %v724_v5 = vld [vmem:[%s1023_s1 + $0x28] sm:$0xff]  }
   0x3   :  { %610 = vmatpush3.bf16.msra.mxu0 %v720_v1  ;;  %711 = vmatpush3.bf16.msra.mxu1 %v720_v1  ;;  %v725_v6 = vld [vmem:[%s1023_s1 + $0x60] sm:$0xff]   ;;  %v727_v8 = vld [vmem:[%s1023_s1 + $0x58] sm:$0xff]   ;;  %v729_v10 = vld [vmem:[%s1023_s1 + $0x50] sm:$0xff]  }
   0x4   :  { %611 = vmatprep.subr.bf16.mxu0 %v721_v2  ;;  %704 = vmatprep.subr.bf16.mxu1 %v721_v2  ;;  %v726_v7 = vld [vmem:[%s1023_s1 + $0x20] sm:$0xff]   ;;  %v728_v9 = vld [vmem:[%s1023_s1 + $0x18] sm:$0xff]   ;;  %v730_v13 = vld [vmem:[%s1023_s1 + $0x10] sm:$0xff]  }
   0x5   :  { %v737_v11 = vld [vmem:[%s1024_s0 + $0x4] ss:$12 sps:$4 sm:$0xff]   ;;  %v740_v12 = vld [vmem:[%s1024_s0 + $0x94] ss:$12 sps:$4 sm:$0xff]   ;;  %v731_v14 = vld [vmem:[%s1023_s1 + $0x48] sm:$0xff]  }
   0x6   :  { %375 = vmatprep.mubr.bf16.mxu0 %v737_v11  ;;  %423 = vmatprep.mubr.bf16.mxu1 %v740_v12  ;;  %v732_v15 = vld [vmem:[%s1023_s1 + $0x8] sm:$0xff]   ;;  %v733_v16 = vld [vmem:[%s1023_s1 + $0x40] sm:$0xff]   ;;  %v738_v20 = vld [vmem:[%s1024_s0 + $0x90] ss:$12 sps:$4 sm:$0xff]  }
   0x7   :  { %612 = vmatpush3.bf16.msra.mxu0 %v722_v3  ;;  %712 = vmatpush3.bf16.msra.mxu1 %v722_v3  ;;  %v734_v17 = vld [vmem:[%s1023_s1] sm:$0xff]   ;;  %v741_v19 = vld [vmem:[%s1023_s1 + $0x88] sm:$0xff]   ;;  %v752_v28 = vld [vmem:[%s1024_s0 + $0x30] ss:$12 sps:$4 sm:$0xff]  }
   0x8   :  { %613 = vmatprep.subr.bf16.mxu0 %v723_v4  ;;  %705 = vmatprep.subr.bf16.mxu1 %v723_v4  ;;  %v735_v18 = vld [vmem:[%s1024_s0] ss:$12 sps:$4 sm:$0xff]   ;;  %v742_v21 = vld [vmem:[%s1024_s0 + $0x1c] ss:$12 sps:$4 sm:$0xff]   ;;  %v746_v24 = vld [vmem:[%s1024_s0 + $0x18] ss:$12 sps:$4 sm:$0xff]  }
   0x9   :  { %v744_v22 = vld [vmem:[%s1024_s0 + $0xac] ss:$12 sps:$4 sm:$0xff]   ;;  %v748_v23 = vld [vmem:[%s1023_s1 + $0x80] sm:$0xff]   ;;  %v747_v25 = vld [vmem:[%s1024_s0 + $0xa8] ss:$12 sps:$4 sm:$0xff]  }
   0xa   :  { %v749_v26 = vld [vmem:[%s1024_s0 + $0x34] ss:$12 sps:$4 sm:$0xff]   ;;  %v754_v30 = vld [vmem:[%s1024_s0 + $0x4c] ss:$12 sps:$4 sm:$0xff]   ;;  %v758_v33 = vld [vmem:[%s1024_s0 + $0x50] ss:$12 sps:$4 sm:$0xff]  }
   0xb   :  { %614 = vmatpush3.bf16.msra.mxu0 %v724_v5  ;;  %713 = vmatpush3.bf16.msra.mxu1 %v724_v5  ;;  %v751_v27 = vld [vmem:[%s1024_s0 + $0x8] ss:$12 sps:$4 sm:$0xff]   ;;  %v753_v29 = vld [vmem:[%s1024_s0 + $0x20] ss:$12 sps:$4 sm:$0xff]   ;;  %v756_v31 = vld [vmem:[%s1024_s0 + $0x38] ss:$12 sps:$4 sm:$0xff]  }
   0xc   :  { %615 = vmatprep.subr.bf16.mxu0 %v725_v6  ;;  %706 = vmatprep.subr.bf16.mxu1 %v725_v6  ;;  %v757_v32 = vld [vmem:[%s1024_s0 + $0x48] ss:$12 sps:$4 sm:$0xff]   ;;  %v759_v34 = vld [vmem:[%s1024_s0 + $0x64] ss:$12 sps:$4 sm:$0xff]   ;;  %v762_v36 = vld [vmem:[%s1024_s0 + $0x60] ss:$12 sps:$4 sm:$0xff]  }
   0xd   :  { %v761_v35 = vld [vmem:[%s1024_s0 + $0x68] ss:$12 sps:$4 sm:$0xff]   ;;  %v763_v37 = vld [vmem:[%s1024_s0 + $0x80] ss:$12 sps:$4 sm:$0xff]   ;;  %v766_v39 = vld [vmem:[%s1024_s0 + $0x98] ss:$12 sps:$4 sm:$0xff]  }
   0xe   :  { %v764_v38 = vld [vmem:[%s1024_s0 + $0x7c] ss:$12 sps:$4 sm:$0xff]   ;;  %v767_v40 = vld [vmem:[%s1024_s0 + $0x78] ss:$12 sps:$4 sm:$0xff]   ;;  %v936_v60 = vld [vmem:[%s1025_s2] ss:$0 sm:$0xff] }
   0xf   :  { %616 = vmatpush3.bf16.msra.mxu0 %v726_v7  ;;  %714 = vmatpush3.bf16.msra.mxu1 %v726_v7  ;;  %v768_v41 = vld [vmem:[%s1024_s0 + $0xb0] ss:$12 sps:$4 sm:$0xff]  }
  0x10   :  { %617 = vmatprep.subr.bf16.mxu0 %v727_v8  ;;  %707 = vmatprep.subr.bf16.mxu1 %v727_v8 }
  0x13   :  { %618 = vmatpush3.bf16.msra.mxu0 %v728_v9  ;;  %715 = vmatpush3.bf16.msra.mxu1 %v728_v9 }
  0x14   :  { %619 = vmatprep.subr.bf16.mxu0 %v729_v10  ;;  %708 = vmatprep.subr.bf16.mxu1 %v729_v10 }
  0x17   :  { %620 = vmatpush3.bf16.msra.mxu0 %v730_v13  ;;  %716 = vmatpush3.bf16.msra.mxu1 %v730_v13 }
  0x18   :  { %621 = vmatprep.subr.bf16.mxu0 %v731_v14  ;;  %709 = vmatprep.subr.bf16.mxu1 %v731_v14 }
  0x1b   :  { %622 = vmatpush3.bf16.msra.mxu0 %v732_v15  ;;  %717 = vmatpush3.bf16.msra.mxu1 %v732_v15 }
  0x1c   :  { %623 = vmatprep.subr.bf16.mxu0 %v733_v16  ;;  %710 = vmatprep.subr.bf16.mxu1 %v733_v16 }
  0x1f   :  { %624 = vmatpush3.bf16.msra.mxu0 %v734_v17  ;;  %718 = vmatpush3.bf16.msra.mxu1 %v734_v17 }
  0x20   :  { %683 = vmatprep.subr.bf16.mxu1 %v741_v19 }
  0x22   :  { %376 = vmatmul.mubr.bf16.vlgmr.msra.gmra.mxu0 %v735_v18  ;;  %424 = vmatmul.mubr.bf16.vlgmr.msra.gmra.mxu1 %v738_v20 }
  0x23   :  { %684 = vmatpush3.bf16.msra.mxu1 %v741_v19  ;;  %383 = vmatprep.mubr.bf16.mxu0 %v742_v21 }
  0x24   :  { %431 = vmatprep.mubr.bf16.mxu1 %v744_v22  ;;  %685 = vmatprep.subr.bf16.mxu1 %v748_v23 }
  0x27   :  { %686 = vmatpush3.bf16.msra.mxu1 %v748_v23 }
  0x2a   :  { %384 = vmatmul.mubr.bf16.gmra.mxu0 %v746_v24  ;;  %432 = vmatmul.mubr.bf16.gmra.mxu1 %v747_v25 }
  0x2b   :  { %391 = vmatprep.mubr.bf16.mxu0 %v749_v26  ;;  %687 = vmatprep.mubr.msk.bf16.mxu1 %vm318_vm0, %v751_v27 }
  0x32   :  { %392 = vmatmul.mubr.bf16.gmra.mxu0 %v752_v28  ;;  %688 = vmatmul.mubr.msk.bf16.vlgmr.msra.gmra.mxu1 %vm318_vm0, %v753_v29 }
  0x33   :  { %399 = vmatprep.mubr.bf16.mxu0 %v754_v30  ;;  %691 = vmatprep.mubr.msk.bf16.mxu1 %vm318_vm0, %v756_v31 }
  0x3a   :  { %400 = vmatmul.mubr.bf16.gmra.mxu0 %v757_v32  ;;  %692 = vmatmul.mubr.msk.bf16.gmra.mxu1 %vm318_vm0, %v758_v33 }
  0x3b   :  { %407 = vmatprep.mubr.bf16.mxu0 %v759_v34  ;;  %695 = vmatprep.mubr.msk.bf16.mxu1 %vm318_vm0, %v761_v35 }
  0x42   :  { %408 = vmatmul.mubr.bf16.gmra.mxu0 %v762_v36  ;;  %696 = vmatmul.mubr.msk.bf16.gmra.mxu1 %vm318_vm0, %v763_v37 }
  0x43   :  { %415 = vmatprep.mubr.bf16.mxu0 %v764_v38  ;;  %699 = vmatprep.mubr.msk.bf16.mxu1 %vm318_vm0, %v766_v39 }
  0x4a   :  { %416 = vmatmul.mubr.bf16.gmra.mxu0 %v767_v40  ;;  %700 = vmatmul.mubr.msk.bf16.gmra.mxu1 %vm318_vm0, %v768_v41 }
  0xe2   :  { %v625_v42 = vpop.f32.mrf.mxu0  ;;  %v923_v43 = vpop.f32.mrf.mxu1 }
  0xe4   :  { %v626_v44 = vpop.f32.mrf.mxu0  ;;  %v925_v45 = vpop.f32.mrf.mxu1 }
  0xe5   :  { %v627_v57 = vadd.f32 %v626_v44, %v625_v42  ;;  %v663_v44 = vadd.f32 %v925_v45, %v923_v43 }
  0xe6   :  { %v628_v46 = vpop.f32.mrf.mxu0  ;;  %v927_v47 = vpop.f32.mrf.mxu1 }
  0xe7   :  { %v378_v3 = vadd.f32 %v627_v57, %v936_v60 }
  0xe8   :  { %v629_v48 = vpop.f32.mrf.mxu0  ;;  %v929_v49 = vpop.f32.mrf.mxu1 }
  0xe9   :  { %v630_v1 = vadd.f32 %v629_v48, %v628_v46  ;;  %v666_v43 = vadd.f32 %v929_v49, %v927_v47 }
  0xea   :  { %v631_v50 = vpop.f32.mrf.mxu0  ;;  %v667_v51 = vpop.f32.mrf.mxu1 }
  0xeb   :  { %v381_v12 = vadd.f32 %v630_v1, %v936_v60 }
  0xec   :  { %v632_v52 = vpop.f32.mrf.mxu0  ;;  %v668_v53 = vpop.f32.mrf.mxu1 }
  0xed   :  { %v633_v54 = vadd.f32 %v632_v52, %v631_v50  ;;  %v669_v38 = vadd.f32 %v668_v53, %v667_v51 }
  0xee   :  { %v634_v55 = vpop.f32.mrf.mxu0  ;;  %v931_v56 = vpop.f32.mrf.mxu1 }
  0xef   :  { %v386_v62 = vadd.f32 %v633_v54, %v936_v60  ;;  %v434_v53 = vadd.f32 %v669_v38, %v936_v60 }
  0xf0   :  { %v635_v58 = vpop.f32.mrf.mxu0  ;;  %v671_v59 = vpop.f32.mrf.mxu1 }
  0xf1   :  { %v636_v61 = vadd.f32 %v635_v58, %v634_v55  ;;  %v672_v52 = vadd.f32 %v671_v59, %v931_v56 }
  0xf2   :  { %v637_v63 = vpop.f32.mrf.mxu0  ;;  %v689_v0 = vpop.f32.mrf.mxu1 }
  0xf3   :  { %v483_v2 = vadd.f32 %v689_v0, %v386_v62  ;;  %v389_v7 = vadd.f32 %v636_v61, %v936_v60  ;;  %v426_v61 = vadd.f32 %v663_v44, %v936_v60  ;;  %v437_v49 = vadd.f32 %v672_v52, %v936_v60 }
  0xf4   :  { %v638_v4 = vpop.f32.mrf.mxu0  ;;  %v474_v5 = vpop.f32.mrf.mxu1 }
  0xf5   :  { %540 = vst.msk [vmem:[%s1026_s3 + $0x10] sm:$0xff] %vm537_vm1, %v483_v2  ;;  %v475_v6 = vadd.f32 %v474_v5, %v378_v3  ;;  %v639_v10 = vadd.f32 %v638_v4, %v637_v63  ;;  %v429_v4 = vadd.f32 %v666_v43, %v936_v60 }
  0xf6   :  { %v640_v8 = vpop.f32.mrf.mxu0  ;;  %v690_v9 = vpop.f32.mrf.mxu1 }
  0xf7   :  { %538 = vst.msk [vmem:[%s1026_s3] sm:$0xff] %vm537_vm1, %v475_v6  ;;  %v486_v11 = vadd.f32 %v690_v9, %v389_v7  ;;  %v394_v19 = vadd.f32 %v639_v10, %v936_v60 }
  0xf8   :  { %v641_v13 = vpop.f32.mrf.mxu0  ;;  %v477_v14 = vpop.f32.mrf.mxu1 }
  0xf9   :  { %541 = vst.msk [vmem:[%s1026_s3 + $0x18] sm:$0xff] %vm537_vm1, %v486_v11  ;;  %v478_v15 = vadd.f32 %v477_v14, %v381_v12  ;;  %v642_v18 = vadd.f32 %v641_v13, %v640_v8 }
  0xfa   :  { %v643_v16 = vpop.f32.mrf.mxu0  ;;  %v693_v17 = vpop.f32.mrf.mxu1 }
  0xfb   :  { %539 = vst.msk [vmem:[%s1026_s3 + $0x8] sm:$0xff] %vm537_vm1, %v478_v15  ;;  %v397_v27 = vadd.f32 %v642_v18, %v936_v60 }
  0xfc   :  { %v644_v20 = vpop.f32.mrf.mxu0  ;;  %v490_v21 = vpop.f32.mrf.mxu1 }
  0xfd   :  { %v645_v22 = vadd.f32 %v644_v20, %v643_v16  ;;  %v491_v23 = vadd.f32 %v490_v21, %v394_v19 }
  0xfe   :  { %v646_v24 = vpop.f32.mrf.mxu0  ;;  %v694_v25 = vpop.f32.mrf.mxu1 }
  0xff   :  { %v402_v26 = vadd.f32 %v645_v22, %v936_v60  ;;  %542 = vst.msk [vmem:[%s1026_s3 + $0x20] sm:$0xff] %vm537_vm1, %v491_v23 }
 0x100   :  { %v647_v28 = vpop.f32.mrf.mxu0  ;;  %v493_v29 = vpop.f32.mrf.mxu1 }
 0x101   :  { %v499_v30 = vadd.f32 %v693_v17, %v402_v26  ;;  %v648_v31 = vadd.f32 %v647_v28, %v646_v24  ;;  %v494_v32 = vadd.f32 %v493_v29, %v397_v27 }
 0x102   :  { %v649_v33 = vpop.f32.mrf.mxu0  ;;  %v697_v34 = vpop.f32.mrf.mxu1 }
 0x103   :  { %544 = vst.msk [vmem:[%s1026_s3 + $0x30] sm:$0xff] %vm537_vm1, %v499_v30  ;;  %v405_v35 = vadd.f32 %v648_v31, %v936_v60  ;;  %543 = vst.msk [vmem:[%s1026_s3 + $0x28] sm:$0xff] %vm537_vm1, %v494_v32 }
 0x104   :  { %v650_v36 = vpop.f32.mrf.mxu0  ;;  %v506_v37 = vpop.f32.mrf.mxu1 }
 0x105   :  { %v502_v39 = vadd.f32 %v694_v25, %v405_v35  ;;  %v651_v40 = vadd.f32 %v650_v36, %v649_v33 }
 0x106   :  { %v652_v41 = vpop.f32.mrf.mxu0  ;;  %v698_v42 = vpop.f32.mrf.mxu1 }
 0x107   :  { %545 = vst.msk [vmem:[%s1026_s3 + $0x38] sm:$0xff] %vm537_vm1, %v502_v39  ;;  %v410_v46 = vadd.f32 %v651_v40, %v936_v60 }
 0x108   :  { %v653_v48 = vpop.f32.mrf.mxu0  ;;  %v509_v50 = vpop.f32.mrf.mxu1 }
 0x109   :  { %v507_v54 = vadd.f32 %v506_v37, %v410_v46  ;;  %v654_v51 = vadd.f32 %v653_v48, %v652_v41 }
 0x10a   :  { %v655_v55 = vpop.f32.mrf.mxu0  ;;  %v701_v57 = vpop.f32.mrf.mxu1 }
 0x10b   :  { %546 = vst.msk [vmem:[%s1026_s3 + $0x40] sm:$0xff] %vm537_vm1, %v507_v54  ;;  %v413_v45 = vadd.f32 %v654_v51, %v936_v60  ;;  %v531_v58 = vadd.f32 %v701_v57, %v434_v53 }
 0x10c   :  { %v656_v56 = vpop.f32.mrf.mxu0  ;;  %v522_v59 = vpop.f32.mrf.mxu1 }
 0x10d   :  { %v510_v62 = vadd.f32 %v509_v50, %v413_v45  ;;  %552 = vst.msk [vmem:[%s1026_s3 + $0x70] sm:$0xff] %vm537_vm1, %v531_v58  ;;  %v657_v63 = vadd.f32 %v656_v56, %v655_v55  ;;  %v523_v47 = vadd.f32 %v522_v59, %v426_v61 }
 0x10e   :  { %v658_v0 = vpop.f32.mrf.mxu0  ;;  %v702_v1 = vpop.f32.mrf.mxu1 }
 0x10f   :  { %547 = vst.msk [vmem:[%s1026_s3 + $0x48] sm:$0xff] %vm537_vm1, %v510_v62  ;;  %v418_v2 = vadd.f32 %v657_v63, %v936_v60  ;;  %550 = vst.msk [vmem:[%s1026_s3 + $0x60] sm:$0xff] %vm537_vm1, %v523_v47  ;;  %v534_v3 = vadd.f32 %v702_v1, %v437_v49 }
 0x110   :  { %v659_v5 = vpop.f32.mrf.mxu0  ;;  %v525_v6 = vpop.f32.mrf.mxu1 }
 0x111   :  { %v515_v7 = vadd.f32 %v697_v34, %v418_v2  ;;  %553 = vst.msk [vmem:[%s1026_s3 + $0x78] sm:$0xff] %vm537_vm1, %v534_v3  ;;  %v660_v8 = vadd.f32 %v659_v5, %v658_v0  ;;  %v526_v9 = vadd.f32 %v525_v6, %v429_v4 }
 0x113   :  { %548 = vst.msk [vmem:[%s1026_s3 + $0x50] sm:$0xff] %vm537_vm1, %v515_v7  ;;  %v421_v10 = vadd.f32 %v660_v8, %v936_v60  ;;  %551 = vst.msk [vmem:[%s1026_s3 + $0x68] sm:$0xff] %vm537_vm1, %v526_v9 }
 0x115   :  { %v518_v11 = vadd.f32 %v698_v42, %v421_v10 }
 0x117   :  { %549 = vst.msk [vmem:[%s1026_s3 + $0x58] sm:$0xff] %vm537_vm1, %v518_v11 }

// kernel: _lambda_.123
= control target key start
LH: loop header
LB: loop body
LE: loop exit
PB: predicated region body
PF: predicated region fallthrough
CT: control target
= control target key end

     0   :  { %s1850_s1 = inlined_call_operand.vmem [shape: bf16[576,32], index: 1, kind: input, shape index: {}]   ;;  %s1851_s0 = inlined_call_operand.vmem [shape: bf16[128,576], index: 0, kind: input, shape index: {}]   ;;  %s1852_s2 = inlined_call_operand.vmem [shape: f32[1,32], index: 2, kind: input, shape index: {}]   ;;  %s1853_s3 = inlined_call_operand.vmem [shape: f32[128,32], index: 3, kind: input, shape index: {}]   ;;  %s1854_s4 = inlined_call_operand.vmem [shape: f32[128,32], index: 4, kind: output, shape index: {}]  }
   0x1   :  { %v1307_v0 = vld [vmem:[%s1850_s1 + $0x78] sm:$0xff]   ;;  %v1311_v4 = vld [vmem:[%s1850_s1 + $0x70] sm:$0xff]   ;;  %v1315_v8 = vld [vmem:[%s1850_s1 + $0x68] sm:$0xff]  }
   0x2   :  { %v1308_v1 = vld [vmem:[%s1850_s1 + $0xf8] sm:$0xff]   ;;  %1135 = vmatprep.subr.bf16.mxu0 %v1307_v0  ;;  %v1312_v5 = vld [vmem:[%s1850_s1 + $0xf0] sm:$0xff]   ;;  %v1316_v9 = vld [vmem:[%s1850_s1 + $0xe8] sm:$0xff]  }
   0x3   :  { %v1309_v2 = vld [vmem:[%s1850_s1 + $0x38] sm:$0xff]   ;;  %1199 = vmatprep.subr.bf16.mxu1 %v1308_v1  ;;  %v1313_v6 = vld [vmem:[%s1850_s1 + $0x30] sm:$0xff]   ;;  %v1317_v10 = vld [vmem:[%s1850_s1 + $0x28] sm:$0xff]  }
   0x4   :  { %v1310_v3 = vld [vmem:[%s1850_s1 + $0xb8] sm:$0xff]   ;;  %1136 = vmatpush3.bf16.msra.mxu0 %v1309_v2  ;;  %v1314_v7 = vld [vmem:[%s1850_s1 + $0xb0] sm:$0xff]   ;;  %v1318_v11 = vld [vmem:[%s1850_s1 + $0xa8] sm:$0xff]  }
   0x5   :  { %1200 = vmatpush3.bf16.msra.mxu1 %v1310_v3  ;;  %1137 = vmatprep.subr.bf16.mxu0 %v1311_v4  ;;  %v1319_v12 = vld [vmem:[%s1850_s1 + $0x60] sm:$0xff]   ;;  %v1323_v16 = vld [vmem:[%s1850_s1 + $0x58] sm:$0xff]   ;;  %v1327_v20 = vld [vmem:[%s1850_s1 + $0x50] sm:$0xff]  }
   0x6   :  { %1201 = vmatprep.subr.bf16.mxu1 %v1312_v5  ;;  %v1320_v13 = vld [vmem:[%s1850_s1 + $0xe0] sm:$0xff]   ;;  %v1324_v17 = vld [vmem:[%s1850_s1 + $0xd8] sm:$0xff]   ;;  %v1328_v21 = vld [vmem:[%s1850_s1 + $0xd0] sm:$0xff]  }
   0x7   :  { %v1321_v14 = vld [vmem:[%s1850_s1 + $0x20] sm:$0xff]   ;;  %v1325_v18 = vld [vmem:[%s1850_s1 + $0x18] sm:$0xff]   ;;  %v1329_v22 = vld [vmem:[%s1850_s1 + $0x10] sm:$0xff]  }
   0x8   :  { %1138 = vmatpush3.bf16.msra.mxu0 %v1313_v6  ;;  %v1322_v15 = vld [vmem:[%s1850_s1 + $0xa0] sm:$0xff]   ;;  %v1326_v19 = vld [vmem:[%s1850_s1 + $0x98] sm:$0xff]   ;;  %v1330_v23 = vld [vmem:[%s1850_s1 + $0x90] sm:$0xff]  }
   0x9   :  { %1202 = vmatpush3.bf16.msra.mxu1 %v1314_v7  ;;  %1139 = vmatprep.subr.bf16.mxu0 %v1315_v8  ;;  %v1331_v24 = vld [vmem:[%s1850_s1 + $0x48] sm:$0xff]   ;;  %v1335_v28 = vld [vmem:[%s1850_s1 + $0x40] sm:$0xff]   ;;  %v21_v33 = vld [vmem:[%s1851_s0 + $0x14] sm:$0xff] }
   0xa   :  { %1203 = vmatprep.subr.bf16.mxu1 %v1316_v9  ;;  %v1332_v25 = vld [vmem:[%s1850_s1 + $0xc8] sm:$0xff]   ;;  %v1336_v29 = vld [vmem:[%s1850_s1 + $0xc0] sm:$0xff]   ;;  %v71_v37 = vunpack.c.l.bf16 %v21_v33  ;;  %v72_v38 = vunpack.c.h.bf16 %v21_v33  ;;  %v1339_v44 = vld [vmem:[%s1850_s1 + $0x118] sm:$0xff]  }
   0xb   :  { %v1333_v26 = vld [vmem:[%s1850_s1 + $0x8] sm:$0xff]   ;;  %v1337_v30 = vld [vmem:[%s1850_s1] sm:$0xff]   ;;  %v25_v57 = vld [vmem:[%s1851_s0 + $0x30] sm:$0xff] }
   0xc   :  { %1140 = vmatpush3.bf16.msra.mxu0 %v1317_v10  ;;  %v1334_v27 = vld [vmem:[%s1850_s1 + $0x88] sm:$0xff]   ;;  %v1338_v31 = vld [vmem:[%s1850_s1 + $0x80] sm:$0xff]   ;;  %vm152_vm1 = vcmp.ge.f32.partialorder %v72_v38, 0.0  ;;  %v232_v46 = vmul.f32 0.01, %v72_v38  ;;  %vm151_vm5 = vcmp.ge.f32.partialorder %v71_v37, 0.0  ;;  %v79_v3 = vunpack.c.h.bf16 %v25_v57 }
   0xd   :  { %1204 = vmatpush3.bf16.msra.mxu1 %v1318_v11  ;;  %1141 = vmatprep.subr.bf16.mxu0 %v1319_v12  ;;  %v18_v32 = vld [vmem:[%s1851_s0] sm:$0xff]  ;;  %v19_v34 = vld [vmem:[%s1851_s0 + $0x8] sm:$0xff]  ;;  %v231_v60 = vmul.f32 0.01, %v71_v37  ;;  %v1340_v8 = vld [vmem:[%s1850_s1 + $0x110] sm:$0xff]  }
   0xe   :  { %1205 = vmatprep.subr.bf16.mxu1 %v1320_v13  ;;  %v66_v35 = vunpack.c.l.bf16 %v18_v32  ;;  %v67_v36 = vunpack.c.h.bf16 %v18_v32  ;;  %v22_v39 = vld [vmem:[%s1851_s0 + $0x1c] sm:$0xff]  ;;  %v68_v40 = vunpack.c.l.bf16 %v19_v34  ;;  %v69_v41 = vunpack.c.h.bf16 %v19_v34  ;;  %v24_v51 = vld [vmem:[%s1851_s0 + $0x28] sm:$0xff] }
   0xf   :  { %v73_v42 = vunpack.c.l.bf16 %v22_v39  ;;  %v74_v43 = vunpack.c.h.bf16 %v22_v39  ;;  %v312_v50 = vsel %vm152_vm1, %v72_v38, %v232_v46  ;;  %v27_v56 = vld [vmem:[%s1851_s0 + $0x3c] sm:$0xff]  ;;  %v28_v58 = vld [vmem:[%s1851_s0 + $0x44] sm:$0xff]  ;;  %v77_v0 = vunpack.c.h.bf16 %v24_v51  ;;  %v34_v34 = vld [vmem:[%s1851_s0 + $0x6c] sm:$0xff] }
  0x10   :  { %1142 = vmatpush3.bf16.msra.mxu0 %v1321_v14  ;;  %vm147_vm0 = vcmp.ge.f32.partialorder %v67_v36, 0.0  ;;  %v227_v45 = vmul.f32 0.01, %v67_v36  ;;  %vm149_vm2 = vcmp.ge.f32.partialorder %v69_v41, 0.0  ;;  %v229_v47 = vmul.f32 0.01, %v69_v41 }
  0x11   :  { %1206 = vmatpush3.bf16.msra.mxu1 %v1322_v15  ;;  %1143 = vmatprep.subr.bf16.mxu0 %v1323_v16  ;;  %vm154_vm3 = vcmp.ge.f32.partialorder %v74_v43, 0.0  ;;  %v234_v48 = vmul.f32 0.01, %v74_v43  ;;  %vm146_vm4 = vcmp.ge.f32.partialorder %v66_v35, 0.0  ;;  %v226_v55 = vmul.f32 0.01, %v66_v35 }
  0x12   :  { %1207 = vmatprep.subr.bf16.mxu1 %v1324_v17  ;;  %v307_v49 = vsel %vm147_vm0, %v67_v36, %v227_v45  ;;  %v309_v53 = vsel %vm149_vm2, %v69_v41, %v229_v47  ;;  %vm148_vm6 = vcmp.ge.f32.partialorder %v68_v40, 0.0  ;;  %vm153_vm7 = vcmp.ge.f32.partialorder %v73_v42, 0.0 }
  0x13   :  { %v387_v52 = vpack.c.bf16 %v312_v50, %v307_v49  ;;  %v314_v54 = vsel %vm154_vm3, %v74_v43, %v234_v48  ;;  %v306_v61 = vsel %vm146_vm4, %v66_v35, %v226_v55  ;;  %v228_v62 = vmul.f32 0.01, %v68_v40 }
  0x14   :  { %1144 = vmatpush3.bf16.msra.mxu0 %v1325_v18  ;;  %v389_v59 = vpack.c.bf16 %v314_v54, %v309_v53  ;;  %v233_v63 = vmul.f32 0.01, %v73_v42  ;;  %v311_v1 = vsel %vm151_vm5, %v71_v37, %v231_v60  ;;  %v82_v2 = vunpack.c.h.bf16 %v27_v56  ;;  %v30_v18 = vld [vmem:[%s1851_s0 + $0x50] sm:$0xff] }
  0x15   :  { %1208 = vmatpush3.bf16.msra.mxu1 %v1326_v19  ;;  %1145 = vmatprep.subr.bf16.mxu0 %v1327_v20  ;;  %v84_v4 = vunpack.c.h.bf16 %v28_v58  ;;  %v386_v5 = vpack.c.bf16 %v311_v1, %v306_v61  ;;  %v308_v6 = vsel %vm148_vm6, %v68_v40, %v228_v62  ;;  %vm157_vm8 = vcmp.ge.f32.partialorder %v77_v0, 0.0  ;;  %v33_v19 = vld [vmem:[%s1851_s0 + $0x64] sm:$0xff] }
  0x16   :  { %1209 = vmatprep.subr.bf16.mxu1 %v1328_v21  ;;  %778 = vmatprep.mubr.bf16.mxu0 %v387_v52  ;;  %v313_v7 = vsel %vm153_vm7, %v73_v42, %v233_v63  ;;  %vm162_vm9 = vcmp.ge.f32.partialorder %v82_v2, 0.0  ;;  %v237_v10 = vmul.f32 0.01, %v77_v0  ;;  %v242_v11 = vmul.f32 0.01, %v82_v2  ;;  %v36_v52 = vld [vmem:[%s1851_s0 + $0x78] sm:$0xff] }
  0x17   :  { %875 = vmatprep.mubr.bf16.mxu1 %v389_v59  ;;  %v388_v9 = vpack.c.bf16 %v313_v7, %v308_v6  ;;  %vm159_vm10 = vcmp.ge.f32.partialorder %v79_v3, 0.0  ;;  %vm164_vm11 = vcmp.ge.f32.partialorder %v84_v4, 0.0  ;;  %v239_v12 = vmul.f32 0.01, %v79_v3 }
  0x18   :  { %1146 = vmatpush3.bf16.msra.mxu0 %v1329_v22  ;;  %v244_v13 = vmul.f32 0.01, %v84_v4  ;;  %v317_v14 = vsel %vm157_vm8, %v77_v0, %v237_v10  ;;  %v322_v15 = vsel %vm162_vm9, %v82_v2, %v242_v11  ;;  %v76_v16 = vunpack.c.l.bf16 %v24_v51 }
  0x19   :  { %1210 = vmatpush3.bf16.msra.mxu1 %v1330_v23  ;;  %1147 = vmatprep.subr.bf16.mxu0 %v1331_v24  ;;  %v81_v17 = vunpack.c.l.bf16 %v27_v56  ;;  %v392_v20 = vpack.c.bf16 %v322_v15, %v317_v14  ;;  %v319_v21 = vsel %vm159_vm10, %v79_v3, %v239_v12  ;;  %v78_v23 = vunpack.c.l.bf16 %v25_v57  ;;  %v31_v24 = vld [vmem:[%s1851_s0 + $0x58] sm:$0xff]  ;;  %v39_v56 = vld [vmem:[%s1851_s0 + $0x8c] sm:$0xff]  ;;  %v37_v3 = vld [vmem:[%s1851_s0 + $0x80] sm:$0xff] }
  0x1a   :  { %1211 = vmatprep.subr.bf16.mxu1 %v1332_v25  ;;  %v324_v22 = vsel %vm164_vm11, %v84_v4, %v244_v13  ;;  %v1341_v25 = vld [vmem:[%s1850_s1 + $0x108] sm:$0xff]   ;;  %vm156_vm12 = vcmp.ge.f32.partialorder %v76_v16, 0.0  ;;  %v87_v32 = vunpack.c.h.bf16 %v30_v18  ;;  %v92_v33 = vunpack.c.h.bf16 %v33_v19  ;;  %v40_v4 = vld [vmem:[%s1851_s0 + $0x94] sm:$0xff] }
  0x1b   :  { %vm161_vm13 = vcmp.ge.f32.partialorder %v81_v17, 0.0  ;;  %vm158_vm14 = vcmp.ge.f32.partialorder %v78_v23, 0.0  ;;  %v89_v35 = vunpack.c.h.bf16 %v31_v24  ;;  %v94_v43 = vunpack.c.h.bf16 %v34_v34 }
  0x1c   :  { %1148 = vmatpush3.bf16.msra.mxu0 %v1333_v26  ;;  %v394_v26 = vpack.c.bf16 %v324_v22, %v319_v21  ;;  %vm167_vm0 = vcmp.ge.f32.partialorder %v87_v32, 0.0  ;;  %vm172_vm1 = vcmp.ge.f32.partialorder %v92_v33, 0.0  ;;  %v247_v40 = vmul.f32 0.01, %v87_v32  ;;  %v45_v21 = vld [vmem:[%s1851_s0 + $0xb4] sm:$0xff] }
  0x1d   :  { %1212 = vmatpush3.bf16.msra.mxu1 %v1334_v27  ;;  %1149 = vmatprep.subr.bf16.mxu0 %v1335_v28  ;;  %v236_v27 = vmul.f32 0.01, %v76_v16  ;;  %v241_v28 = vmul.f32 0.01, %v81_v17  ;;  %v252_v42 = vmul.f32 0.01, %v92_v33  ;;  %v86_v48 = vunpack.c.l.bf16 %v30_v18 }
  0x1e   :  { %1213 = vmatprep.subr.bf16.mxu1 %v1336_v29  ;;  %v83_v29 = vunpack.c.l.bf16 %v28_v58  ;;  %vm169_vm2 = vcmp.ge.f32.partialorder %v89_v35, 0.0  ;;  %v327_v46 = vsel %vm167_vm0, %v87_v32, %v247_v40  ;;  %v249_v47 = vmul.f32 0.01, %v89_v35  ;;  %v43_v32 = vld [vmem:[%s1851_s0 + $0xa8] sm:$0xff] }
  0x1f   :  { %v321_v36 = vsel %vm161_vm13, %v81_v17, %v241_v28  ;;  %v332_v49 = vsel %vm172_vm1, %v92_v33, %v252_v42  ;;  %vm174_vm3 = vcmp.ge.f32.partialorder %v94_v43, 0.0  ;;  %v254_v50 = vmul.f32 0.01, %v94_v43 }
  0x20   :  { %1150 = vmatpush3.bf16.msra.mxu0 %v1337_v30  ;;  %v238_v30 = vmul.f32 0.01, %v78_v23  ;;  %vm163_vm15 = vcmp.ge.f32.partialorder %v83_v29, 0.0  ;;  %v243_v37 = vmul.f32 0.01, %v83_v29  ;;  %v91_v51 = vunpack.c.l.bf16 %v33_v19 }
  0x21   :  { %1214 = vmatpush3.bf16.msra.mxu1 %v1338_v31  ;;  %1275 = vmatprep.subr.bf16.mxu0 %v1339_v44  ;;  %v316_v31 = vsel %vm156_vm12, %v76_v16, %v236_v27  ;;  %v397_v53 = vpack.c.bf16 %v332_v49, %v327_v46  ;;  %v329_v54 = vsel %vm169_vm2, %v89_v35, %v249_v47  ;;  %vm166_vm4 = vcmp.ge.f32.partialorder %v86_v48, 0.0  ;;  %v46_v35 = vld [vmem:[%s1851_s0 + $0xbc] sm:$0xff]  ;;  %v48_v49 = vld [vmem:[%s1851_s0 + $0xc8] sm:$0xff] }
  0x22   :  { %1299 = vmatprep.subr.bf16.mxu1 %v1339_v44  ;;  %v318_v38 = vsel %vm158_vm14, %v78_v23, %v238_v30  ;;  %v391_v39 = vpack.c.bf16 %v321_v36, %v316_v31  ;;  %v323_v41 = vsel %vm163_vm15, %v83_v29, %v243_v37  ;;  %v246_v55 = vmul.f32 0.01, %v86_v48 }
  0x23   :  { %779 = vmatmul.mubr.bf16.vlgmr.msra.gmra.mxu0 %v386_v5  ;;  %v393_v45 = vpack.c.bf16 %v323_v41, %v318_v38  ;;  %v334_v57 = vsel %vm174_vm3, %v94_v43, %v254_v50  ;;  %vm171_vm5 = vcmp.ge.f32.partialorder %v91_v51, 0.0  ;;  %v251_v58 = vmul.f32 0.01, %v91_v51 }
  0x24   :  { %876 = vmatmul.mubr.bf16.vlgmr.msra.gmra.mxu1 %v388_v9  ;;  %1276 = vmatpush3.bf16.msra.mxu0 %v1339_v44  ;;  %v88_v59 = vunpack.c.l.bf16 %v31_v24  ;;  %v399_v60 = vpack.c.bf16 %v334_v57, %v329_v54  ;;  %v326_v61 = vsel %vm166_vm4, %v86_v48, %v246_v55  ;;  %v93_v62 = vunpack.c.l.bf16 %v34_v34 }
  0x25   :  { %1303 = vmatpush3.bf16.msra.mxu1 %v1339_v44  ;;  %1277 = vmatprep.subr.bf16.mxu0 %v1340_v8  ;;  %v1342_v44 = vld [vmem:[%s1850_s1 + $0x100] sm:$0xff]   ;;  %v97_v63 = vunpack.c.h.bf16 %v36_v52  ;;  %v331_v0 = vsel %vm171_vm5, %v91_v51, %v251_v58  ;;  %v102_v2 = vunpack.c.h.bf16 %v39_v56  ;;  %v99_v11 = vunpack.c.h.bf16 %v37_v3 }
  0x26   :  { %1300 = vmatprep.subr.bf16.mxu1 %v1340_v8  ;;  %786 = vmatprep.mubr.bf16.mxu0 %v392_v20  ;;  %vm168_vm6 = vcmp.ge.f32.partialorder %v88_v59, 0.0  ;;  %v248_v1 = vmul.f32 0.01, %v88_v59  ;;  %v396_v5 = vpack.c.bf16 %v331_v0, %v326_v61  ;;  %vm173_vm7 = vcmp.ge.f32.partialorder %v93_v62, 0.0  ;;  %v42_v20 = vld [vmem:[%s1851_s0 + $0xa0] sm:$0xff]  ;;  %v49_v0 = vld [vmem:[%s1851_s0 + $0xd0] sm:$0xff] }
  0x27   :  { %883 = vmatprep.mubr.bf16.mxu1 %v394_v26  ;;  %v253_v6 = vmul.f32 0.01, %v93_v62  ;;  %vm177_vm8 = vcmp.ge.f32.partialorder %v97_v63, 0.0  ;;  %vm182_vm9 = vcmp.ge.f32.partialorder %v102_v2, 0.0  ;;  %v262_v9 = vmul.f32 0.01, %v102_v2 }
  0x28   :  { %1278 = vmatpush3.bf16.msra.mxu0 %v1340_v8  ;;  %v328_v7 = vsel %vm168_vm6, %v88_v59, %v248_v1  ;;  %v104_v12 = vunpack.c.h.bf16 %v40_v4  ;;  %v96_v13 = vunpack.c.l.bf16 %v36_v52  ;;  %v101_v17 = vunpack.c.l.bf16 %v39_v56  ;;  %v51_v59 = vld [vmem:[%s1851_s0 + $0xdc] sm:$0xff] }
  0x29   :  { %1304 = vmatpush3.bf16.msra.mxu1 %v1340_v8  ;;  %1279 = vmatprep.subr.bf16.mxu0 %v1341_v25  ;;  %v257_v8 = vmul.f32 0.01, %v97_v63  ;;  %v333_v10 = vsel %vm173_vm7, %v93_v62, %v253_v6  ;;  %v342_v16 = vsel %vm182_vm9, %v102_v2, %v262_v9  ;;  %vm179_vm10 = vcmp.ge.f32.partialorder %v99_v11, 0.0  ;;  %v52_v6 = vld [vmem:[%s1851_s0 + $0xe4] sm:$0xff] }
  0x2a   :  { %1301 = vmatprep.subr.bf16.mxu1 %v1341_v25  ;;  %v398_v14 = vpack.c.bf16 %v333_v10, %v328_v7  ;;  %vm184_vm11 = vcmp.ge.f32.partialorder %v104_v12, 0.0  ;;  %v259_v19 = vmul.f32 0.01, %v99_v11  ;;  %v264_v22 = vmul.f32 0.01, %v104_v12 }
  0x2b   :  { %787 = vmatmul.mubr.bf16.gmra.mxu0 %v391_v39  ;;  %v337_v15 = vsel %vm177_vm8, %v97_v63, %v257_v8  ;;  %vm176_vm12 = vcmp.ge.f32.partialorder %v96_v13, 0.0  ;;  %vm181_vm13 = vcmp.ge.f32.partialorder %v101_v17, 0.0  ;;  %v256_v23 = vmul.f32 0.01, %v96_v13 }
  0x2c   :  { %1280 = vmatpush3.bf16.msra.mxu0 %v1341_v25  ;;  %884 = vmatmul.mubr.bf16.gmra.mxu1 %v393_v45  ;;  %v402_v18 = vpack.c.bf16 %v342_v16, %v337_v15  ;;  %v339_v24 = vsel %vm179_vm10, %v99_v11, %v259_v19  ;;  %v98_v26 = vunpack.c.l.bf16 %v37_v3  ;;  %v103_v27 = vunpack.c.l.bf16 %v40_v4 }
  0x2d   :  { %1305 = vmatpush3.bf16.msra.mxu1 %v1341_v25  ;;  %1281 = vmatprep.subr.bf16.mxu0 %v1342_v44  ;;  %v261_v25 = vmul.f32 0.01, %v101_v17  ;;  %v344_v28 = vsel %vm184_vm11, %v104_v12, %v264_v22  ;;  %v336_v29 = vsel %vm176_vm12, %v96_v13, %v256_v23  ;;  %v107_v30 = vunpack.c.h.bf16 %v42_v20 }
  0x2e   :  { %1302 = vmatprep.subr.bf16.mxu1 %v1342_v44  ;;  %794 = vmatprep.mubr.bf16.mxu0 %v397_v53  ;;  %v112_v31 = vunpack.c.h.bf16 %v45_v21  ;;  %v404_v33 = vpack.c.bf16 %v344_v28, %v339_v24  ;;  %vm178_vm14 = vcmp.ge.f32.partialorder %v98_v26, 0.0  ;;  %vm183_vm15 = vcmp.ge.f32.partialorder %v103_v27, 0.0  ;;  %v54_v24 = vld [vmem:[%s1851_s0 + $0xf0] sm:$0xff] }
  0x2f   :  { %891 = vmatprep.mubr.bf16.mxu1 %v399_v60  ;;  %v341_v34 = vsel %vm181_vm13, %v101_v17, %v261_v25  ;;  %v258_v37 = vmul.f32 0.01, %v98_v26  ;;  %v263_v38 = vmul.f32 0.01, %v103_v27  ;;  %vm187_vm0 = vcmp.ge.f32.partialorder %v107_v30, 0.0  ;;  %v57_v25 = vld [vmem:[%s1851_s0 + $0x104] sm:$0xff] }
  0x30   :  { %1282 = vmatpush3.bf16.msra.mxu0 %v1342_v44  ;;  %v401_v36 = vpack.c.bf16 %v341_v34, %v336_v29  ;;  %vm192_vm1 = vcmp.ge.f32.partialorder %v112_v31, 0.0  ;;  %v267_v39 = vmul.f32 0.01, %v107_v30  ;;  %v272_v40 = vmul.f32 0.01, %v112_v31 }
  0x31   :  { %1306 = vmatpush3.bf16.msra.mxu1 %v1342_v44  ;;  %v109_v41 = vunpack.c.h.bf16 %v43_v32  ;;  %v338_v42 = vsel %vm178_vm14, %v98_v26, %v258_v37  ;;  %v343_v43 = vsel %vm183_vm15, %v103_v27, %v263_v38  ;;  %v114_v44 = vunpack.c.h.bf16 %v46_v35 }
  0x32   :  { %v106_v45 = vunpack.c.l.bf16 %v42_v20  ;;  %v403_v46 = vpack.c.bf16 %v343_v43, %v338_v42  ;;  %v347_v47 = vsel %vm187_vm0, %v107_v30, %v267_v39  ;;  %v352_v48 = vsel %vm192_vm1, %v112_v31, %v272_v40  ;;  %v55_v30 = vld [vmem:[%s1851_s0 + $0xf8] sm:$0xff]  ;;  %v58_v31 = vld [vmem:[%s1851_s0 + $0x10c] sm:$0xff] }
  0x33   :  { %795 = vmatmul.mubr.bf16.gmra.mxu0 %v396_v5  ;;  %vm189_vm2 = vcmp.ge.f32.partialorder %v109_v41, 0.0  ;;  %v407_v50 = vpack.c.bf16 %v352_v48, %v347_v47  ;;  %vm194_vm3 = vcmp.ge.f32.partialorder %v114_v44, 0.0  ;;  %v269_v51 = vmul.f32 0.01, %v109_v41 }
  0x34   :  { %892 = vmatmul.mubr.bf16.gmra.mxu1 %v398_v14  ;;  %802 = vmatprep.mubr.bf16.mxu0 %v402_v18  ;;  %v274_v52 = vmul.f32 0.01, %v114_v44  ;;  %v111_v53 = vunpack.c.l.bf16 %v45_v21  ;;  %vm186_vm4 = vcmp.ge.f32.partialorder %v106_v45, 0.0  ;;  %v266_v54 = vmul.f32 0.01, %v106_v45 }
  0x35   :  { %899 = vmatprep.mubr.bf16.mxu1 %v404_v33  ;;  %v108_v55 = vunpack.c.l.bf16 %v43_v32  ;;  %v349_v56 = vsel %vm189_vm2, %v109_v41, %v269_v51  ;;  %v113_v58 = vunpack.c.l.bf16 %v46_v35  ;;  %v117_v60 = vunpack.c.h.bf16 %v48_v49 }
  0x36   :  { %v354_v57 = vsel %vm194_vm3, %v114_v44, %v274_v52  ;;  %vm191_vm5 = vcmp.ge.f32.partialorder %v111_v53, 0.0  ;;  %v271_v62 = vmul.f32 0.01, %v111_v53  ;;  %v346_v63 = vsel %vm186_vm4, %v106_v45, %v266_v54 }
  0x37   :  { %v409_v61 = vpack.c.bf16 %v354_v57, %v349_v56  ;;  %vm188_vm6 = vcmp.ge.f32.partialorder %v108_v55, 0.0  ;;  %vm193_vm7 = vcmp.ge.f32.partialorder %v113_v58, 0.0  ;;  %v268_v1 = vmul.f32 0.01, %v108_v55  ;;  %v63_v56 = vld [vmem:[%s1851_s0 + $0x12c] sm:$0xff] }
  0x38   :  { %v273_v2 = vmul.f32 0.01, %v113_v58  ;;  %v351_v3 = vsel %vm191_vm5, %v111_v53, %v271_v62  ;;  %v122_v4 = vunpack.c.h.bf16 %v51_v59  ;;  %vm197_vm8 = vcmp.ge.f32.partialorder %v117_v60, 0.0 }
  0x39   :  { %v277_v5 = vmul.f32 0.01, %v117_v60  ;;  %v406_v7 = vpack.c.bf16 %v351_v3, %v346_v63  ;;  %v348_v8 = vsel %vm188_vm6, %v108_v55, %v268_v1  ;;  %v119_v10 = vunpack.c.h.bf16 %v49_v0  ;;  %v60_v55 = vld [vmem:[%s1851_s0 + $0x118] sm:$0xff] }
  0x3a   :  { %v353_v9 = vsel %vm193_vm7, %v113_v58, %v273_v2  ;;  %vm202_vm9 = vcmp.ge.f32.partialorder %v122_v4, 0.0  ;;  %v282_v12 = vmul.f32 0.01, %v122_v4  ;;  %v124_v14 = vunpack.c.h.bf16 %v52_v6 }
  0x3b   :  { %803 = vmatmul.mubr.bf16.gmra.mxu0 %v401_v36  ;;  %v408_v11 = vpack.c.bf16 %v353_v9, %v348_v8  ;;  %v357_v13 = vsel %vm197_vm8, %v117_v60, %v277_v5  ;;  %vm199_vm10 = vcmp.ge.f32.partialorder %v119_v10, 0.0  ;;  %v279_v15 = vmul.f32 0.01, %v119_v10  ;;  %v61_v60 = vld [vmem:[%s1851_s0 + $0x120] sm:$0xff] }
  0x3c   :  { %900 = vmatmul.mubr.bf16.gmra.mxu1 %v403_v46  ;;  %810 = vmatprep.mubr.bf16.mxu0 %v407_v50  ;;  %v116_v16 = vunpack.c.l.bf16 %v48_v49  ;;  %v362_v17 = vsel %vm202_vm9, %v122_v4, %v282_v12  ;;  %v121_v18 = vunpack.c.l.bf16 %v51_v59  ;;  %v118_v19 = vunpack.c.l.bf16 %v49_v0  ;;  %v64_v4 = vld [vmem:[%s1851_s0 + $0x134] sm:$0xff] }
  0x3d   :  { %907 = vmatprep.mubr.bf16.mxu1 %v409_v61  ;;  %v123_v20 = vunpack.c.l.bf16 %v52_v6  ;;  %v412_v21 = vpack.c.bf16 %v362_v17, %v357_v13  ;;  %vm204_vm11 = vcmp.ge.f32.partialorder %v124_v14, 0.0  ;;  %v284_v22 = vmul.f32 0.01, %v124_v14 }
  0x3e   :  { %v359_v23 = vsel %vm199_vm10, %v119_v10, %v279_v15  ;;  %vm196_vm12 = vcmp.ge.f32.partialorder %v116_v16, 0.0  ;;  %vm201_vm13 = vcmp.ge.f32.partialorder %v121_v18, 0.0  ;;  %v276_v26 = vmul.f32 0.01, %v116_v16 }
  0x3f   :  { %v281_v27 = vmul.f32 0.01, %v121_v18  ;;  %v364_v28 = vsel %vm204_vm11, %v124_v14, %v284_v22  ;;  %vm198_vm14 = vcmp.ge.f32.partialorder %v118_v19, 0.0  ;;  %vm203_vm15 = vcmp.ge.f32.partialorder %v123_v20, 0.0 }
  0x40   :  { %v278_v29 = vmul.f32 0.01, %v118_v19  ;;  %v414_v32 = vpack.c.bf16 %v364_v28, %v359_v23  ;;  %v356_v33 = vsel %vm196_vm12, %v116_v16, %v276_v26  ;;  %v283_v35 = vmul.f32 0.01, %v123_v20 }
  0x41   :  { %v361_v34 = vsel %vm201_vm13, %v121_v18, %v281_v27  ;;  %v127_v38 = vunpack.c.h.bf16 %v54_v24  ;;  %v132_v39 = vunpack.c.h.bf16 %v57_v25  ;;  %v129_v41 = vunpack.c.h.bf16 %v55_v30 }
  0x42   :  { %v411_v36 = vpack.c.bf16 %v361_v34, %v356_v33  ;;  %v358_v37 = vsel %vm198_vm14, %v118_v19, %v278_v29  ;;  %v363_v40 = vsel %vm203_vm15, %v123_v20, %v283_v35  ;;  %v134_v42 = vunpack.c.h.bf16 %v58_v31  ;;  %v20_v20 = vld [vmem:[%s1851_s0 + $0x10] ss:$20 sps:$4 sm:$0xff]   ;;  %v26_v35 = vld [vmem:[%s1851_s0 + $0x38] ss:$20 sps:$4 sm:$0xff]  }
  0x43   :  { %811 = vmatmul.mubr.bf16.gmra.mxu0 %v406_v7  ;;  %v126_v43 = vunpack.c.l.bf16 %v54_v24  ;;  %v413_v44 = vpack.c.bf16 %v363_v40, %v358_v37  ;;  %vm207_vm0 = vcmp.ge.f32.partialorder %v127_v38, 0.0  ;;  %vm212_vm1 = vcmp.ge.f32.partialorder %v132_v39, 0.0 }
  0x44   :  { %908 = vmatmul.mubr.bf16.gmra.mxu1 %v408_v11  ;;  %818 = vmatprep.mubr.bf16.mxu0 %v412_v21  ;;  %v287_v45 = vmul.f32 0.01, %v127_v38  ;;  %v292_v46 = vmul.f32 0.01, %v132_v39  ;;  %vm209_vm2 = vcmp.ge.f32.partialorder %v129_v41, 0.0  ;;  %vm214_vm3 = vcmp.ge.f32.partialorder %v134_v42, 0.0 }
  0x45   :  { %915 = vmatprep.mubr.bf16.mxu1 %v414_v32  ;;  %v289_v47 = vmul.f32 0.01, %v129_v41  ;;  %v294_v49 = vmul.f32 0.01, %v134_v42  ;;  %v131_v50 = vunpack.c.l.bf16 %v57_v25  ;;  %vm206_vm4 = vcmp.ge.f32.partialorder %v126_v43, 0.0 }
  0x46   :  { %v367_v48 = vsel %vm207_vm0, %v127_v38, %v287_v45  ;;  %v372_v51 = vsel %vm212_vm1, %v132_v39, %v292_v46  ;;  %v286_v53 = vmul.f32 0.01, %v126_v43  ;;  %v128_v54 = vunpack.c.l.bf16 %v55_v30 }
  0x47   :  { %v369_v52 = vsel %vm209_vm2, %v129_v41, %v289_v47  ;;  %v417_v57 = vpack.c.bf16 %v372_v51, %v367_v48  ;;  %v374_v58 = vsel %vm214_vm3, %v134_v42, %v294_v49  ;;  %vm211_vm5 = vcmp.ge.f32.partialorder %v131_v50, 0.0  ;;  %v50_v49 = vld [vmem:[%s1851_s0 + $0xd8] ss:$20 sps:$4 sm:$0xff]  }
  0x48   :  { %v291_v59 = vmul.f32 0.01, %v131_v50  ;;  %v419_v61 = vpack.c.bf16 %v374_v58, %v369_v52  ;;  %v366_v62 = vsel %vm206_vm4, %v126_v43, %v286_v53  ;;  %v133_v63 = vunpack.c.l.bf16 %v58_v31  ;;  %v44_v31 = vld [vmem:[%s1851_s0 + $0xb0] ss:$20 sps:$4 sm:$0xff]   ;;  %v32_v52 = vld [vmem:[%s1851_s0 + $0x60] ss:$20 sps:$4 sm:$0xff]  }
  0x49   :  { %vm208_vm6 = vcmp.ge.f32.partialorder %v128_v54, 0.0  ;;  %v288_v1 = vmul.f32 0.01, %v128_v54  ;;  %v137_v2 = vunpack.c.h.bf16 %v60_v55  ;;  %v142_v3 = vunpack.c.h.bf16 %v63_v56 }
  0x4a   :  { %v371_v0 = vsel %vm211_vm5, %v131_v50, %v291_v59  ;;  %vm213_vm7 = vcmp.ge.f32.partialorder %v133_v63, 0.0  ;;  %v293_v6 = vmul.f32 0.01, %v133_v63  ;;  %v139_v7 = vunpack.c.h.bf16 %v61_v60 }
  0x4b   :  { %819 = vmatmul.mubr.bf16.gmra.mxu0 %v411_v36  ;;  %v416_v5 = vpack.c.bf16 %v371_v0, %v366_v62  ;;  %v368_v8 = vsel %vm208_vm6, %v128_v54, %v288_v1  ;;  %vm217_vm8 = vcmp.ge.f32.partialorder %v137_v2, 0.0  ;;  %vm222_vm9 = vcmp.ge.f32.partialorder %v142_v3, 0.0 }
  0x4c   :  { %916 = vmatmul.mubr.bf16.gmra.mxu1 %v413_v44  ;;  %826 = vmatprep.mubr.bf16.mxu0 %v417_v57  ;;  %v297_v9 = vmul.f32 0.01, %v137_v2  ;;  %v373_v10 = vsel %vm213_vm7, %v133_v63, %v293_v6  ;;  %v302_v11 = vmul.f32 0.01, %v142_v3  ;;  %v144_v12 = vunpack.c.h.bf16 %v64_v4  ;;  %v56_v63 = vld [vmem:[%s1851_s0 + $0x100] ss:$20 sps:$4 sm:$0xff]  }
  0x4d   :  { %923 = vmatprep.mubr.bf16.mxu1 %v419_v61  ;;  %vm219_vm10 = vcmp.ge.f32.partialorder %v139_v7, 0.0  ;;  %v418_v13 = vpack.c.bf16 %v373_v10, %v368_v8  ;;  %v299_v15 = vmul.f32 0.01, %v139_v7  ;;  %v136_v16 = vunpack.c.l.bf16 %v60_v55 }
  0x4e   :  { %v377_v14 = vsel %vm217_vm8, %v137_v2, %v297_v9  ;;  %v382_v17 = vsel %vm222_vm9, %v142_v3, %v302_v11  ;;  %vm224_vm11 = vcmp.ge.f32.partialorder %v144_v12, 0.0  ;;  %v304_v18 = vmul.f32 0.01, %v144_v12  ;;  %v38_v2 = vld [vmem:[%s1851_s0 + $0x88] ss:$20 sps:$4 sm:$0xff]  }
  0x4f   :  { %v141_v19 = vunpack.c.l.bf16 %v63_v56  ;;  %vm721_vm12 = vcmask 523264   ;;  %v422_v21 = vpack.c.bf16 %v382_v17, %v377_v14  ;;  %v379_v22 = vsel %vm219_vm10, %v139_v7, %v299_v15 }
  0x50   :  { %vm216_vm13 = vcmp.ge.f32.partialorder %v136_v16, 0.0  ;;  %v296_v23 = vmul.f32 0.01, %v136_v16  ;;  %v384_v24 = vsel %vm224_vm11, %v144_v12, %v304_v18  ;;  %v138_v26 = vunpack.c.l.bf16 %v61_v60 }
  0x51   :  { %vm221_vm14 = vcmp.ge.f32.partialorder %v141_v19, 0.0  ;;  %v301_v25 = vmul.f32 0.01, %v141_v19  ;;  %v424_v27 = vpack.c.bf16 %v384_v24, %v379_v22  ;;  %v143_v29 = vunpack.c.l.bf16 %v64_v4 }
  0x52   :  { %v376_v28 = vsel %vm216_vm13, %v136_v16, %v296_v23  ;;  %v70_v30 = vunpack.c.l.bf16 %v20_v20  ;;  %vm218_vm15 = vcmp.ge.f32.partialorder %v138_v26, 0.0  ;;  %v298_v33 = vmul.f32 0.01, %v138_v26 }
  0x53   :  { %827 = vmatmul.mubr.bf16.gmra.mxu0 %v416_v5  ;;  %v381_v32 = vsel %vm221_vm14, %v141_v19, %v301_v25  ;;  %v75_v34 = vunpack.c.h.bf16 %v20_v20  ;;  %vm223_vm0 = vcmp.ge.f32.partialorder %v143_v29, 0.0  ;;  %v303_v37 = vmul.f32 0.01, %v143_v29 }
  0x54   :  { %924 = vmatmul.mubr.bf16.gmra.mxu1 %v418_v13  ;;  %834 = vmatprep.mubr.bf16.mxu0 %v422_v21  ;;  %v421_v36 = vpack.c.bf16 %v381_v32, %v376_v28  ;;  %vm150_vm1 = vcmp.ge.f32.partialorder %v70_v30, 0.0  ;;  %v378_v38 = vsel %vm218_vm15, %v138_v26, %v298_v33  ;;  %v230_v39 = vmul.f32 0.01, %v70_v30  ;;  %v62_v13 = vld [vmem:[%s1851_s0 + $0x128] ss:$20 sps:$4 sm:$0xff]  }
  0x55   :  { %931 = vmatprep.mubr.bf16.mxu1 %v424_v27  ;;  %vm155_vm2 = vcmp.ge.f32.partialorder %v75_v34, 0.0  ;;  %v235_v40 = vmul.f32 0.01, %v75_v34  ;;  %v383_v41 = vsel %vm223_vm0, %v143_v29, %v303_v37  ;;  %v110_v42 = vunpack.c.l.bf16 %v44_v31 }
  0x56   :  { %v115_v43 = vunpack.c.h.bf16 %v44_v31  ;;  %v80_v44 = vunpack.c.l.bf16 %v26_v35  ;;  %v423_v45 = vpack.c.bf16 %v383_v41, %v378_v38  ;;  %v310_v46 = vsel %vm150_vm1, %v70_v30, %v230_v39 }
  0x57   :  { %v315_v47 = vsel %vm155_vm2, %v75_v34, %v235_v40  ;;  %v85_v48 = vunpack.c.h.bf16 %v26_v35  ;;  %vm190_vm3 = vcmp.ge.f32.partialorder %v110_v42, 0.0  ;;  %v270_v51 = vmul.f32 0.01, %v110_v42 }
  0x58   :  { %v390_v50 = vpack.c.bf16 %v315_v47, %v310_v46  ;;  %vm195_vm4 = vcmp.ge.f32.partialorder %v115_v43, 0.0  ;;  %v275_v53 = vmul.f32 0.01, %v115_v43  ;;  %vm160_vm5 = vcmp.ge.f32.partialorder %v80_v44, 0.0 }
  0x59   :  { %vm165_vm6 = vcmp.ge.f32.partialorder %v85_v48, 0.0  ;;  %v240_v54 = vmul.f32 0.01, %v80_v44  ;;  %v350_v55 = vsel %vm190_vm3, %v110_v42, %v270_v51  ;;  %v245_v56 = vmul.f32 0.01, %v85_v48 }
  0x5a   :  { %v120_v57 = vunpack.c.l.bf16 %v50_v49  ;;  %v125_v58 = vunpack.c.h.bf16 %v50_v49  ;;  %v355_v59 = vsel %vm195_vm4, %v115_v43, %v275_v53  ;;  %v90_v61 = vunpack.c.l.bf16 %v32_v52 }
  0x5b   :  { %835 = vmatmul.mubr.bf16.gmra.mxu0 %v421_v36  ;;  %v320_v60 = vsel %vm160_vm5, %v80_v44, %v240_v54  ;;  %v95_v62 = vunpack.c.h.bf16 %v32_v52  ;;  %v410_v0 = vpack.c.bf16 %v355_v59, %v350_v55  ;;  %v325_v1 = vsel %vm165_vm6, %v85_v48, %v245_v56 }
  0x5c   :  { %932 = vmatmul.mubr.bf16.gmra.mxu1 %v423_v45  ;;  %1283 = vmatprep.mubr.msk.bf16.mxu0 %vm721_vm12, %v390_v50  ;;  %vm200_vm7 = vcmp.ge.f32.partialorder %v120_v57, 0.0  ;;  %vm205_vm8 = vcmp.ge.f32.partialorder %v125_v58, 0.0  ;;  %v395_v3 = vpack.c.bf16 %v325_v1, %v320_v60  ;;  %v280_v4 = vmul.f32 0.01, %v120_v57 }
  0x5d   :  { %v285_v5 = vmul.f32 0.01, %v125_v58  ;;  %vm170_vm9 = vcmp.ge.f32.partialorder %v90_v61, 0.0  ;;  %1291 = vmatprep.mubr.msk.bf16.mxu1 %vm721_vm12, %v410_v0  ;;  %vm175_vm10 = vcmp.ge.f32.partialorder %v95_v62, 0.0  ;;  %v250_v6 = vmul.f32 0.01, %v90_v61 }
  0x5e   :  { %v255_v7 = vmul.f32 0.01, %v95_v62  ;;  %v130_v8 = vunpack.c.l.bf16 %v56_v63  ;;  %v360_v9 = vsel %vm200_vm7, %v120_v57, %v280_v4  ;;  %v135_v11 = vunpack.c.h.bf16 %v56_v63 }
  0x5f   :  { %v365_v10 = vsel %vm205_vm8, %v125_v58, %v285_v5  ;;  %v100_v12 = vunpack.c.l.bf16 %v38_v2  ;;  %v330_v15 = vsel %vm170_vm9, %v90_v61, %v250_v6  ;;  %v105_v20 = vunpack.c.h.bf16 %v38_v2 }
  0x60   :  { %v415_v14 = vpack.c.bf16 %v365_v10, %v360_v9  ;;  %v335_v16 = vsel %vm175_vm10, %v95_v62, %v255_v7  ;;  %vm210_vm11 = vcmp.ge.f32.partialorder %v130_v8, 0.0  ;;  %vm215_vm13 = vcmp.ge.f32.partialorder %v135_v11, 0.0 }
  0x61   :  { %v400_v17 = vpack.c.bf16 %v335_v16, %v330_v15  ;;  %v290_v18 = vmul.f32 0.01, %v130_v8  ;;  %v295_v19 = vmul.f32 0.01, %v135_v11  ;;  %vm180_vm14 = vcmp.ge.f32.partialorder %v100_v12, 0.0 }
  0x62   :  { %v260_v21 = vmul.f32 0.01, %v100_v12  ;;  %v140_v22 = vunpack.c.l.bf16 %v62_v13  ;;  %v145_v25 = vunpack.c.h.bf16 %v62_v13  ;;  %vm185_vm15 = vcmp.ge.f32.partialorder %v105_v20, 0.0 }
  0x63   :  { %1284 = vmatmul.mubr.msk.bf16.vlgmr.msra.gmra.mxu0 %vm721_vm12, %v395_v3  ;;  %v370_v23 = vsel %vm210_vm11, %v130_v8, %v290_v18  ;;  %v375_v24 = vsel %vm215_vm13, %v135_v11, %v295_v19  ;;  %v265_v27 = vmul.f32 0.01, %v105_v20 }
  0x64   :  { %1292 = vmatmul.mubr.msk.bf16.vlgmr.msra.gmra.mxu1 %vm721_vm12, %v415_v14  ;;  %1287 = vmatprep.mubr.msk.bf16.mxu0 %vm721_vm12, %v400_v17  ;;  %v420_v26 = vpack.c.bf16 %v375_v24, %v370_v23  ;;  %v340_v28 = vsel %vm180_vm14, %v100_v12, %v260_v21  ;;  %vm220_vm0 = vcmp.ge.f32.partialorder %v140_v22, 0.0  ;;  %vm225_vm1 = vcmp.ge.f32.partialorder %v145_v25, 0.0 }
  0x65   :  { %v300_v29 = vmul.f32 0.01, %v140_v22  ;;  %v305_v30 = vmul.f32 0.01, %v145_v25  ;;  %v345_v31 = vsel %vm185_vm15, %v105_v20, %v265_v27 }
  0x66   :  { %1295 = vmatprep.mubr.msk.bf16.mxu1 %vm721_vm12, %v420_v26  ;;  %v405_v32 = vpack.c.bf16 %v345_v31, %v340_v28 }
  0x67   :  { %v380_v33 = vsel %vm220_vm0, %v140_v22, %v300_v29  ;;  %v385_v34 = vsel %vm225_vm1, %v145_v25, %v305_v30 }
  0x68   :  { %v425_v35 = vpack.c.bf16 %v385_v34, %v380_v33 }
  0x6b   :  { %1288 = vmatmul.mubr.msk.bf16.gmra.mxu0 %vm721_vm12, %v405_v32  ;;  %v1671_v32 = vld [vmem:[%s1852_s2] ss:$0 sm:$0xff] }
  0x6c   :  { %1296 = vmatmul.mubr.msk.bf16.gmra.mxu1 %vm721_vm12, %v425_v35  ;;  %vm1069_vm12 = vcmask 261120  }
  0xe3   :  { %v1151_v36 = vpop.f32.mrf.mxu0 }
  0xe4   :  { %v1606_v37 = vpop.f32.mrf.mxu1 }
  0xe5   :  { %v1152_v38 = vpop.f32.mrf.mxu0 }
  0xe6   :  { %v1608_v39 = vpop.f32.mrf.mxu1  ;;  %v1153_v27 = vadd.f32 %v1152_v38, %v1151_v36 }
  0xe7   :  { %v1154_v40 = vpop.f32.mrf.mxu0 }
  0xe8   :  { %v1610_v41 = vpop.f32.mrf.mxu1 }
  0xe9   :  { %v1155_v42 = vpop.f32.mrf.mxu0 }
  0xea   :  { %v1612_v43 = vpop.f32.mrf.mxu1  ;;  %v1156_v28 = vadd.f32 %v1155_v42, %v1154_v40  ;;  %v1217_v42 = vadd.f32 %v1608_v39, %v1606_v37 }
  0xeb   :  { %v1157_v44 = vpop.f32.mrf.mxu0 }
  0xec   :  { %v1614_v45 = vpop.f32.mrf.mxu1  ;;  %v784_v36 = vadd.f32 %v1156_v28, %v1671_v32 }
  0xed   :  { %v1158_v46 = vpop.f32.mrf.mxu0 }
  0xee   :  { %v1616_v47 = vpop.f32.mrf.mxu1  ;;  %v1159_v29 = vadd.f32 %v1158_v46, %v1157_v44  ;;  %v1220_v44 = vadd.f32 %v1612_v43, %v1610_v41 }
  0xef   :  { %v1160_v48 = vpop.f32.mrf.mxu0 }
  0xf0   :  { %v1618_v49 = vpop.f32.mrf.mxu1  ;;  %v789_v38 = vadd.f32 %v1159_v29, %v1671_v32 }
  0xf1   :  { %v1161_v50 = vpop.f32.mrf.mxu0 }
  0xf2   :  { %v1620_v51 = vpop.f32.mrf.mxu1  ;;  %v1162_v33 = vadd.f32 %v1161_v50, %v1160_v48 }
  0xf3   :  { %v1163_v52 = vpop.f32.mrf.mxu0  ;;  %v1226_v28 = vadd.f32 %v1620_v51, %v1618_v49 }
  0xf4   :  { %v1622_v54 = vpop.f32.mrf.mxu1  ;;  %v792_v46 = vadd.f32 %v1162_v33, %v1671_v32 }
  0xf5   :  { %v1164_v53 = vpop.f32.mrf.mxu0 }
  0xf6   :  { %v1626_v56 = vpop.f32.mrf.mxu1  ;;  %v1165_v34 = vadd.f32 %v1164_v53, %v1163_v52  ;;  %v1223_v52 = vadd.f32 %v1616_v47, %v1614_v45  ;;  %v881_v45 = vadd.f32 %v1220_v44, %v784_v36 }
  0xf7   :  { %v1624_v55 = vpop.f32.mrf.mxu0  ;;  %v1229_v43 = vadd.f32 %v1626_v56, %v1622_v54 }
  0xf8   :  { %v1630_v58 = vpop.f32.mrf.mxu1  ;;  %v797_v53 = vadd.f32 %v1165_v34, %v1671_v32 }
  0xf9   :  { %v1628_v57 = vpop.f32.mrf.mxu0  ;;  %1855 = vst [vmem:[#allocation2_spill] sm:$0xff] %v1630_v58 }
  0xfa   :  { %v1632_v59 = vpop.f32.mrf.mxu1  ;;  %v1697_v47 = vadd.f32 %v1628_v57, %v1624_v55 }
  0xfb   :  { %1856 = vst [vmem:[#allocation3_spill] sm:$0xff] %v1632_v59  ;;  %v1169_v60 = vpop.f32.mrf.mxu0 }
  0xfc   :  { %v1634_v62 = vpop.f32.mrf.mxu1 }
  0xfd   :  { %v1170_v61 = vpop.f32.mrf.mxu0 }
  0xfe   :  { %v1638_v0 = vpop.f32.mrf.mxu1 }
  0xff   :  { %v1636_v63 = vpop.f32.mrf.mxu0 }
 0x100   :  { %v1642_v2 = vpop.f32.mrf.mxu1 }
 0x101   :  { %v1640_v1 = vpop.f32.mrf.mxu0 }
 0x102   :  { %v1644_v3 = vpop.f32.mrf.mxu1 }
 0x103   :  { %1857 = vst [vmem:[#allocation4_spill] sm:$0xff] %v1644_v3  ;;  %v1175_v4 = vpop.f32.mrf.mxu0  ;;  %v781_v3 = vadd.f32 %v1153_v27, %v1671_v32 }
 0x104   :  { %v1646_v5 = vpop.f32.mrf.mxu1 }
 0x105   :  { %v1176_v6 = vpop.f32.mrf.mxu0 }
 0x106   :  { %v1648_v7 = vpop.f32.mrf.mxu1  ;;  %v1177_v48 = vadd.f32 %v1176_v6, %v1175_v4  ;;  %v886_v4 = vadd.f32 %v1223_v52, %v789_v38  ;;  %v878_v6 = vadd.f32 %v1217_v42, %v781_v3  ;;  %v1047_v38 = vld [vmem:[%s1853_s3 + $0x50] sm:$0xff] }
 0x107   :  { %v1178_v8 = vpop.f32.mrf.mxu0  ;;  %v1241_v55 = vadd.f32 %v1648_v7, %v1646_v5  ;;  %v1235_v5 = vadd.f32 %v1638_v0, %v1634_v62  ;;  %v1174_v7 = vadd.f32 %v1640_v1, %v1636_v63  ;;  %v1045_v63 = vld [vmem:[%s1853_s3 + $0x40] sm:$0xff] }
 0x108   :  { %v1650_v9 = vpop.f32.mrf.mxu1 }
 0x109   :  { %v1179_v10 = vpop.f32.mrf.mxu0 }
 0x10a   :  { %v1652_v11 = vpop.f32.mrf.mxu1  ;;  %v1180_v37 = vadd.f32 %v1179_v10, %v1178_v8  ;;  %v889_v8 = vadd.f32 %v1226_v28, %v792_v46  ;;  %v1707_v10 = vadd.f32 %v1229_v43, %v797_v53 }
 0x10b   :  { %v1181_v12 = vpop.f32.mrf.mxu0 }
 0x10c   :  { %v1245_v13 = vpop.f32.mrf.mxu1  ;;  %v816_v57 = vadd.f32 %v1180_v37, %v1671_v32 }
 0x10d   :  { %v1182_v14 = vpop.f32.mrf.mxu0 }
 0x10e   :  { %v1246_v15 = vpop.f32.mrf.mxu1  ;;  %v1183_v59 = vadd.f32 %v1182_v14, %v1181_v12  ;;  %v1171_v12 = vadd.f32 %v1170_v61, %v1169_v60  ;;  %v813_v60 = vadd.f32 %v1177_v48, %v1671_v32 }
 0x10f   :  { %v1184_v16 = vpop.f32.mrf.mxu0  ;;  %v1247_v61 = vadd.f32 %v1246_v15, %v1245_v13 }
 0x110   :  { %v1654_v17 = vpop.f32.mrf.mxu1  ;;  %v821_v39 = vadd.f32 %v1183_v59, %v1671_v32  ;;  %v1039_v59 = vld [vmem:[%s1853_s3 + $0x10] sm:$0xff]  ;;  %v805_v54 = vadd.f32 %v1171_v12, %v1671_v32 }
 0x111   :  { %v1185_v18 = vpop.f32.mrf.mxu0 }
 0x112   :  { %v1249_v19 = vpop.f32.mrf.mxu1  ;;  %v1186_v14 = vadd.f32 %v1185_v18, %v1184_v16  ;;  %v918_v15 = vadd.f32 %v1247_v61, %v821_v39  ;;  %v1037_v18 = vld [vmem:[%s1853_s3] sm:$0xff] }
 0x113   :  { %v1187_v20 = vpop.f32.mrf.mxu0  ;;  %v1250_v29 = vadd.f32 %v1249_v19, %v1654_v17  ;;  %v1040_v17 = vld [vmem:[%s1853_s3 + $0x18] sm:$0xff]  ;;  %v1244_v19 = vadd.f32 %v1652_v11, %v1650_v9  ;;  %v1038_v9 = vld [vmem:[%s1853_s3 + $0x8] sm:$0xff] }
 0x114   :  { %v1656_v22 = vpop.f32.mrf.mxu1  ;;  %v824_v56 = vadd.f32 %v1186_v14, %v1671_v32 }
 0x115   :  { %v1188_v21 = vpop.f32.mrf.mxu0  ;;  %v913_v28 = vadd.f32 %v1244_v19, %v816_v57  ;;  %v1051_v57 = vld [vmem:[%s1853_s3 + $0x70] sm:$0xff]  ;;  %v1052_v19 = vld [vmem:[%s1853_s3 + $0x78] sm:$0xff] }
 0x116   :  { %v1660_v24 = vpop.f32.mrf.mxu1  ;;  %v1189_v33 = vadd.f32 %v1188_v21, %v1187_v20  ;;  %v921_v1 = vadd.f32 %v1250_v29, %v824_v56  ;;  %v1041_v29 = vld [vmem:[%s1853_s3 + $0x20] sm:$0xff] }
 0x117   :  { %v1658_v23 = vpop.f32.mrf.mxu0 }
 0x118   :  { %v1664_v26 = vpop.f32.mrf.mxu1  ;;  %v829_v11 = vadd.f32 %v1189_v33, %v1671_v32  ;;  %v1859_v33 = vld [vmem:[#allocation2_spill] sm:$0xff] }
 0x119   :  { %v1662_v25 = vpop.f32.mrf.mxu0 }
 0x11a   :  { %v1666_v30 = vpop.f32.mrf.mxu1  ;;  %v1192_v37 = vadd.f32 %v1662_v25, %v1658_v23 }
 0x11b   :  { %v1193_v31 = vpop.f32.mrf.mxu0 }
 0x11c   :  { %v1673_v58 = vpop.f32.mrf.mxu1 }
 0x11d   :  { %v1194_v35 = vpop.f32.mrf.mxu0 }
 0x11e   :  { %v1683_v50 = vpop.f32.mrf.mxu1  ;;  %v1195_v13 = vadd.f32 %v1194_v35, %v1193_v31  ;;  %v910_v35 = vadd.f32 %v1241_v55, %v813_v60  ;;  %v1253_v60 = vadd.f32 %v1660_v24, %v1656_v22 }
 0x11f   :  { %v1196_v40 = vpop.f32.mrf.mxu0  ;;  %v1259_v39 = vadd.f32 %v1683_v50, %v1673_v58  ;;  %v1046_v58 = vld [vmem:[%s1853_s3 + $0x48] sm:$0xff]  ;;  %v902_v50 = vadd.f32 %v1235_v5, %v805_v54  ;;  %v1858_v54 = vld [vmem:[#allocation4_spill] sm:$0xff]  ;;  %v1256_v5 = vadd.f32 %v1666_v30, %v1664_v26 }
 0x120   :  { %v1691_v41 = vpop.f32.mrf.mxu1  ;;  %v837_v21 = vadd.f32 %v1195_v13, %v1671_v32  ;;  %v1238_v56 = vadd.f32 %v1858_v54, %v1642_v2  ;;  %v926_v13 = vadd.f32 %v1253_v60, %v829_v11 }
 0x121   :  { %v1197_v27 = vpop.f32.mrf.mxu0 }
 0x122   :  { %v1700_v49 = vpop.f32.mrf.mxu1  ;;  %v1198_v46 = vadd.f32 %v1197_v27, %v1196_v40  ;;  %v1048_v40 = vld [vmem:[%s1853_s3 + $0x58] sm:$0xff] }
 0x123   :  { %v1285_v51 = vpop.f32.mrf.mxu0 }
 0x124   :  { %v983_v3 = vadd.f32 %v1285_v51, %v886_v4  ;;  %v1293_v36 = vpop.f32.mrf.mxu1  ;;  %v1043_v51 = vld [vmem:[%s1853_s3 + $0x30] sm:$0xff] }
 0x125   :  { %v974_v16 = vpop.f32.mrf.mxu0  ;;  %v1015_v31 = vadd.f32 %v1293_v36, %v918_v15  ;;  %v832_v15 = vadd.f32 %v1192_v37, %v1671_v32 }
 0x126   :  { %v1055_v34 = vadd.f32 %v1039_v59, %v983_v3  ;;  %v975_v42 = vadd.f32 %v974_v16, %v878_v6  ;;  %v1006_v62 = vpop.f32.mrf.mxu1  ;;  %v808_v6 = vadd.f32 %v1174_v7, %v1671_v32  ;;  %v934_v59 = vadd.f32 %v1259_v39, %v837_v21 }
 0x127   :  { %v1286_v44 = vpop.f32.mrf.mxu0  ;;  %v1063_v48 = vadd.f32 %v1047_v38, %v1015_v31  ;;  %v1007_v52 = vadd.f32 %v1006_v62, %v910_v35  ;;  %v929_v21 = vadd.f32 %v1256_v5, %v832_v15 }
 0x128   :  { %1072 = vst.msk [vmem:[%s1854_s4 + $0x10] sm:$0xff] %vm1069_vm12, %v1055_v34  ;;  %v1053_v20 = vadd.f32 %v1037_v18, %v975_v42  ;;  %v986_v0 = vadd.f32 %v1286_v44, %v889_v8  ;;  %v1294_v14 = vpop.f32.mrf.mxu1  ;;  %v800_v8 = vadd.f32 %v1697_v47, %v1671_v32  ;;  %v1262_v47 = vadd.f32 %v1700_v49, %v1691_v41  ;;  %v1860_v34 = vld [vmem:[#allocation3_spill] sm:$0xff]  ;;  %v1049_v41 = vld [vmem:[%s1853_s3 + $0x60] sm:$0xff] }
 0x129   :  { %v977_v53 = vpop.f32.mrf.mxu0  ;;  %1080 = vst.msk [vmem:[%s1854_s4 + $0x50] sm:$0xff] %vm1069_vm12, %v1063_v48  ;;  %v1061_v43 = vadd.f32 %v1045_v63, %v1007_v52  ;;  %v1018_v4 = vadd.f32 %v1294_v14, %v921_v1  ;;  %v1232_v36 = vadd.f32 %v1860_v34, %v1859_v33  ;;  %v905_v49 = vadd.f32 %v1238_v56, %v808_v6  ;;  %v1042_v1 = vld [vmem:[%s1853_s3 + $0x28] sm:$0xff] }
 0x12a   :  { %1070 = vst.msk [vmem:[%s1854_s4] sm:$0xff] %vm1069_vm12, %v1053_v20  ;;  %v1056_v12 = vadd.f32 %v1040_v17, %v986_v0  ;;  %v978_v27 = vadd.f32 %v977_v53, %v881_v45  ;;  %v1009_v25 = vpop.f32.mrf.mxu1  ;;  %v840_v45 = vadd.f32 %v1198_v46, %v1671_v32  ;;  %v1050_v53 = vld [vmem:[%s1853_s3 + $0x68] sm:$0xff] }
 0x12b   :  { %1078 = vst.msk [vmem:[%s1854_s4 + $0x40] sm:$0xff] %vm1069_vm12, %v1061_v43  ;;  %v1064_v22 = vadd.f32 %v1048_v40, %v1018_v4  ;;  %v1010_v24 = vadd.f32 %v1009_v25, %v913_v28  ;;  %v1289_v61 = vpop.f32.mrf.mxu0  ;;  %v897_v20 = vadd.f32 %v1232_v36, %v800_v8 }
 0x12c   :  { %1073 = vst.msk [vmem:[%s1854_s4 + $0x18] sm:$0xff] %vm1069_vm12, %v1056_v12  ;;  %v1054_v23 = vadd.f32 %v1038_v9, %v978_v27  ;;  %v999_v3 = vadd.f32 %v1289_v61, %v902_v50  ;;  %v1297_v55 = vpop.f32.mrf.mxu1  ;;  %v937_v44 = vadd.f32 %v1262_v47, %v840_v45 }
 0x12d   :  { %1081 = vst.msk [vmem:[%s1854_s4 + $0x58] sm:$0xff] %vm1069_vm12, %v1064_v22  ;;  %v1062_v2 = vadd.f32 %v1046_v58, %v1010_v24  ;;  %v1031_v16 = vadd.f32 %v1297_v55, %v934_v59  ;;  %v990_v18 = vpop.f32.mrf.mxu0 }
 0x12e   :  { %1071 = vst.msk [vmem:[%s1854_s4 + $0x8] sm:$0xff] %vm1069_vm12, %v1054_v23  ;;  %v1059_v38 = vadd.f32 %v1043_v51, %v999_v3  ;;  %v991_v32 = vadd.f32 %v990_v18, %v1707_v10  ;;  %v1022_v42 = vpop.f32.mrf.mxu1  ;;  %v1044_v10 = vld [vmem:[%s1853_s3 + $0x38] sm:$0xff] }
 0x12f   :  { %1079 = vst.msk [vmem:[%s1854_s4 + $0x48] sm:$0xff] %vm1069_vm12, %v1062_v2  ;;  %v1067_v7 = vadd.f32 %v1051_v57, %v1031_v16  ;;  %v1023_v31 = vadd.f32 %v1022_v42, %v926_v13  ;;  %v1290_v35 = vpop.f32.mrf.mxu0 }
 0x130   :  { %1076 = vst.msk [vmem:[%s1854_s4 + $0x30] sm:$0xff] %vm1069_vm12, %v1059_v38  ;;  %v1057_v17 = vadd.f32 %v1041_v29, %v991_v32  ;;  %v1002_v26 = vadd.f32 %v1290_v35, %v905_v49  ;;  %v1298_v30 = vpop.f32.mrf.mxu1 }
 0x131   :  { %1084 = vst.msk [vmem:[%s1854_s4 + $0x70] sm:$0xff] %vm1069_vm12, %v1067_v7  ;;  %v1065_v62 = vadd.f32 %v1049_v41, %v1023_v31  ;;  %v1034_v63 = vadd.f32 %v1298_v30, %v937_v44  ;;  %v993_v0 = vpop.f32.mrf.mxu0 }
 0x132   :  { %1074 = vst.msk [vmem:[%s1854_s4 + $0x20] sm:$0xff] %vm1069_vm12, %v1057_v17  ;;  %v1060_v46 = vadd.f32 %v1044_v10, %v1002_v26  ;;  %v994_v48 = vadd.f32 %v993_v0, %v897_v20  ;;  %v1025_v52 = vpop.f32.mrf.mxu1 }
 0x133   :  { %1082 = vst.msk [vmem:[%s1854_s4 + $0x60] sm:$0xff] %vm1069_vm12, %v1065_v62  ;;  %v1068_v9 = vadd.f32 %v1052_v19, %v1034_v63  ;;  %v1026_v11 = vadd.f32 %v1025_v52, %v929_v21 }
 0x134   :  { %1077 = vst.msk [vmem:[%s1854_s4 + $0x38] sm:$0xff] %vm1069_vm12, %v1060_v46  ;;  %v1058_v12 = vadd.f32 %v1042_v1, %v994_v48 }
 0x135   :  { %1085 = vst.msk [vmem:[%s1854_s4 + $0x78] sm:$0xff] %vm1069_vm12, %v1068_v9  ;;  %v1066_v14 = vadd.f32 %v1050_v53, %v1026_v11 }
 0x136   :  { %1075 = vst.msk [vmem:[%s1854_s4 + $0x28] sm:$0xff] %vm1069_vm12, %v1058_v12 }
 0x137   :  { %1083 = vst.msk [vmem:[%s1854_s4 + $0x68] sm:$0xff] %vm1069_vm12, %v1066_v14 }

// kernel: _lambda_.127
= control target key start
LH: loop header
LB: loop body
LE: loop exit
PB: predicated region body
PF: predicated region fallthrough
CT: control target
= control target key end

     0   :  { %s993_s12 = smov 0   ;;  %s995_s13 = smov 0   ;;  %s1171_s0 = inlined_call_operand.vmem [shape: bf16[512,16], index: 0, kind: input, shape index: {}]   ;;  %s1172_s1 = inlined_call_operand.vmem [shape: bf16[16,16], index: 1, kind: input, shape index: {}]   ;;  %s1173_s2 = inlined_call_operand.vmem [shape: f32[1,16], index: 2, kind: input, shape index: {}]   ;;  %s1174_s3 = inlined_call_operand.vmem [shape: f32[512,16], index: 3, kind: output, shape index: {}]  }
   0x1   :  { %s997_s14 = smov 0  }
   0x2 LB: > { %s25_s15 = sadd.s32 1, %s967_s13  ;;  %p767_p0 = scmp.ge.s32.totalorder %s971_s14, 1  ;;  %s971_s14 = sphi %s997_s14, %s13_s14   ;;  %s967_s13 = sphi %s995_s13, %s1176_s13   ;;  %s963_s12 = sphi %s993_s12, %s1175_s12  }
   0x3   : > { %p27_p1 = scmp.ge.s32.totalorder %s25_s15, 2  ;;  %p169_p2 = scmp.lt.s32.totalorder %s971_s14, 3 }
   0x5   : > { %s1178_s15 = smov (%p27_p1, %s25_s15), 0  ;;  %p170_p3 = pnand %p767_p0, %p169_p2 }
   0x6   : > { %s768_s18 = sshll.u32 (!%p170_p3), %s963_s12, 5 }
   0x7   : > { %173 = sbr.rel (%p170_p3) target bundleno = 258 (0x102), region = 32  ;;  %p204_p4 = scmp.lt.s32.totalorder (!%p170_p3), %s768_s18, 63 }
   0xc   : > { %v948_v0 = vld [vmem:[%s1172_s1] sm:$0xff]   ;;  %s1180_s18 = smov (!%p204_p4, %s768_s18), 63  ;;  %vm417_vm0 = vcmask 130048  }
   0xd   : > { %888 = vmatprep.subr.bf16.mxu0 %v948_v0  ;;  %922 = vmatprep.subr.bf16.mxu1 %v948_v0  ;;  %s769_s19 = sshll.u32 %s1180_s18, 2  ;;  %s771_s23 = sshll.u32 %s1180_s18, 3 }
   0xe   : > { %889 = vmatpush3.bf16.msra.mxu0 %v948_v0  ;;  %923 = vmatpush3.bf16.msra.mxu1 %v948_v0  ;;  %s1020_s22 = scalar_lea.vmem %s1171_s0, %s769_s19  ;;  %s1064_s28 = scalar_lea.vmem %s1174_s3, %s771_s23 }
   0xf   : > { %v793_v1 = vld [vmem:[%s1020_s22] sm:$0xff]   ;;  %v856_v3 = vld [vmem:[%s1020_s22 + $0x8] sm:$0xff]   ;;  %v857_v19 = vld [vmem:[%s1020_s22 + $0x10] sm:$0xff]  }
  0x10   : > { %v863_v2 = vld [vmem:[%s1020_s22 + $0x40] sm:$0xff]   ;;  %v794_v4 = vunpack.c.l.bf16 %v793_v1  ;;  %v795_v5 = vunpack.c.h.bf16 %v793_v1  ;;  %v864_v8 = vld [vmem:[%s1020_s22 + $0x48] sm:$0xff]   ;;  %v798_v9 = vunpack.c.l.bf16 %v856_v3  ;;  %v799_v10 = vunpack.c.h.bf16 %v856_v3  ;;  %v865_v24 = vld [vmem:[%s1020_s22 + $0x50] sm:$0xff]  }
  0x11   : > { %v826_v6 = vunpack.c.l.bf16 %v863_v2  ;;  %v827_v7 = vunpack.c.h.bf16 %v863_v2  ;;  %v830_v11 = vunpack.c.l.bf16 %v864_v8  ;;  %v831_v12 = vunpack.c.h.bf16 %v864_v8  ;;  %v858_v38 = vld [vmem:[%s1020_s22 + $0x18] sm:$0xff]   ;;  %v859_v53 = vld [vmem:[%s1020_s22 + $0x20] sm:$0xff]   ;;  %v860_v3 = vld [vmem:[%s1020_s22 + $0x28] sm:$0xff]  }
  0x12   : > { %vm290_vm1 = vcmp.ge.f32.partialorder %v794_v4, 0.0  ;;  %vm291_vm2 = vcmp.ge.f32.partialorder %v795_v5, 0.0  ;;  %v322_v13 = vmul.f32 0.01, %v794_v4  ;;  %v323_v14 = vmul.f32 0.01, %v795_v5 }
  0x13   : > { %vm306_vm3 = vcmp.ge.f32.partialorder %v826_v6, 0.0  ;;  %vm307_vm4 = vcmp.ge.f32.partialorder %v827_v7, 0.0  ;;  %v338_v15 = vmul.f32 0.01, %v826_v6  ;;  %v339_v16 = vmul.f32 0.01, %v827_v7 }
  0x14   : > { %v354_v17 = vsel %vm290_vm1, %v794_v4, %v322_v13  ;;  %v355_v18 = vsel %vm291_vm2, %v795_v5, %v323_v14  ;;  %vm292_vm5 = vcmp.ge.f32.partialorder %v798_v9, 0.0  ;;  %vm293_vm6 = vcmp.ge.f32.partialorder %v799_v10, 0.0  ;;  %v866_v42 = vld [vmem:[%s1020_s22 + $0x58] sm:$0xff]   ;;  %v867_v54 = vld [vmem:[%s1020_s22 + $0x60] sm:$0xff]   ;;  %v868_v13 = vld [vmem:[%s1020_s22 + $0x68] sm:$0xff]  }
  0x15   : > { %v386_v20 = vpack.c.bf16 %v355_v18, %v354_v17  ;;  %v370_v21 = vsel %vm306_vm3, %v826_v6, %v338_v15  ;;  %v371_v22 = vsel %vm307_vm4, %v827_v7, %v339_v16  ;;  %v324_v23 = vmul.f32 0.01, %v798_v9  ;;  %v861_v17 = vld [vmem:[%s1020_s22 + $0x30] sm:$0xff]  }
  0x16   : > { %v394_v25 = vpack.c.bf16 %v371_v22, %v370_v21  ;;  %v325_v26 = vmul.f32 0.01, %v799_v10  ;;  %vm308_vm7 = vcmp.ge.f32.partialorder %v830_v11, 0.0  ;;  %vm309_vm8 = vcmp.ge.f32.partialorder %v831_v12, 0.0 }
  0x17   : > { %890 = vmatprep.mubr.msk.bf16.mxu0 %vm417_vm0, %v386_v20  ;;  %v356_v27 = vsel %vm292_vm5, %v798_v9, %v324_v23  ;;  %v340_v28 = vmul.f32 0.01, %v830_v11  ;;  %v341_v29 = vmul.f32 0.01, %v831_v12  ;;  %v802_v30 = vunpack.c.l.bf16 %v857_v19 }
  0x18   : > { %906 = vmatprep.mubr.msk.bf16.mxu1 %vm417_vm0, %v394_v25  ;;  %v357_v31 = vsel %vm293_vm6, %v799_v10, %v325_v26  ;;  %v803_v32 = vunpack.c.h.bf16 %v857_v19  ;;  %v834_v33 = vunpack.c.l.bf16 %v865_v24  ;;  %v835_v34 = vunpack.c.h.bf16 %v865_v24 }
  0x19   : > { %v387_v35 = vpack.c.bf16 %v357_v31, %v356_v27  ;;  %v372_v36 = vsel %vm308_vm7, %v830_v11, %v340_v28  ;;  %v373_v37 = vsel %vm309_vm8, %v831_v12, %v341_v29  ;;  %vm294_vm9 = vcmp.ge.f32.partialorder %v802_v30, 0.0  ;;  %v869_v31 = vld [vmem:[%s1020_s22 + $0x70] sm:$0xff]  }
  0x1a   : > { %v395_v39 = vpack.c.bf16 %v373_v37, %v372_v36  ;;  %vm295_vm10 = vcmp.ge.f32.partialorder %v803_v32, 0.0  ;;  %v326_v40 = vmul.f32 0.01, %v802_v30  ;;  %v327_v41 = vmul.f32 0.01, %v803_v32 }
  0x1b   : > { %891 = vmatmul.mubr.msk.bf16.vlgmr.msra.gmra.mxu0 %vm417_vm0, %v387_v35  ;;  %vm310_vm11 = vcmp.ge.f32.partialorder %v834_v33, 0.0  ;;  %vm311_vm12 = vcmp.ge.f32.partialorder %v835_v34, 0.0  ;;  %v342_v43 = vmul.f32 0.01, %v834_v33  ;;  %v343_v44 = vmul.f32 0.01, %v835_v34 }
  0x1c   : > { %907 = vmatmul.mubr.msk.bf16.vlgmr.msra.gmra.mxu1 %vm417_vm0, %v395_v39  ;;  %v358_v45 = vsel %vm294_vm9, %v802_v30, %v326_v40  ;;  %v359_v46 = vsel %vm295_vm10, %v803_v32, %v327_v41  ;;  %v806_v47 = vunpack.c.l.bf16 %v858_v38  ;;  %v807_v48 = vunpack.c.h.bf16 %v858_v38  ;;  %v862_v32 = vld [vmem:[%s1020_s22 + $0x38] sm:$0xff]  }
  0x1d   : > { %v388_v49 = vpack.c.bf16 %v359_v46, %v358_v45  ;;  %v374_v50 = vsel %vm310_vm11, %v834_v33, %v342_v43  ;;  %v375_v51 = vsel %vm311_vm12, %v835_v34, %v343_v44  ;;  %v838_v52 = vunpack.c.l.bf16 %v866_v42  ;;  %v870_v46 = vld [vmem:[%s1020_s22 + $0x78] sm:$0xff]  }
  0x1e   : > { %v396_v55 = vpack.c.bf16 %v375_v51, %v374_v50  ;;  %vm296_vm13 = vcmp.ge.f32.partialorder %v806_v47, 0.0  ;;  %vm297_vm14 = vcmp.ge.f32.partialorder %v807_v48, 0.0  ;;  %v328_v56 = vmul.f32 0.01, %v806_v47 }
  0x1f   : > { %894 = vmatprep.mubr.msk.bf16.mxu0 %vm417_vm0, %v388_v49  ;;  %v329_v57 = vmul.f32 0.01, %v807_v48  ;;  %v839_v58 = vunpack.c.h.bf16 %v866_v42  ;;  %vm312_vm15 = vcmp.ge.f32.partialorder %v838_v52, 0.0  ;;  %v344_v59 = vmul.f32 0.01, %v838_v52 }
  0x20   : > { %910 = vmatprep.mubr.msk.bf16.mxu1 %vm417_vm0, %v396_v55  ;;  %v360_v60 = vsel %vm296_vm13, %v806_v47, %v328_v56  ;;  %v810_v61 = vunpack.c.l.bf16 %v859_v53  ;;  %v811_v62 = vunpack.c.h.bf16 %v859_v53  ;;  %v842_v63 = vunpack.c.l.bf16 %v867_v54 }
  0x21   : > { %v361_v0 = vsel %vm297_vm14, %v807_v48, %v329_v57  ;;  %vm313_vm1 = vcmp.ge.f32.partialorder %v839_v58, 0.0  ;;  %v345_v1 = vmul.f32 0.01, %v839_v58  ;;  %v376_v2 = vsel %vm312_vm15, %v838_v52, %v344_v59 }
  0x22   : > { %v389_v4 = vpack.c.bf16 %v361_v0, %v360_v60  ;;  %vm298_vm2 = vcmp.ge.f32.partialorder %v810_v61, 0.0  ;;  %vm299_vm3 = vcmp.ge.f32.partialorder %v811_v62, 0.0  ;;  %v330_v5 = vmul.f32 0.01, %v810_v61 }
  0x23   : > { %v377_v6 = vsel %vm313_vm1, %v839_v58, %v345_v1  ;;  %v331_v7 = vmul.f32 0.01, %v811_v62  ;;  %v843_v8 = vunpack.c.h.bf16 %v867_v54  ;;  %vm314_vm4 = vcmp.ge.f32.partialorder %v842_v63, 0.0  ;;  %v1059_v1 = vld [vmem:[%s1173_s2] ss:$0 sm:$0xff] }
  0x24   : > { %895 = vmatmul.mubr.msk.bf16.gmra.mxu0 %vm417_vm0, %v389_v4  ;;  %v397_v9 = vpack.c.bf16 %v377_v6, %v376_v2  ;;  %v362_v10 = vsel %vm298_vm2, %v810_v61, %v330_v5  ;;  %v346_v11 = vmul.f32 0.01, %v842_v63  ;;  %v814_v12 = vunpack.c.l.bf16 %v860_v3 }
  0x25   : > { %v363_v14 = vsel %vm299_vm3, %v811_v62, %v331_v7  ;;  %vm315_vm5 = vcmp.ge.f32.partialorder %v843_v8, 0.0  ;;  %v347_v15 = vmul.f32 0.01, %v843_v8  ;;  %v815_v16 = vunpack.c.h.bf16 %v860_v3 }
  0x26   : > { %911 = vmatmul.mubr.msk.bf16.gmra.mxu1 %vm417_vm0, %v397_v9  ;;  %v390_v18 = vpack.c.bf16 %v363_v14, %v362_v10  ;;  %v378_v19 = vsel %vm314_vm4, %v842_v63, %v346_v11  ;;  %vm300_vm6 = vcmp.ge.f32.partialorder %v814_v12, 0.0  ;;  %v332_v20 = vmul.f32 0.01, %v814_v12 }
  0x27   : > { %v379_v21 = vsel %vm315_vm5, %v843_v8, %v347_v15  ;;  %vm301_vm7 = vcmp.ge.f32.partialorder %v815_v16, 0.0  ;;  %v333_v22 = vmul.f32 0.01, %v815_v16  ;;  %v846_v23 = vunpack.c.l.bf16 %v868_v13 }
  0x28   : > { %898 = vmatprep.mubr.msk.bf16.mxu0 %vm417_vm0, %v390_v18  ;;  %v398_v24 = vpack.c.bf16 %v379_v21, %v378_v19  ;;  %v364_v25 = vsel %vm300_vm6, %v814_v12, %v332_v20  ;;  %v847_v26 = vunpack.c.h.bf16 %v868_v13  ;;  %v818_v27 = vunpack.c.l.bf16 %v861_v17 }
  0x29   : > { %v365_v28 = vsel %vm301_vm7, %v815_v16, %v333_v22  ;;  %vm316_vm8 = vcmp.ge.f32.partialorder %v846_v23, 0.0  ;;  %v348_v29 = vmul.f32 0.01, %v846_v23  ;;  %v819_v30 = vunpack.c.h.bf16 %v861_v17 }
  0x2a   : > { %914 = vmatprep.mubr.msk.bf16.mxu1 %vm417_vm0, %v398_v24  ;;  %v391_v33 = vpack.c.bf16 %v365_v28, %v364_v25  ;;  %vm317_vm9 = vcmp.ge.f32.partialorder %v847_v26, 0.0  ;;  %v349_v34 = vmul.f32 0.01, %v847_v26  ;;  %vm302_vm10 = vcmp.ge.f32.partialorder %v818_v27, 0.0 }
  0x2b   : > { %v380_v35 = vsel %vm316_vm8, %v846_v23, %v348_v29  ;;  %vm303_vm11 = vcmp.ge.f32.partialorder %v819_v30, 0.0  ;;  %v334_v36 = vmul.f32 0.01, %v818_v27  ;;  %v335_v37 = vmul.f32 0.01, %v819_v30 }
  0x2c   : > { %899 = vmatmul.mubr.msk.bf16.gmra.mxu0 %vm417_vm0, %v391_v33  ;;  %v381_v38 = vsel %vm317_vm9, %v847_v26, %v349_v34  ;;  %v850_v39 = vunpack.c.l.bf16 %v869_v31  ;;  %v851_v40 = vunpack.c.h.bf16 %v869_v31  ;;  %v822_v41 = vunpack.c.l.bf16 %v862_v32 }
  0x2d   : > { %v399_v42 = vpack.c.bf16 %v381_v38, %v380_v35  ;;  %v366_v43 = vsel %vm302_vm10, %v818_v27, %v334_v36  ;;  %v367_v44 = vsel %vm303_vm11, %v819_v30, %v335_v37  ;;  %v823_v45 = vunpack.c.h.bf16 %v862_v32 }
  0x2e   : > { %v392_v47 = vpack.c.bf16 %v367_v44, %v366_v43  ;;  %vm318_vm12 = vcmp.ge.f32.partialorder %v850_v39, 0.0  ;;  %vm319_vm13 = vcmp.ge.f32.partialorder %v851_v40, 0.0  ;;  %v350_v48 = vmul.f32 0.01, %v850_v39 }
  0x2f   : > { %915 = vmatmul.mubr.msk.bf16.gmra.mxu1 %vm417_vm0, %v399_v42  ;;  %v351_v49 = vmul.f32 0.01, %v851_v40  ;;  %vm304_vm14 = vcmp.ge.f32.partialorder %v822_v41, 0.0  ;;  %vm305_vm15 = vcmp.ge.f32.partialorder %v823_v45, 0.0  ;;  %v336_v50 = vmul.f32 0.01, %v822_v41 }
  0x30   : > { %902 = vmatprep.mubr.msk.bf16.mxu0 %vm417_vm0, %v392_v47  ;;  %v382_v51 = vsel %vm318_vm12, %v850_v39, %v350_v48  ;;  %v337_v52 = vmul.f32 0.01, %v823_v45  ;;  %v854_v53 = vunpack.c.l.bf16 %v870_v46  ;;  %v855_v54 = vunpack.c.h.bf16 %v870_v46 }
  0x31   : > { %v383_v55 = vsel %vm319_vm13, %v851_v40, %v351_v49  ;;  %v368_v56 = vsel %vm304_vm14, %v822_v41, %v336_v50 }
  0x32   : > { %v400_v57 = vpack.c.bf16 %v383_v55, %v382_v51  ;;  %v369_v58 = vsel %vm305_vm15, %v823_v45, %v337_v52  ;;  %vm320_vm1 = vcmp.ge.f32.partialorder %v854_v53, 0.0  ;;  %vm321_vm2 = vcmp.ge.f32.partialorder %v855_v54, 0.0 }
  0x33   : > { %v393_v59 = vpack.c.bf16 %v369_v58, %v368_v56  ;;  %v352_v60 = vmul.f32 0.01, %v854_v53  ;;  %v353_v61 = vmul.f32 0.01, %v855_v54 }
  0x34   : > { %918 = vmatprep.mubr.msk.bf16.mxu1 %vm417_vm0, %v400_v57 }
  0x35   : > { %903 = vmatmul.mubr.msk.bf16.gmra.mxu0 %vm417_vm0, %v393_v59  ;;  %v384_v62 = vsel %vm320_vm1, %v854_v53, %v352_v60  ;;  %v385_v63 = vsel %vm321_vm2, %v855_v54, %v353_v61 }
  0x36   : > { %v401_v0 = vpack.c.bf16 %v385_v63, %v384_v62 }
  0x38   : > { %919 = vmatmul.mubr.msk.bf16.gmra.mxu1 %vm417_vm0, %v401_v0 }
  0xdb   : > { %v892_v2 = vpop.f32.mrf.mxu0 }
  0xdc   : > { %v509_v3 = vadd.f32 %v892_v2, %v1059_v1  ;;  %v908_v4 = vpop.f32.mrf.mxu1 }
  0xdd   : > { %v573_v5 = vadd.f32 %v908_v4, %v1059_v1  ;;  %v500_v6 = vpop.f32.mrf.mxu0 }
  0xde   : > { %629 = vst.msk [vmem:[%s1064_s28 + $0x10] sm:$0xff] %vm417_vm0, %v509_v3  ;;  %v501_v7 = vadd.f32 %v1059_v1, %v500_v6  ;;  %v564_v8 = vpop.f32.mrf.mxu1 }
  0xdf   : > { %645 = vst.msk [vmem:[%s1064_s28 + $0x90] sm:$0xff] %vm417_vm0, %v573_v5  ;;  %v565_v9 = vadd.f32 %v1059_v1, %v564_v8  ;;  %v893_v10 = vpop.f32.mrf.mxu0 }
  0xe0   : > { %627 = vst.msk [vmem:[%s1064_s28] sm:$0xff] %vm417_vm0, %v501_v7  ;;  %v512_v11 = vadd.f32 %v893_v10, %v1059_v1  ;;  %v909_v12 = vpop.f32.mrf.mxu1 }
  0xe1   : > { %643 = vst.msk [vmem:[%s1064_s28 + $0x80] sm:$0xff] %vm417_vm0, %v565_v9  ;;  %v576_v13 = vadd.f32 %v909_v12, %v1059_v1  ;;  %v503_v14 = vpop.f32.mrf.mxu0 }
  0xe2   : > { %630 = vst.msk [vmem:[%s1064_s28 + $0x18] sm:$0xff] %vm417_vm0, %v512_v11  ;;  %v504_v15 = vadd.f32 %v1059_v1, %v503_v14  ;;  %v567_v16 = vpop.f32.mrf.mxu1 }
  0xe3   : > { %646 = vst.msk [vmem:[%s1064_s28 + $0x98] sm:$0xff] %vm417_vm0, %v576_v13  ;;  %v568_v17 = vadd.f32 %v1059_v1, %v567_v16 }
  0xe4   : > { %628 = vst.msk [vmem:[%s1064_s28 + $0x8] sm:$0xff] %vm417_vm0, %v504_v15  ;;  %v896_v18 = vpop.f32.mrf.mxu0 }
  0xe5   : > { %644 = vst.msk [vmem:[%s1064_s28 + $0x88] sm:$0xff] %vm417_vm0, %v568_v17  ;;  %v525_v19 = vadd.f32 %v896_v18, %v1059_v1 }
  0xe6   : > { %v912_v20 = vpop.f32.mrf.mxu1  ;;  %v516_v21 = vpop.f32.mrf.mxu0 }
  0xe7   : > { %633 = vst.msk [vmem:[%s1064_s28 + $0x30] sm:$0xff] %vm417_vm0, %v525_v19  ;;  %v589_v22 = vadd.f32 %v912_v20, %v1059_v1  ;;  %v517_v23 = vadd.f32 %v1059_v1, %v516_v21 }
  0xe8   : > { %v580_v24 = vpop.f32.mrf.mxu1  ;;  %v897_v25 = vpop.f32.mrf.mxu0 }
  0xe9   : > { %649 = vst.msk [vmem:[%s1064_s28 + $0xb0] sm:$0xff] %vm417_vm0, %v589_v22  ;;  %631 = vst.msk [vmem:[%s1064_s28 + $0x20] sm:$0xff] %vm417_vm0, %v517_v23  ;;  %v581_v26 = vadd.f32 %v1059_v1, %v580_v24  ;;  %v528_v27 = vadd.f32 %v897_v25, %v1059_v1 }
  0xea   : > { %v913_v28 = vpop.f32.mrf.mxu1  ;;  %v519_v29 = vpop.f32.mrf.mxu0 }
  0xeb   : > { %647 = vst.msk [vmem:[%s1064_s28 + $0xa0] sm:$0xff] %vm417_vm0, %v581_v26  ;;  %634 = vst.msk [vmem:[%s1064_s28 + $0x38] sm:$0xff] %vm417_vm0, %v528_v27  ;;  %v592_v30 = vadd.f32 %v913_v28, %v1059_v1  ;;  %v520_v31 = vadd.f32 %v1059_v1, %v519_v29 }
  0xec   : > { %v583_v32 = vpop.f32.mrf.mxu1  ;;  %v900_v33 = vpop.f32.mrf.mxu0 }
  0xed   : > { %650 = vst.msk [vmem:[%s1064_s28 + $0xb8] sm:$0xff] %vm417_vm0, %v592_v30  ;;  %632 = vst.msk [vmem:[%s1064_s28 + $0x28] sm:$0xff] %vm417_vm0, %v520_v31  ;;  %v584_v34 = vadd.f32 %v1059_v1, %v583_v32  ;;  %v541_v35 = vadd.f32 %v900_v33, %v1059_v1 }
  0xee   : > { %v532_v36 = vpop.f32.mrf.mxu0 }
  0xef   : > { %648 = vst.msk [vmem:[%s1064_s28 + $0xa8] sm:$0xff] %vm417_vm0, %v584_v34  ;;  %637 = vst.msk [vmem:[%s1064_s28 + $0x50] sm:$0xff] %vm417_vm0, %v541_v35  ;;  %v916_v37 = vpop.f32.mrf.mxu1  ;;  %v533_v38 = vadd.f32 %v1059_v1, %v532_v36 }
  0xf0   : > { %v605_v39 = vadd.f32 %v916_v37, %v1059_v1  ;;  %v901_v40 = vpop.f32.mrf.mxu0 }
  0xf1   : > { %635 = vst.msk [vmem:[%s1064_s28 + $0x40] sm:$0xff] %vm417_vm0, %v533_v38  ;;  %v596_v41 = vpop.f32.mrf.mxu1  ;;  %v544_v42 = vadd.f32 %v901_v40, %v1059_v1 }
  0xf2   : > { %653 = vst.msk [vmem:[%s1064_s28 + $0xd0] sm:$0xff] %vm417_vm0, %v605_v39  ;;  %v597_v43 = vadd.f32 %v1059_v1, %v596_v41  ;;  %v535_v44 = vpop.f32.mrf.mxu0 }
  0xf3   : > { %638 = vst.msk [vmem:[%s1064_s28 + $0x58] sm:$0xff] %vm417_vm0, %v544_v42  ;;  %v917_v45 = vpop.f32.mrf.mxu1  ;;  %v536_v46 = vadd.f32 %v1059_v1, %v535_v44 }
  0xf4   : > { %651 = vst.msk [vmem:[%s1064_s28 + $0xc0] sm:$0xff] %vm417_vm0, %v597_v43  ;;  %v608_v47 = vadd.f32 %v917_v45, %v1059_v1 }
  0xf5   : > { %636 = vst.msk [vmem:[%s1064_s28 + $0x48] sm:$0xff] %vm417_vm0, %v536_v46  ;;  %v599_v48 = vpop.f32.mrf.mxu1  ;;  %v904_v49 = vpop.f32.mrf.mxu0 }
  0xf6   : > { %654 = vst.msk [vmem:[%s1064_s28 + $0xd8] sm:$0xff] %vm417_vm0, %v608_v47  ;;  %v600_v50 = vadd.f32 %v1059_v1, %v599_v48  ;;  %v557_v51 = vadd.f32 %v904_v49, %v1059_v1 }
  0xf7   : > { %v548_v52 = vpop.f32.mrf.mxu0 }
  0xf8   : > { %652 = vst.msk [vmem:[%s1064_s28 + $0xc8] sm:$0xff] %vm417_vm0, %v600_v50  ;;  %641 = vst.msk [vmem:[%s1064_s28 + $0x70] sm:$0xff] %vm417_vm0, %v557_v51  ;;  %v920_v53 = vpop.f32.mrf.mxu1  ;;  %v549_v54 = vadd.f32 %v1059_v1, %v548_v52 }
  0xf9   : > { %v621_v55 = vadd.f32 %v920_v53, %v1059_v1  ;;  %v905_v56 = vpop.f32.mrf.mxu0 }
  0xfa   : > { %639 = vst.msk [vmem:[%s1064_s28 + $0x60] sm:$0xff] %vm417_vm0, %v549_v54  ;;  %v612_v57 = vpop.f32.mrf.mxu1  ;;  %v560_v58 = vadd.f32 %v905_v56, %v1059_v1 }
  0xfb   : > { %657 = vst.msk [vmem:[%s1064_s28 + $0xf0] sm:$0xff] %vm417_vm0, %v621_v55  ;;  %v613_v59 = vadd.f32 %v1059_v1, %v612_v57  ;;  %v551_v60 = vpop.f32.mrf.mxu0 }
  0xfc   : > { %642 = vst.msk [vmem:[%s1064_s28 + $0x78] sm:$0xff] %vm417_vm0, %v560_v58  ;;  %v921_v61 = vpop.f32.mrf.mxu1  ;;  %v552_v62 = vadd.f32 %v1059_v1, %v551_v60 }
  0xfd   : > { %655 = vst.msk [vmem:[%s1064_s28 + $0xe0] sm:$0xff] %vm417_vm0, %v613_v59  ;;  %v624_v63 = vadd.f32 %v921_v61, %v1059_v1 }
  0xfe   : > { %640 = vst.msk [vmem:[%s1064_s28 + $0x68] sm:$0xff] %vm417_vm0, %v552_v62  ;;  %v615_v0 = vpop.f32.mrf.mxu1 }
  0xff   : > { %658 = vst.msk [vmem:[%s1064_s28 + $0xf8] sm:$0xff] %vm417_vm0, %v624_v63  ;;  %v616_v2 = vadd.f32 %v1059_v1, %v615_v0 }
 0x101   : > { %656 = vst.msk [vmem:[%s1064_s28 + $0xe8] sm:$0xff] %vm417_vm0, %v616_v2 }
 0x102 PF: > { %s13_s14 = sadd.s32 1, %s971_s14   ;;  %s1175_s12 = smov %s967_s13 }
 0x103   : > { %p10_p5 = scmp.ge.s32.totalorder %s13_s14, 4   ;;  %s1176_s13 = smov %s1178_s15 }
 0x105   :  { %12 = sbr.rel (!%p10_p5) target bundleno = 2 (0x2), region = 68 }

// kernel: _lambda_.131
= control target key start
LH: loop header
LB: loop body
LE: loop exit
PB: predicated region body
PF: predicated region fallthrough
CT: control target
= control target key end

     0   :  { %s1047_s12 = smov 0   ;;  %s1049_s13 = smov 0   ;;  %s1267_s0 = inlined_call_operand.vmem [shape: bf16[512,144], index: 0, kind: input, shape index: {}]   ;;  %s1268_s1 = inlined_call_operand.vmem [shape: bf16[144,3], index: 1, kind: input, shape index: {}]   ;;  %s1269_s2 = inlined_call_operand.vmem [shape: f32[1,3], index: 2, kind: input, shape index: {}]   ;;  %s1270_s3 = inlined_call_operand.vmem [shape: f32[512,3], index: 3, kind: output, shape index: {}]  }
   0x1   :  { %s1051_s14 = smov 0  }
   0x2 LB: > { %s25_s15 = sadd.s32 1, %s1020_s13  ;;  %p835_p0 = scmp.ge.s32.totalorder %s1024_s14, 1  ;;  %s1024_s14 = sphi %s1051_s14, %s13_s14   ;;  %s1020_s13 = sphi %s1049_s13, %s1272_s13   ;;  %s1016_s12 = sphi %s1047_s12, %s1271_s12  }
   0x3   : > { %p27_p1 = scmp.ge.s32.totalorder %s25_s15, 2  ;;  %p170_p2 = scmp.lt.s32.totalorder %s1024_s14, 3 }
   0x5   : > { %s1274_s15 = smov (%p27_p1, %s25_s15), 0  ;;  %p171_p3 = pnand %p835_p0, %p170_p2 }
   0x6   : > { %s836_s18 = sshll.u32 (!%p171_p3), %s1016_s12, 5 }
   0x7   : > { %174 = sbr.rel (%p171_p3) target bundleno = 305 (0x131), region = 32  ;;  %p206_p4 = scmp.lt.s32.totalorder (!%p171_p3), %s836_s18, 63 }
   0xc   : > { %v945_v0 = vld [vmem:[%s1268_s1 + $0x38] sm:$0xff]   ;;  %v1026_v1 = vmov 0   ;;  %v946_v2 = vld [vmem:[%s1268_s1 + $0x30] sm:$0xff]   ;;  %s1276_s18 = smov (!%p206_p4, %s836_s18), 63  ;;  %v947_v3 = vld [vmem:[%s1268_s1 + $0x28] sm:$0xff]   ;;  %vm484_vm0 = vcmask 130048  }
   0xd   : > { %533 = vmatprep.subr.bf16.mxu0 %v1026_v1  ;;  %902 = vmatprep.subr.bf16.mxu1 %v1026_v1  ;;  %s901_s23 = sshll.u32 %s1276_s18, 3  ;;  %v948_v4 = vld [vmem:[%s1268_s1 + $0x20] sm:$0xff]   ;;  %v949_v7 = vld [vmem:[%s1268_s1 + $0x18] sm:$0xff]   ;;  %v950_v8 = vld [vmem:[%s1268_s1 + $0x10] sm:$0xff]   ;;  %vm694_vm1 = vcmask 23552  }
   0xe   : > { %534 = vmatpush1.bf16.msra.mxu0 %v945_v0  ;;  %911 = vmatpush1.bf16.msra.mxu1 %v945_v0  ;;  %s1082_s26 = scalar_lea.vmem %s1267_s0, %s901_s23  ;;  %v951_v9 = vld [vmem:[%s1268_s1 + $0x8] sm:$0xff]   ;;  %v952_v10 = vld [vmem:[%s1268_s1] sm:$0xff]   ;;  %s1160_s20 = scalar_lea.vmem %s1270_s3, %s901_s23 }
   0xf   : > { %535 = vmatprep.subr.bf16.mxu0 %v1026_v1  ;;  %903 = vmatprep.subr.bf16.mxu1 %v1026_v1  ;;  %v956_v5 = vld [vmem:[%s1082_s26 + $0x4] ss:$8 sps:$4 sm:$0xff]   ;;  %v954_v12 = vld [vmem:[%s1082_s26] ss:$8 sps:$4 sm:$0xff]   ;;  %v960_v14 = vld [vmem:[%s1082_s26 + $0x14] ss:$8 sps:$4 sm:$0xff]  }
  0x10   : > { %v959_v6 = vld [vmem:[%s1082_s26 + $0x84] ss:$8 sps:$4 sm:$0xff]   ;;  %883 = vmatprep.mubr.msk.bf16.mxu0 %vm484_vm0, %v956_v5  ;;  %v957_v13 = vld [vmem:[%s1082_s26 + $0x80] ss:$8 sps:$4 sm:$0xff]   ;;  %v962_v15 = vld [vmem:[%s1082_s26 + $0x94] ss:$8 sps:$4 sm:$0xff]  }
  0x11   : > { %891 = vmatprep.mubr.msk.bf16.mxu1 %vm484_vm0, %v959_v6  ;;  %v953_v11 = vld [vmem:[%s1268_s1 + $0x40] sm:$0xff]   ;;  %v964_v16 = vld [vmem:[%s1082_s26 + $0x10] ss:$8 sps:$4 sm:$0xff]   ;;  %v972_v22 = vld [vmem:[%s1082_s26 + $0x34] ss:$8 sps:$4 sm:$0xff]  }
  0x12   : > { %536 = vmatpush1.bf16.msra.mxu0 %v946_v2  ;;  %912 = vmatpush1.bf16.msra.mxu1 %v946_v2  ;;  %v965_v17 = vld [vmem:[%s1082_s26 + $0x90] ss:$8 sps:$4 sm:$0xff]   ;;  %v966_v18 = vld [vmem:[%s1082_s26 + $0x24] ss:$8 sps:$4 sm:$0xff]   ;;  %v970_v20 = vld [vmem:[%s1082_s26 + $0x20] ss:$8 sps:$4 sm:$0xff]  }
  0x13   : > { %537 = vmatprep.subr.bf16.mxu0 %v1026_v1  ;;  %904 = vmatprep.subr.bf16.mxu1 %v1026_v1  ;;  %v968_v19 = vld [vmem:[%s1082_s26 + $0xa4] ss:$8 sps:$4 sm:$0xff]   ;;  %v971_v21 = vld [vmem:[%s1082_s26 + $0xa0] ss:$8 sps:$4 sm:$0xff]   ;;  %v974_v23 = vld [vmem:[%s1082_s26 + $0xb4] ss:$8 sps:$4 sm:$0xff]  }
  0x14   : > { %v976_v24 = vld [vmem:[%s1082_s26 + $0x30] ss:$8 sps:$4 sm:$0xff]   ;;  %v978_v26 = vld [vmem:[%s1082_s26 + $0x44] ss:$8 sps:$4 sm:$0xff]   ;;  %v982_v28 = vld [vmem:[%s1082_s26 + $0x40] ss:$8 sps:$4 sm:$0xff]  }
  0x15   : > { %v977_v25 = vld [vmem:[%s1082_s26 + $0xb0] ss:$8 sps:$4 sm:$0xff]   ;;  %v980_v27 = vld [vmem:[%s1082_s26 + $0xc4] ss:$8 sps:$4 sm:$0xff]   ;;  %v983_v29 = vld [vmem:[%s1082_s26 + $0xc0] ss:$8 sps:$4 sm:$0xff]  }
  0x16   : > { %538 = vmatpush1.bf16.msra.mxu0 %v947_v3  ;;  %913 = vmatpush1.bf16.msra.mxu1 %v947_v3  ;;  %v984_v30 = vld [vmem:[%s1082_s26 + $0x54] ss:$8 sps:$4 sm:$0xff]   ;;  %v988_v32 = vld [vmem:[%s1082_s26 + $0x50] ss:$8 sps:$4 sm:$0xff]   ;;  %v990_v34 = vld [vmem:[%s1082_s26 + $0x64] ss:$8 sps:$4 sm:$0xff]  }
  0x17   : > { %539 = vmatprep.subr.bf16.mxu0 %v1026_v1  ;;  %905 = vmatprep.subr.bf16.mxu1 %v1026_v1  ;;  %v986_v31 = vld [vmem:[%s1082_s26 + $0xd4] ss:$8 sps:$4 sm:$0xff]   ;;  %v989_v33 = vld [vmem:[%s1082_s26 + $0xd0] ss:$8 sps:$4 sm:$0xff]   ;;  %v992_v35 = vld [vmem:[%s1082_s26 + $0xe4] ss:$8 sps:$4 sm:$0xff]  }
  0x18   : > { %v994_v36 = vld [vmem:[%s1082_s26 + $0x60] ss:$8 sps:$4 sm:$0xff]   ;;  %v996_v38 = vld [vmem:[%s1082_s26 + $0x74] ss:$8 sps:$4 sm:$0xff]   ;;  %v1000_v40 = vld [vmem:[%s1082_s26 + $0x70] ss:$8 sps:$4 sm:$0xff]  }
  0x19   : > { %v995_v37 = vld [vmem:[%s1082_s26 + $0xe0] ss:$8 sps:$4 sm:$0xff]   ;;  %v998_v39 = vld [vmem:[%s1082_s26 + $0xf4] ss:$8 sps:$4 sm:$0xff]   ;;  %v1001_v41 = vld [vmem:[%s1082_s26 + $0xf0] ss:$8 sps:$4 sm:$0xff]  }
  0x1a   : > { %540 = vmatpush1.bf16.msra.mxu0 %v948_v4  ;;  %914 = vmatpush1.bf16.msra.mxu1 %v948_v4  ;;  %v1153_v42 = vld [vmem:[%s1269_s2] ss:$0 sm:$0xff] }
  0x1b   : > { %541 = vmatprep.subr.bf16.mxu0 %v1026_v1  ;;  %906 = vmatprep.subr.bf16.mxu1 %v1026_v1 }
  0x1e   : > { %542 = vmatpush1.bf16.msra.mxu0 %v949_v7  ;;  %915 = vmatpush1.bf16.msra.mxu1 %v949_v7 }
  0x1f   : > { %543 = vmatprep.subr.bf16.mxu0 %v1026_v1  ;;  %907 = vmatprep.subr.bf16.mxu1 %v1026_v1 }
  0x22   : > { %544 = vmatpush1.bf16.msra.mxu0 %v950_v8  ;;  %916 = vmatpush1.bf16.msra.mxu1 %v950_v8 }
  0x23   : > { %545 = vmatprep.subr.bf16.mxu0 %v1026_v1  ;;  %908 = vmatprep.subr.bf16.mxu1 %v1026_v1 }
  0x26   : > { %546 = vmatpush1.bf16.msra.mxu0 %v951_v9  ;;  %917 = vmatpush1.bf16.msra.mxu1 %v951_v9 }
  0x27   : > { %547 = vmatprep.subr.bf16.mxu0 %v1026_v1  ;;  %909 = vmatprep.subr.bf16.mxu1 %v1026_v1 }
  0x2a   : > { %548 = vmatpush1.bf16.msra.mxu0 %v952_v10  ;;  %918 = vmatpush1.bf16.msra.mxu1 %v952_v10 }
  0x2b   : > { %563 = vmatprep.subr.bf16.mxu0 %v1026_v1  ;;  %910 = vmatprep.subr.bf16.mxu1 %v1026_v1 }
  0x2e   : > { %564 = vmatpush2.bf16.msra.mxu0 %v953_v11  ;;  %919 = vmatpush2.bf16.msra.mxu1 %v953_v11 }
  0x31   : > { %566 = vmatmul.mubr.bf16.vlgmr.msra.gmra.mxu0 %v954_v12  ;;  %630 = vmatmul.mubr.bf16.vlgmr.msra.gmra.mxu1 %v957_v13 }
  0x32   : > { %884 = vmatprep.mubr.msk.bf16.mxu0 %vm484_vm0, %v960_v14  ;;  %892 = vmatprep.mubr.msk.bf16.mxu1 %vm484_vm0, %v962_v15 }
  0x39   : > { %574 = vmatmul.mubr.bf16.gmra.mxu0 %v964_v16  ;;  %638 = vmatmul.mubr.bf16.gmra.mxu1 %v965_v17 }
  0x3a   : > { %885 = vmatprep.mubr.msk.bf16.mxu0 %vm484_vm0, %v966_v18  ;;  %893 = vmatprep.mubr.msk.bf16.mxu1 %vm484_vm0, %v968_v19 }
  0x41   : > { %582 = vmatmul.mubr.bf16.gmra.mxu0 %v970_v20  ;;  %646 = vmatmul.mubr.bf16.gmra.mxu1 %v971_v21 }
  0x42   : > { %886 = vmatprep.mubr.msk.bf16.mxu0 %vm484_vm0, %v972_v22  ;;  %894 = vmatprep.mubr.msk.bf16.mxu1 %vm484_vm0, %v974_v23 }
  0x49   : > { %590 = vmatmul.mubr.bf16.gmra.mxu0 %v976_v24  ;;  %654 = vmatmul.mubr.bf16.gmra.mxu1 %v977_v25 }
  0x4a   : > { %887 = vmatprep.mubr.msk.bf16.mxu0 %vm484_vm0, %v978_v26  ;;  %895 = vmatprep.mubr.msk.bf16.mxu1 %vm484_vm0, %v980_v27 }
  0x51   : > { %598 = vmatmul.mubr.bf16.gmra.mxu0 %v982_v28  ;;  %662 = vmatmul.mubr.bf16.gmra.mxu1 %v983_v29 }
  0x52   : > { %888 = vmatprep.mubr.msk.bf16.mxu0 %vm484_vm0, %v984_v30  ;;  %896 = vmatprep.mubr.msk.bf16.mxu1 %vm484_vm0, %v986_v31 }
  0x59   : > { %606 = vmatmul.mubr.bf16.gmra.mxu0 %v988_v32  ;;  %670 = vmatmul.mubr.bf16.gmra.mxu1 %v989_v33 }
  0x5a   : > { %889 = vmatprep.mubr.msk.bf16.mxu0 %vm484_vm0, %v990_v34  ;;  %897 = vmatprep.mubr.msk.bf16.mxu1 %vm484_vm0, %v992_v35 }
  0x61   : > { %614 = vmatmul.mubr.bf16.gmra.mxu0 %v994_v36  ;;  %678 = vmatmul.mubr.bf16.gmra.mxu1 %v995_v37 }
  0x62   : > { %890 = vmatprep.mubr.msk.bf16.mxu0 %vm484_vm0, %v996_v38  ;;  %898 = vmatprep.mubr.msk.bf16.mxu1 %vm484_vm0, %v998_v39 }
  0x69   : > { %622 = vmatmul.mubr.bf16.gmra.mxu0 %v1000_v40  ;;  %686 = vmatmul.mubr.bf16.gmra.mxu1 %v1001_v41 }
  0xf1   : > { %v567_v43 = vpop.f32.mrf.mxu0  ;;  %v631_v44 = vpop.f32.mrf.mxu1 }
  0xf2   : > { %v568_v45 = vadd.f32 %v1153_v42, %v567_v43  ;;  %v632_v46 = vadd.f32 %v1153_v42, %v631_v44 }
  0xf3   : > { %v569_v47 = vpop.f32.mrf.mxu0  ;;  %v633_v48 = vpop.f32.mrf.mxu1 }
  0xf4   : > { %695 = vst.msk [vmem:[%s1160_s20] sm:$0xff] %vm694_vm1, %v568_v45  ;;  %711 = vst.msk [vmem:[%s1160_s20 + $0x80] sm:$0xff] %vm694_vm1, %v632_v46 }
  0xf5   : > { %v570_v49 = vpop.f32.mrf.mxu0  ;;  %v634_v50 = vpop.f32.mrf.mxu1 }
  0xf6   : > { %v571_v51 = vadd.f32 %v1153_v42, %v570_v49  ;;  %v635_v52 = vadd.f32 %v1153_v42, %v634_v50 }
  0xf7   : > { %v572_v53 = vpop.f32.mrf.mxu0  ;;  %v636_v54 = vpop.f32.mrf.mxu1 }
  0xf8   : > { %696 = vst.msk [vmem:[%s1160_s20 + $0x8] sm:$0xff] %vm694_vm1, %v571_v51  ;;  %712 = vst.msk [vmem:[%s1160_s20 + $0x88] sm:$0xff] %vm694_vm1, %v635_v52 }
  0xf9   : > { %v575_v55 = vpop.f32.mrf.mxu0  ;;  %v639_v56 = vpop.f32.mrf.mxu1 }
  0xfa   : > { %v576_v57 = vadd.f32 %v1153_v42, %v575_v55  ;;  %v640_v58 = vadd.f32 %v1153_v42, %v639_v56 }
  0xfb   : > { %v577_v59 = vpop.f32.mrf.mxu0  ;;  %v641_v60 = vpop.f32.mrf.mxu1 }
  0xfc   : > { %697 = vst.msk [vmem:[%s1160_s20 + $0x10] sm:$0xff] %vm694_vm1, %v576_v57  ;;  %713 = vst.msk [vmem:[%s1160_s20 + $0x90] sm:$0xff] %vm694_vm1, %v640_v58 }
  0xfd   : > { %v578_v61 = vpop.f32.mrf.mxu0  ;;  %v642_v62 = vpop.f32.mrf.mxu1 }
  0xfe   : > { %v579_v63 = vadd.f32 %v1153_v42, %v578_v61  ;;  %v643_v0 = vadd.f32 %v1153_v42, %v642_v62 }
  0xff   : > { %v580_v1 = vpop.f32.mrf.mxu0  ;;  %v644_v2 = vpop.f32.mrf.mxu1 }
 0x100   : > { %698 = vst.msk [vmem:[%s1160_s20 + $0x18] sm:$0xff] %vm694_vm1, %v579_v63  ;;  %714 = vst.msk [vmem:[%s1160_s20 + $0x98] sm:$0xff] %vm694_vm1, %v643_v0 }
 0x101   : > { %v583_v3 = vpop.f32.mrf.mxu0  ;;  %v647_v4 = vpop.f32.mrf.mxu1 }
 0x102   : > { %v584_v5 = vadd.f32 %v1153_v42, %v583_v3  ;;  %v648_v6 = vadd.f32 %v1153_v42, %v647_v4 }
 0x103   : > { %v585_v7 = vpop.f32.mrf.mxu0  ;;  %v649_v8 = vpop.f32.mrf.mxu1 }
 0x104   : > { %699 = vst.msk [vmem:[%s1160_s20 + $0x20] sm:$0xff] %vm694_vm1, %v584_v5  ;;  %715 = vst.msk [vmem:[%s1160_s20 + $0xa0] sm:$0xff] %vm694_vm1, %v648_v6 }
 0x105   : > { %v586_v9 = vpop.f32.mrf.mxu0  ;;  %v650_v10 = vpop.f32.mrf.mxu1 }
 0x106   : > { %v587_v11 = vadd.f32 %v1153_v42, %v586_v9  ;;  %v651_v12 = vadd.f32 %v1153_v42, %v650_v10 }
 0x107   : > { %v588_v13 = vpop.f32.mrf.mxu0  ;;  %v652_v14 = vpop.f32.mrf.mxu1 }
 0x108   : > { %700 = vst.msk [vmem:[%s1160_s20 + $0x28] sm:$0xff] %vm694_vm1, %v587_v11  ;;  %716 = vst.msk [vmem:[%s1160_s20 + $0xa8] sm:$0xff] %vm694_vm1, %v651_v12 }
 0x109   : > { %v591_v15 = vpop.f32.mrf.mxu0  ;;  %v655_v16 = vpop.f32.mrf.mxu1 }
 0x10a   : > { %v592_v17 = vadd.f32 %v1153_v42, %v591_v15  ;;  %v656_v18 = vadd.f32 %v1153_v42, %v655_v16 }
 0x10b   : > { %v593_v19 = vpop.f32.mrf.mxu0  ;;  %v657_v20 = vpop.f32.mrf.mxu1 }
 0x10c   : > { %701 = vst.msk [vmem:[%s1160_s20 + $0x30] sm:$0xff] %vm694_vm1, %v592_v17  ;;  %717 = vst.msk [vmem:[%s1160_s20 + $0xb0] sm:$0xff] %vm694_vm1, %v656_v18 }
 0x10d   : > { %v594_v21 = vpop.f32.mrf.mxu0  ;;  %v658_v22 = vpop.f32.mrf.mxu1 }
 0x10e   : > { %v595_v23 = vadd.f32 %v1153_v42, %v594_v21  ;;  %v659_v24 = vadd.f32 %v1153_v42, %v658_v22 }
 0x10f   : > { %v596_v25 = vpop.f32.mrf.mxu0  ;;  %v660_v26 = vpop.f32.mrf.mxu1 }
 0x110   : > { %702 = vst.msk [vmem:[%s1160_s20 + $0x38] sm:$0xff] %vm694_vm1, %v595_v23  ;;  %718 = vst.msk [vmem:[%s1160_s20 + $0xb8] sm:$0xff] %vm694_vm1, %v659_v24 }
 0x111   : > { %v599_v27 = vpop.f32.mrf.mxu0  ;;  %v663_v28 = vpop.f32.mrf.mxu1 }
 0x112   : > { %v600_v29 = vadd.f32 %v1153_v42, %v599_v27  ;;  %v664_v30 = vadd.f32 %v1153_v42, %v663_v28 }
 0x113   : > { %v601_v31 = vpop.f32.mrf.mxu0  ;;  %v665_v32 = vpop.f32.mrf.mxu1 }
 0x114   : > { %703 = vst.msk [vmem:[%s1160_s20 + $0x40] sm:$0xff] %vm694_vm1, %v600_v29  ;;  %719 = vst.msk [vmem:[%s1160_s20 + $0xc0] sm:$0xff] %vm694_vm1, %v664_v30 }
 0x115   : > { %v602_v33 = vpop.f32.mrf.mxu0  ;;  %v666_v34 = vpop.f32.mrf.mxu1 }
 0x116   : > { %v603_v35 = vadd.f32 %v1153_v42, %v602_v33  ;;  %v667_v36 = vadd.f32 %v1153_v42, %v666_v34 }
 0x117   : > { %v604_v37 = vpop.f32.mrf.mxu0  ;;  %v668_v38 = vpop.f32.mrf.mxu1 }
 0x118   : > { %704 = vst.msk [vmem:[%s1160_s20 + $0x48] sm:$0xff] %vm694_vm1, %v603_v35  ;;  %720 = vst.msk [vmem:[%s1160_s20 + $0xc8] sm:$0xff] %vm694_vm1, %v667_v36 }
 0x119   : > { %v607_v39 = vpop.f32.mrf.mxu0  ;;  %v671_v40 = vpop.f32.mrf.mxu1 }
 0x11a   : > { %v608_v41 = vadd.f32 %v1153_v42, %v607_v39  ;;  %v672_v43 = vadd.f32 %v1153_v42, %v671_v40 }
 0x11b   : > { %v609_v44 = vpop.f32.mrf.mxu0  ;;  %v673_v45 = vpop.f32.mrf.mxu1 }
 0x11c   : > { %705 = vst.msk [vmem:[%s1160_s20 + $0x50] sm:$0xff] %vm694_vm1, %v608_v41  ;;  %721 = vst.msk [vmem:[%s1160_s20 + $0xd0] sm:$0xff] %vm694_vm1, %v672_v43 }
 0x11d   : > { %v610_v46 = vpop.f32.mrf.mxu0  ;;  %v674_v47 = vpop.f32.mrf.mxu1 }
 0x11e   : > { %v611_v48 = vadd.f32 %v1153_v42, %v610_v46  ;;  %v675_v49 = vadd.f32 %v1153_v42, %v674_v47 }
 0x11f   : > { %v612_v50 = vpop.f32.mrf.mxu0  ;;  %v676_v51 = vpop.f32.mrf.mxu1 }
 0x120   : > { %706 = vst.msk [vmem:[%s1160_s20 + $0x58] sm:$0xff] %vm694_vm1, %v611_v48  ;;  %722 = vst.msk [vmem:[%s1160_s20 + $0xd8] sm:$0xff] %vm694_vm1, %v675_v49 }
 0x121   : > { %v615_v52 = vpop.f32.mrf.mxu0  ;;  %v679_v53 = vpop.f32.mrf.mxu1 }
 0x122   : > { %v616_v54 = vadd.f32 %v1153_v42, %v615_v52  ;;  %v680_v55 = vadd.f32 %v1153_v42, %v679_v53 }
 0x123   : > { %v617_v56 = vpop.f32.mrf.mxu0  ;;  %v681_v57 = vpop.f32.mrf.mxu1 }
 0x124   : > { %707 = vst.msk [vmem:[%s1160_s20 + $0x60] sm:$0xff] %vm694_vm1, %v616_v54  ;;  %723 = vst.msk [vmem:[%s1160_s20 + $0xe0] sm:$0xff] %vm694_vm1, %v680_v55 }
 0x125   : > { %v618_v58 = vpop.f32.mrf.mxu0  ;;  %v682_v59 = vpop.f32.mrf.mxu1 }
 0x126   : > { %v619_v60 = vadd.f32 %v1153_v42, %v618_v58  ;;  %v683_v61 = vadd.f32 %v1153_v42, %v682_v59 }
 0x127   : > { %v620_v62 = vpop.f32.mrf.mxu0  ;;  %v684_v63 = vpop.f32.mrf.mxu1 }
 0x128   : > { %708 = vst.msk [vmem:[%s1160_s20 + $0x68] sm:$0xff] %vm694_vm1, %v619_v60  ;;  %724 = vst.msk [vmem:[%s1160_s20 + $0xe8] sm:$0xff] %vm694_vm1, %v683_v61 }
 0x129   : > { %v623_v0 = vpop.f32.mrf.mxu0  ;;  %v687_v1 = vpop.f32.mrf.mxu1 }
 0x12a   : > { %v624_v2 = vadd.f32 %v1153_v42, %v623_v0  ;;  %v688_v3 = vadd.f32 %v1153_v42, %v687_v1 }
 0x12b   : > { %v625_v4 = vpop.f32.mrf.mxu0  ;;  %v689_v5 = vpop.f32.mrf.mxu1 }
 0x12c   : > { %709 = vst.msk [vmem:[%s1160_s20 + $0x70] sm:$0xff] %vm694_vm1, %v624_v2  ;;  %725 = vst.msk [vmem:[%s1160_s20 + $0xf0] sm:$0xff] %vm694_vm1, %v688_v3 }
 0x12d   : > { %v626_v6 = vpop.f32.mrf.mxu0  ;;  %v690_v7 = vpop.f32.mrf.mxu1 }
 0x12e   : > { %v627_v8 = vadd.f32 %v1153_v42, %v626_v6  ;;  %v691_v9 = vadd.f32 %v1153_v42, %v690_v7 }
 0x12f   : > { %v628_v10 = vpop.f32.mrf.mxu0  ;;  %v692_v11 = vpop.f32.mrf.mxu1 }
 0x130   : > { %710 = vst.msk [vmem:[%s1160_s20 + $0x78] sm:$0xff] %vm694_vm1, %v627_v8  ;;  %726 = vst.msk [vmem:[%s1160_s20 + $0xf8] sm:$0xff] %vm694_vm1, %v691_v9 }
 0x131 PF: > { %s13_s14 = sadd.s32 1, %s1024_s14   ;;  %s1271_s12 = smov %s1020_s13 }
 0x132   : > { %p10_p5 = scmp.ge.s32.totalorder %s13_s14, 4   ;;  %s1272_s13 = smov %s1274_s15 }
 0x134   :  { %12 = sbr.rel (!%p10_p5) target bundleno = 2 (0x2), region = 68 }

// kernel: _lambda_.128
= control target key start
LH: loop header
LB: loop body
LE: loop exit
PB: predicated region body
PF: predicated region fallthrough
CT: control target
= control target key end

     0   :  { %s1845_s15 = smov 0   ;;  %s1847_s16 = smov 0   ;;  %s2177_s0 = inlined_call_operand.vmem [shape: bf16[512,288], index: 0, kind: input, shape index: {}]   ;;  %s2178_s1 = inlined_call_operand.vmem [shape: bf16[288,16], index: 1, kind: input, shape index: {}]   ;;  %s2179_s2 = inlined_call_operand.vmem [shape: f32[1,16], index: 2, kind: input, shape index: {}]   ;;  %s2180_s3 = inlined_call_operand.vmem [shape: f32[512,16], index: 3, kind: input, shape index: {}]   ;;  %s2181_s4 = inlined_call_operand.vmem [shape: f32[512,16], index: 4, kind: output, shape index: {}]  }
   0x1   :  { %s1849_s17 = smov 0  }
   0x2 LB: > { %s26_s18 = sadd.s32 1, %s1814_s16  ;;  %p1527_p0 = scmp.ge.s32.totalorder %s1818_s17, 1  ;;  %s1818_s17 = sphi %s1849_s17, %s14_s17   ;;  %s1814_s16 = sphi %s1847_s16, %s2183_s16   ;;  %s1810_s15 = sphi %s1845_s15, %s2182_s15  }
   0x3   : > { %p28_p1 = scmp.ge.s32.totalorder %s26_s18, 2  ;;  %p211_p2 = scmp.lt.s32.totalorder %s1818_s17, 3 }
   0x5   : > { %s2185_s18 = smov (%p28_p1, %s26_s18), 0  ;;  %p212_p3 = pnand %p1527_p0, %p211_p2 }
   0x6   : > { %s1528_s21 = sshll.u32 (!%p212_p3), %s1810_s15, 5 }
   0x7   : > { %215 = sbr.rel (%p212_p3) target bundleno = 341 (0x155), region = 36  ;;  %p257_p4 = scmp.lt.s32.totalorder (!%p212_p3), %s1528_s21, 63 }
   0xc   : > { %v1778_v0 = vld [vmem:[%s2178_s1 + $0x78] sm:$0xff]   ;;  %v1780_v2 = vld [vmem:[%s2178_s1 + $0x70] sm:$0xff]   ;;  %v1782_v4 = vld [vmem:[%s2178_s1 + $0x68] sm:$0xff]   ;;  %s2187_s21 = smov (!%p257_p4, %s1528_s21), 63 }
   0xd   : > { %v1779_v1 = vld [vmem:[%s2178_s1 + $0x38] sm:$0xff]   ;;  %1571 = vmatprep.subr.bf16.mxu0 %v1778_v0  ;;  %1737 = vmatprep.subr.bf16.mxu1 %v1778_v0  ;;  %v1781_v3 = vld [vmem:[%s2178_s1 + $0x30] sm:$0xff]   ;;  %v1783_v5 = vld [vmem:[%s2178_s1 + $0x28] sm:$0xff]   ;;  %s1753_s8 = smul.u32 12, %s2187_s21  ;;  %s1531_s12 = sshll.u32 %s2187_s21, 3 }
   0xe   : > { %1572 = vmatpush3.bf16.msra.mxu0 %v1779_v1  ;;  %1745 = vmatpush3.bf16.msra.mxu1 %v1779_v1  ;;  %v1784_v6 = vld [vmem:[%s2178_s1 + $0x60] sm:$0xff]   ;;  %v1786_v8 = vld [vmem:[%s2178_s1 + $0x58] sm:$0xff]   ;;  %v1788_v10 = vld [vmem:[%s2178_s1 + $0x50] sm:$0xff]   ;;  %s2027_s23 = scalar_lea.vmem %s2181_s4, %s1531_s12 }
   0xf   : > { %1573 = vmatprep.subr.bf16.mxu0 %v1780_v2  ;;  %1738 = vmatprep.subr.bf16.mxu1 %v1780_v2  ;;  %v1785_v7 = vld [vmem:[%s2178_s1 + $0x20] sm:$0xff]   ;;  %s1896_s15 = scalar_lea.vmem %s2177_s0, %s1753_s8  ;;  %v1787_v9 = vld [vmem:[%s2178_s1 + $0x18] sm:$0xff]   ;;  %v1789_v19 = vld [vmem:[%s2178_s1 + $0x10] sm:$0xff]  }
  0x10   : > { %v289_v11 = vld [vmem:[%s1896_s15] sm:$0xff]  ;;  %v291_v12 = vld [vmem:[%s1896_s15 + $0xc] sm:$0xff]  ;;  %v293_v32 = vld [vmem:[%s1896_s15 + $0x18] sm:$0xff] }
  0x11   : > { %v337_v13 = vld [vmem:[%s1896_s15 + $0x120] sm:$0xff]  ;;  %v353_v14 = vunpack.c.l.bf16 %v289_v11  ;;  %v354_v15 = vunpack.c.h.bf16 %v289_v11  ;;  %v356_v16 = vunpack.c.l.bf16 %v291_v12  ;;  %v357_v17 = vunpack.c.h.bf16 %v291_v12  ;;  %v339_v18 = vld [vmem:[%s1896_s15 + $0x12c] sm:$0xff]  ;;  %v341_v39 = vld [vmem:[%s1896_s15 + $0x138] sm:$0xff] }
  0x12   : > { %1574 = vmatpush3.bf16.msra.mxu0 %v1781_v3  ;;  %1746 = vmatpush3.bf16.msra.mxu1 %v1781_v3  ;;  %v1790_v20 = vld [vmem:[%s2178_s1 + $0x48] sm:$0xff]   ;;  %v425_v21 = vunpack.c.l.bf16 %v337_v13  ;;  %v426_v22 = vunpack.c.h.bf16 %v337_v13  ;;  %v428_v23 = vunpack.c.l.bf16 %v339_v18  ;;  %v429_v24 = vunpack.c.h.bf16 %v339_v18  ;;  %v1792_v33 = vld [vmem:[%s2178_s1 + $0x40] sm:$0xff]  }
  0x13   : > { %1575 = vmatprep.subr.bf16.mxu0 %v1782_v4  ;;  %1739 = vmatprep.subr.bf16.mxu1 %v1782_v4  ;;  %vm450_vm0 = vcmp.ge.f32.partialorder %v354_v15, 0.0  ;;  %vm453_vm1 = vcmp.ge.f32.partialorder %v357_v17, 0.0  ;;  %v546_v25 = vmul.f32 0.01, %v354_v15  ;;  %v549_v26 = vmul.f32 0.01, %v357_v17 }
  0x14   : > { %vm522_vm2 = vcmp.ge.f32.partialorder %v426_v22, 0.0  ;;  %vm525_vm3 = vcmp.ge.f32.partialorder %v429_v24, 0.0  ;;  %v618_v27 = vmul.f32 0.01, %v426_v22  ;;  %v621_v28 = vmul.f32 0.01, %v429_v24 }
  0x15   : > { %v1791_v29 = vld [vmem:[%s2178_s1 + $0x8] sm:$0xff]   ;;  %v642_v30 = vsel %vm450_vm0, %v354_v15, %v546_v25  ;;  %v645_v31 = vsel %vm453_vm1, %v357_v17, %v549_v26  ;;  %vm449_vm4 = vcmp.ge.f32.partialorder %v353_v14, 0.0  ;;  %vm452_vm5 = vcmp.ge.f32.partialorder %v356_v16, 0.0  ;;  %v1793_v51 = vld [vmem:[%s2178_s1] sm:$0xff]  }
  0x16   : > { %1576 = vmatpush3.bf16.msra.mxu0 %v1783_v5  ;;  %1747 = vmatpush3.bf16.msra.mxu1 %v1783_v5  ;;  %v738_v34 = vpack.c.bf16 %v645_v31, %v642_v30  ;;  %v714_v35 = vsel %vm522_vm2, %v426_v22, %v618_v27  ;;  %v717_v36 = vsel %vm525_vm3, %v429_v24, %v621_v28  ;;  %v545_v37 = vmul.f32 0.01, %v353_v14  ;;  %v295_v38 = vld [vmem:[%s1896_s15 + $0x24] sm:$0xff]  ;;  %v297_v5 = vld [vmem:[%s1896_s15 + $0x30] sm:$0xff]  ;;  %v347_v17 = vld [vmem:[%s1896_s15 + $0x15c] sm:$0xff] }
  0x17   : > { %1577 = vmatprep.subr.bf16.mxu0 %v1784_v6  ;;  %1740 = vmatprep.subr.bf16.mxu1 %v1784_v6  ;;  %v343_v40 = vld [vmem:[%s1896_s15 + $0x144] sm:$0xff]  ;;  %v774_v41 = vpack.c.bf16 %v717_v36, %v714_v35  ;;  %v548_v42 = vmul.f32 0.01, %v356_v16  ;;  %vm521_vm6 = vcmp.ge.f32.partialorder %v425_v21, 0.0  ;;  %vm524_vm7 = vcmp.ge.f32.partialorder %v428_v23, 0.0  ;;  %v299_v6 = vld [vmem:[%s1896_s15 + $0x3c] sm:$0xff] }
  0x18   : > { %v641_v43 = vsel %vm449_vm4, %v353_v14, %v545_v37  ;;  %v617_v44 = vmul.f32 0.01, %v425_v21  ;;  %v620_v45 = vmul.f32 0.01, %v428_v23  ;;  %v360_v46 = vunpack.c.h.bf16 %v293_v32  ;;  %1017 = vmatprep.mubr.bf16.mxu0 %v738_v34  ;;  %v1794_v56 = vld [vmem:[%s2178_s1 + $0x88] sm:$0xff]   ;;  %v1795_v13 = vld [vmem:[%s2178_s1 + $0x80] sm:$0xff]  }
  0x19   : > { %1113 = vmatprep.mubr.bf16.mxu1 %v774_v41  ;;  %v644_v47 = vsel %vm452_vm5, %v356_v16, %v548_v42  ;;  %v363_v48 = vunpack.c.h.bf16 %v295_v38  ;;  %v432_v49 = vunpack.c.h.bf16 %v341_v39  ;;  %v435_v50 = vunpack.c.h.bf16 %v343_v40  ;;  %v301_v34 = vld [vmem:[%s1896_s15 + $0x48] sm:$0xff] }
  0x1a   : > { %1578 = vmatpush3.bf16.msra.mxu0 %v1785_v7  ;;  %1748 = vmatpush3.bf16.msra.mxu1 %v1785_v7  ;;  %v737_v52 = vpack.c.bf16 %v644_v47, %v641_v43  ;;  %v713_v53 = vsel %vm521_vm6, %v425_v21, %v617_v44  ;;  %v716_v54 = vsel %vm524_vm7, %v428_v23, %v620_v45  ;;  %vm456_vm8 = vcmp.ge.f32.partialorder %v360_v46, 0.0  ;;  %v345_v7 = vld [vmem:[%s1896_s15 + $0x150] sm:$0xff] }
  0x1b   : > { %1579 = vmatprep.subr.bf16.mxu0 %v1786_v8  ;;  %1741 = vmatprep.subr.bf16.mxu1 %v1786_v8  ;;  %v773_v55 = vpack.c.bf16 %v716_v54, %v713_v53  ;;  %vm459_vm9 = vcmp.ge.f32.partialorder %v363_v48, 0.0  ;;  %v552_v57 = vmul.f32 0.01, %v360_v46  ;;  %v555_v58 = vmul.f32 0.01, %v363_v48 }
  0x1c   : > { %vm528_vm10 = vcmp.ge.f32.partialorder %v432_v49, 0.0  ;;  %vm531_vm11 = vcmp.ge.f32.partialorder %v435_v50, 0.0  ;;  %v624_v59 = vmul.f32 0.01, %v432_v49  ;;  %v627_v60 = vmul.f32 0.01, %v435_v50 }
  0x1d   : > { %v648_v61 = vsel %vm456_vm8, %v360_v46, %v552_v57  ;;  %v651_v62 = vsel %vm459_vm9, %v363_v48, %v555_v58  ;;  %v359_v63 = vunpack.c.l.bf16 %v293_v32  ;;  %v362_v0 = vunpack.c.l.bf16 %v295_v38  ;;  %v303_v38 = vld [vmem:[%s1896_s15 + $0x54] sm:$0xff] }
  0x1e   : > { %1580 = vmatpush3.bf16.msra.mxu0 %v1787_v9  ;;  %1749 = vmatpush3.bf16.msra.mxu1 %v1787_v9  ;;  %v741_v1 = vpack.c.bf16 %v651_v62, %v648_v61  ;;  %v720_v2 = vsel %vm528_vm10, %v432_v49, %v624_v59  ;;  %v723_v3 = vsel %vm531_vm11, %v435_v50, %v627_v60  ;;  %v431_v4 = vunpack.c.l.bf16 %v341_v39  ;;  %v349_v49 = vld [vmem:[%s1896_s15 + $0x168] sm:$0xff]  ;;  %v351_v50 = vld [vmem:[%s1896_s15 + $0x174] sm:$0xff] }
  0x1f   : > { %1581 = vmatprep.subr.bf16.mxu0 %v1788_v10  ;;  %1742 = vmatprep.subr.bf16.mxu1 %v1788_v10  ;;  %v777_v8 = vpack.c.bf16 %v723_v3, %v720_v2  ;;  %vm455_vm12 = vcmp.ge.f32.partialorder %v359_v63, 0.0  ;;  %vm458_vm13 = vcmp.ge.f32.partialorder %v362_v0, 0.0  ;;  %v551_v9 = vmul.f32 0.01, %v359_v63  ;;  %v305_v2 = vld [vmem:[%s1896_s15 + $0x60] sm:$0xff]  ;;  %v307_v3 = vld [vmem:[%s1896_s15 + $0x6c] sm:$0xff] }
  0x20   : > { %v554_v10 = vmul.f32 0.01, %v362_v0  ;;  %v434_v11 = vunpack.c.l.bf16 %v343_v40  ;;  %vm527_vm14 = vcmp.ge.f32.partialorder %v431_v4, 0.0  ;;  %v623_v12 = vmul.f32 0.01, %v431_v4 }
  0x21   : > { %v647_v14 = vsel %vm455_vm12, %v359_v63, %v551_v9  ;;  %v366_v15 = vunpack.c.h.bf16 %v297_v5  ;;  %v369_v16 = vunpack.c.h.bf16 %v299_v6  ;;  %v438_v18 = vunpack.c.h.bf16 %v345_v7 }
  0x22   : > { %1582 = vmatpush3.bf16.msra.mxu0 %v1789_v19  ;;  %1750 = vmatpush3.bf16.msra.mxu1 %v1789_v19  ;;  %v650_v19 = vsel %vm458_vm13, %v362_v0, %v554_v10  ;;  %vm530_vm15 = vcmp.ge.f32.partialorder %v434_v11, 0.0  ;;  %v719_v21 = vsel %vm527_vm14, %v431_v4, %v623_v12  ;;  %v441_v26 = vunpack.c.h.bf16 %v347_v17 }
  0x23   : > { %1583 = vmatprep.subr.bf16.mxu0 %v1790_v20  ;;  %1743 = vmatprep.subr.bf16.mxu1 %v1790_v20  ;;  %v626_v20 = vmul.f32 0.01, %v434_v11  ;;  %v740_v22 = vpack.c.bf16 %v650_v19, %v647_v14  ;;  %vm462_vm0 = vcmp.ge.f32.partialorder %v366_v15, 0.0  ;;  %vm465_vm1 = vcmp.ge.f32.partialorder %v369_v16, 0.0  ;;  %v290_v14 = vld [vmem:[%s1896_s15 + $0x8] ss:$12 sps:$4 sm:$0xff]  }
  0x24   : > { %v558_v23 = vmul.f32 0.01, %v366_v15  ;;  %v561_v25 = vmul.f32 0.01, %v369_v16  ;;  %vm534_vm2 = vcmp.ge.f32.partialorder %v438_v18, 0.0  ;;  %v365_v30 = vunpack.c.l.bf16 %v297_v5 }
  0x25   : > { %v722_v24 = vsel %vm530_vm15, %v434_v11, %v626_v20  ;;  %vm537_vm3 = vcmp.ge.f32.partialorder %v441_v26, 0.0  ;;  %v633_v32 = vmul.f32 0.01, %v441_v26  ;;  %v437_v41 = vunpack.c.l.bf16 %v345_v7 }
  0x26   : > { %1584 = vmatpush3.bf16.msra.mxu0 %v1791_v29  ;;  %1751 = vmatpush3.bf16.msra.mxu1 %v1791_v29  ;;  %v776_v27 = vpack.c.bf16 %v722_v24, %v719_v21  ;;  %v654_v28 = vsel %vm462_vm0, %v366_v15, %v558_v23  ;;  %v630_v29 = vmul.f32 0.01, %v438_v18  ;;  %v657_v31 = vsel %vm465_vm1, %v369_v16, %v561_v25 }
  0x27   : > { %1585 = vmatprep.subr.bf16.mxu0 %v1792_v33  ;;  %1744 = vmatprep.subr.bf16.mxu1 %v1792_v33  ;;  %v368_v33 = vunpack.c.l.bf16 %v299_v6  ;;  %v744_v35 = vpack.c.bf16 %v657_v31, %v654_v28  ;;  %vm461_vm4 = vcmp.ge.f32.partialorder %v365_v30, 0.0  ;;  %v557_v37 = vmul.f32 0.01, %v365_v30  ;;  %v309_v31 = vld [vmem:[%s1896_s15 + $0x78] sm:$0xff] }
  0x28   : > { %v726_v36 = vsel %vm534_vm2, %v438_v18, %v630_v29  ;;  %v729_v39 = vsel %vm537_vm3, %v441_v26, %v633_v32  ;;  %v440_v44 = vunpack.c.l.bf16 %v347_v17  ;;  %v372_v45 = vunpack.c.h.bf16 %v301_v34 }
  0x29   : > { %vm464_vm5 = vcmp.ge.f32.partialorder %v368_v33, 0.0  ;;  %v560_v40 = vmul.f32 0.01, %v368_v33  ;;  %v780_v42 = vpack.c.bf16 %v729_v39, %v726_v36  ;;  %v653_v43 = vsel %vm461_vm4, %v365_v30, %v557_v37 }
  0x2a   : > { %1586 = vmatpush3.bf16.msra.mxu0 %v1793_v51  ;;  %1752 = vmatpush3.bf16.msra.mxu1 %v1793_v51  ;;  %vm533_vm6 = vcmp.ge.f32.partialorder %v437_v41, 0.0  ;;  %v629_v47 = vmul.f32 0.01, %v437_v41  ;;  %v375_v48 = vunpack.c.h.bf16 %v303_v38  ;;  %vm536_vm7 = vcmp.ge.f32.partialorder %v440_v44, 0.0 }
  0x2b   : > { %1701 = vmatprep.subr.bf16.mxu1 %v1794_v56  ;;  %v656_v46 = vsel %vm464_vm5, %v368_v33, %v560_v40  ;;  %vm468_vm8 = vcmp.ge.f32.partialorder %v372_v45, 0.0  ;;  %v564_v54 = vmul.f32 0.01, %v372_v45  ;;  %v444_v57 = vunpack.c.h.bf16 %v349_v49 }
  0x2c   : > { %v743_v51 = vpack.c.bf16 %v656_v46, %v653_v43  ;;  %v725_v53 = vsel %vm533_vm6, %v437_v41, %v629_v47  ;;  %vm471_vm9 = vcmp.ge.f32.partialorder %v375_v48, 0.0  ;;  %v447_v58 = vunpack.c.h.bf16 %v351_v50  ;;  %v311_v41 = vld [vmem:[%s1896_s15 + $0x84] sm:$0xff] }
  0x2d   : > { %1018 = vmatmul.mubr.bf16.vlgmr.msra.gmra.mxu0 %v737_v52  ;;  %1114 = vmatmul.mubr.bf16.vlgmr.msra.gmra.mxu1 %v773_v55  ;;  %v632_v52 = vmul.f32 0.01, %v440_v44  ;;  %v567_v55 = vmul.f32 0.01, %v375_v48  ;;  %v371_v59 = vunpack.c.l.bf16 %v301_v34  ;;  %v660_v61 = vsel %vm468_vm8, %v372_v45, %v564_v54  ;;  %v298_v46 = vld [vmem:[%s1896_s15 + $0x38] ss:$12 sps:$4 sm:$0xff]  }
  0x2e   : > { %1702 = vmatpush3.bf16.msra.mxu1 %v1794_v56  ;;  %1025 = vmatprep.mubr.bf16.mxu0 %v741_v1  ;;  %v374_v63 = vunpack.c.l.bf16 %v303_v38  ;;  %vm540_vm10 = vcmp.ge.f32.partialorder %v444_v57, 0.0  ;;  %vm543_vm11 = vcmp.ge.f32.partialorder %v447_v58, 0.0  ;;  %v636_v1 = vmul.f32 0.01, %v444_v57 }
  0x2f   : > { %1121 = vmatprep.mubr.bf16.mxu1 %v777_v8  ;;  %1703 = vmatprep.subr.bf16.mxu1 %v1795_v13  ;;  %v728_v56 = vsel %vm536_vm7, %v440_v44, %v632_v52  ;;  %v663_v62 = vsel %vm471_vm9, %v375_v48, %v567_v55  ;;  %v639_v4 = vmul.f32 0.01, %v447_v58  ;;  %vm467_vm12 = vcmp.ge.f32.partialorder %v371_v59, 0.0 }
  0x30   : > { %v779_v60 = vpack.c.bf16 %v728_v56, %v725_v53  ;;  %v747_v0 = vpack.c.bf16 %v663_v62, %v660_v61  ;;  %vm470_vm13 = vcmp.ge.f32.partialorder %v374_v63, 0.0  ;;  %v563_v5 = vmul.f32 0.01, %v371_v59  ;;  %v302_v56 = vld [vmem:[%s1896_s15 + $0x50] ss:$12 sps:$4 sm:$0xff]  }
  0x31   : > { %v732_v6 = vsel %vm540_vm10, %v444_v57, %v636_v1  ;;  %v566_v7 = vmul.f32 0.01, %v374_v63  ;;  %v443_v8 = vunpack.c.l.bf16 %v349_v49  ;;  %v446_v9 = vunpack.c.l.bf16 %v351_v50 }
  0x32   : > { %1704 = vmatpush3.bf16.msra.mxu1 %v1795_v13  ;;  %v735_v10 = vsel %vm543_vm11, %v447_v58, %v639_v4  ;;  %v659_v11 = vsel %vm467_vm12, %v371_v59, %v563_v5  ;;  %v378_v12 = vunpack.c.h.bf16 %v305_v2  ;;  %v381_v13 = vunpack.c.h.bf16 %v307_v3 }
  0x33   : > { %vm936_vm14 = vcmask 261120   ;;  %v783_v15 = vpack.c.bf16 %v735_v10, %v732_v6  ;;  %v662_v16 = vsel %vm470_vm13, %v374_v63, %v566_v7  ;;  %vm539_vm15 = vcmp.ge.f32.partialorder %v443_v8, 0.0  ;;  %v313_v6 = vld [vmem:[%s1896_s15 + $0x90] sm:$0xff]  ;;  %v315_v7 = vld [vmem:[%s1896_s15 + $0x9c] sm:$0xff] }
  0x34   : > { %vm542_vm0 = vcmp.ge.f32.partialorder %v446_v9, 0.0  ;;  %v746_v17 = vpack.c.bf16 %v662_v16, %v659_v11  ;;  %v635_v18 = vmul.f32 0.01, %v443_v8  ;;  %v638_v19 = vmul.f32 0.01, %v446_v9 }
  0x35   : > { %1026 = vmatmul.mubr.bf16.gmra.mxu0 %v740_v22  ;;  %1122 = vmatmul.mubr.bf16.gmra.mxu1 %v776_v27  ;;  %vm474_vm1 = vcmp.ge.f32.partialorder %v378_v12, 0.0  ;;  %vm477_vm2 = vcmp.ge.f32.partialorder %v381_v13, 0.0  ;;  %v570_v20 = vmul.f32 0.01, %v378_v12  ;;  %v573_v21 = vmul.f32 0.01, %v381_v13 }
  0x36   : > { %1033 = vmatprep.mubr.bf16.mxu0 %v744_v35  ;;  %1129 = vmatprep.mubr.bf16.mxu1 %v780_v42  ;;  %v355_v22 = vunpack.c.l.bf16 %v290_v14  ;;  %v731_v23 = vsel %vm539_vm15, %v443_v8, %v635_v18  ;;  %v734_v24 = vsel %vm542_vm0, %v446_v9, %v638_v19  ;;  %v358_v25 = vunpack.c.h.bf16 %v290_v14  ;;  %v294_v27 = vld [vmem:[%s1896_s15 + $0x20] ss:$12 sps:$4 sm:$0xff]  }
  0x37   : > { %v377_v26 = vunpack.c.l.bf16 %v305_v2  ;;  %v782_v28 = vpack.c.bf16 %v734_v24, %v731_v23  ;;  %v666_v29 = vsel %vm474_vm1, %v378_v12, %v570_v20  ;;  %v669_v30 = vsel %vm477_vm2, %v381_v13, %v573_v21  ;;  %v306_v12 = vld [vmem:[%s1896_s15 + $0x68] ss:$12 sps:$4 sm:$0xff]  }
  0x38   : > { %vm451_vm3 = vcmp.ge.f32.partialorder %v355_v22, 0.0  ;;  %v750_v32 = vpack.c.bf16 %v669_v30, %v666_v29  ;;  %vm454_vm4 = vcmp.ge.f32.partialorder %v358_v25, 0.0  ;;  %v547_v33 = vmul.f32 0.01, %v355_v22 }
  0x39   : > { %v550_v34 = vmul.f32 0.01, %v358_v25  ;;  %v380_v35 = vunpack.c.l.bf16 %v307_v3  ;;  %vm473_vm5 = vcmp.ge.f32.partialorder %v377_v26, 0.0  ;;  %v569_v36 = vmul.f32 0.01, %v377_v26 }
  0x3a   : > { %v361_v37 = vunpack.c.l.bf16 %v294_v27  ;;  %v643_v38 = vsel %vm451_vm3, %v355_v22, %v547_v33  ;;  %v364_v40 = vunpack.c.h.bf16 %v294_v27  ;;  %v384_v42 = vunpack.c.h.bf16 %v309_v31  ;;  %v310_v27 = vld [vmem:[%s1896_s15 + $0x80] ss:$12 sps:$4 sm:$0xff]  }
  0x3b   : > { %v646_v39 = vsel %vm454_vm4, %v358_v25, %v550_v34  ;;  %vm476_vm6 = vcmp.ge.f32.partialorder %v380_v35, 0.0  ;;  %v572_v44 = vmul.f32 0.01, %v380_v35  ;;  %v665_v45 = vsel %vm473_vm5, %v377_v26, %v569_v36 }
  0x3c   : > { %v739_v43 = vpack.c.bf16 %v646_v39, %v643_v38  ;;  %vm457_vm7 = vcmp.ge.f32.partialorder %v361_v37, 0.0  ;;  %vm460_vm8 = vcmp.ge.f32.partialorder %v364_v40, 0.0  ;;  %v553_v47 = vmul.f32 0.01, %v361_v37  ;;  %v319_v38 = vld [vmem:[%s1896_s15 + $0xb4] sm:$0xff] }
  0x3d   : > { %1034 = vmatmul.mubr.bf16.gmra.mxu0 %v743_v51  ;;  %1130 = vmatmul.mubr.bf16.gmra.mxu1 %v779_v60  ;;  %v556_v48 = vmul.f32 0.01, %v364_v40  ;;  %v668_v49 = vsel %vm476_vm6, %v380_v35, %v572_v44  ;;  %v387_v50 = vunpack.c.h.bf16 %v311_v41  ;;  %vm480_vm9 = vcmp.ge.f32.partialorder %v384_v42, 0.0 }
  0x3e   : > { %1041 = vmatprep.mubr.bf16.mxu0 %v747_v0  ;;  %1137 = vmatprep.mubr.bf16.mxu1 %v783_v15  ;;  %v576_v51 = vmul.f32 0.01, %v384_v42  ;;  %v749_v52 = vpack.c.bf16 %v668_v49, %v665_v45  ;;  %v649_v53 = vsel %vm457_vm7, %v361_v37, %v553_v47  ;;  %v367_v55 = vunpack.c.l.bf16 %v298_v46  ;;  %v317_v37 = vld [vmem:[%s1896_s15 + $0xa8] sm:$0xff] }
  0x3f   : > { %v652_v54 = vsel %vm460_vm8, %v364_v40, %v556_v48  ;;  %vm483_vm10 = vcmp.ge.f32.partialorder %v387_v50, 0.0  ;;  %v579_v58 = vmul.f32 0.01, %v387_v50  ;;  %v370_v60 = vunpack.c.h.bf16 %v298_v46 }
  0x40   : > { %v742_v57 = vpack.c.bf16 %v652_v54, %v649_v53  ;;  %v672_v59 = vsel %vm480_vm9, %v384_v42, %v576_v51  ;;  %vm463_vm11 = vcmp.ge.f32.partialorder %v367_v55, 0.0  ;;  %v559_v61 = vmul.f32 0.01, %v367_v55  ;;  %v314_v42 = vld [vmem:[%s1896_s15 + $0x98] ss:$12 sps:$4 sm:$0xff]  }
  0x41   : > { %v383_v62 = vunpack.c.l.bf16 %v309_v31  ;;  %v675_v63 = vsel %vm483_vm10, %v387_v50, %v579_v58  ;;  %v386_v0 = vunpack.c.l.bf16 %v311_v41  ;;  %v373_v1 = vunpack.c.l.bf16 %v302_v56 }
  0x42   : > { %v376_v2 = vunpack.c.h.bf16 %v302_v56  ;;  %v753_v3 = vpack.c.bf16 %v675_v63, %v672_v59  ;;  %vm466_vm12 = vcmp.ge.f32.partialorder %v370_v60, 0.0  ;;  %v562_v4 = vmul.f32 0.01, %v370_v60 }
  0x43   : > { %v655_v5 = vsel %vm463_vm11, %v367_v55, %v559_v61  ;;  %vm479_vm13 = vcmp.ge.f32.partialorder %v383_v62, 0.0  ;;  %vm482_vm15 = vcmp.ge.f32.partialorder %v386_v0, 0.0  ;;  %v575_v8 = vmul.f32 0.01, %v383_v62 }
  0x44   : > { %v578_v9 = vmul.f32 0.01, %v386_v0  ;;  %v658_v10 = vsel %vm466_vm12, %v370_v60, %v562_v4  ;;  %vm469_vm0 = vcmp.ge.f32.partialorder %v373_v1, 0.0  ;;  %vm472_vm1 = vcmp.ge.f32.partialorder %v376_v2, 0.0 }
  0x45   : > { %1042 = vmatmul.mubr.bf16.gmra.mxu0 %v746_v17  ;;  %1138 = vmatmul.mubr.bf16.gmra.mxu1 %v782_v28  ;;  %v565_v11 = vmul.f32 0.01, %v373_v1  ;;  %v745_v13 = vpack.c.bf16 %v658_v10, %v655_v5  ;;  %v671_v14 = vsel %vm479_vm13, %v383_v62, %v575_v8  ;;  %v568_v16 = vmul.f32 0.01, %v376_v2  ;;  %v318_v62 = vld [vmem:[%s1896_s15 + $0xb0] ss:$12 sps:$4 sm:$0xff]  }
  0x46   : > { %1049 = vmatprep.mubr.bf16.mxu0 %v750_v32  ;;  %1705 = vmatprep.mubr.msk.bf16.mxu1 %vm936_vm14, %v739_v43  ;;  %v674_v15 = vsel %vm482_vm15, %v386_v0, %v578_v9  ;;  %v390_v19 = vunpack.c.h.bf16 %v313_v6  ;;  %v393_v20 = vunpack.c.h.bf16 %v315_v7  ;;  %v379_v22 = vunpack.c.l.bf16 %v306_v12 }
  0x47   : > { %v752_v17 = vpack.c.bf16 %v674_v15, %v671_v14  ;;  %v661_v18 = vsel %vm469_vm0, %v373_v1, %v565_v11  ;;  %v664_v21 = vsel %vm472_vm1, %v376_v2, %v568_v16  ;;  %v382_v23 = vunpack.c.h.bf16 %v306_v12  ;;  %v321_v2 = vld [vmem:[%s1896_s15 + $0xc0] sm:$0xff] }
  0x48   : > { %v389_v24 = vunpack.c.l.bf16 %v313_v6  ;;  %v748_v25 = vpack.c.bf16 %v664_v21, %v661_v18  ;;  %vm486_vm2 = vcmp.ge.f32.partialorder %v390_v19, 0.0  ;;  %vm489_vm3 = vcmp.ge.f32.partialorder %v393_v20, 0.0  ;;  %v323_v6 = vld [vmem:[%s1896_s15 + $0xcc] sm:$0xff] }
  0x49   : > { %v582_v26 = vmul.f32 0.01, %v390_v19  ;;  %v585_v28 = vmul.f32 0.01, %v393_v20  ;;  %vm475_vm4 = vcmp.ge.f32.partialorder %v379_v22, 0.0  ;;  %vm478_vm5 = vcmp.ge.f32.partialorder %v382_v23, 0.0 }
  0x4a   : > { %v571_v29 = vmul.f32 0.01, %v379_v22  ;;  %v574_v31 = vmul.f32 0.01, %v382_v23  ;;  %v392_v32 = vunpack.c.l.bf16 %v315_v7  ;;  %vm485_vm6 = vcmp.ge.f32.partialorder %v389_v24, 0.0 }
  0x4b   : > { %v678_v30 = vsel %vm486_vm2, %v390_v19, %v582_v26  ;;  %v681_v33 = vsel %vm489_vm3, %v393_v20, %v585_v28  ;;  %v581_v35 = vmul.f32 0.01, %v389_v24  ;;  %v385_v36 = vunpack.c.l.bf16 %v310_v27 }
  0x4c   : > { %v667_v34 = vsel %vm475_vm4, %v379_v22, %v571_v29  ;;  %v756_v39 = vpack.c.bf16 %v681_v33, %v678_v30  ;;  %v670_v40 = vsel %vm478_vm5, %v382_v23, %v574_v31  ;;  %vm488_vm7 = vcmp.ge.f32.partialorder %v392_v32, 0.0  ;;  %v326_v31 = vld [vmem:[%s1896_s15 + $0xe0] ss:$12 sps:$4 sm:$0xff]  }
  0x4d   : > { %1050 = vmatmul.mubr.bf16.gmra.mxu0 %v749_v52  ;;  %1706 = vmatmul.mubr.msk.bf16.vlgmr.msra.gmra.mxu1 %vm936_vm14, %v742_v57  ;;  %v584_v41 = vmul.f32 0.01, %v392_v32  ;;  %v751_v43 = vpack.c.bf16 %v670_v40, %v667_v34  ;;  %v677_v44 = vsel %vm485_vm6, %v389_v24, %v581_v35  ;;  %v388_v45 = vunpack.c.h.bf16 %v310_v27  ;;  %v325_v34 = vld [vmem:[%s1896_s15 + $0xd8] sm:$0xff]  ;;  %v327_v35 = vld [vmem:[%s1896_s15 + $0xe4] sm:$0xff] }
  0x4e   : > { %1057 = vmatprep.mubr.bf16.mxu0 %v753_v3  ;;  %1709 = vmatprep.mubr.msk.bf16.mxu1 %vm936_vm14, %v745_v13  ;;  %vm481_vm8 = vcmp.ge.f32.partialorder %v385_v36, 0.0  ;;  %v577_v47 = vmul.f32 0.01, %v385_v36  ;;  %v396_v48 = vunpack.c.h.bf16 %v317_v37  ;;  %v399_v49 = vunpack.c.h.bf16 %v319_v38 }
  0x4f   : > { %v680_v46 = vsel %vm488_vm7, %v392_v32, %v584_v41  ;;  %vm484_vm9 = vcmp.ge.f32.partialorder %v388_v45, 0.0  ;;  %v580_v51 = vmul.f32 0.01, %v388_v45  ;;  %v391_v52 = vunpack.c.l.bf16 %v314_v42 }
  0x50   : > { %v755_v50 = vpack.c.bf16 %v680_v46, %v677_v44  ;;  %v673_v53 = vsel %vm481_vm8, %v385_v36, %v577_v47  ;;  %vm492_vm10 = vcmp.ge.f32.partialorder %v396_v48, 0.0  ;;  %vm495_vm11 = vcmp.ge.f32.partialorder %v399_v49, 0.0  ;;  %v330_v46 = vld [vmem:[%s1896_s15 + $0xf8] ss:$12 sps:$4 sm:$0xff]  }
  0x51   : > { %v588_v54 = vmul.f32 0.01, %v396_v48  ;;  %v676_v55 = vsel %vm484_vm9, %v388_v45, %v580_v51  ;;  %v591_v56 = vmul.f32 0.01, %v399_v49  ;;  %v394_v57 = vunpack.c.h.bf16 %v314_v42 }
  0x52   : > { %vm487_vm12 = vcmp.ge.f32.partialorder %v391_v52, 0.0  ;;  %v754_v58 = vpack.c.bf16 %v676_v55, %v673_v53  ;;  %v583_v60 = vmul.f32 0.01, %v391_v52  ;;  %v395_v61 = vunpack.c.l.bf16 %v317_v37 }
  0x53   : > { %v684_v59 = vsel %vm492_vm10, %v396_v48, %v588_v54  ;;  %v687_v63 = vsel %vm495_vm11, %v399_v49, %v591_v56  ;;  %vm490_vm13 = vcmp.ge.f32.partialorder %v394_v57, 0.0  ;;  %v586_v0 = vmul.f32 0.01, %v394_v57 }
  0x54   : > { %v398_v1 = vunpack.c.l.bf16 %v319_v38  ;;  %v759_v3 = vpack.c.bf16 %v687_v63, %v684_v59  ;;  %v679_v4 = vsel %vm487_vm12, %v391_v52, %v583_v60  ;;  %vm491_vm15 = vcmp.ge.f32.partialorder %v395_v61, 0.0  ;;  %v334_v59 = vld [vmem:[%s1896_s15 + $0x110] ss:$12 sps:$4 sm:$0xff]  }
  0x55   : > { %1058 = vmatmul.mubr.bf16.gmra.mxu0 %v752_v17  ;;  %1710 = vmatmul.mubr.msk.bf16.gmra.mxu1 %vm936_vm14, %v748_v25  ;;  %v587_v5 = vmul.f32 0.01, %v395_v61  ;;  %v682_v7 = vsel %vm490_vm13, %v394_v57, %v586_v0  ;;  %v397_v9 = vunpack.c.l.bf16 %v318_v62  ;;  %v400_v12 = vunpack.c.h.bf16 %v318_v62  ;;  %v322_v17 = vld [vmem:[%s1896_s15 + $0xc8] ss:$12 sps:$4 sm:$0xff]  }
  0x56   : > { %1065 = vmatprep.mubr.bf16.mxu0 %v756_v39  ;;  %1713 = vmatprep.mubr.msk.bf16.mxu1 %vm936_vm14, %v751_v43  ;;  %vm494_vm0 = vcmp.ge.f32.partialorder %v398_v1, 0.0  ;;  %v590_v8 = vmul.f32 0.01, %v398_v1  ;;  %v757_v10 = vpack.c.bf16 %v682_v7, %v679_v4  ;;  %v402_v13 = vunpack.c.h.bf16 %v321_v2  ;;  %v329_v63 = vld [vmem:[%s1896_s15 + $0xf0] sm:$0xff] }
  0x57   : > { %v683_v11 = vsel %vm491_vm15, %v395_v61, %v587_v5  ;;  %vm493_vm1 = vcmp.ge.f32.partialorder %v397_v9, 0.0  ;;  %v589_v15 = vmul.f32 0.01, %v397_v9  ;;  %v405_v16 = vunpack.c.h.bf16 %v323_v6 }
  0x58   : > { %v686_v14 = vsel %vm494_vm0, %v398_v1, %v590_v8  ;;  %vm496_vm2 = vcmp.ge.f32.partialorder %v400_v12, 0.0  ;;  %v592_v19 = vmul.f32 0.01, %v400_v12  ;;  %vm498_vm3 = vcmp.ge.f32.partialorder %v402_v13, 0.0 }
  0x59   : > { %v758_v18 = vpack.c.bf16 %v686_v14, %v683_v11  ;;  %v685_v20 = vsel %vm493_vm1, %v397_v9, %v589_v15  ;;  %vm501_vm4 = vcmp.ge.f32.partialorder %v405_v16, 0.0  ;;  %v594_v21 = vmul.f32 0.01, %v402_v13  ;;  %v331_v9 = vld [vmem:[%s1896_s15 + $0xfc] sm:$0xff]  ;;  %v338_v14 = vld [vmem:[%s1896_s15 + $0x128] ss:$12 sps:$4 sm:$0xff]  }
  0x5a   : > { %v597_v22 = vmul.f32 0.01, %v405_v16  ;;  %v688_v23 = vsel %vm496_vm2, %v400_v12, %v592_v19  ;;  %v403_v24 = vunpack.c.l.bf16 %v322_v17  ;;  %v406_v25 = vunpack.c.h.bf16 %v322_v17 }
  0x5b   : > { %v401_v26 = vunpack.c.l.bf16 %v321_v2  ;;  %v760_v27 = vpack.c.bf16 %v688_v23, %v685_v20  ;;  %v690_v28 = vsel %vm498_vm3, %v402_v13, %v594_v21  ;;  %v404_v30 = vunpack.c.l.bf16 %v323_v6 }
  0x5c   : > { %v693_v29 = vsel %vm501_vm4, %v405_v16, %v597_v22  ;;  %vm499_vm5 = vcmp.ge.f32.partialorder %v403_v24, 0.0  ;;  %vm502_vm6 = vcmp.ge.f32.partialorder %v406_v25, 0.0  ;;  %v595_v33 = vmul.f32 0.01, %v403_v24 }
  0x5d   : > { %1066 = vmatmul.mubr.bf16.gmra.mxu0 %v755_v50  ;;  %1714 = vmatmul.mubr.msk.bf16.gmra.mxu1 %vm936_vm14, %v754_v58  ;;  %v762_v32 = vpack.c.bf16 %v693_v29, %v690_v28  ;;  %v598_v36 = vmul.f32 0.01, %v406_v25  ;;  %vm497_vm7 = vcmp.ge.f32.partialorder %v401_v26, 0.0  ;;  %vm500_vm8 = vcmp.ge.f32.partialorder %v404_v30, 0.0 }
  0x5e   : > { %1073 = vmatprep.mubr.bf16.mxu0 %v759_v3  ;;  %1717 = vmatprep.mubr.msk.bf16.mxu1 %vm936_vm14, %v757_v10  ;;  %v593_v37 = vmul.f32 0.01, %v401_v26  ;;  %v691_v38 = vsel %vm499_vm5, %v403_v24, %v595_v33  ;;  %v596_v39 = vmul.f32 0.01, %v404_v30  ;;  %v409_v40 = vunpack.c.l.bf16 %v326_v31  ;;  %v342_v24 = vld [vmem:[%s1896_s15 + $0x140] ss:$12 sps:$4 sm:$0xff]  }
  0x5f   : > { %v412_v41 = vunpack.c.h.bf16 %v326_v31  ;;  %v694_v42 = vsel %vm502_vm6, %v406_v25, %v598_v36  ;;  %v408_v44 = vunpack.c.h.bf16 %v325_v34  ;;  %v411_v45 = vunpack.c.h.bf16 %v327_v35 }
  0x60   : > { %v689_v43 = vsel %vm497_vm7, %v401_v26, %v593_v37  ;;  %v763_v47 = vpack.c.bf16 %v694_v42, %v691_v38  ;;  %v692_v48 = vsel %vm500_vm8, %v404_v30, %v596_v39  ;;  %vm505_vm9 = vcmp.ge.f32.partialorder %v409_v40, 0.0  ;;  %v333_v38 = vld [vmem:[%s1896_s15 + $0x108] sm:$0xff]  ;;  %v335_v39 = vld [vmem:[%s1896_s15 + $0x114] sm:$0xff] }
  0x61   : > { %vm508_vm10 = vcmp.ge.f32.partialorder %v412_v41, 0.0  ;;  %v761_v49 = vpack.c.bf16 %v692_v48, %v689_v43  ;;  %v601_v50 = vmul.f32 0.01, %v409_v40  ;;  %v604_v51 = vmul.f32 0.01, %v412_v41 }
  0x62   : > { %vm504_vm11 = vcmp.ge.f32.partialorder %v408_v44, 0.0  ;;  %vm507_vm12 = vcmp.ge.f32.partialorder %v411_v45, 0.0  ;;  %v600_v52 = vmul.f32 0.01, %v408_v44  ;;  %v603_v53 = vmul.f32 0.01, %v411_v45 }
  0x63   : > { %v415_v54 = vunpack.c.l.bf16 %v330_v46  ;;  %v697_v55 = vsel %vm505_vm9, %v409_v40, %v601_v50  ;;  %v700_v56 = vsel %vm508_vm10, %v412_v41, %v604_v51  ;;  %v418_v57 = vunpack.c.h.bf16 %v330_v46 }
  0x64   : > { %v407_v58 = vunpack.c.l.bf16 %v325_v34  ;;  %v766_v60 = vpack.c.bf16 %v700_v56, %v697_v55  ;;  %v696_v61 = vsel %vm504_vm11, %v408_v44, %v600_v52  ;;  %v699_v62 = vsel %vm507_vm12, %v411_v45, %v603_v53  ;;  %v346_v44 = vld [vmem:[%s1896_s15 + $0x158] ss:$12 sps:$4 sm:$0xff]  }
  0x65   : > { %1074 = vmatmul.mubr.bf16.gmra.mxu0 %v758_v18  ;;  %1718 = vmatmul.mubr.msk.bf16.gmra.mxu1 %vm936_vm14, %v760_v27  ;;  %vm511_vm13 = vcmp.ge.f32.partialorder %v415_v54, 0.0  ;;  %v765_v0 = vpack.c.bf16 %v699_v62, %v696_v61  ;;  %vm514_vm15 = vcmp.ge.f32.partialorder %v418_v57, 0.0  ;;  %v607_v1 = vmul.f32 0.01, %v415_v54 }
  0x66   : > { %1081 = vmatprep.mubr.bf16.mxu0 %v762_v32  ;;  %1721 = vmatprep.mubr.msk.bf16.mxu1 %vm936_vm14, %v763_v47  ;;  %v610_v2 = vmul.f32 0.01, %v418_v57  ;;  %v410_v3 = vunpack.c.l.bf16 %v327_v35  ;;  %vm503_vm0 = vcmp.ge.f32.partialorder %v407_v58, 0.0  ;;  %v599_v4 = vmul.f32 0.01, %v407_v58 }
  0x67   : > { %v421_v5 = vunpack.c.l.bf16 %v334_v59  ;;  %v703_v6 = vsel %vm511_vm13, %v415_v54, %v607_v1  ;;  %v424_v8 = vunpack.c.h.bf16 %v334_v59  ;;  %v414_v10 = vunpack.c.h.bf16 %v329_v63  ;;  %v350_v59 = vld [vmem:[%s1896_s15 + $0x170] ss:$12 sps:$4 sm:$0xff]   ;;  %s2012_s15 = scalar_lea.vmem %s2180_s3, %s1531_s12 }
  0x68   : > { %v706_v7 = vsel %vm514_vm15, %v418_v57, %v610_v2  ;;  %vm506_vm1 = vcmp.ge.f32.partialorder %v410_v3, 0.0  ;;  %v602_v12 = vmul.f32 0.01, %v410_v3  ;;  %v695_v13 = vsel %vm503_vm0, %v407_v58, %v599_v4 }
  0x69   : > { %v769_v11 = vpack.c.bf16 %v706_v7, %v703_v6  ;;  %vm517_vm2 = vcmp.ge.f32.partialorder %v421_v5, 0.0  ;;  %vm520_vm3 = vcmp.ge.f32.partialorder %v424_v8, 0.0  ;;  %v613_v15 = vmul.f32 0.01, %v421_v5 }
  0x6a   : > { %v616_v16 = vmul.f32 0.01, %v424_v8  ;;  %v698_v17 = vsel %vm506_vm1, %v410_v3, %v602_v12  ;;  %v417_v18 = vunpack.c.h.bf16 %v331_v9  ;;  %vm510_vm4 = vcmp.ge.f32.partialorder %v414_v10, 0.0 }
  0x6b   : > { %v606_v19 = vmul.f32 0.01, %v414_v10  ;;  %v764_v20 = vpack.c.bf16 %v698_v17, %v695_v13  ;;  %v709_v21 = vsel %vm517_vm2, %v421_v5, %v613_v15  ;;  %v427_v23 = vunpack.c.l.bf16 %v338_v14 }
  0x6c   : > { %v712_v22 = vsel %vm520_vm3, %v424_v8, %v616_v16  ;;  %vm513_vm5 = vcmp.ge.f32.partialorder %v417_v18, 0.0  ;;  %v609_v26 = vmul.f32 0.01, %v417_v18  ;;  %v430_v28 = vunpack.c.h.bf16 %v338_v14 }
  0x6d   : > { %1082 = vmatmul.mubr.bf16.gmra.mxu0 %v761_v49  ;;  %1722 = vmatmul.mubr.msk.bf16.gmra.mxu1 %vm936_vm14, %v766_v60  ;;  %v772_v25 = vpack.c.bf16 %v712_v22, %v709_v21  ;;  %v702_v27 = vsel %vm510_vm4, %v414_v10, %v606_v19  ;;  %vm523_vm6 = vcmp.ge.f32.partialorder %v427_v23, 0.0  ;;  %v619_v29 = vmul.f32 0.01, %v427_v23 }
  0x6e   : > { %1089 = vmatprep.mubr.bf16.mxu0 %v765_v0  ;;  %1725 = vmatprep.mubr.msk.bf16.mxu1 %vm936_vm14, %v769_v11  ;;  %v413_v30 = vunpack.c.l.bf16 %v329_v63  ;;  %v705_v31 = vsel %vm513_vm5, %v417_v18, %v609_v26  ;;  %v416_v32 = vunpack.c.l.bf16 %v331_v9  ;;  %v433_v33 = vunpack.c.l.bf16 %v342_v24 }
  0x6f   : > { %v436_v34 = vunpack.c.h.bf16 %v342_v24  ;;  %v768_v35 = vpack.c.bf16 %v705_v31, %v702_v27  ;;  %vm526_vm7 = vcmp.ge.f32.partialorder %v430_v28, 0.0  ;;  %v622_v36 = vmul.f32 0.01, %v430_v28 }
  0x70   : > { %v715_v37 = vsel %vm523_vm6, %v427_v23, %v619_v29  ;;  %vm509_vm8 = vcmp.ge.f32.partialorder %v413_v30, 0.0  ;;  %vm512_vm9 = vcmp.ge.f32.partialorder %v416_v32, 0.0  ;;  %v605_v40 = vmul.f32 0.01, %v413_v30 }
  0x71   : > { %v608_v41 = vmul.f32 0.01, %v416_v32  ;;  %v718_v42 = vsel %vm526_vm7, %v430_v28, %v622_v36  ;;  %vm529_vm10 = vcmp.ge.f32.partialorder %v433_v33, 0.0  ;;  %vm532_vm11 = vcmp.ge.f32.partialorder %v436_v34, 0.0 }
  0x72   : > { %v625_v43 = vmul.f32 0.01, %v433_v33  ;;  %v775_v45 = vpack.c.bf16 %v718_v42, %v715_v37  ;;  %v701_v46 = vsel %vm509_vm8, %v413_v30, %v605_v40  ;;  %v628_v48 = vmul.f32 0.01, %v436_v34 }
  0x73   : > { %v704_v47 = vsel %vm512_vm9, %v416_v32, %v608_v41  ;;  %v420_v51 = vunpack.c.h.bf16 %v333_v38  ;;  %v423_v52 = vunpack.c.h.bf16 %v335_v39  ;;  %v439_v54 = vunpack.c.l.bf16 %v346_v44 }
  0x74   : > { %v767_v49 = vpack.c.bf16 %v704_v47, %v701_v46  ;;  %v721_v50 = vsel %vm529_vm10, %v433_v33, %v625_v43  ;;  %v724_v53 = vsel %vm532_vm11, %v436_v34, %v628_v48  ;;  %v442_v55 = vunpack.c.h.bf16 %v346_v44 }
  0x75   : > { %1090 = vmatmul.mubr.bf16.gmra.mxu0 %v764_v20  ;;  %1726 = vmatmul.mubr.msk.bf16.gmra.mxu1 %vm936_vm14, %v772_v25  ;;  %v419_v56 = vunpack.c.l.bf16 %v333_v38  ;;  %v778_v57 = vpack.c.bf16 %v724_v53, %v721_v50  ;;  %vm516_vm12 = vcmp.ge.f32.partialorder %v420_v51, 0.0  ;;  %vm519_vm13 = vcmp.ge.f32.partialorder %v423_v52, 0.0 }
  0x76   : > { %1097 = vmatprep.mubr.bf16.mxu0 %v768_v35  ;;  %1729 = vmatprep.mubr.msk.bf16.mxu1 %vm936_vm14, %v775_v45  ;;  %v612_v58 = vmul.f32 0.01, %v420_v51  ;;  %v615_v60 = vmul.f32 0.01, %v423_v52  ;;  %vm535_vm15 = vcmp.ge.f32.partialorder %v439_v54, 0.0  ;;  %vm538_vm0 = vcmp.ge.f32.partialorder %v442_v55, 0.0 }
  0x77   : > { %v631_v61 = vmul.f32 0.01, %v439_v54  ;;  %v634_v63 = vmul.f32 0.01, %v442_v55  ;;  %v422_v0 = vunpack.c.l.bf16 %v335_v39  ;;  %vm515_vm1 = vcmp.ge.f32.partialorder %v419_v56, 0.0 }
  0x78   : > { %v708_v62 = vsel %vm516_vm12, %v420_v51, %v612_v58  ;;  %v711_v1 = vsel %vm519_vm13, %v423_v52, %v615_v60  ;;  %v611_v3 = vmul.f32 0.01, %v419_v56  ;;  %v445_v4 = vunpack.c.l.bf16 %v350_v59 }
  0x79   : > { %v727_v2 = vsel %vm535_vm15, %v439_v54, %v631_v61  ;;  %v771_v5 = vpack.c.bf16 %v711_v1, %v708_v62  ;;  %v730_v6 = vsel %vm538_vm0, %v442_v55, %v634_v63  ;;  %vm518_vm2 = vcmp.ge.f32.partialorder %v422_v0, 0.0  ;;  %v1309_v1 = vld [vmem:[%s2012_s15 + $0x10] sm:$0xff] }
  0x7a   : > { %v614_v7 = vmul.f32 0.01, %v422_v0  ;;  %v781_v8 = vpack.c.bf16 %v730_v6, %v727_v2  ;;  %v707_v9 = vsel %vm515_vm1, %v419_v56, %v611_v3  ;;  %v448_v10 = vunpack.c.h.bf16 %v350_v59  ;;  %v2017_v59 = vld [vmem:[%s2179_s2] ss:$0 sm:$0xff] }
  0x7b   : > { %vm541_vm3 = vcmp.ge.f32.partialorder %v445_v4, 0.0  ;;  %v637_v12 = vmul.f32 0.01, %v445_v4 }
  0x7c   : > { %v710_v11 = vsel %vm518_vm2, %v422_v0, %v614_v7  ;;  %vm544_vm4 = vcmp.ge.f32.partialorder %v448_v10, 0.0  ;;  %v640_v14 = vmul.f32 0.01, %v448_v10  ;;  %v1307_v7 = vld [vmem:[%s2012_s15] sm:$0xff] }
  0x7d   : > { %1098 = vmatmul.mubr.bf16.gmra.mxu0 %v767_v49  ;;  %1730 = vmatmul.mubr.msk.bf16.gmra.mxu1 %vm936_vm14, %v778_v57  ;;  %v770_v13 = vpack.c.bf16 %v710_v11, %v707_v9  ;;  %v733_v15 = vsel %vm541_vm3, %v445_v4, %v637_v12 }
  0x7e   : > { %1105 = vmatprep.mubr.bf16.mxu0 %v771_v5  ;;  %1733 = vmatprep.mubr.msk.bf16.mxu1 %vm936_vm14, %v781_v8  ;;  %v736_v16 = vsel %vm544_vm4, %v448_v10, %v640_v14  ;;  %v1310_v14 = vld [vmem:[%s2012_s15 + $0x18] sm:$0xff] }
  0x7f   : > { %v784_v17 = vpack.c.bf16 %v736_v16, %v733_v15 }
  0x85   : > { %1106 = vmatmul.mubr.bf16.gmra.mxu0 %v770_v13  ;;  %1734 = vmatmul.mubr.msk.bf16.gmra.mxu1 %vm936_vm14, %v784_v17  ;;  %vm1371_vm14 = vcmask 130048  }
  0xed   : > { %v1587_v18 = vpop.f32.mrf.mxu0  ;;  %v1659_v19 = vpop.f32.mrf.mxu1 }
  0xef   : > { %v1588_v20 = vpop.f32.mrf.mxu0  ;;  %v1660_v21 = vpop.f32.mrf.mxu1 }
  0xf0   : > { %v1994_v22 = vadd.f32 %v1660_v21, %v1659_v19  ;;  %v1589_v56 = vadd.f32 %v1588_v20, %v1587_v18  ;;  %v1308_v21 = vld [vmem:[%s2012_s15 + $0x8] sm:$0xff] }
  0xf1   : > { %v1590_v23 = vpop.f32.mrf.mxu0  ;;  %v1662_v24 = vpop.f32.mrf.mxu1 }
  0xf2   : > { %v1020_v4 = vadd.f32 %v1589_v56, %v2017_v59 }
  0xf3   : > { %v1591_v25 = vpop.f32.mrf.mxu0  ;;  %v1663_v26 = vpop.f32.mrf.mxu1 }
  0xf4   : > { %v1996_v27 = vadd.f32 %v1663_v26, %v1662_v24  ;;  %v1592_v2 = vadd.f32 %v1591_v25, %v1590_v23 }
  0xf5   : > { %v1593_v28 = vpop.f32.mrf.mxu0  ;;  %v1665_v29 = vpop.f32.mrf.mxu1 }
  0xf6   : > { %v1023_v18 = vadd.f32 %v1592_v2, %v2017_v59 }
  0xf7   : > { %v1594_v30 = vpop.f32.mrf.mxu0  ;;  %v1666_v31 = vpop.f32.mrf.mxu1 }
  0xf8   : > { %v1998_v32 = vadd.f32 %v1666_v31, %v1665_v29  ;;  %v1595_v52 = vadd.f32 %v1594_v30, %v1593_v28  ;;  %v1313_v30 = vld [vmem:[%s2012_s15 + $0x30] sm:$0xff] }
  0xf9   : > { %v1596_v33 = vpop.f32.mrf.mxu0  ;;  %v1668_v34 = vpop.f32.mrf.mxu1 }
  0xfa   : > { %v1028_v62 = vadd.f32 %v1595_v52, %v2017_v59 }
  0xfb   : > { %v1597_v35 = vpop.f32.mrf.mxu0  ;;  %v1669_v36 = vpop.f32.mrf.mxu1 }
  0xfc   : > { %v2000_v37 = vadd.f32 %v1669_v36, %v1668_v34  ;;  %v1598_v60 = vadd.f32 %v1597_v35, %v1596_v33 }
  0xfd   : > { %v1599_v38 = vpop.f32.mrf.mxu0  ;;  %v1671_v39 = vpop.f32.mrf.mxu1 }
  0xfe   : > { %v1031_v11 = vadd.f32 %v1598_v60, %v2017_v59 }
  0xff   : > { %v1600_v40 = vpop.f32.mrf.mxu0  ;;  %v1672_v41 = vpop.f32.mrf.mxu1 }
 0x100   : > { %v2002_v42 = vadd.f32 %v1672_v41, %v1671_v39  ;;  %v1601_v15 = vadd.f32 %v1600_v40, %v1599_v38  ;;  %v1311_v39 = vld [vmem:[%s2012_s15 + $0x20] sm:$0xff] }
 0x101   : > { %v1602_v43 = vpop.f32.mrf.mxu0  ;;  %v1674_v44 = vpop.f32.mrf.mxu1 }
 0x102   : > { %v1036_v35 = vadd.f32 %v1601_v15, %v2017_v59  ;;  %v1318_v15 = vld [vmem:[%s2012_s15 + $0x58] sm:$0xff] }
 0x103   : > { %v1603_v45 = vpop.f32.mrf.mxu0  ;;  %v1675_v46 = vpop.f32.mrf.mxu1 }
 0x104   : > { %v2004_v47 = vadd.f32 %v1675_v46, %v1674_v44  ;;  %v1604_v31 = vadd.f32 %v1603_v45, %v1602_v43  ;;  %v1314_v45 = vld [vmem:[%s2012_s15 + $0x38] sm:$0xff] }
 0x105   : > { %v1605_v48 = vpop.f32.mrf.mxu0  ;;  %v1677_v49 = vpop.f32.mrf.mxu1 }
 0x107   : > { %v1606_v50 = vpop.f32.mrf.mxu0  ;;  %v1678_v51 = vpop.f32.mrf.mxu1 }
 0x108   : > { %v2007_v53 = vadd.f32 %v1678_v51, %v1677_v49  ;;  %v1607_v8 = vadd.f32 %v1606_v50, %v1605_v48  ;;  %v1039_v51 = vadd.f32 %v1604_v31, %v2017_v59 }
 0x109   : > { %v1608_v54 = vpop.f32.mrf.mxu0  ;;  %v1680_v55 = vpop.f32.mrf.mxu1 }
 0x10a   : > { %v1044_v26 = vadd.f32 %v1607_v8, %v2017_v59  ;;  %v1315_v8 = vld [vmem:[%s2012_s15 + $0x40] sm:$0xff] }
 0x10b   : > { %v1609_v57 = vpop.f32.mrf.mxu0  ;;  %v1681_v58 = vpop.f32.mrf.mxu1 }
 0x10c   : > { %v2019_v61 = vadd.f32 %v1681_v58, %v1680_v55  ;;  %v1610_v23 = vadd.f32 %v1609_v57, %v1608_v54  ;;  %v1312_v55 = vld [vmem:[%s2012_s15 + $0x28] sm:$0xff] }
 0x10d   : > { %v1611_v63 = vpop.f32.mrf.mxu0  ;;  %v1707_v0 = vpop.f32.mrf.mxu1 }
 0x10e   : > { %v1189_v3 = vadd.f32 %v1707_v0, %v1028_v62  ;;  %v1047_v44 = vadd.f32 %v1610_v23, %v2017_v59 }
 0x10f   : > { %v1612_v5 = vpop.f32.mrf.mxu0  ;;  %v1180_v6 = vpop.f32.mrf.mxu1 }
 0x110   : > { %v1341_v9 = vadd.f32 %v1309_v1, %v1189_v3  ;;  %v1181_v10 = vadd.f32 %v1180_v6, %v1020_v4  ;;  %v1613_v56 = vadd.f32 %v1612_v5, %v1611_v63  ;;  %v1317_v3 = vld [vmem:[%s2012_s15 + $0x50] sm:$0xff] }
 0x111   : > { %v1614_v12 = vpop.f32.mrf.mxu0  ;;  %v1708_v13 = vpop.f32.mrf.mxu1 }
 0x112   : > { %1374 = vst.msk [vmem:[%s2027_s23 + $0x10] sm:$0xff] %vm1371_vm14, %v1341_v9  ;;  %v1339_v16 = vadd.f32 %v1307_v7, %v1181_v10  ;;  %v1192_v17 = vadd.f32 %v1708_v13, %v1031_v11  ;;  %v1052_v5 = vadd.f32 %v1613_v56, %v2017_v59 }
 0x113   : > { %v1615_v19 = vpop.f32.mrf.mxu0  ;;  %v1183_v20 = vpop.f32.mrf.mxu1 }
 0x114   : > { %1372 = vst.msk [vmem:[%s2027_s23] sm:$0xff] %vm1371_vm14, %v1339_v16  ;;  %v1342_v24 = vadd.f32 %v1310_v14, %v1192_v17  ;;  %v1184_v25 = vadd.f32 %v1183_v20, %v1023_v18  ;;  %v1616_v6 = vadd.f32 %v1615_v19, %v1614_v12 }
 0x115   : > { %v1617_v28 = vpop.f32.mrf.mxu0  ;;  %v1711_v29 = vpop.f32.mrf.mxu1 }
 0x116   : > { %1375 = vst.msk [vmem:[%s2027_s23 + $0x18] sm:$0xff] %vm1371_vm14, %v1342_v24  ;;  %v1340_v33 = vadd.f32 %v1308_v21, %v1184_v25  ;;  %v1205_v34 = vadd.f32 %v1711_v29, %v1044_v26  ;;  %v1055_v18 = vadd.f32 %v1616_v6, %v2017_v59  ;;  %v1316_v21 = vld [vmem:[%s2012_s15 + $0x48] sm:$0xff]  ;;  %v1323_v6 = vld [vmem:[%s2012_s15 + $0x80] sm:$0xff] }
 0x117   : > { %v1618_v36 = vpop.f32.mrf.mxu0  ;;  %v1196_v38 = vpop.f32.mrf.mxu1 }
 0x118   : > { %1373 = vst.msk [vmem:[%s2027_s23 + $0x8] sm:$0xff] %vm1371_vm14, %v1340_v33  ;;  %v1345_v40 = vadd.f32 %v1313_v30, %v1205_v34  ;;  %v1197_v41 = vadd.f32 %v1196_v38, %v1036_v35  ;;  %v1619_v48 = vadd.f32 %v1618_v36, %v1617_v28  ;;  %v1319_v38 = vld [vmem:[%s2012_s15 + $0x60] sm:$0xff] }
 0x119   : > { %v1620_v46 = vpop.f32.mrf.mxu0  ;;  %v1712_v43 = vpop.f32.mrf.mxu1 }
 0x11a   : > { %1378 = vst.msk [vmem:[%s2027_s23 + $0x30] sm:$0xff] %vm1371_vm14, %v1345_v40  ;;  %v1343_v49 = vadd.f32 %v1311_v39, %v1197_v41  ;;  %v1208_v50 = vadd.f32 %v1712_v43, %v1047_v44  ;;  %v1060_v1 = vadd.f32 %v1619_v48, %v2017_v59  ;;  %v1321_v39 = vld [vmem:[%s2012_s15 + $0x70] sm:$0xff] }
 0x11b   : > { %v1621_v52 = vpop.f32.mrf.mxu0  ;;  %v1199_v54 = vpop.f32.mrf.mxu1 }
 0x11c   : > { %1376 = vst.msk [vmem:[%s2027_s23 + $0x20] sm:$0xff] %vm1371_vm14, %v1343_v49  ;;  %v1346_v57 = vadd.f32 %v1314_v45, %v1208_v50  ;;  %v1200_v58 = vadd.f32 %v1199_v54, %v1039_v51  ;;  %v1622_v62 = vadd.f32 %v1621_v52, %v1620_v46  ;;  %v1320_v52 = vld [vmem:[%s2012_s15 + $0x68] sm:$0xff] }
 0x11d   : > { %v1623_v60 = vpop.f32.mrf.mxu0  ;;  %v1715_v2 = vpop.f32.mrf.mxu1 }
 0x11e   : > { %1379 = vst.msk [vmem:[%s2027_s23 + $0x38] sm:$0xff] %vm1371_vm14, %v1346_v57  ;;  %v1344_v0 = vadd.f32 %v1312_v55, %v1200_v58  ;;  %v1221_v63 = vadd.f32 %v1715_v2, %v1060_v1  ;;  %v1063_v13 = vadd.f32 %v1622_v62, %v2017_v59  ;;  %v1322_v55 = vld [vmem:[%s2012_s15 + $0x78] sm:$0xff] }
 0x11f   : > { %v1624_v4 = vpop.f32.mrf.mxu0  ;;  %v1212_v7 = vpop.f32.mrf.mxu1 }
 0x120   : > { %1377 = vst.msk [vmem:[%s2027_s23 + $0x28] sm:$0xff] %vm1371_vm14, %v1344_v0  ;;  %v1349_v10 = vadd.f32 %v1317_v3, %v1221_v63  ;;  %v1213_v11 = vadd.f32 %v1212_v7, %v1052_v5  ;;  %v1625_v19 = vadd.f32 %v1624_v4, %v1623_v60 }
 0x121   : > { %v1626_v9 = vpop.f32.mrf.mxu0  ;;  %v1716_v14 = vpop.f32.mrf.mxu1 }
 0x122   : > { %1382 = vst.msk [vmem:[%s2027_s23 + $0x50] sm:$0xff] %vm1371_vm14, %v1349_v10  ;;  %v1347_v12 = vadd.f32 %v1315_v8, %v1213_v11  ;;  %v1224_v17 = vadd.f32 %v1716_v14, %v1063_v13  ;;  %v1068_v33 = vadd.f32 %v1625_v19, %v2017_v59  ;;  %v1324_v13 = vld [vmem:[%s2012_s15 + $0x88] sm:$0xff] }
 0x123   : > { %v1627_v16 = vpop.f32.mrf.mxu0  ;;  %v1215_v20 = vpop.f32.mrf.mxu1 }
 0x124   : > { %1380 = vst.msk [vmem:[%s2027_s23 + $0x40] sm:$0xff] %vm1371_vm14, %v1347_v12  ;;  %v1350_v24 = vadd.f32 %v1318_v15, %v1224_v17  ;;  %v1216_v25 = vadd.f32 %v1215_v20, %v1055_v18  ;;  %v1628_v31 = vadd.f32 %v1627_v16, %v1626_v9 }
 0x125   : > { %v1629_v23 = vpop.f32.mrf.mxu0  ;;  %v1719_v29 = vpop.f32.mrf.mxu1 }
 0x126   : > { %1383 = vst.msk [vmem:[%s2027_s23 + $0x58] sm:$0xff] %vm1371_vm14, %v1350_v24  ;;  %v1348_v28 = vadd.f32 %v1316_v21, %v1216_v25  ;;  %v1071_v48 = vadd.f32 %v1628_v31, %v2017_v59  ;;  %v1325_v24 = vld [vmem:[%s2012_s15 + $0x90] sm:$0xff] }
 0x127   : > { %v1630_v26 = vpop.f32.mrf.mxu0  ;;  %v1228_v36 = vpop.f32.mrf.mxu1 }
 0x128   : > { %v1631_v30 = vadd.f32 %v1630_v26, %v1629_v23  ;;  %1381 = vst.msk [vmem:[%s2027_s23 + $0x48] sm:$0xff] %vm1371_vm14, %v1348_v28  ;;  %v1229_v40 = vadd.f32 %v1228_v36, %v1068_v33 }
 0x129   : > { %v1632_v34 = vpop.f32.mrf.mxu0  ;;  %v1720_v46 = vpop.f32.mrf.mxu1 }
 0x12a   : > { %v1076_v35 = vadd.f32 %v1631_v30, %v2017_v59  ;;  %v1351_v45 = vadd.f32 %v1319_v38, %v1229_v40  ;;  %v1333_v38 = vld [vmem:[%s2012_s15 + $0xd0] sm:$0xff] }
 0x12b   : > { %v1633_v41 = vpop.f32.mrf.mxu0  ;;  %v1231_v51 = vpop.f32.mrf.mxu1 }
 0x12c   : > { %v1237_v44 = vadd.f32 %v1719_v29, %v1076_v35  ;;  %v1634_v43 = vadd.f32 %v1633_v41, %v1632_v34  ;;  %1384 = vst.msk [vmem:[%s2027_s23 + $0x60] sm:$0xff] %vm1371_vm14, %v1351_v45  ;;  %v1232_v56 = vadd.f32 %v1231_v51, %v1071_v48  ;;  %v1124_v34 = vadd.f32 %v1998_v32, %v2017_v59  ;;  %v1326_v35 = vld [vmem:[%s2012_s15 + $0x98] sm:$0xff]  ;;  %v1331_v45 = vld [vmem:[%s2012_s15 + $0xc0] sm:$0xff] }
 0x12d   : > { %v1635_v54 = vpop.f32.mrf.mxu0  ;;  %v1723_v62 = vpop.f32.mrf.mxu1  ;;  %v1127_v32 = vadd.f32 %v2000_v37, %v2017_v59 }
 0x12e   : > { %v1353_v49 = vadd.f32 %v1321_v39, %v1237_v44  ;;  %v1079_v50 = vadd.f32 %v1634_v43, %v2017_v59  ;;  %v1352_v60 = vadd.f32 %v1320_v52, %v1232_v56  ;;  %v1334_v56 = vld [vmem:[%s2012_s15 + $0xd8] sm:$0xff] }
 0x12f   : > { %v1636_v58 = vpop.f32.mrf.mxu0  ;;  %v1244_v4 = vpop.f32.mrf.mxu1 }
 0x130   : > { %1386 = vst.msk [vmem:[%s2027_s23 + $0x70] sm:$0xff] %vm1371_vm14, %v1353_v49  ;;  %v1240_v57 = vadd.f32 %v1720_v46, %v1079_v50  ;;  %v1637_v0 = vadd.f32 %v1636_v58, %v1635_v54  ;;  %1385 = vst.msk [vmem:[%s2027_s23 + $0x68] sm:$0xff] %vm1371_vm14, %v1352_v60  ;;  %v1116_v46 = vadd.f32 %v1994_v22, %v2017_v59  ;;  %v1327_v54 = vld [vmem:[%s2012_s15 + $0xa0] sm:$0xff] }
 0x131   : > { %v1638_v2 = vpop.f32.mrf.mxu0  ;;  %v1724_v7 = vpop.f32.mrf.mxu1  ;;  %v1119_v22 = vadd.f32 %v1996_v27, %v2017_v59 }
 0x132   : > { %v1354_v1 = vadd.f32 %v1322_v55, %v1240_v57  ;;  %v1084_v3 = vadd.f32 %v1637_v0, %v2017_v59 }
 0x133   : > { %v1639_v63 = vpop.f32.mrf.mxu0  ;;  %v1247_v11 = vpop.f32.mrf.mxu1 }
 0x134   : > { %1387 = vst.msk [vmem:[%s2027_s23 + $0x78] sm:$0xff] %vm1371_vm14, %v1354_v1  ;;  %v1245_v5 = vadd.f32 %v1244_v4, %v1084_v3  ;;  %v1640_v8 = vadd.f32 %v1639_v63, %v1638_v2  ;;  %v1332_v1 = vld [vmem:[%s2012_s15 + $0xc8] sm:$0xff] }
 0x135   : > { %v1641_v14 = vpop.f32.mrf.mxu0  ;;  %v2096_v16 = vpop.f32.mrf.mxu1  ;;  %v1328_v63 = vld [vmem:[%s2012_s15 + $0xa8] sm:$0xff] }
 0x136   : > { %v1355_v9 = vadd.f32 %v1323_v6, %v1245_v5  ;;  %v1087_v10 = vadd.f32 %v1640_v8, %v2017_v59  ;;  %v1140_v8 = vadd.f32 %v2007_v53, %v2017_v59 }
 0x137   : > { %v1642_v12 = vpop.f32.mrf.mxu0  ;;  %v1260_v19 = vpop.f32.mrf.mxu1 }
 0x138   : > { %1388 = vst.msk [vmem:[%s2027_s23 + $0x80] sm:$0xff] %vm1371_vm14, %v1355_v9  ;;  %v1248_v15 = vadd.f32 %v1247_v11, %v1087_v10  ;;  %v1643_v18 = vadd.f32 %v1642_v12, %v1641_v14  ;;  %v1337_v11 = vld [vmem:[%s2012_s15 + $0xf0] sm:$0xff]  ;;  %v1132_v12 = vadd.f32 %v2002_v42, %v2017_v59 }
 0x139   : > { %v1644_v20 = vpop.f32.mrf.mxu0  ;;  %v2101_v23 = vpop.f32.mrf.mxu1 }
 0x13a   : > { %v1356_v17 = vadd.f32 %v1324_v13, %v1248_v15  ;;  %v1092_v21 = vadd.f32 %v1643_v18, %v2017_v59 }
 0x13b   : > { %v1645_v25 = vpop.f32.mrf.mxu0  ;;  %v1263_v29 = vpop.f32.mrf.mxu1 }
 0x13c   : > { %1389 = vst.msk [vmem:[%s2027_s23 + $0x88] sm:$0xff] %vm1371_vm14, %v1356_v17  ;;  %v1253_v26 = vadd.f32 %v1723_v62, %v1092_v21  ;;  %v1646_v28 = vadd.f32 %v1645_v25, %v1644_v20  ;;  %v1335_v20 = vld [vmem:[%s2012_s15 + $0xe0] sm:$0xff]  ;;  %v1329_v21 = vld [vmem:[%s2012_s15 + $0xb0] sm:$0xff]  ;;  %v1143_v25 = vadd.f32 %v2019_v61, %v2017_v59 }
 0x13d   : > { %v1647_v30 = vpop.f32.mrf.mxu0  ;;  %v1731_v36 = vpop.f32.mrf.mxu1 }
 0x13e   : > { %v1357_v31 = vadd.f32 %v1325_v24, %v1253_v26  ;;  %v1095_v33 = vadd.f32 %v1646_v28, %v2017_v59  ;;  %v1285_v41 = vadd.f32 %v1731_v36, %v1124_v34  ;;  %v1135_v34 = vadd.f32 %v2004_v47, %v2017_v59 }
 0x13f   : > { %v1648_v39 = vpop.f32.mrf.mxu0  ;;  %v1276_v43 = vpop.f32.mrf.mxu1 }
 0x140   : > { %1390 = vst.msk [vmem:[%s2027_s23 + $0x90] sm:$0xff] %vm1371_vm14, %v1357_v31  ;;  %v1256_v40 = vadd.f32 %v1724_v7, %v1095_v33  ;;  %v1649_v44 = vadd.f32 %v1648_v39, %v1647_v30  ;;  %v1365_v50 = vadd.f32 %v1333_v38, %v1285_v41  ;;  %v1277_v52 = vadd.f32 %v1276_v43, %v1116_v46  ;;  %v1336_v38 = vld [vmem:[%s2012_s15 + $0xe8] sm:$0xff]  ;;  %v1330_v39 = vld [vmem:[%s2012_s15 + $0xb8] sm:$0xff] }
 0x141   : > { %v1650_v48 = vpop.f32.mrf.mxu0  ;;  %v1732_v55 = vpop.f32.mrf.mxu1 }
 0x142   : > { %v1358_v49 = vadd.f32 %v1326_v35, %v1256_v40  ;;  %v1100_v51 = vadd.f32 %v1649_v44, %v2017_v59  ;;  %1398 = vst.msk [vmem:[%s2027_s23 + $0xd0] sm:$0xff] %vm1371_vm14, %v1365_v50  ;;  %v1363_v58 = vadd.f32 %v1331_v45, %v1277_v52  ;;  %v1288_v60 = vadd.f32 %v1732_v55, %v1127_v32 }
 0x143   : > { %v1651_v57 = vpop.f32.mrf.mxu0  ;;  %v1279_v0 = vpop.f32.mrf.mxu1 }
 0x144   : > { %1391 = vst.msk [vmem:[%s2027_s23 + $0x98] sm:$0xff] %vm1371_vm14, %v1358_v49  ;;  %v1261_v37 = vadd.f32 %v1260_v19, %v1100_v51  ;;  %v1652_v62 = vadd.f32 %v1651_v57, %v1650_v48  ;;  %1396 = vst.msk [vmem:[%s2027_s23 + $0xc0] sm:$0xff] %vm1371_vm14, %v1363_v58  ;;  %v1366_v3 = vadd.f32 %v1334_v56, %v1288_v60 }
 0x145   : > { %v1280_v4 = vadd.f32 %v1279_v0, %v1119_v22  ;;  %v1653_v6 = vpop.f32.mrf.mxu0  ;;  %v1735_v10 = vpop.f32.mrf.mxu1 }
 0x146   : > { %v1359_v2 = vadd.f32 %v1327_v54, %v1261_v37  ;;  %v1103_v27 = vadd.f32 %v1652_v62, %v2017_v59  ;;  %1399 = vst.msk [vmem:[%s2027_s23 + $0xd8] sm:$0xff] %vm1371_vm14, %v1366_v3  ;;  %v1301_v15 = vadd.f32 %v1735_v10, %v1140_v8 }
 0x147   : > { %v1364_v7 = vadd.f32 %v1332_v1, %v1280_v4  ;;  %v1654_v9 = vpop.f32.mrf.mxu0  ;;  %v1292_v19 = vpop.f32.mrf.mxu1 }
 0x148   : > { %1392 = vst.msk [vmem:[%s2027_s23 + $0xa0] sm:$0xff] %vm1371_vm14, %v1359_v2  ;;  %v1264_v5 = vadd.f32 %v1263_v29, %v1103_v27  ;;  %v1655_v13 = vadd.f32 %v1654_v9, %v1653_v6  ;;  %v1369_v53 = vadd.f32 %v1337_v11, %v1301_v15  ;;  %v1293_v24 = vadd.f32 %v1292_v19, %v1132_v12  ;;  %v1338_v29 = vld [vmem:[%s2012_s15 + $0xf8] sm:$0xff] }
 0x149   : > { %1397 = vst.msk [vmem:[%s2027_s23 + $0xc8] sm:$0xff] %vm1371_vm14, %v1364_v7  ;;  %v1656_v17 = vpop.f32.mrf.mxu0  ;;  %v1736_v42 = vpop.f32.mrf.mxu1 }
 0x14a   : > { %v1360_v14 = vadd.f32 %v1328_v63, %v1264_v5  ;;  %v1108_v18 = vadd.f32 %v1655_v13, %v2017_v59  ;;  %1402 = vst.msk [vmem:[%s2027_s23 + $0xf0] sm:$0xff] %vm1371_vm14, %v1369_v53  ;;  %v1367_v31 = vadd.f32 %v1335_v20, %v1293_v24  ;;  %v1304_v33 = vadd.f32 %v1736_v42, %v1143_v25 }
 0x14b   : > { %v1657_v26 = vpop.f32.mrf.mxu0  ;;  %v1295_v36 = vpop.f32.mrf.mxu1 }
 0x14c   : > { %1393 = vst.msk [vmem:[%s2027_s23 + $0xa8] sm:$0xff] %vm1371_vm14, %v1360_v14  ;;  %v1269_v28 = vadd.f32 %v2096_v16, %v1108_v18  ;;  %v1658_v30 = vadd.f32 %v1657_v26, %v1656_v17  ;;  %1400 = vst.msk [vmem:[%s2027_s23 + $0xe0] sm:$0xff] %vm1371_vm14, %v1367_v31  ;;  %v1370_v16 = vadd.f32 %v1338_v29, %v1304_v33 }
 0x14d   : > { %v1296_v40 = vadd.f32 %v1295_v36, %v1135_v34 }
 0x14e   : > { %v1361_v35 = vadd.f32 %v1329_v21, %v1269_v28  ;;  %v1111_v61 = vadd.f32 %v1658_v30, %v2017_v59  ;;  %1403 = vst.msk [vmem:[%s2027_s23 + $0xf8] sm:$0xff] %vm1371_vm14, %v1370_v16 }
 0x14f   : > { %v1368_v44 = vadd.f32 %v1336_v38, %v1296_v40 }
 0x150   : > { %1394 = vst.msk [vmem:[%s2027_s23 + $0xb0] sm:$0xff] %vm1371_vm14, %v1361_v35  ;;  %v1272_v41 = vadd.f32 %v2101_v23, %v1111_v61 }
 0x151   : > { %1401 = vst.msk [vmem:[%s2027_s23 + $0xe8] sm:$0xff] %vm1371_vm14, %v1368_v44 }
 0x152   : > { %v1362_v46 = vadd.f32 %v1330_v39, %v1272_v41 }
 0x154   : > { %1395 = vst.msk [vmem:[%s2027_s23 + $0xb8] sm:$0xff] %vm1371_vm14, %v1362_v46 }
 0x155 PF: > { %s14_s17 = sadd.s32 1, %s1818_s17   ;;  %s2182_s15 = smov %s1814_s16 }
 0x156   : > { %p11_p5 = scmp.ge.s32.totalorder %s14_s17, 4   ;;  %s2183_s16 = smov %s2185_s18 }
 0x158   :  { %13 = sbr.rel (!%p11_p5) target bundleno = 2 (0x2), region = 75 }

</bundles_post_ra>
